<compile_context>
chip_gen: v7x
topology: tpu7x:2x2x1
jax: 0.10.0
libtpu: 0.0.40
codegen_flags: <defaults>
</compile_context>

<pallas_src>
import functools
import math

import jax
import jax.numpy as jnp
from jax.experimental import pallas as pl
from jax.experimental.pallas import tpu as pltpu


# ---------------------------------------------------------------------------
# Relative position index (same math as the PyTorch helper)
# ---------------------------------------------------------------------------
def get_relative_position_index(win_h, win_w):
    coords = jnp.stack(
        jnp.meshgrid(jnp.arange(win_h), jnp.arange(win_w), indexing="ij")
    )  # (2, Wh, Ww)
    coords_flatten = coords.reshape(2, -1)  # (2, Wh*Ww)
    relative_coords = coords_flatten[:, :, None] - coords_flatten[:, None, :]
    relative_coords = relative_coords.transpose(1, 2, 0)  # (N, N, 2)
    relative_coords = relative_coords.at[:, :, 0].add(win_h - 1)
    relative_coords = relative_coords.at[:, :, 1].add(win_w - 1)
    relative_coords = relative_coords.at[:, :, 0].multiply(2 * win_w - 1)
    return relative_coords.sum(-1)  # (N, N)


# ---------------------------------------------------------------------------
# Pallas kernel: WB windows per grid step
# ---------------------------------------------------------------------------
def _wmsa_kernel(x_ref, wq_ref, wk_ref, wv_ref, bq_ref, bk_ref, bv_ref,
                 wproj_ref, bproj_ref, bias_ref, o_ref,
                 *, num_heads, wb, n_pad, head_dim):
    f32 = jnp.float32
    x = x_ref[0]                                            # (WB*Np, C)
    rows = wb * n_pad

    out = None
    for h in range(num_heads):
        # Per-head Q/K/V projections, batched over all WB windows (M = WB*Np).
        # Leading-axis ref indexing (wq_ref[h], ...) is free -- no lane slicing.
        # Attention scale is already folded into wq/bq in the glue code.
        q = jnp.dot(x, wq_ref[h], preferred_element_type=f32) + bq_ref[h]
        k = jnp.dot(x, wk_ref[h], preferred_element_type=f32) + bk_ref[h]
        v = jnp.dot(x, wv_ref[h], preferred_element_type=f32) + bv_ref[h]

        # Split windows along the (sublane-aligned) row axis: n_pad % 8 == 0,
        # so these reshapes are layout-preserving.
        qb = q.reshape(wb, n_pad, head_dim)                 # (WB, Np, hd)
        kb = k.reshape(wb, n_pad, head_dim)
        vb = v.reshape(wb, n_pad, head_dim)

        # Batched per-window scores: one dot_general over all WB windows.
        s = jnp.einsum("bqd,bkd->bqk", qb, kb,
                       preferred_element_type=f32)          # (WB, Np, Np)
        s = s + bias_ref[h]                                 # pad cols hold -1e30
        s = s - jnp.max(s, axis=-1, keepdims=True)
        p = jnp.exp(s)                                      # masked cols -> 0
        p = p * pl.reciprocal(jnp.sum(p, axis=-1, keepdims=True), approx=True)
        # attn_drop is identity (p = 0.0)

        ctx = jnp.einsum("bqk,bkd->bqd", p, vb,
                         preferred_element_type=f32)        # (WB, Np, hd)

        # Output projection for this head, batched over all WB windows, and
        # accumulated into one (WB*Np, C) tile (replaces lane-axis concatenate).
        contrib = jnp.dot(ctx.reshape(rows, head_dim), wproj_ref[h],
                          preferred_element_type=f32)       # (rows, C)
        out = contrib if out is None else out + contrib

    # proj_drop is identity (p = 0.0).  Output stays C=32 lanes wide: packing
    # windows into lanes would need an in-kernel transpose costing more than
    # the masked stores it saves at this size.
    o_ref[0] = (out + bproj_ref[...]).astype(o_ref.dtype)


# ---------------------------------------------------------------------------
# Wrapper: window partition -> pallas_call -> window reverse
# ---------------------------------------------------------------------------
def w_msa_forward(x, params, *, num_heads, head_dim, window_size=7):
    B, L, C = x.shape
    ws = window_size
    h = w = int(math.isqrt(L))
    assert h * w == L and h % ws == 0 and w % ws == 0
    h_, w_ = h // ws, w // ws
    N = ws * ws
    n_pad = ((N + 7) // 8) * 8              # pad window rows to sublane multiple (56)
    scale = head_dim ** (-0.5)

    # ---- window partition (glue) ----
    xw = x.reshape(B, h_, ws, w_, ws, C)
    xw = xw.transpose(0, 1, 3, 2, 4, 5).reshape(B * h_ * w_, N, C)
    B_ = xw.shape[0]

    # Batch WB windows per grid step; keep >=2 parallel steps for v7x megacore.
    num_steps = 2 if B_ % 2 == 0 else 1
    wb = B_ // num_steps
    rows = wb * n_pad

    xw = jnp.pad(xw, ((0, 0), (0, n_pad - N), (0, 0)))
    x_blk = xw.reshape(num_steps, rows, C)

    # ---- per-head weight slabs (glue, free); fold attention scale into Q ----
    w3 = params["w_qkv"].reshape(C, 3, num_heads, head_dim)
    wq = jnp.transpose(w3[:, 0], (1, 0, 2)) * scale          # (H, C, hd)
    wk = jnp.transpose(w3[:, 1], (1, 0, 2))
    wv = jnp.transpose(w3[:, 2], (1, 0, 2))
    b3 = params["b_qkv"].reshape(3, num_heads, 1, head_dim)
    bq = b3[0] * scale                                       # (H, 1, hd)
    bk, bv = b3[1], b3[2]
    wproj = params["w_proj"].reshape(num_heads, head_dim, C)  # (H, hd, C)
    bproj = params["b_proj"].reshape(1, C)

    # ---- relative position bias with key-padding mask (glue) ----
    rel_idx = get_relative_position_index(ws, ws).reshape(-1)
    rel_bias = params["rel_pos_table"][rel_idx].reshape(N, N, num_heads)
    rel_bias = rel_bias.transpose(2, 0, 1).astype(jnp.float32)          # (H, N, N)
    bias = jnp.zeros((num_heads, n_pad, n_pad), jnp.float32)
    bias = bias.at[:, :N, :N].set(rel_bias)
    bias = bias.at[:, :, N:].set(-1e30)                     # mask padded key columns

    kernel = functools.partial(_wmsa_kernel, num_heads=num_heads, wb=wb,
                               n_pad=n_pad, head_dim=head_dim)
    full3 = lambda i: (0, 0, 0)

    out_blk = pl.pallas_call(
        kernel,
        out_shape=jax.ShapeDtypeStruct((num_steps, rows, C), x.dtype),
        grid=(num_steps,),
        in_specs=[
            pl.BlockSpec((1, rows, C), lambda i: (i, 0, 0)),            # x block
            pl.BlockSpec((num_heads, C, head_dim), full3),              # Wq (scaled)
            pl.BlockSpec((num_heads, C, head_dim), full3),              # Wk
            pl.BlockSpec((num_heads, C, head_dim), full3),              # Wv
            pl.BlockSpec((num_heads, 1, head_dim), full3),              # bq (scaled)
            pl.BlockSpec((num_heads, 1, head_dim), full3),              # bk
            pl.BlockSpec((num_heads, 1, head_dim), full3),              # bv
            pl.BlockSpec((num_heads, head_dim, C), full3),              # Wproj
            pl.BlockSpec((1, C), lambda i: (0, 0)),                     # bproj
            pl.BlockSpec((num_heads, n_pad, n_pad), full3),             # rel bias
        ],
        out_specs=pl.BlockSpec((1, rows, C), lambda i: (i, 0, 0)),
        compiler_params=pltpu.CompilerParams(dimension_semantics=("parallel",)),
    )(x_blk, wq, wk, wv, bq, bk, bv, wproj, bproj, bias)

    # ---- drop padding + window reverse (glue) ----
    xo = out_blk.reshape(B_, n_pad, C)[:, :N, :]
    xo = xo.reshape(B, h_, w_, ws, ws, C).transpose(0, 1, 3, 2, 4, 5)
    return xo.reshape(B, h * w, C)


# ---------------------------------------------------------------------------
# Pure-JAX reference (for correctness check)
# ---------------------------------------------------------------------------
def w_msa_reference(x, params, *, num_heads, head_dim, window_size=7):
    B, L, C = x.shape
    ws = window_size
    h = w = int(math.isqrt(L))
    h_, w_ = h // ws, w // ws
    N = ws * ws
    A = num_heads * head_dim
    xw = x.reshape(B, h_, ws, w_, ws, C).transpose(0, 1, 3, 2, 4, 5).reshape(-1, N, C)
    qkv = xw @ params["w_qkv"] + params["b_qkv"]
    qkv = qkv.reshape(-1, N, 3, num_heads, head_dim).transpose(2, 0, 3, 1, 4)
    q, k, v = qkv[0], qkv[1], qkv[2]
    q = q * head_dim ** (-0.5)
    attn = jnp.einsum("bhnd,bhmd->bhnm", q, k)
    rel_idx = get_relative_position_index(ws, ws).reshape(-1)
    bias = params["rel_pos_table"][rel_idx].reshape(N, N, num_heads).transpose(2, 0, 1)
    attn = attn + bias[None]
    attn = jax.nn.softmax(attn, axis=-1)
    o = jnp.einsum("bhnm,bhmd->bhnd", attn, v).transpose(0, 2, 1, 3).reshape(-1, N, A)
    o = o @ params["w_proj"] + params["b_proj"]
    o = o.reshape(B, h_, w_, ws, ws, C).transpose(0, 1, 3, 2, 4, 5).reshape(B, h * w, C)
    return o


# ---------------------------------------------------------------------------
if __name__ == "__main__":
    # Module config (window_size fixed to 7 by the rel-pos table in the module).
    dim = 32
    num_heads = 4
    head_dim = dim // num_heads
    attn_dim = num_heads * head_dim
    window_size = 7

    # Input: B=2, spatial 14x14 -> L=196, C=32  (2x2 = 4 windows per image)
    B, H, W = 2, 14, 14
    L = H * W

    key = jax.random.PRNGKey(0)
    k_x, k_t, k_qw, k_qb, k_pw, k_pb = jax.random.split(key, 6)

    x = jax.random.normal(k_x, (B, L, dim), dtype=jnp.float32)

    params = {
        # trunc_normal_(std=0.02) equivalent (deterministic synthetic init)
        "rel_pos_table": 0.02 * jax.random.truncated_normal(
            k_t, -2.0, 2.0, ((2 * 7 - 1) * (2 * 7 - 1), num_heads), dtype=jnp.float32),
        # nn.Linear weights stored here as (in, out); semantics identical.
        "w_qkv": 0.05 * jax.random.normal(k_qw, (dim, 3 * attn_dim), dtype=jnp.float32),
        "b_qkv": 0.05 * jax.random.normal(k_qb, (3 * attn_dim,), dtype=jnp.float32),
        "w_proj": 0.05 * jax.random.normal(k_pw, (attn_dim, dim), dtype=jnp.float32),
        "b_proj": 0.05 * jax.random.normal(k_pb, (dim,), dtype=jnp.float32),
    }

    out = w_msa_forward(x, params, num_heads=num_heads, head_dim=head_dim,
                        window_size=window_size)
    out = jax.block_until_ready(out)

    ref = w_msa_reference(x, params, num_heads=num_heads, head_dim=head_dim,
                          window_size=window_size)
    assert out.shape == (B, L, dim)
    # Tolerance slightly looser than 1e-4 because of pl.reciprocal(approx=True)
    # in the softmax normalisation (matmuls/softmax accumulation stay in f32).
    assert jnp.allclose(out, ref, atol=2e-3, rtol=2e-3)

    print("KERNEL_OK")
</pallas_src>

<mosaic_0001>
module attributes {stable_mosaic.version = 11 : i64} {
  func.func @_wmsa_kernel(%arg0: i32, %arg1: memref<1x224x32xf32, #tpu.memory_space<vmem>>, %arg2: memref<4x32x8xf32, #tpu.memory_space<vmem>>, %arg3: memref<4x32x8xf32, #tpu.memory_space<vmem>>, %arg4: memref<4x32x8xf32, #tpu.memory_space<vmem>>, %arg5: memref<4x1x8xf32, #tpu.memory_space<vmem>>, %arg6: memref<4x1x8xf32, #tpu.memory_space<vmem>>, %arg7: memref<4x1x8xf32, #tpu.memory_space<vmem>>, %arg8: memref<4x8x32xf32, #tpu.memory_space<vmem>>, %arg9: memref<1x32xf32, #tpu.memory_space<vmem>>, %arg10: memref<4x56x56xf32, #tpu.memory_space<vmem>>, %arg11: memref<1x224x32xf32, #tpu.memory_space<vmem>>) attributes {dimension_semantics = [#tpu.dimension_semantics<parallel>], iteration_bounds = array<i64: 2>, scalar_prefetch = 0 : i64, scratch_operands = 0 : i64, tpu.core_type = #tpu.core_type<tc>, window_params = [{transform_indices = @transform_0, window_bounds = array<i64: 1, 224, 32>}, {pipeline_mode = #tpu.pipeline_mode<synchronous>, transform_indices = @transform_1, window_bounds = array<i64: 4, 32, 8>}, {pipeline_mode = #tpu.pipeline_mode<synchronous>, transform_indices = @transform_2, window_bounds = array<i64: 4, 32, 8>}, {pipeline_mode = #tpu.pipeline_mode<synchronous>, transform_indices = @transform_3, window_bounds = array<i64: 4, 32, 8>}, {pipeline_mode = #tpu.pipeline_mode<synchronous>, transform_indices = @transform_4, window_bounds = array<i64: 4, 1, 8>}, {pipeline_mode = #tpu.pipeline_mode<synchronous>, transform_indices = @transform_5, window_bounds = array<i64: 4, 1, 8>}, {pipeline_mode = #tpu.pipeline_mode<synchronous>, transform_indices = @transform_6, window_bounds = array<i64: 4, 1, 8>}, {pipeline_mode = #tpu.pipeline_mode<synchronous>, transform_indices = @transform_7, window_bounds = array<i64: 4, 8, 32>}, {pipeline_mode = #tpu.pipeline_mode<synchronous>, transform_indices = @transform_8, window_bounds = array<i64: 1, 32>}, {pipeline_mode = #tpu.pipeline_mode<synchronous>, transform_indices = @transform_9, window_bounds = array<i64: 4, 56, 56>}, {transform_indices = @transform_10, window_bounds = array<i64: 1, 224, 32>}]} {
    %c0 = arith.constant 0 : index
    %c0_0 = arith.constant 0 : index
    %c0_1 = arith.constant 0 : index
    %0 = vector.load %arg1[%c0, %c0_0, %c0_1] : memref<1x224x32xf32, #tpu.memory_space<vmem>>, vector<1x224x32xf32>
    %1 = vector.shape_cast %0 : vector<1x224x32xf32> to vector<224x32xf32>
    %c0_2 = arith.constant 0 : index
    %c0_3 = arith.constant 0 : index
    %c0_4 = arith.constant 0 : index
    %2 = vector.load %arg2[%c0_2, %c0_3, %c0_4] : memref<4x32x8xf32, #tpu.memory_space<vmem>>, vector<1x32x8xf32>
    %3 = vector.shape_cast %2 : vector<1x32x8xf32> to vector<32x8xf32>
    %cst = arith.constant dense<0.000000e+00> : vector<224x8xf32>
    %4 = tpu.matmul %1, %3, %cst {dimension_numbers = #tpu.dot_dimension_numbers<[1], [0], [0], [1], [0, 0, 1, 1], [], []>} : vector<224x32xf32>, vector<32x8xf32>, vector<224x8xf32> -> vector<224x8xf32>
    %c0_5 = arith.constant 0 : index
    %c0_6 = arith.constant 0 : index
    %c0_7 = arith.constant 0 : index
    %5 = vector.load %arg5[%c0_5, %c0_6, %c0_7] : memref<4x1x8xf32, #tpu.memory_space<vmem>>, vector<1x1x8xf32>
    %6 = vector.shape_cast %5 : vector<1x1x8xf32> to vector<1x8xf32>
    %7 = vector.broadcast %6 : vector<1x8xf32> to vector<224x8xf32>
    %8 = arith.addf %4, %7 : vector<224x8xf32>
    %c0_8 = arith.constant 0 : index
    %c0_9 = arith.constant 0 : index
    %c0_10 = arith.constant 0 : index
    %9 = vector.load %arg3[%c0_8, %c0_9, %c0_10] : memref<4x32x8xf32, #tpu.memory_space<vmem>>, vector<1x32x8xf32>
    %10 = vector.shape_cast %9 : vector<1x32x8xf32> to vector<32x8xf32>
    %cst_11 = arith.constant dense<0.000000e+00> : vector<224x8xf32>
    %11 = tpu.matmul %1, %10, %cst_11 {dimension_numbers = #tpu.dot_dimension_numbers<[1], [0], [0], [1], [0, 0, 1, 1], [], []>} : vector<224x32xf32>, vector<32x8xf32>, vector<224x8xf32> -> vector<224x8xf32>
    %c0_12 = arith.constant 0 : index
    %c0_13 = arith.constant 0 : index
    %c0_14 = arith.constant 0 : index
    %12 = vector.load %arg6[%c0_12, %c0_13, %c0_14] : memref<4x1x8xf32, #tpu.memory_space<vmem>>, vector<1x1x8xf32>
    %13 = vector.shape_cast %12 : vector<1x1x8xf32> to vector<1x8xf32>
    %14 = vector.broadcast %13 : vector<1x8xf32> to vector<224x8xf32>
    %15 = arith.addf %11, %14 : vector<224x8xf32>
    %c0_15 = arith.constant 0 : index
    %c0_16 = arith.constant 0 : index
    %c0_17 = arith.constant 0 : index
    %16 = vector.load %arg4[%c0_15, %c0_16, %c0_17] : memref<4x32x8xf32, #tpu.memory_space<vmem>>, vector<1x32x8xf32>
    %17 = vector.shape_cast %16 : vector<1x32x8xf32> to vector<32x8xf32>
    %cst_18 = arith.constant dense<0.000000e+00> : vector<224x8xf32>
    %18 = tpu.matmul %1, %17, %cst_18 {dimension_numbers = #tpu.dot_dimension_numbers<[1], [0], [0], [1], [0, 0, 1, 1], [], []>} : vector<224x32xf32>, vector<32x8xf32>, vector<224x8xf32> -> vector<224x8xf32>
    %c0_19 = arith.constant 0 : index
    %c0_20 = arith.constant 0 : index
    %c0_21 = arith.constant 0 : index
    %19 = vector.load %arg7[%c0_19, %c0_20, %c0_21] : memref<4x1x8xf32, #tpu.memory_space<vmem>>, vector<1x1x8xf32>
    %20 = vector.shape_cast %19 : vector<1x1x8xf32> to vector<1x8xf32>
    %21 = vector.broadcast %20 : vector<1x8xf32> to vector<224x8xf32>
    %22 = arith.addf %18, %21 : vector<224x8xf32>
    %23 = vector.shape_cast %8 : vector<224x8xf32> to vector<4x56x8xf32>
    %24 = vector.shape_cast %15 : vector<224x8xf32> to vector<4x56x8xf32>
    %25 = vector.shape_cast %22 : vector<224x8xf32> to vector<4x56x8xf32>
    "tpu.trace_start"() <{level = 10 : i32, message = "bqd,bkd->bqk"}> : () -> ()
    %cst_22 = arith.constant dense<0.000000e+00> : vector<4x56x56xf32>
    %26 = tpu.matmul %23, %24, %cst_22 {dimension_numbers = #tpu.dot_dimension_numbers<[2], [2], [1], [1], [0, 0, 0, 1, 1, 1], [0], [0]>} : vector<4x56x8xf32>, vector<4x56x8xf32>, vector<4x56x56xf32> -> vector<4x56x56xf32>
    "tpu.trace_stop"() : () -> ()
    %c0_23 = arith.constant 0 : index
    %c0_24 = arith.constant 0 : index
    %c0_25 = arith.constant 0 : index
    %27 = vector.load %arg10[%c0_23, %c0_24, %c0_25] : memref<4x56x56xf32, #tpu.memory_space<vmem>>, vector<1x56x56xf32>
    %28 = vector.shape_cast %27 : vector<1x56x56xf32> to vector<56x56xf32>
    %29 = vector.shape_cast %28 : vector<56x56xf32> to vector<1x56x56xf32>
    %30 = vector.broadcast %29 : vector<1x56x56xf32> to vector<4x56x56xf32>
    %31 = arith.addf %26, %30 : vector<4x56x56xf32>
    %cst_26 = arith.constant dense<0xFF800000> : vector<4x56xf32>
    %32 = vector.multi_reduction <maximumf>, %31, %cst_26 [2] : vector<4x56x56xf32> to vector<4x56xf32>
    %33 = vector.shape_cast %32 : vector<4x56xf32> to vector<4x56x1xf32>
    %34 = vector.broadcast %33 : vector<4x56x1xf32> to vector<4x56x56xf32>
    %35 = arith.subf %31, %34 : vector<4x56x56xf32>
    %36 = math.exp %35 : vector<4x56x56xf32>
    %cst_27 = arith.constant dense<0.000000e+00> : vector<4x56xf32>
    %37 = vector.multi_reduction <add>, %36, %cst_27 [2] : vector<4x56x56xf32> to vector<4x56xf32>
    %38 = vector.shape_cast %37 : vector<4x56xf32> to vector<4x56x1xf32>
    %39 = tpu.reciprocal %38 {approx = true} : vector<4x56x1xf32> -> vector<4x56x1xf32>
    %40 = vector.broadcast %39 : vector<4x56x1xf32> to vector<4x56x56xf32>
    %41 = arith.mulf %36, %40 : vector<4x56x56xf32>
    "tpu.trace_start"() <{level = 10 : i32, message = "bqk,bkd->bqd"}> : () -> ()
    %cst_28 = arith.constant dense<0.000000e+00> : vector<4x56x8xf32>
    %42 = tpu.matmul %41, %25, %cst_28 {dimension_numbers = #tpu.dot_dimension_numbers<[2], [1], [1], [2], [0, 0, 0, 1, 1, 2], [0], [0]>} : vector<4x56x56xf32>, vector<4x56x8xf32>, vector<4x56x8xf32> -> vector<4x56x8xf32>
    "tpu.trace_stop"() : () -> ()
    %43 = vector.shape_cast %42 : vector<4x56x8xf32> to vector<224x8xf32>
    %c0_29 = arith.constant 0 : index
    %c0_30 = arith.constant 0 : index
    %c0_31 = arith.constant 0 : index
    %44 = vector.load %arg8[%c0_29, %c0_30, %c0_31] : memref<4x8x32xf32, #tpu.memory_space<vmem>>, vector<1x8x32xf32>
    %45 = vector.shape_cast %44 : vector<1x8x32xf32> to vector<8x32xf32>
    %cst_32 = arith.constant dense<0.000000e+00> : vector<224x32xf32>
    %46 = tpu.matmul %43, %45, %cst_32 {dimension_numbers = #tpu.dot_dimension_numbers<[1], [0], [0], [1], [0, 0, 1, 1], [], []>} : vector<224x8xf32>, vector<8x32xf32>, vector<224x32xf32> -> vector<224x32xf32>
    %c1 = arith.constant 1 : index
    %c0_33 = arith.constant 0 : index
    %c0_34 = arith.constant 0 : index
    %47 = vector.load %arg2[%c1, %c0_33, %c0_34] : memref<4x32x8xf32, #tpu.memory_space<vmem>>, vector<1x32x8xf32>
    %48 = vector.shape_cast %47 : vector<1x32x8xf32> to vector<32x8xf32>
    %cst_35 = arith.constant dense<0.000000e+00> : vector<224x8xf32>
    %49 = tpu.matmul %1, %48, %cst_35 {dimension_numbers = #tpu.dot_dimension_numbers<[1], [0], [0], [1], [0, 0, 1, 1], [], []>} : vector<224x32xf32>, vector<32x8xf32>, vector<224x8xf32> -> vector<224x8xf32>
    %c1_36 = arith.constant 1 : index
    %c0_37 = arith.constant 0 : index
    %c0_38 = arith.constant 0 : index
    %50 = vector.load %arg5[%c1_36, %c0_37, %c0_38] : memref<4x1x8xf32, #tpu.memory_space<vmem>>, vector<1x1x8xf32>
    %51 = vector.shape_cast %50 : vector<1x1x8xf32> to vector<1x8xf32>
    %52 = vector.broadcast %51 : vector<1x8xf32> to vector<224x8xf32>
    %53 = arith.addf %49, %52 : vector<224x8xf32>
    %c1_39 = arith.constant 1 : index
    %c0_40 = arith.constant 0 : index
    %c0_41 = arith.constant 0 : index
    %54 = vector.load %arg3[%c1_39, %c0_40, %c0_41] : memref<4x32x8xf32, #tpu.memory_space<vmem>>, vector<1x32x8xf32>
    %55 = vector.shape_cast %54 : vector<1x32x8xf32> to vector<32x8xf32>
    %cst_42 = arith.constant dense<0.000000e+00> : vector<224x8xf32>
    %56 = tpu.matmul %1, %55, %cst_42 {dimension_numbers = #tpu.dot_dimension_numbers<[1], [0], [0], [1], [0, 0, 1, 1], [], []>} : vector<224x32xf32>, vector<32x8xf32>, vector<224x8xf32> -> vector<224x8xf32>
    %c1_43 = arith.constant 1 : index
    %c0_44 = arith.constant 0 : index
    %c0_45 = arith.constant 0 : index
    %57 = vector.load %arg6[%c1_43, %c0_44, %c0_45] : memref<4x1x8xf32, #tpu.memory_space<vmem>>, vector<1x1x8xf32>
    %58 = vector.shape_cast %57 : vector<1x1x8xf32> to vector<1x8xf32>
    %59 = vector.broadcast %58 : vector<1x8xf32> to vector<224x8xf32>
    %60 = arith.addf %56, %59 : vector<224x8xf32>
    %c1_46 = arith.constant 1 : index
    %c0_47 = arith.constant 0 : index
    %c0_48 = arith.constant 0 : index
    %61 = vector.load %arg4[%c1_46, %c0_47, %c0_48] : memref<4x32x8xf32, #tpu.memory_space<vmem>>, vector<1x32x8xf32>
    %62 = vector.shape_cast %61 : vector<1x32x8xf32> to vector<32x8xf32>
    %cst_49 = arith.constant dense<0.000000e+00> : vector<224x8xf32>
    %63 = tpu.matmul %1, %62, %cst_49 {dimension_numbers = #tpu.dot_dimension_numbers<[1], [0], [0], [1], [0, 0, 1, 1], [], []>} : vector<224x32xf32>, vector<32x8xf32>, vector<224x8xf32> -> vector<224x8xf32>
    %c1_50 = arith.constant 1 : index
    %c0_51 = arith.constant 0 : index
    %c0_52 = arith.constant 0 : index
    %64 = vector.load %arg7[%c1_50, %c0_51, %c0_52] : memref<4x1x8xf32, #tpu.memory_space<vmem>>, vector<1x1x8xf32>
    %65 = vector.shape_cast %64 : vector<1x1x8xf32> to vector<1x8xf32>
    %66 = vector.broadcast %65 : vector<1x8xf32> to vector<224x8xf32>
    %67 = arith.addf %63, %66 : vector<224x8xf32>
    %68 = vector.shape_cast %53 : vector<224x8xf32> to vector<4x56x8xf32>
    %69 = vector.shape_cast %60 : vector<224x8xf32> to vector<4x56x8xf32>
    %70 = vector.shape_cast %67 : vector<224x8xf32> to vector<4x56x8xf32>
    "tpu.trace_start"() <{level = 10 : i32, message = "bqd,bkd->bqk"}> : () -> ()
    %cst_53 = arith.constant dense<0.000000e+00> : vector<4x56x56xf32>
    %71 = tpu.matmul %68, %69, %cst_53 {dimension_numbers = #tpu.dot_dimension_numbers<[2], [2], [1], [1], [0, 0, 0, 1, 1, 1], [0], [0]>} : vector<4x56x8xf32>, vector<4x56x8xf32>, vector<4x56x56xf32> -> vector<4x56x56xf32>
    "tpu.trace_stop"() : () -> ()
    %c1_54 = arith.constant 1 : index
    %c0_55 = arith.constant 0 : index
    %c0_56 = arith.constant 0 : index
    %72 = vector.load %arg10[%c1_54, %c0_55, %c0_56] : memref<4x56x56xf32, #tpu.memory_space<vmem>>, vector<1x56x56xf32>
    %73 = vector.shape_cast %72 : vector<1x56x56xf32> to vector<56x56xf32>
    %74 = vector.shape_cast %73 : vector<56x56xf32> to vector<1x56x56xf32>
    %75 = vector.broadcast %74 : vector<1x56x56xf32> to vector<4x56x56xf32>
    %76 = arith.addf %71, %75 : vector<4x56x56xf32>
    %cst_57 = arith.constant dense<0xFF800000> : vector<4x56xf32>
    %77 = vector.multi_reduction <maximumf>, %76, %cst_57 [2] : vector<4x56x56xf32> to vector<4x56xf32>
    %78 = vector.shape_cast %77 : vector<4x56xf32> to vector<4x56x1xf32>
    %79 = vector.broadcast %78 : vector<4x56x1xf32> to vector<4x56x56xf32>
    %80 = arith.subf %76, %79 : vector<4x56x56xf32>
    %81 = math.exp %80 : vector<4x56x56xf32>
    %cst_58 = arith.constant dense<0.000000e+00> : vector<4x56xf32>
    %82 = vector.multi_reduction <add>, %81, %cst_58 [2] : vector<4x56x56xf32> to vector<4x56xf32>
    %83 = vector.shape_cast %82 : vector<4x56xf32> to vector<4x56x1xf32>
    %84 = tpu.reciprocal %83 {approx = true} : vector<4x56x1xf32> -> vector<4x56x1xf32>
    %85 = vector.broadcast %84 : vector<4x56x1xf32> to vector<4x56x56xf32>
    %86 = arith.mulf %81, %85 : vector<4x56x56xf32>
    "tpu.trace_start"() <{level = 10 : i32, message = "bqk,bkd->bqd"}> : () -> ()
    %cst_59 = arith.constant dense<0.000000e+00> : vector<4x56x8xf32>
    %87 = tpu.matmul %86, %70, %cst_59 {dimension_numbers = #tpu.dot_dimension_numbers<[2], [1], [1], [2], [0, 0, 0, 1, 1, 2], [0], [0]>} : vector<4x56x56xf32>, vector<4x56x8xf32>, vector<4x56x8xf32> -> vector<4x56x8xf32>
    "tpu.trace_stop"() : () -> ()
    %88 = vector.shape_cast %87 : vector<4x56x8xf32> to vector<224x8xf32>
    %c1_60 = arith.constant 1 : index
    %c0_61 = arith.constant 0 : index
    %c0_62 = arith.constant 0 : index
    %89 = vector.load %arg8[%c1_60, %c0_61, %c0_62] : memref<4x8x32xf32, #tpu.memory_space<vmem>>, vector<1x8x32xf32>
    %90 = vector.shape_cast %89 : vector<1x8x32xf32> to vector<8x32xf32>
    %cst_63 = arith.constant dense<0.000000e+00> : vector<224x32xf32>
    %91 = tpu.matmul %88, %90, %cst_63 {dimension_numbers = #tpu.dot_dimension_numbers<[1], [0], [0], [1], [0, 0, 1, 1], [], []>} : vector<224x8xf32>, vector<8x32xf32>, vector<224x32xf32> -> vector<224x32xf32>
    %92 = arith.addf %46, %91 : vector<224x32xf32>
    %c2 = arith.constant 2 : index
    %c0_64 = arith.constant 0 : index
    %c0_65 = arith.constant 0 : index
    %93 = vector.load %arg2[%c2, %c0_64, %c0_65] : memref<4x32x8xf32, #tpu.memory_space<vmem>>, vector<1x32x8xf32>
    %94 = vector.shape_cast %93 : vector<1x32x8xf32> to vector<32x8xf32>
    %cst_66 = arith.constant dense<0.000000e+00> : vector<224x8xf32>
    %95 = tpu.matmul %1, %94, %cst_66 {dimension_numbers = #tpu.dot_dimension_numbers<[1], [0], [0], [1], [0, 0, 1, 1], [], []>} : vector<224x32xf32>, vector<32x8xf32>, vector<224x8xf32> -> vector<224x8xf32>
    %c2_67 = arith.constant 2 : index
    %c0_68 = arith.constant 0 : index
    %c0_69 = arith.constant 0 : index
    %96 = vector.load %arg5[%c2_67, %c0_68, %c0_69] : memref<4x1x8xf32, #tpu.memory_space<vmem>>, vector<1x1x8xf32>
    %97 = vector.shape_cast %96 : vector<1x1x8xf32> to vector<1x8xf32>
    %98 = vector.broadcast %97 : vector<1x8xf32> to vector<224x8xf32>
    %99 = arith.addf %95, %98 : vector<224x8xf32>
    %c2_70 = arith.constant 2 : index
    %c0_71 = arith.constant 0 : index
    %c0_72 = arith.constant 0 : index
    %100 = vector.load %arg3[%c2_70, %c0_71, %c0_72] : memref<4x32x8xf32, #tpu.memory_space<vmem>>, vector<1x32x8xf32>
    %101 = vector.shape_cast %100 : vector<1x32x8xf32> to vector<32x8xf32>
    %cst_73 = arith.constant dense<0.000000e+00> : vector<224x8xf32>
    %102 = tpu.matmul %1, %101, %cst_73 {dimension_numbers = #tpu.dot_dimension_numbers<[1], [0], [0], [1], [0, 0, 1, 1], [], []>} : vector<224x32xf32>, vector<32x8xf32>, vector<224x8xf32> -> vector<224x8xf32>
    %c2_74 = arith.constant 2 : index
    %c0_75 = arith.constant 0 : index
    %c0_76 = arith.constant 0 : index
    %103 = vector.load %arg6[%c2_74, %c0_75, %c0_76] : memref<4x1x8xf32, #tpu.memory_space<vmem>>, vector<1x1x8xf32>
    %104 = vector.shape_cast %103 : vector<1x1x8xf32> to vector<1x8xf32>
    %105 = vector.broadcast %104 : vector<1x8xf32> to vector<224x8xf32>
    %106 = arith.addf %102, %105 : vector<224x8xf32>
    %c2_77 = arith.constant 2 : index
    %c0_78 = arith.constant 0 : index
    %c0_79 = arith.constant 0 : index
    %107 = vector.load %arg4[%c2_77, %c0_78, %c0_79] : memref<4x32x8xf32, #tpu.memory_space<vmem>>, vector<1x32x8xf32>
    %108 = vector.shape_cast %107 : vector<1x32x8xf32> to vector<32x8xf32>
    %cst_80 = arith.constant dense<0.000000e+00> : vector<224x8xf32>
    %109 = tpu.matmul %1, %108, %cst_80 {dimension_numbers = #tpu.dot_dimension_numbers<[1], [0], [0], [1], [0, 0, 1, 1], [], []>} : vector<224x32xf32>, vector<32x8xf32>, vector<224x8xf32> -> vector<224x8xf32>
    %c2_81 = arith.constant 2 : index
    %c0_82 = arith.constant 0 : index
    %c0_83 = arith.constant 0 : index
    %110 = vector.load %arg7[%c2_81, %c0_82, %c0_83] : memref<4x1x8xf32, #tpu.memory_space<vmem>>, vector<1x1x8xf32>
    %111 = vector.shape_cast %110 : vector<1x1x8xf32> to vector<1x8xf32>
    %112 = vector.broadcast %111 : vector<1x8xf32> to vector<224x8xf32>
    %113 = arith.addf %109, %112 : vector<224x8xf32>
    %114 = vector.shape_cast %99 : vector<224x8xf32> to vector<4x56x8xf32>
    %115 = vector.shape_cast %106 : vector<224x8xf32> to vector<4x56x8xf32>
    %116 = vector.shape_cast %113 : vector<224x8xf32> to vector<4x56x8xf32>
    "tpu.trace_start"() <{level = 10 : i32, message = "bqd,bkd->bqk"}> : () -> ()
    %cst_84 = arith.constant dense<0.000000e+00> : vector<4x56x56xf32>
    %117 = tpu.matmul %114, %115, %cst_84 {dimension_numbers = #tpu.dot_dimension_numbers<[2], [2], [1], [1], [0, 0, 0, 1, 1, 1], [0], [0]>} : vector<4x56x8xf32>, vector<4x56x8xf32>, vector<4x56x56xf32> -> vector<4x56x56xf32>
    "tpu.trace_stop"() : () -> ()
    %c2_85 = arith.constant 2 : index
    %c0_86 = arith.constant 0 : index
    %c0_87 = arith.constant 0 : index
    %118 = vector.load %arg10[%c2_85, %c0_86, %c0_87] : memref<4x56x56xf32, #tpu.memory_space<vmem>>, vector<1x56x56xf32>
    %119 = vector.shape_cast %118 : vector<1x56x56xf32> to vector<56x56xf32>
    %120 = vector.shape_cast %119 : vector<56x56xf32> to vector<1x56x56xf32>
    %121 = vector.broadcast %120 : vector<1x56x56xf32> to vector<4x56x56xf32>
    %122 = arith.addf %117, %121 : vector<4x56x56xf32>
    %cst_88 = arith.constant dense<0xFF800000> : vector<4x56xf32>
    %123 = vector.multi_reduction <maximumf>, %122, %cst_88 [2] : vector<4x56x56xf32> to vector<4x56xf32>
    %124 = vector.shape_cast %123 : vector<4x56xf32> to vector<4x56x1xf32>
    %125 = vector.broadcast %124 : vector<4x56x1xf32> to vector<4x56x56xf32>
    %126 = arith.subf %122, %125 : vector<4x56x56xf32>
    %127 = math.exp %126 : vector<4x56x56xf32>
    %cst_89 = arith.constant dense<0.000000e+00> : vector<4x56xf32>
    %128 = vector.multi_reduction <add>, %127, %cst_89 [2] : vector<4x56x56xf32> to vector<4x56xf32>
    %129 = vector.shape_cast %128 : vector<4x56xf32> to vector<4x56x1xf32>
    %130 = tpu.reciprocal %129 {approx = true} : vector<4x56x1xf32> -> vector<4x56x1xf32>
    %131 = vector.broadcast %130 : vector<4x56x1xf32> to vector<4x56x56xf32>
    %132 = arith.mulf %127, %131 : vector<4x56x56xf32>
    "tpu.trace_start"() <{level = 10 : i32, message = "bqk,bkd->bqd"}> : () -> ()
    %cst_90 = arith.constant dense<0.000000e+00> : vector<4x56x8xf32>
    %133 = tpu.matmul %132, %116, %cst_90 {dimension_numbers = #tpu.dot_dimension_numbers<[2], [1], [1], [2], [0, 0, 0, 1, 1, 2], [0], [0]>} : vector<4x56x56xf32>, vector<4x56x8xf32>, vector<4x56x8xf32> -> vector<4x56x8xf32>
    "tpu.trace_stop"() : () -> ()
    %134 = vector.shape_cast %133 : vector<4x56x8xf32> to vector<224x8xf32>
    %c2_91 = arith.constant 2 : index
    %c0_92 = arith.constant 0 : index
    %c0_93 = arith.constant 0 : index
    %135 = vector.load %arg8[%c2_91, %c0_92, %c0_93] : memref<4x8x32xf32, #tpu.memory_space<vmem>>, vector<1x8x32xf32>
    %136 = vector.shape_cast %135 : vector<1x8x32xf32> to vector<8x32xf32>
    %cst_94 = arith.constant dense<0.000000e+00> : vector<224x32xf32>
    %137 = tpu.matmul %134, %136, %cst_94 {dimension_numbers = #tpu.dot_dimension_numbers<[1], [0], [0], [1], [0, 0, 1, 1], [], []>} : vector<224x8xf32>, vector<8x32xf32>, vector<224x32xf32> -> vector<224x32xf32>
    %138 = arith.addf %92, %137 : vector<224x32xf32>
    %c3 = arith.constant 3 : index
    %c0_95 = arith.constant 0 : index
    %c0_96 = arith.constant 0 : index
    %139 = vector.load %arg2[%c3, %c0_95, %c0_96] : memref<4x32x8xf32, #tpu.memory_space<vmem>>, vector<1x32x8xf32>
    %140 = vector.shape_cast %139 : vector<1x32x8xf32> to vector<32x8xf32>
    %cst_97 = arith.constant dense<0.000000e+00> : vector<224x8xf32>
    %141 = tpu.matmul %1, %140, %cst_97 {dimension_numbers = #tpu.dot_dimension_numbers<[1], [0], [0], [1], [0, 0, 1, 1], [], []>} : vector<224x32xf32>, vector<32x8xf32>, vector<224x8xf32> -> vector<224x8xf32>
    %c3_98 = arith.constant 3 : index
    %c0_99 = arith.constant 0 : index
    %c0_100 = arith.constant 0 : index
    %142 = vector.load %arg5[%c3_98, %c0_99, %c0_100] : memref<4x1x8xf32, #tpu.memory_space<vmem>>, vector<1x1x8xf32>
    %143 = vector.shape_cast %142 : vector<1x1x8xf32> to vector<1x8xf32>
    %144 = vector.broadcast %143 : vector<1x8xf32> to vector<224x8xf32>
    %145 = arith.addf %141, %144 : vector<224x8xf32>
    %c3_101 = arith.constant 3 : index
    %c0_102 = arith.constant 0 : index
    %c0_103 = arith.constant 0 : index
    %146 = vector.load %arg3[%c3_101, %c0_102, %c0_103] : memref<4x32x8xf32, #tpu.memory_space<vmem>>, vector<1x32x8xf32>
    %147 = vector.shape_cast %146 : vector<1x32x8xf32> to vector<32x8xf32>
    %cst_104 = arith.constant dense<0.000000e+00> : vector<224x8xf32>
    %148 = tpu.matmul %1, %147, %cst_104 {dimension_numbers = #tpu.dot_dimension_numbers<[1], [0], [0], [1], [0, 0, 1, 1], [], []>} : vector<224x32xf32>, vector<32x8xf32>, vector<224x8xf32> -> vector<224x8xf32>
    %c3_105 = arith.constant 3 : index
    %c0_106 = arith.constant 0 : index
    %c0_107 = arith.constant 0 : index
    %149 = vector.load %arg6[%c3_105, %c0_106, %c0_107] : memref<4x1x8xf32, #tpu.memory_space<vmem>>, vector<1x1x8xf32>
    %150 = vector.shape_cast %149 : vector<1x1x8xf32> to vector<1x8xf32>
    %151 = vector.broadcast %150 : vector<1x8xf32> to vector<224x8xf32>
    %152 = arith.addf %148, %151 : vector<224x8xf32>
    %c3_108 = arith.constant 3 : index
    %c0_109 = arith.constant 0 : index
    %c0_110 = arith.constant 0 : index
    %153 = vector.load %arg4[%c3_108, %c0_109, %c0_110] : memref<4x32x8xf32, #tpu.memory_space<vmem>>, vector<1x32x8xf32>
    %154 = vector.shape_cast %153 : vector<1x32x8xf32> to vector<32x8xf32>
    %cst_111 = arith.constant dense<0.000000e+00> : vector<224x8xf32>
    %155 = tpu.matmul %1, %154, %cst_111 {dimension_numbers = #tpu.dot_dimension_numbers<[1], [0], [0], [1], [0, 0, 1, 1], [], []>} : vector<224x32xf32>, vector<32x8xf32>, vector<224x8xf32> -> vector<224x8xf32>
    %c3_112 = arith.constant 3 : index
    %c0_113 = arith.constant 0 : index
    %c0_114 = arith.constant 0 : index
    %156 = vector.load %arg7[%c3_112, %c0_113, %c0_114] : memref<4x1x8xf32, #tpu.memory_space<vmem>>, vector<1x1x8xf32>
    %157 = vector.shape_cast %156 : vector<1x1x8xf32> to vector<1x8xf32>
    %158 = vector.broadcast %157 : vector<1x8xf32> to vector<224x8xf32>
    %159 = arith.addf %155, %158 : vector<224x8xf32>
    %160 = vector.shape_cast %145 : vector<224x8xf32> to vector<4x56x8xf32>
    %161 = vector.shape_cast %152 : vector<224x8xf32> to vector<4x56x8xf32>
    %162 = vector.shape_cast %159 : vector<224x8xf32> to vector<4x56x8xf32>
    "tpu.trace_start"() <{level = 10 : i32, message = "bqd,bkd->bqk"}> : () -> ()
    %cst_115 = arith.constant dense<0.000000e+00> : vector<4x56x56xf32>
    %163 = tpu.matmul %160, %161, %cst_115 {dimension_numbers = #tpu.dot_dimension_numbers<[2], [2], [1], [1], [0, 0, 0, 1, 1, 1], [0], [0]>} : vector<4x56x8xf32>, vector<4x56x8xf32>, vector<4x56x56xf32> -> vector<4x56x56xf32>
    "tpu.trace_stop"() : () -> ()
    %c3_116 = arith.constant 3 : index
    %c0_117 = arith.constant 0 : index
    %c0_118 = arith.constant 0 : index
    %164 = vector.load %arg10[%c3_116, %c0_117, %c0_118] : memref<4x56x56xf32, #tpu.memory_space<vmem>>, vector<1x56x56xf32>
    %165 = vector.shape_cast %164 : vector<1x56x56xf32> to vector<56x56xf32>
    %166 = vector.shape_cast %165 : vector<56x56xf32> to vector<1x56x56xf32>
    %167 = vector.broadcast %166 : vector<1x56x56xf32> to vector<4x56x56xf32>
    %168 = arith.addf %163, %167 : vector<4x56x56xf32>
    %cst_119 = arith.constant dense<0xFF800000> : vector<4x56xf32>
    %169 = vector.multi_reduction <maximumf>, %168, %cst_119 [2] : vector<4x56x56xf32> to vector<4x56xf32>
    %170 = vector.shape_cast %169 : vector<4x56xf32> to vector<4x56x1xf32>
    %171 = vector.broadcast %170 : vector<4x56x1xf32> to vector<4x56x56xf32>
    %172 = arith.subf %168, %171 : vector<4x56x56xf32>
    %173 = math.exp %172 : vector<4x56x56xf32>
    %cst_120 = arith.constant dense<0.000000e+00> : vector<4x56xf32>
    %174 = vector.multi_reduction <add>, %173, %cst_120 [2] : vector<4x56x56xf32> to vector<4x56xf32>
    %175 = vector.shape_cast %174 : vector<4x56xf32> to vector<4x56x1xf32>
    %176 = tpu.reciprocal %175 {approx = true} : vector<4x56x1xf32> -> vector<4x56x1xf32>
    %177 = vector.broadcast %176 : vector<4x56x1xf32> to vector<4x56x56xf32>
    %178 = arith.mulf %173, %177 : vector<4x56x56xf32>
    "tpu.trace_start"() <{level = 10 : i32, message = "bqk,bkd->bqd"}> : () -> ()
    %cst_121 = arith.constant dense<0.000000e+00> : vector<4x56x8xf32>
    %179 = tpu.matmul %178, %162, %cst_121 {dimension_numbers = #tpu.dot_dimension_numbers<[2], [1], [1], [2], [0, 0, 0, 1, 1, 2], [0], [0]>} : vector<4x56x56xf32>, vector<4x56x8xf32>, vector<4x56x8xf32> -> vector<4x56x8xf32>
    "tpu.trace_stop"() : () -> ()
    %180 = vector.shape_cast %179 : vector<4x56x8xf32> to vector<224x8xf32>
    %c3_122 = arith.constant 3 : index
    %c0_123 = arith.constant 0 : index
    %c0_124 = arith.constant 0 : index
    %181 = vector.load %arg8[%c3_122, %c0_123, %c0_124] : memref<4x8x32xf32, #tpu.memory_space<vmem>>, vector<1x8x32xf32>
    %182 = vector.shape_cast %181 : vector<1x8x32xf32> to vector<8x32xf32>
    %cst_125 = arith.constant dense<0.000000e+00> : vector<224x32xf32>
    %183 = tpu.matmul %180, %182, %cst_125 {dimension_numbers = #tpu.dot_dimension_numbers<[1], [0], [0], [1], [0, 0, 1, 1], [], []>} : vector<224x8xf32>, vector<8x32xf32>, vector<224x32xf32> -> vector<224x32xf32>
    %184 = arith.addf %138, %183 : vector<224x32xf32>
    %c0_126 = arith.constant 0 : index
    %c0_127 = arith.constant 0 : index
    %185 = vector.load %arg9[%c0_126, %c0_127] : memref<1x32xf32, #tpu.memory_space<vmem>>, vector<1x32xf32>
    %186 = vector.broadcast %185 : vector<1x32xf32> to vector<224x32xf32>
    %187 = arith.addf %184, %186 : vector<224x32xf32>
    %c0_128 = arith.constant 0 : index
    %c0_129 = arith.constant 0 : index
    %c0_130 = arith.constant 0 : index
    %188 = vector.load %arg11[%c0_128, %c0_129, %c0_130] : memref<1x224x32xf32, #tpu.memory_space<vmem>>, vector<1x224x32xf32>
    %189 = vector.shape_cast %188 : vector<1x224x32xf32> to vector<224x32xf32>
    %190 = vector.shape_cast %187 : vector<224x32xf32> to vector<1x224x32xf32>
    tpu.vector_store %arg11[%c0_128, %c0_129, %c0_130], %190 {strides = array<i32>} : memref<1x224x32xf32, #tpu.memory_space<vmem>>, vector<1x224x32xf32>,
    return
  }
  func.func @transform_0(%arg0: i32) -> (i32, i32, i32) {
    %c0_i32 = arith.constant 0 : i32
    %c0_i32_0 = arith.constant 0 : i32
    %c0_i32_1 = arith.constant 0 : i32
    return %arg0, %c0_i32, %c0_i32_0 : i32, i32, i32
  }
  func.func @transform_1(%arg0: i32) -> (i32, i32, i32) {
    %c0_i32 = arith.constant 0 : i32
    %c0_i32_0 = arith.constant 0 : i32
    %c0_i32_1 = arith.constant 0 : i32
    %c0_i32_2 = arith.constant 0 : i32
    return %c0_i32, %c0_i32_0, %c0_i32_1 : i32, i32, i32
  }
  func.func @transform_2(%arg0: i32) -> (i32, i32, i32) {
    %c0_i32 = arith.constant 0 : i32
    %c0_i32_0 = arith.constant 0 : i32
    %c0_i32_1 = arith.constant 0 : i32
    %c0_i32_2 = arith.constant 0 : i32
    return %c0_i32, %c0_i32_0, %c0_i32_1 : i32, i32, i32
  }
  func.func @transform_3(%arg0: i32) -> (i32, i32, i32) {
    %c0_i32 = arith.constant 0 : i32
    %c0_i32_0 = arith.constant 0 : i32
    %c0_i32_1 = arith.constant 0 : i32
    %c0_i32_2 = arith.constant 0 : i32
    return %c0_i32, %c0_i32_0, %c0_i32_1 : i32, i32, i32
  }
  func.func @transform_4(%arg0: i32) -> (i32, i32, i32) {
    %c0_i32 = arith.constant 0 : i32
    %c0_i32_0 = arith.constant 0 : i32
    %c0_i32_1 = arith.constant 0 : i32
    %c0_i32_2 = arith.constant 0 : i32
    return %c0_i32, %c0_i32_0, %c0_i32_1 : i32, i32, i32
  }
  func.func @transform_5(%arg0: i32) -> (i32, i32, i32) {
    %c0_i32 = arith.constant 0 : i32
    %c0_i32_0 = arith.constant 0 : i32
    %c0_i32_1 = arith.constant 0 : i32
    %c0_i32_2 = arith.constant 0 : i32
    return %c0_i32, %c0_i32_0, %c0_i32_1 : i32, i32, i32
  }
  func.func @transform_6(%arg0: i32) -> (i32, i32, i32) {
    %c0_i32 = arith.constant 0 : i32
    %c0_i32_0 = arith.constant 0 : i32
    %c0_i32_1 = arith.constant 0 : i32
    %c0_i32_2 = arith.constant 0 : i32
    return %c0_i32, %c0_i32_0, %c0_i32_1 : i32, i32, i32
  }
  func.func @transform_7(%arg0: i32) -> (i32, i32, i32) {
    %c0_i32 = arith.constant 0 : i32
    %c0_i32_0 = arith.constant 0 : i32
    %c0_i32_1 = arith.constant 0 : i32
    %c0_i32_2 = arith.constant 0 : i32
    return %c0_i32, %c0_i32_0, %c0_i32_1 : i32, i32, i32
  }
  func.func @transform_8(%arg0: i32) -> (i32, i32) {
    %c0_i32 = arith.constant 0 : i32
    %c0_i32_0 = arith.constant 0 : i32
    %c0_i32_1 = arith.constant 0 : i32
    return %c0_i32, %c0_i32_0 : i32, i32
  }
  func.func @transform_9(%arg0: i32) -> (i32, i32, i32) {
    %c0_i32 = arith.constant 0 : i32
    %c0_i32_0 = arith.constant 0 : i32
    %c0_i32_1 = arith.constant 0 : i32
    %c0_i32_2 = arith.constant 0 : i32
    return %c0_i32, %c0_i32_0, %c0_i32_1 : i32, i32, i32
  }
  func.func @transform_10(%arg0: i32) -> (i32, i32, i32) {
    %c0_i32 = arith.constant 0 : i32
    %c0_i32_0 = arith.constant 0 : i32
    %c0_i32_1 = arith.constant 0 : i32
    return %arg0, %c0_i32, %c0_i32_0 : i32, i32, i32
  }
}

</mosaic_0001>

<bundles_post_ra>
// kernel: tpu_custom_call.1
= control target key start
LH: loop header
LB: loop body
LE: loop exit
PB: predicated region body
PF: predicated region fallthrough
CT: control target
= control target key end

     0   :  { %s14743_s13 = smov 0   ;;  %s19527_s0 = inlined_call_operand.vmem [shape: f32[2,224,32], index: 0, kind: input, shape index: {}]   ;;  %s19528_s1 = inlined_call_operand.vmem [shape: f32[4,32,8], index: 1, kind: input, shape index: {}]   ;;  %s19529_s2 = inlined_call_operand.vmem [shape: f32[4,32,8], index: 2, kind: input, shape index: {}]   ;;  %s19530_s3 = inlined_call_operand.vmem [shape: f32[4,32,8], index: 3, kind: input, shape index: {}]   ;;  %s19531_s4 = inlined_call_operand.vmem [shape: f32[4,1,8], index: 4, kind: input, shape index: {}]   ;;  %s19532_s5 = inlined_call_operand.vmem [shape: f32[4,1,8], index: 5, kind: input, shape index: {}]   ;;  %s19533_s6 = inlined_call_operand.vmem [shape: f32[4,1,8], index: 6, kind: input, shape index: {}]   ;;  %s19534_s7 = inlined_call_operand.vmem [shape: f32[4,8,32], index: 7, kind: input, shape index: {}]   ;;  %s19535_s8 = inlined_call_operand.vmem [shape: f32[1,32], index: 8, kind: input, shape index: {}]   ;;  %s19536_s9 = inlined_call_operand.vmem [shape: f32[4,56,56], index: 9, kind: input, shape index: {}]   ;;  %s19537_s10 = inlined_call_operand.vmem [shape: f32[2,224,32], index: 10, kind: output, shape index: {}]  }
   0x1 LB: > { %s9893_s14 = sadd.s32 4294967295, %s14683_s13   ;;  %p9897_p0 = scmp.ge.s32.totalorder %s14683_s13, 1  ;;  %s14683_s13 = sphi %s14743_s13, %s20_s13  }
   0x2   : > { %p312_p1 = scmp.lt.s32.totalorder %s14683_s13, 3 }
   0x4   : > { %p313_p2 = pnand %p9897_p0, %p312_p1 }
   0x6   : > { %316 = sbr.rel (%p313_p2) target bundleno = 4158 (0x103e), region = 60 }
   0xd   : > { %v388_v0 = vld [vmem:[%s19528_s1] sm:$0xff]  ;;  %v389_v1 = vld [vmem:[%s19528_s1 + $0x8] sm:$0xff]  ;;  %v390_v2 = vld [vmem:[%s19528_s1 + $0x10] sm:$0xff]  ;;  %p350_p3 = scmp.lt.s32.totalorder %s9893_s14, 1  ;;  %vm399_vm0 = vcmask 261120   ;;  %v19538_v46 = vmov 0.0|0.0  }
   0xe   : > { %v13612_v3 = vpack.c.bf16 %v389_v1, %v388_v0  ;;  %v391_v4 = vld [vmem:[%s19528_s1 + $0x18] sm:$0xff]  ;;  %v689_v6 = vld [vmem:[%s19529_s2] sm:$0xff]  ;;  %v690_v7 = vld [vmem:[%s19529_s2 + $0x8] sm:$0xff]  ;;  %vm14686_vm1 = vmmov 0   ;;  %v19540_v47 = vmov 0.0   ;;  %vm1128_vm2 = vcmask 64512  }
   0xf   : > { %v13616_v5 = vpack.c.bf16 %v391_v4, %v390_v2  ;;  %s19626_s14 = smov (!%p350_p3, %s9893_s14), 1  ;;  %v13620_v8 = vpack.c.bf16 %v690_v7, %v689_v6  ;;  %v691_v9 = vld [vmem:[%s19529_s2 + $0x10] sm:$0xff]  ;;  %v692_v10 = vld [vmem:[%s19529_s2 + $0x18] sm:$0xff]  ;;  %v905_v40 = vld [vmem:[%s19530_s3] sm:$0xff]  ;;  %vm1697_vm4 = vcmask 457728  }
  0x10   : > { %14044 = vmatprep.subr.bf16.mxu1 %v13612_v3  ;;  %13613 = vmatprep.subr.bf16.mxu0 %v13612_v3  ;;  %s14132_s27 = smul.u32 224, %s19626_s14  ;;  %v13624_v14 = vpack.c.bf16 %v692_v10, %v691_v9  ;;  %v906_v41 = vld [vmem:[%s19530_s3 + $0x8] sm:$0xff]  ;;  %v907_v43 = vld [vmem:[%s19530_s3 + $0x10] sm:$0xff]  ;;  %v908_v44 = vld [vmem:[%s19530_s3 + $0x18] sm:$0xff] }
  0x11   : > { %14046 = vmatpush3.bf16.msra.mxu1 %v13612_v3  ;;  %13615 = vmatpush3.bf16.msra.mxu0 %v13612_v3  ;;  %v13628_v42 = vpack.c.bf16 %v906_v41, %v905_v40  ;;  %v13632_v45 = vpack.c.bf16 %v908_v44, %v907_v43  ;;  %v15068_v63 = vld [vmem:[%s19531_s4] ss:$0 sm:$0xff]  ;;  %vm15110_vm3 = vmpackc.low %vm1128_vm2, %vm1128_vm2 }
  0x12   : > { %14045 = vmatprep.subr.bf16.mxu1 %v13616_v5  ;;  %13617 = vmatprep.subr.bf16.mxu0 %v13616_v5  ;;  %s14777_s30 = scalar_lea.vmem %s19527_s0, %s14132_s27  ;;  %s19438_s11 = scalar_lea.vmem %s19537_s10, %s14132_s27 }
  0x13   : > { %v14786_v11 = vld [vmem:[%s14777_s30 + $0x70] sm:$0xff]  ;;  %v14791_v12 = vld [vmem:[%s14777_s30 + $0x78] sm:$0xff]  ;;  %v14794_v13 = vld [vmem:[%s14777_s30 + $0x80] sm:$0xff] }
  0x14   : > { %11745 = vmatprep.mubr.msk.f32.mxu1 %vm399_vm0, %v14786_v11  ;;  %v14801_v15 = vld [vmem:[%s14777_s30 + $0x88] sm:$0xff]  ;;  %v360_v16 = vld [vmem:[%s14777_s30] sm:$0xff]  ;;  %v14805_v17 = vld [vmem:[%s14777_s30 + $0x90] sm:$0xff] }
  0x15   : > { %14047 = vmatpush3.bf16.msra.mxu1 %v13616_v5  ;;  %13619 = vmatpush3.bf16.msra.mxu0 %v13616_v5  ;;  %v14808_v18 = vld [vmem:[%s14777_s30 + $0x8] sm:$0xff]  ;;  %v14812_v19 = vld [vmem:[%s14777_s30 + $0x10] sm:$0xff]  ;;  %v14823_v20 = vld [vmem:[%s14777_s30 + $0x98] sm:$0xff] }
  0x16   : > { %13621 = vmatprep.subr.bf16.mxu1 %v13620_v8  ;;  %11724 = vmatprep.mubr.msk.f32.mxu0 %vm399_vm0, %v360_v16  ;;  %v14826_v21 = vld [vmem:[%s14777_s30 + $0xa0] sm:$0xff]  ;;  %v14829_v22 = vld [vmem:[%s14777_s30 + $0x18] sm:$0xff]  ;;  %v14843_v24 = vld [vmem:[%s14777_s30 + $0xa8] sm:$0xff] }
  0x17   : > { %v14832_v23 = vld [vmem:[%s14777_s30 + $0x20] sm:$0xff]  ;;  %v14846_v25 = vld [vmem:[%s14777_s30 + $0xb0] sm:$0xff]  ;;  %v14849_v26 = vld [vmem:[%s14777_s30 + $0x28] sm:$0xff]  ;;  %13629 = vmatprep.subr.bf16.mxu0 %v13628_v42 }
  0x18   : > { %11746 = vmatmul.mubr.msk.f32.vlgmr.msra.gmra.mrb[0].mxu1 %vm399_vm0, %v14791_v12  ;;  %11725 = vmatmul.mubr.msk.f32.vlgmr.msra.gmra.mrb[0].mxu0 %vm399_vm0, %v14808_v18  ;;  %v14852_v27 = vld [vmem:[%s14777_s30 + $0x30] sm:$0xff]  ;;  %v14863_v28 = vld [vmem:[%s14777_s30 + $0xb8] sm:$0xff]  ;;  %v14866_v29 = vld [vmem:[%s14777_s30 + $0xc0] sm:$0xff] }
  0x19   : > { %11748 = vmatprep.mubr.msk.f32.mxu1 %vm399_vm0, %v14794_v13  ;;  %13623 = vmatpush3.bf16.msra.mxu1 %v13620_v8  ;;  %v14869_v30 = vld [vmem:[%s14777_s30 + $0x38] sm:$0xff]  ;;  %v14872_v31 = vld [vmem:[%s14777_s30 + $0x40] sm:$0xff]  ;;  %v14883_v32 = vld [vmem:[%s14777_s30 + $0xc8] sm:$0xff] }
  0x1a   : > { %13625 = vmatprep.subr.bf16.mxu1 %v13624_v14  ;;  %11727 = vmatprep.mubr.msk.f32.mxu0 %vm399_vm0, %v14812_v19  ;;  %v14886_v33 = vld [vmem:[%s14777_s30 + $0xd0] sm:$0xff]  ;;  %v14889_v34 = vld [vmem:[%s14777_s30 + $0x48] sm:$0xff]  ;;  %v14903_v36 = vld [vmem:[%s14777_s30 + $0xd8] sm:$0xff] }
  0x1b   : > { %v14892_v35 = vld [vmem:[%s14777_s30 + $0x50] sm:$0xff]  ;;  %v371_v37 = vld [vmem:[%s14777_s30 + $0x58] sm:$0xff]  ;;  %v372_v38 = vld [vmem:[%s14777_s30 + $0x60] sm:$0xff]  ;;  %13631 = vmatpush3.bf16.msra.mxu0 %v13628_v42 }
  0x1c   : > { %11749 = vmatmul.mubr.msk.f32.gmra.mrb[2].mxu1 %vm399_vm0, %v14801_v15  ;;  %11728 = vmatmul.mubr.msk.f32.gmra.mrb[2].mxu0 %vm399_vm0, %v14829_v22  ;;  %v373_v39 = vld [vmem:[%s14777_s30 + $0x68] sm:$0xff] }
  0x1d   : > { %11751 = vmatprep.mubr.msk.f32.mxu1 %vm399_vm0, %v14805_v17  ;;  %13627 = vmatpush3.bf16.msra.mxu1 %v13624_v14 }
  0x1e   : > { %11730 = vmatprep.mubr.msk.f32.mxu0 %vm399_vm0, %v14832_v23  ;;  %13633 = vmatprep.subr.bf16.mxu0 %v13632_v45 }
  0x1f   : > { %13635 = vmatpush3.bf16.msra.mxu0 %v13632_v45  ;;  %13636 = vmatprep.subr.bf16.mxu1 %v19538_v46 }
  0x20   : > { %11752 = vmatmul.mubr.msk.f32.gmra.mrb[4].mxu1 %vm399_vm0, %v14823_v20  ;;  %11731 = vmatmul.mubr.msk.f32.gmra.mrb[4].mxu0 %vm399_vm0, %v14849_v26 }
  0x21   : > { %11754 = vmatprep.mubr.msk.f32.mxu1 %vm399_vm0, %v14826_v21  ;;  %11733 = vmatprep.mubr.msk.f32.mxu0 %vm399_vm0, %v14852_v27 }
  0x22   : > { %13660 = vmatprep.subr.bf16.mxu0 %v19538_v46 }
  0x24   : > { %11755 = vmatmul.mubr.msk.f32.gmra.mrb[6].mxu1 %vm399_vm0, %v14843_v24  ;;  %11734 = vmatmul.mubr.msk.f32.gmra.mrb[6].mxu0 %vm399_vm0, %v14869_v30 }
  0x25   : > { %11757 = vmatprep.mubr.msk.f32.mxu1 %vm399_vm0, %v14846_v25  ;;  %11736 = vmatprep.mubr.msk.f32.mxu0 %vm399_vm0, %v14872_v31 }
  0x28   : > { %11758 = vmatmul.mubr.msk.f32.gmra.mrb[8].mxu1 %vm399_vm0, %v14863_v28  ;;  %11737 = vmatmul.mubr.msk.f32.gmra.mrb[8].mxu0 %vm399_vm0, %v14889_v34 }
  0x29   : > { %11760 = vmatprep.mubr.msk.f32.mxu1 %vm399_vm0, %v14866_v29  ;;  %11739 = vmatprep.mubr.msk.f32.mxu0 %vm399_vm0, %v14892_v35 }
  0x2c   : > { %11761 = vmatmul.mubr.msk.f32.gmra.mrb[10].mxu1 %vm399_vm0, %v14883_v32  ;;  %11740 = vmatmul.mubr.msk.f32.gmra.mrb[10].mxu0 %vm399_vm0, %v371_v37 }
  0x2d   : > { %11763 = vmatprep.mubr.msk.f32.mxu1 %vm399_vm0, %v14886_v33  ;;  %11742 = vmatprep.mubr.msk.f32.mxu0 %vm399_vm0, %v372_v38 }
  0x30   : > { %11764 = vmatmul.mubr.msk.f32.gmra.mrb[12].mxu1 %vm399_vm0, %v14903_v36  ;;  %11743 = vmatmul.mubr.msk.f32.gmra.mrb[12].mxu0 %vm399_vm0, %v373_v39 }
  0x31   : > { %11774 = vmatprep.mubr.msk.f32.mxu1 %vm399_vm0, %v360_v16  ;;  %11824 = vmatprep.mubr.msk.f32.mxu0 %vm399_vm0, %v360_v16  ;;  %v15100_v16 = vld [vmem:[%s19532_s5] ss:$0 sm:$0xff] }
  0x34   : > { %11775 = vmatmul.mubr.msk.f32.vlgmr.msra.gmra.mrb[14].mxu1 %vm399_vm0, %v14808_v18  ;;  %11825 = vmatmul.mubr.msk.f32.vlgmr.msra.gmra.mrb[14].mxu0 %vm399_vm0, %v14808_v18 }
  0x35   : > { %11777 = vmatprep.mubr.msk.f32.mxu1 %vm399_vm0, %v14812_v19  ;;  %11827 = vmatprep.mubr.msk.f32.mxu0 %vm399_vm0, %v14812_v19 }
  0x38   : > { %11778 = vmatmul.mubr.msk.f32.gmra.mrb[16].mxu1 %vm399_vm0, %v14829_v22  ;;  %11828 = vmatmul.mubr.msk.f32.gmra.mrb[16].mxu0 %vm399_vm0, %v14829_v22 }
  0x39   : > { %11780 = vmatprep.mubr.msk.f32.mxu1 %vm399_vm0, %v14832_v23  ;;  %11830 = vmatprep.mubr.msk.f32.mxu0 %vm399_vm0, %v14832_v23  ;;  %v19544_v23 = vmov 0 }
  0x3a   : > { %v19545_v23 = vsel %vm15110_vm3, 4294967295, %v19544_v23 }
  0x3b   : > { %19546 = vst [vmem:[#allocation2_spill] sm:$0xff] %v19545_v23 }
  0x3c   : > { %11781 = vmatmul.mubr.msk.f32.gmra.mrb[18].mxu1 %vm399_vm0, %v14849_v26  ;;  %11831 = vmatmul.mubr.msk.f32.gmra.mrb[18].mxu0 %vm399_vm0, %v14849_v26 }
  0x3d   : > { %11783 = vmatprep.mubr.msk.f32.mxu1 %vm399_vm0, %v14852_v27  ;;  %11833 = vmatprep.mubr.msk.f32.mxu0 %vm399_vm0, %v14852_v27 }
  0x40   : > { %11784 = vmatmul.mubr.msk.f32.gmra.mrb[20].mxu1 %vm399_vm0, %v14869_v30  ;;  %11834 = vmatmul.mubr.msk.f32.gmra.mrb[20].mxu0 %vm399_vm0, %v14869_v30 }
  0x41   : > { %11786 = vmatprep.mubr.msk.f32.mxu1 %vm399_vm0, %v14872_v31  ;;  %11836 = vmatprep.mubr.msk.f32.mxu0 %vm399_vm0, %v14872_v31 }
  0x44   : > { %11787 = vmatmul.mubr.msk.f32.gmra.mrb[22].mxu1 %vm399_vm0, %v14889_v34  ;;  %11837 = vmatmul.mubr.msk.f32.gmra.mrb[22].mxu0 %vm399_vm0, %v14889_v34 }
  0x45   : > { %11789 = vmatprep.mubr.msk.f32.mxu1 %vm399_vm0, %v14892_v35  ;;  %11839 = vmatprep.mubr.msk.f32.mxu0 %vm399_vm0, %v14892_v35 }
  0x48   : > { %11790 = vmatmul.mubr.msk.f32.gmra.mrb[24].mxu1 %vm399_vm0, %v371_v37  ;;  %11840 = vmatmul.mubr.msk.f32.gmra.mrb[24].mxu0 %vm399_vm0, %v371_v37 }
  0x49   : > { %11792 = vmatprep.mubr.msk.f32.mxu1 %vm399_vm0, %v372_v38  ;;  %11842 = vmatprep.mubr.msk.f32.mxu0 %vm399_vm0, %v372_v38 }
  0x4c   : > { %11793 = vmatmul.mubr.msk.f32.gmra.mrb[26].mxu1 %vm399_vm0, %v373_v39  ;;  %11843 = vmatmul.mubr.msk.f32.gmra.mrb[26].mxu0 %vm399_vm0, %v373_v39 }
  0x4d   : > { %11795 = vmatprep.mubr.msk.f32.mxu1 %vm399_vm0, %v14786_v11  ;;  %11845 = vmatprep.mubr.msk.f32.mxu0 %vm399_vm0, %v14786_v11 }
  0x50   : > { %11796 = vmatmul.mubr.msk.f32.gmra.mrb[28].mxu1 %vm399_vm0, %v14791_v12  ;;  %11846 = vmatmul.mubr.msk.f32.gmra.mrb[28].mxu0 %vm399_vm0, %v14791_v12 }
  0x51   : > { %11798 = vmatprep.mubr.msk.f32.mxu1 %vm399_vm0, %v14794_v13  ;;  %11848 = vmatprep.mubr.msk.f32.mxu0 %vm399_vm0, %v14794_v13 }
  0x54   : > { %11799 = vmatmul.mubr.msk.f32.gmra.mrb[30].mxu1 %vm399_vm0, %v14801_v15  ;;  %11849 = vmatmul.mubr.msk.f32.gmra.mrb[30].mxu0 %vm399_vm0, %v14801_v15 }
  0x55   : > { %11801 = vmatprep.mubr.msk.f32.mxu1 %vm399_vm0, %v14805_v17  ;;  %11851 = vmatprep.mubr.msk.f32.mxu0 %vm399_vm0, %v14805_v17 }
  0x58   : > { %11802 = vmatmul.mubr.msk.f32.gmra.mrb[32].mxu1 %vm399_vm0, %v14823_v20  ;;  %11852 = vmatmul.mubr.msk.f32.gmra.mrb[32].mxu0 %vm399_vm0, %v14823_v20 }
  0x59   : > { %11804 = vmatprep.mubr.msk.f32.mxu1 %vm399_vm0, %v14826_v21  ;;  %11854 = vmatprep.mubr.msk.f32.mxu0 %vm399_vm0, %v14826_v21 }
  0x5c   : > { %11805 = vmatmul.mubr.msk.f32.gmra.mrb[34].mxu1 %vm399_vm0, %v14843_v24  ;;  %11855 = vmatmul.mubr.msk.f32.gmra.mrb[34].mxu0 %vm399_vm0, %v14843_v24 }
  0x5d   : > { %11807 = vmatprep.mubr.msk.f32.mxu1 %vm399_vm0, %v14846_v25  ;;  %11857 = vmatprep.mubr.msk.f32.mxu0 %vm399_vm0, %v14846_v25 }
  0x60   : > { %11808 = vmatmul.mubr.msk.f32.gmra.mrb[36].mxu1 %vm399_vm0, %v14863_v28  ;;  %11858 = vmatmul.mubr.msk.f32.gmra.mrb[36].mxu0 %vm399_vm0, %v14863_v28 }
  0x61   : > { %11810 = vmatprep.mubr.msk.f32.mxu1 %vm399_vm0, %v14866_v29  ;;  %11860 = vmatprep.mubr.msk.f32.mxu0 %vm399_vm0, %v14866_v29 }
  0x64   : > { %11811 = vmatmul.mubr.msk.f32.gmra.mrb[38].mxu1 %vm399_vm0, %v14883_v32  ;;  %11861 = vmatmul.mubr.msk.f32.gmra.mrb[38].mxu0 %vm399_vm0, %v14883_v32 }
  0x65   : > { %11813 = vmatprep.mubr.msk.f32.mxu1 %vm399_vm0, %v14886_v33  ;;  %11863 = vmatprep.mubr.msk.f32.mxu0 %vm399_vm0, %v14886_v33 }
  0x68   : > { %11814 = vmatmul.mubr.msk.f32.gmra.mrb[40].mxu1 %vm399_vm0, %v14903_v36  ;;  %11864 = vmatmul.mubr.msk.f32.gmra.mrb[40].mxu0 %vm399_vm0, %v14903_v36 }
  0x69   : > { %11880 = vmatprep.mubr.msk.f32.mxu1 %vm14686_vm1, %v19540_v47  ;;  %11950 = vmatprep.mubr.msk.f32.mxu0 %vm14686_vm1, %v19540_v47 }
  0xeb   : > { %v15035_v48 = vpop.f32.mrb[0].mxu1  ;;  %v15039_v50 = vpop.f32.mrb[0].mxu0 }
  0xec   : > { %v15037_v49 = vpop.f32.mrb[1].mxu1  ;;  %v15043_v52 = vpop.f32.mrb[1].mxu0 }
  0xef   : > { %v15041_v51 = vpop.f32.mrb[2].mxu1  ;;  %v15047_v54 = vpop.f32.mrb[2].mxu0 }
  0xf0   : > { %v15045_v53 = vpop.f32.mrb[3].mxu1  ;;  %v15051_v56 = vpop.f32.mrb[3].mxu0 }
  0xf3   : > { %v15049_v55 = vpop.f32.mrb[4].mxu1  ;;  %v15055_v58 = vpop.f32.mrb[4].mxu0 }
  0xf4   : > { %v15053_v57 = vpop.f32.mrb[5].mxu1  ;;  %v15059_v60 = vpop.f32.mrb[5].mxu0 }
  0xf7   : > { %v15057_v59 = vpop.f32.mrb[6].mxu1  ;;  %v15063_v62 = vpop.f32.mrb[6].mxu0 }
  0xf8   : > { %v15061_v61 = vpop.f32.mrb[7].mxu1  ;;  %v15070_v1 = vpop.f32.mrb[7].mxu0 }
  0xfb   : > { %v11759_v0 = vpop.f32.mrb[8].mxu1  ;;  %v15077_v4 = vpop.f32.mrb[8].mxu0 }
  0xfc   : > { %v15073_v2 = vadd.f32 %v11759_v0, %v15068_v63  ;;  %v15075_v3 = vpop.f32.mrb[9].mxu1  ;;  %v15079_v6 = vpop.f32.mrb[9].mxu0 }
  0xff   : > { %v11762_v5 = vpop.f32.mrb[10].mxu1  ;;  %v15087_v10 = vpop.f32.mrb[10].mxu0 }
 0x100   : > { %v15082_v7 = vadd.f32 %v11762_v5, %v15068_v63  ;;  %v670_v8 = vpop.f32.mrb[11].mxu1  ;;  %v15089_v12 = vpop.f32.mrb[11].mxu0 }
 0x101   : > { %v15085_v9 = vadd.f32 %v15068_v63, %v670_v8 }
 0x103   : > { %v11765_v11 = vpop.f32.mrb[12].mxu1  ;;  %v15102_v17 = vpop.f32.mrb[12].mxu0 }
 0x104   : > { %v15092_v13 = vadd.f32 %v11765_v11, %v15068_v63  ;;  %v680_v14 = vpop.f32.mrb[13].mxu1  ;;  %v15104_v19 = vpop.f32.mrb[13].mxu0 }
 0x105   : > { %v15095_v15 = vadd.f32 %v15068_v63, %v680_v14 }
 0x107   : > { %v11776_v18 = vpop.f32.mrb[14].mxu1 }
 0x108   : > { %v772_v20 = vadd.f32 %v11776_v18, %v15100_v16  ;;  %v766_v21 = vpop.f32.mrb[15].mxu1 }
 0x109   : > { %v767_v22 = vadd.f32 %v15100_v16, %v766_v21 }
 0x10b   : > { %v13637_v24 = vpack.c.bf16 %v772_v20, %v767_v22  ;;  %v11779_v25 = vpop.f32.mrb[16].mxu1 }
 0x10c   : > { %v782_v26 = vadd.f32 %v11779_v25, %v15100_v16  ;;  %v776_v27 = vpop.f32.mrb[17].mxu1 }
 0x10d   : > { %13639 = vmatpush3.bf16.xpose.msk.msra.mxu1 %vm15110_vm3, %v13637_v24  ;;  %v777_v28 = vadd.f32 %v15100_v16, %v776_v27  ;;  %v551_v24 = vadd.f32 %v15068_v63, %v15043_v52 }
 0x10e   : > { %13640 = vmatprep.subr.bf16.mxu1 %v19538_v46 }
 0x10f   : > { %v13641_v29 = vpack.c.bf16 %v782_v26, %v777_v28  ;;  %v11782_v30 = vpop.f32.mrb[18].mxu1 }
 0x110   : > { %v792_v31 = vadd.f32 %v11782_v30, %v15100_v16  ;;  %v786_v32 = vpop.f32.mrb[19].mxu1 }
 0x111   : > { %v787_v33 = vadd.f32 %v15100_v16, %v786_v32 }
 0x113   : > { %v13645_v34 = vpack.c.bf16 %v792_v31, %v787_v33  ;;  %v11785_v35 = vpop.f32.mrb[20].mxu1  ;;  %v556_v31 = vadd.f32 %v15039_v50, %v15068_v63 }
 0x114   : > { %v796_v36 = vpop.f32.mrb[21].mxu1  ;;  %v802_v37 = vadd.f32 %v11785_v35, %v15100_v16 }
 0x115   : > { %13643 = vmatpush3.bf16.xpose.msk.msra.mxu1 %vm15110_vm3, %v13641_v29  ;;  %v797_v18 = vadd.f32 %v15100_v16, %v796_v36 }
 0x116   : > { %13644 = vmatprep.subr.bf16.mxu1 %v19538_v46 }
 0x117   : > { %v11788_v38 = vpop.f32.mrb[22].mxu1 }
 0x118   : > { %v806_v39 = vpop.f32.mrb[23].mxu1  ;;  %v812_v41 = vadd.f32 %v11788_v38, %v15100_v16 }
 0x119   : > { %v807_v40 = vadd.f32 %v15100_v16, %v806_v39 }
 0x11b   : > { %v13649_v42 = vpack.c.bf16 %v807_v40, %v802_v37  ;;  %v11791_v43 = vpop.f32.mrb[24].mxu1 }
 0x11c   : > { %v816_v44 = vpop.f32.mrb[25].mxu1  ;;  %v822_v0 = vadd.f32 %v11791_v43, %v15100_v16 }
 0x11d   : > { %13647 = vmatpush3.bf16.xpose.msk.msra.mxu1 %vm15110_vm3, %v13645_v34  ;;  %v817_v45 = vadd.f32 %v15100_v16, %v816_v44  ;;  %v561_v34 = vadd.f32 %v15068_v63, %v15051_v56  ;;  %v566_v56 = vadd.f32 %v15047_v54, %v15068_v63 }
 0x11e   : > { %11878 = vmatprep.subr.mxu1 %v19540_v47 }
 0x11f   : > { %v13653_v5 = vpack.c.bf16 %v817_v45, %v812_v41  ;;  %v15132_v8 = vpop.f32.mrb[26].mxu1 }
 0x120   : > { %v826_v11 = vpop.f32.mrb[27].mxu1 }
 0x121   : > { %v827_v14 = vadd.f32 %v15100_v16, %v826_v11 }
 0x123   : > { %v13657_v20 = vpack.c.bf16 %v827_v14, %v822_v0  ;;  %v11797_v21 = vpop.f32.mrb[28].mxu1  ;;  %v576_v14 = vadd.f32 %v15055_v58, %v15068_v63 }
 0x124   : > { %v842_v22 = vadd.f32 %v11797_v21, %v15100_v16  ;;  %v836_v25 = vpop.f32.mrb[29].mxu1 }
 0x125   : > { %v837_v26 = vadd.f32 %v15100_v16, %v836_v25  ;;  %11879 = vmatpush3.xpose.msk.msra.mxu1 %vm1128_vm2, %v797_v18  ;;  %v832_v25 = vadd.f32 %v15132_v8, %v15100_v16  ;;  %v636_v8 = vadd.f32 %v15041_v51, %v15068_v63  ;;  %v606_v51 = vadd.f32 %v15087_v10, %v15068_v63 }
 0x126   : > { %13648 = vmatprep.subr.bf16.mxu1 %v19538_v46  ;;  %v656_v10 = vadd.f32 %v15057_v59, %v15068_v63  ;;  %v15321_v59 = vld [vmem:[%s19533_s6] ss:$0 sm:$0xff] }
 0x127   : > { %v13661_v27 = vpack.c.bf16 %v842_v22, %v837_v26  ;;  %v11800_v28 = vpop.f32.mrb[30].mxu1 }
 0x128   : > { %11881 = vmatmul.mubr.msk.f32.vlgmr.msra.gmra.mrb[42].mxu1 %vm1128_vm2, %v551_v24  ;;  %v852_v29 = vadd.f32 %v11800_v28, %v15100_v16  ;;  %v846_v30 = vpop.f32.mrb[31].mxu1  ;;  %v586_v28 = vadd.f32 %v15063_v62, %v15068_v63  ;;  %v631_v62 = vadd.f32 %v15068_v63, %v15045_v53  ;;  %v641_v53 = vadd.f32 %v15068_v63, %v15053_v57 }
 0x129   : > { %13651 = vmatpush3.bf16.xpose.msk.msra.mxu1 %vm15110_vm3, %v13649_v42  ;;  %13663 = vmatpush3.bf16.xpose.msk.msra.mxu0 %vm15110_vm3, %v13661_v27  ;;  %v847_v52 = vadd.f32 %v15100_v16, %v846_v30  ;;  %v571_v42 = vadd.f32 %v15068_v63, %v15059_v60  ;;  %v651_v57 = vadd.f32 %v15068_v63, %v15061_v61  ;;  %v11826_v61 = vpop.f32.mrb[14].mxu0 }
 0x12a   : > { %11883 = vmatprep.mubr.msk.f32.mxu1 %vm14686_vm1, %v19540_v47  ;;  %13652 = vmatprep.subr.bf16.mxu1 %v19538_v46 }
 0x12b   : > { %v13665_v32 = vpack.c.bf16 %v852_v29, %v847_v52  ;;  %13664 = vmatprep.subr.bf16.mxu0 %v19538_v46  ;;  %v11803_v33 = vpop.f32.mrb[32].mxu1 }
 0x12c   : > { %11884 = vmatmul.mubr.msk.f32.gmra.mrb[44].mxu1 %vm1128_vm2, %v556_v31  ;;  %v862_v35 = vadd.f32 %v11803_v33, %v15100_v16  ;;  %v856_v36 = vpop.f32.mrb[33].mxu1 }
 0x12d   : > { %11886 = vmatprep.mubr.msk.f32.mxu1 %vm14686_vm1, %v19540_v47  ;;  %v857_v50 = vadd.f32 %v15100_v16, %v856_v36 }
 0x12f   : > { %v13669_v37 = vpack.c.bf16 %v862_v35, %v857_v50  ;;  %v11806_v38 = vpop.f32.mrb[34].mxu1 }
 0x130   : > { %11887 = vmatmul.mubr.msk.f32.gmra.mrb[46].mxu1 %vm1128_vm2, %v561_v34  ;;  %v866_v39 = vpop.f32.mrb[35].mxu1  ;;  %v872_v40 = vadd.f32 %v11806_v38, %v15100_v16 }
 0x131   : > { %13655 = vmatpush3.bf16.xpose.msk.msra.mxu1 %vm15110_vm3, %v13653_v5  ;;  %13667 = vmatpush3.bf16.xpose.msk.msra.mxu0 %vm15110_vm3, %v13665_v32  ;;  %v867_v26 = vadd.f32 %v15100_v16, %v866_v39 }
 0x132   : > { %11889 = vmatprep.mubr.msk.f32.mxu1 %vm14686_vm1, %v19540_v47  ;;  %13656 = vmatprep.subr.bf16.mxu1 %v19538_v46 }
 0x133   : > { %13668 = vmatprep.subr.bf16.mxu0 %v19538_v46  ;;  %v11809_v41 = vpop.f32.mrb[36].mxu1 }
 0x134   : > { %11890 = vmatmul.mubr.msk.f32.gmra.mrb[48].mxu1 %vm1128_vm2, %v566_v56  ;;  %v882_v43 = vadd.f32 %v11809_v41, %v15100_v16  ;;  %v876_v44 = vpop.f32.mrb[37].mxu1 }
 0x135   : > { %11892 = vmatprep.mubr.msk.f32.mxu1 %vm14686_vm1, %v19540_v47  ;;  %v877_v54 = vadd.f32 %v15100_v16, %v876_v44 }
 0x137   : > { %v13673_v45 = vpack.c.bf16 %v877_v54, %v872_v40  ;;  %v11812_v0 = vpop.f32.mrb[38].mxu1 }
 0x138   : > { %11893 = vmatmul.mubr.msk.f32.gmra.mrb[50].mxu1 %vm1128_vm2, %v571_v42  ;;  %v892_v5 = vadd.f32 %v11812_v0, %v15100_v16  ;;  %v886_v11 = vpop.f32.mrb[39].mxu1 }
 0x139   : > { %13659 = vmatpush3.bf16.xpose.msk.msra.mxu1 %vm15110_vm3, %v13657_v20  ;;  %13671 = vmatpush3.bf16.xpose.msk.msra.mxu0 %vm15110_vm3, %v13669_v37  ;;  %v887_v60 = vadd.f32 %v15100_v16, %v886_v11  ;;  %v581_v20 = vadd.f32 %v15068_v63, %v15070_v1  ;;  %v621_v1 = vadd.f32 %v15068_v63, %v15037_v49 }
 0x13a   : > { %11895 = vmatprep.mubr.msk.f32.mxu1 %vm14686_vm1, %v19540_v47  ;;  %11913 = vmatprep.subr.mxu1 %v19540_v47  ;;  %v626_v49 = vadd.f32 %v15035_v48, %v15068_v63  ;;  %v596_v48 = vadd.f32 %v15077_v4, %v15068_v63  ;;  %v611_v4 = vadd.f32 %v15068_v63, %v15104_v19 }
 0x13b   : > { %v13677_v18 = vpack.c.bf16 %v887_v60, %v882_v43  ;;  %11948 = vmatprep.subr.mxu0 %v19540_v47  ;;  %v11815_v21 = vpop.f32.mrb[40].mxu1 }
 0x13c   : > { %11896 = vmatmul.mubr.msk.f32.gmra.mrb[52].mxu1 %vm1128_vm2, %v576_v14  ;;  %v902_v22 = vadd.f32 %v11815_v21, %v15100_v16  ;;  %v896_v24 = vpop.f32.mrb[41].mxu1 }
 0x13d   : > { %11898 = vmatprep.mubr.msk.f32.mxu1 %vm14686_vm1, %v19540_v47  ;;  %v897_v58 = vadd.f32 %v15100_v16, %v896_v24  ;;  %v591_v16 = vadd.f32 %v15068_v63, %v15079_v6  ;;  %v601_v6 = vadd.f32 %v15068_v63, %v15089_v12  ;;  %v646_v12 = vadd.f32 %v15049_v55, %v15068_v63 }
 0x13e   : > { %v616_v55 = vadd.f32 %v15102_v17, %v15068_v63  ;;  %v661_v17 = vadd.f32 %v15068_v63, %v15075_v3  ;;  %v988_v63 = vadd.f32 %v11826_v61, %v15321_v59 }
 0x13f   : > { %v13681_v27 = vpack.c.bf16 %v897_v58, %v892_v5 }
 0x140   : > { %11899 = vmatmul.mubr.msk.f32.gmra.mrb[54].mxu1 %vm1128_vm2, %v581_v20 }
 0x141   : > { %11914 = vmatpush3.xpose.msk.msra.mxu1 %vm1128_vm2, %v832_v25  ;;  %11949 = vmatpush3.xpose.msk.msra.mxu0 %vm1128_vm2, %v867_v26 }
 0x142   : > { %11915 = vmatprep.mubr.msk.f32.mxu1 %vm14686_vm1, %v19540_v47  ;;  %13672 = vmatprep.subr.bf16.mxu1 %v19538_v46 }
 0x143   : > { %13684 = vmatprep.subr.bf16.mxu0 %v19538_v46 }
 0x144   : > { %11916 = vmatmul.mubr.msk.f32.vlgmr.msra.gmra.mrb[56].mxu1 %vm1128_vm2, %v586_v28  ;;  %11951 = vmatmul.mubr.msk.f32.vlgmr.msra.gmra.mrb[42].mxu0 %vm1128_vm2, %v621_v1 }
 0x145   : > { %13675 = vmatpush3.bf16.xpose.msk.msra.mxu1 %vm15110_vm3, %v13673_v45  ;;  %11918 = vmatprep.mubr.msk.f32.mxu1 %vm14686_vm1, %v19540_v47 }
 0x146   : > { %11953 = vmatprep.mubr.msk.f32.mxu0 %vm14686_vm1, %v19540_v47  ;;  %13676 = vmatprep.subr.bf16.mxu1 %v19538_v46 }
 0x148   : > { %11919 = vmatmul.mubr.msk.f32.gmra.mrb[58].mxu1 %vm1128_vm2, %v591_v16  ;;  %11954 = vmatmul.mubr.msk.f32.gmra.mrb[44].mxu0 %vm1128_vm2, %v626_v49 }
 0x149   : > { %11921 = vmatprep.mubr.msk.f32.mxu1 %vm14686_vm1, %v19540_v47  ;;  %11956 = vmatprep.mubr.msk.f32.mxu0 %vm14686_vm1, %v19540_v47 }
 0x14c   : > { %11922 = vmatmul.mubr.msk.f32.gmra.mrb[60].mxu1 %vm1128_vm2, %v596_v48  ;;  %11957 = vmatmul.mubr.msk.f32.gmra.mrb[46].mxu0 %vm1128_vm2, %v631_v62 }
 0x14d   : > { %13679 = vmatpush3.bf16.xpose.msk.msra.mxu1 %vm15110_vm3, %v13677_v18  ;;  %11924 = vmatprep.mubr.msk.f32.mxu1 %vm14686_vm1, %v19540_v47 }
 0x14e   : > { %11959 = vmatprep.mubr.msk.f32.mxu0 %vm14686_vm1, %v19540_v47  ;;  %13680 = vmatprep.subr.bf16.mxu1 %v19538_v46 }
 0x150   : > { %11925 = vmatmul.mubr.msk.f32.gmra.mrb[62].mxu1 %vm1128_vm2, %v601_v6  ;;  %11960 = vmatmul.mubr.msk.f32.gmra.mrb[48].mxu0 %vm1128_vm2, %v636_v8 }
 0x151   : > { %11927 = vmatprep.mubr.msk.f32.mxu1 %vm14686_vm1, %v19540_v47  ;;  %11962 = vmatprep.mubr.msk.f32.mxu0 %vm14686_vm1, %v19540_v47 }
 0x154   : > { %11928 = vmatmul.mubr.msk.f32.gmra.mrb[64].mxu1 %vm1128_vm2, %v606_v51  ;;  %11963 = vmatmul.mubr.msk.f32.gmra.mrb[50].mxu0 %vm1128_vm2, %v641_v53 }
 0x155   : > { %13683 = vmatpush3.bf16.xpose.msk.msra.mxu1 %vm15110_vm3, %v13681_v27  ;;  %11930 = vmatprep.mubr.msk.f32.mxu1 %vm14686_vm1, %v19540_v47 }
 0x156   : > { %11965 = vmatprep.mubr.msk.f32.mxu0 %vm14686_vm1, %v19540_v47  ;;  %11983 = vmatprep.subr.mxu1 %v19540_v47 }
 0x158   : > { %11931 = vmatmul.mubr.msk.f32.gmra.mrb[66].mxu1 %vm1128_vm2, %v611_v4  ;;  %11966 = vmatmul.mubr.msk.f32.gmra.mrb[52].mxu0 %vm1128_vm2, %v646_v12 }
 0x159   : > { %11933 = vmatprep.mubr.msk.f32.mxu1 %vm14686_vm1, %v19540_v47  ;;  %11968 = vmatprep.mubr.msk.f32.mxu0 %vm14686_vm1, %v19540_v47 }
 0x15c   : > { %11934 = vmatmul.mubr.msk.f32.gmra.mrb[68].mxu1 %vm1128_vm2, %v616_v55  ;;  %11969 = vmatmul.mubr.msk.f32.gmra.mrb[54].mxu0 %vm1128_vm2, %v651_v57 }
 0x15d   : > { %11984 = vmatpush3.xpose.msk.msra.mxu1 %vm1128_vm2, %v902_v22  ;;  %11985 = vmatprep.mubr.msk.f32.mxu1 %vm14686_vm1, %v19540_v47 }
 0x15e   : > { %13693 = vmatprep.subr.bf16.mxu1 %v19538_v46  ;;  %12020 = vmatprep.mubr.msk.f32.mxu0 %vm14686_vm1, %v19540_v47 }
 0x160   : > { %11986 = vmatmul.mubr.msk.f32.vlgmr.msra.gmra.mrb[70].mxu1 %vm1128_vm2, %v656_v10 }
 0x161   : > { %11988 = vmatprep.mubr.msk.f32.mxu1 %vm14686_vm1, %v19540_v47 }
 0x164   : > { %11989 = vmatmul.mubr.msk.f32.gmra.mrb[72].mxu1 %vm1128_vm2, %v661_v17 }
 0x165   : > { %11991 = vmatprep.mubr.msk.f32.mxu1 %vm14686_vm1, %v19540_v47 }
 0x168   : > { %11992 = vmatmul.mubr.msk.f32.gmra.mrb[74].mxu1 %vm1128_vm2, %v15073_v2  ;;  %v982_v2 = vpop.f32.mrb[15].mxu0 }
 0x169   : > { %11994 = vmatprep.mubr.msk.f32.mxu1 %vm14686_vm1, %v19540_v47  ;;  %v983_v3 = vadd.f32 %v15321_v59, %v982_v2 }
 0x16b   : > { %v13685_v19 = vpack.c.bf16 %v988_v63, %v983_v3 }
 0x16c   : > { %11995 = vmatmul.mubr.msk.f32.gmra.mrb[76].mxu1 %vm1128_vm2, %v15085_v9 }
 0x16d   : > { %11997 = vmatprep.mubr.msk.f32.mxu1 %vm14686_vm1, %v19540_v47  ;;  %13686 = vmatpush3.bf16.msra.mxu0 %v13685_v19 }
 0x16e   : > { %13687 = vmatprep.subr.bf16.mxu0 %v19538_v46 }
 0x170   : > { %11998 = vmatmul.mubr.msk.f32.gmra.mrb[78].mxu1 %vm1128_vm2, %v15082_v7  ;;  %v11829_v7 = vpop.f32.mrb[16].mxu0 }
 0x171   : > { %12000 = vmatprep.mubr.msk.f32.mxu1 %vm14686_vm1, %v19540_v47  ;;  %v998_v9 = vadd.f32 %v11829_v7, %v15321_v59 }
 0x174   : > { %12001 = vmatmul.mubr.msk.f32.gmra.mrb[80].mxu1 %vm1128_vm2, %v15095_v15  ;;  %v992_v15 = vpop.f32.mrb[17].mxu0 }
 0x175   : > { %12003 = vmatprep.mubr.msk.f32.mxu1 %vm14686_vm1, %v19540_v47  ;;  %v993_v29 = vadd.f32 %v15321_v59, %v992_v15  ;;  %v11832_v30 = vpop.f32.mrb[18].mxu0 }
 0x176   : > { %v1008_v52 = vadd.f32 %v11832_v30, %v15321_v59  ;;  %v1002_v31 = vpop.f32.mrb[19].mxu0 }
 0x177   : > { %v1003_v32 = vadd.f32 %v15321_v59, %v1002_v31  ;;  %v11835_v33 = vpop.f32.mrb[20].mxu0 }
 0x178   : > { %12004 = vmatmul.mubr.msk.f32.gmra.mrb[82].mxu1 %vm1128_vm2, %v15092_v13  ;;  %v13688_v13 = vpack.c.bf16 %v998_v9, %v993_v29  ;;  %v1012_v34 = vpop.f32.mrb[21].mxu0  ;;  %v1018_v36 = vadd.f32 %v11835_v33, %v15321_v59 }
 0x179   : > { %12055 = vmatprep.mubr.msk.f32.mxu1 %vm14686_vm1, %v19540_v47  ;;  %v13691_v35 = vpack.c.bf16 %v1008_v52, %v1003_v32  ;;  %v11838_v50 = vpop.f32.mrb[22].mxu0  ;;  %v1013_v45 = vadd.f32 %v15321_v59, %v1012_v34 }
 0x17a   : > { %v1022_v37 = vpop.f32.mrb[23].mxu0  ;;  %v1028_v38 = vadd.f32 %v11838_v50, %v15321_v59  ;;  %13689 = vmatpush3.bf16.msra.mxu0 %v13688_v13 }
 0x17b   : > { %v1023_v39 = vadd.f32 %v15321_v59, %v1022_v37  ;;  %v11841_v56 = vpop.f32.mrb[24].mxu0  ;;  %13690 = vmatprep.subr.bf16.mxu0 %v19538_v46 }
 0x17c   : > { %v1032_v40 = vpop.f32.mrb[25].mxu0  ;;  %v1038_v42 = vadd.f32 %v11841_v56, %v15321_v59 }
 0x17d   : > { %v13694_v41 = vpack.c.bf16 %v1023_v39, %v1018_v36  ;;  %v1033_v43 = vadd.f32 %v15321_v59, %v1032_v40  ;;  %v11844_v44 = vpop.f32.mrb[26].mxu0  ;;  %v15422_v40 = vld [vmem:[%s19536_s9] sm:$0xff] }
 0x17e   : > { %v1042_v54 = vpop.f32.mrb[27].mxu0  ;;  %13692 = vmatpush3.bf16.msra.mxu0 %v13691_v35  ;;  %v1048_v6 = vadd.f32 %v11844_v44, %v15321_v59 }
 0x17f   : > { %v13697_v0 = vpack.c.bf16 %v1033_v43, %v1028_v38  ;;  %v1043_v5 = vadd.f32 %v15321_v59, %v1042_v54  ;;  %v11847_v11 = vpop.f32.mrb[28].mxu0  ;;  %13695 = vmatpush3.bf16.msra.mxu1 %v13694_v41  ;;  %12018 = vmatprep.subr.mxu0 %v19540_v47 }
 0x180   : > { %v15343_v60 = vadd.f32 %v11847_v11, %v15321_v59  ;;  %v1052_v14 = vpop.f32.mrb[29].mxu0  ;;  %13696 = vmatprep.subr.bf16.mxu1 %v19538_v46 }
 0x181   : > { %v13700_v18 = vpack.c.bf16 %v1043_v5, %v1038_v42  ;;  %v15348_v21 = vadd.f32 %v15321_v59, %v1052_v14  ;;  %v11850_v20 = vpop.f32.mrb[30].mxu0 }
 0x182   : > { %v15351_v22 = vadd.f32 %v11850_v20, %v15321_v59  ;;  %v1062_v24 = vpop.f32.mrb[31].mxu0  ;;  %12019 = vmatpush3.msra.mxu0 %v1013_v45 }
 0x183   : > { %v13703_v58 = vpack.c.bf16 %v15343_v60, %v15348_v21  ;;  %v15356_v25 = vadd.f32 %v15321_v59, %v1062_v24  ;;  %v11853_v26 = vpop.f32.mrb[32].mxu0  ;;  %13698 = vmatpush3.bf16.msra.mxu1 %v13697_v0  ;;  %13702 = vmatprep.subr.bf16.mxu0 %v19538_v46  ;;  %v15434_v0 = vld [vmem:[%s19536_s9 + $0x8] sm:$0xff] }
 0x184   : > { %v15359_v27 = vadd.f32 %v11853_v26, %v15321_v59  ;;  %v1072_v1 = vpop.f32.mrb[33].mxu0  ;;  %13699 = vmatprep.subr.bf16.mxu1 %v19538_v46  ;;  %v15446_v26 = vld [vmem:[%s19536_s9 + $0x10] sm:$0xff] }
 0x185   : > { %v15366_v16 = vadd.f32 %v15321_v59, %v1072_v1  ;;  %v11856_v49 = vpop.f32.mrb[34].mxu0  ;;  %v19547_v21 = vpack.c.bf16 %v15351_v22, %v15356_v25  ;;  %v10071_v22 = vld [vmem:[%s19528_s1 + $0x20] sm:$0xff]  ;;  %v10072_v25 = vld [vmem:[%s19528_s1 + $0x28] sm:$0xff] }
 0x186   : > { %v15369_v62 = vadd.f32 %v11856_v49, %v15321_v59  ;;  %v1082_v48 = vpop.f32.mrb[35].mxu0 }
 0x187   : > { %v15375_v53 = vadd.f32 %v15321_v59, %v1082_v48  ;;  %v11859_v51 = vpop.f32.mrb[36].mxu0  ;;  %13701 = vmatpush3.bf16.msra.mxu1 %v13700_v18 }
 0x188   : > { %v15378_v4 = vadd.f32 %v11859_v51, %v15321_v59  ;;  %v1092_v12 = vpop.f32.mrb[37].mxu0  ;;  %12053 = vmatprep.subr.mxu1 %v19540_v47 }
 0x189   : > { %v15382_v57 = vadd.f32 %v15321_v59, %v1092_v12  ;;  %v11862_v55 = vpop.f32.mrb[38].mxu0 }
 0x18a   : > { %v15385_v10 = vadd.f32 %v11862_v55, %v15321_v59  ;;  %v1102_v61 = vpop.f32.mrb[39].mxu0  ;;  %v15458_v55 = vld [vmem:[%s19536_s9 + $0x18] sm:$0xff] }
 0x18b   : > { %v13712_v17 = vpack.c.bf16 %v15382_v57, %v15369_v62  ;;  %v15390_v63 = vadd.f32 %v15321_v59, %v1102_v61  ;;  %v11865_v2 = vpop.f32.mrb[40].mxu0  ;;  %12054 = vmatpush3.msra.mxu1 %v1048_v6 }
 0x18c   : > { %v15393_v3 = vadd.f32 %v11865_v2, %v15321_v59  ;;  %v1112_v7 = vpop.f32.mrb[41].mxu0  ;;  %13711 = vmatprep.subr.bf16.mxu1 %v19538_v46 }
 0x18d   : > { %v13715_v9 = vpack.c.bf16 %v15390_v63, %v15378_v4  ;;  %v15399_v15 = vadd.f32 %v15321_v59, %v1112_v7 }
 0x18f   : > { %v13718_v19 = vpack.c.bf16 %v15399_v15, %v15385_v10 }
 0x1fb   : > { %v15403_v29 = vpop.f32.mrb[42].mxu1 }
 0x1fc   : > { %v11882_v30 = vpop.f32.mrb[43].mxu1 }
 0x1ff   : > { %v15405_v52 = vpop.f32.mrb[44].mxu1 }
 0x200   : > { %v11885_v31 = vpop.f32.mrb[45].mxu1 }
 0x203   : > { %v15407_v13 = vpop.f32.mrb[46].mxu1 }
 0x204   : > { %v11888_v32 = vpop.f32.mrb[47].mxu1 }
 0x207   : > { %v15409_v33 = vpop.f32.mrb[48].mxu1 }
 0x208   : > { %v11891_v34 = vpop.f32.mrb[49].mxu1 }
 0x209   : > { %v15470_v34 = vld [vmem:[%s19536_s9 + $0x20] sm:$0xff] }
 0x20b   : > { %v15411_v35 = vpop.f32.mrb[50].mxu1 }
 0x20c   : > { %v11894_v36 = vpop.f32.mrb[51].mxu1 }
 0x20f   : > { %v15413_v59 = vpop.f32.mrb[52].mxu1 }
 0x210   : > { %v11897_v50 = vpop.f32.mrb[53].mxu1 }
 0x213   : > { %v15415_v37 = vpop.f32.mrb[54].mxu1 }
 0x214   : > { %v11900_v38 = vpop.f32.mrb[55].mxu1 }
 0x217   : > { %v1379_v39 = vpop.f32.mrb[56].mxu1  ;;  %v15417_v56 = vpop.f32.mrb[42].mxu0 }
 0x218   : > { %v11917_v41 = vpop.f32.mrb[57].mxu1  ;;  %v11952_v42 = vpop.f32.mrb[43].mxu0  ;;  %v15425_v43 = vadd.f32 %v1379_v39, %v15422_v40 }
 0x21a   : > { %v1719_v44 = vsel %vm1697_vm4, %v15425_v43, -inf }
 0x21b   : > { %v15429_v54 = vpop.f32.mrb[44].mxu0  ;;  %1720 = vmax.xlane.f32.xlu0 %v1719_v44  ;;  %v1384_v45 = vpop.f32.mrb[58].mxu1  ;;  %v15482_v44 = vld [vmem:[%s19536_s9 + $0x28] sm:$0xff] }
 0x21c   : > { %v11920_v5 = vpop.f32.mrb[59].mxu1  ;;  %v11955_v11 = vpop.f32.mrb[45].mxu0  ;;  %v15437_v14 = vadd.f32 %v1384_v45, %v15434_v0  ;;  %v15580_v28 = vadd.f32 %v15429_v54, %v15434_v0 }
 0x21e   : > { %v1722_v18 = vsel %vm1697_vm4, %v15437_v14, -inf }
 0x21f   : > { %v15441_v20 = vpop.f32.mrb[46].mxu0  ;;  %1723 = vmax.xlane.f32.xlu0 %v1722_v18  ;;  %v1389_v24 = vpop.f32.mrb[60].mxu1 }
 0x220   : > { %v11923_v1 = vpop.f32.mrb[61].mxu1  ;;  %v11958_v49 = vpop.f32.mrb[47].mxu0  ;;  %v15449_v48 = vadd.f32 %v1389_v24, %v15446_v26  ;;  %v15596_v54 = vadd.f32 %v15441_v20, %v15446_v26 }
 0x221   : > { %v15494_v49 = vld [vmem:[%s19536_s9 + $0x30] sm:$0xff] }
 0x222   : > { %v1725_v6 = vsel %vm1697_vm4, %v15449_v48, -inf  ;;  %v15569_v8 = vadd.f32 %v15415_v37, %v15494_v49  ;;  %v15584_v37 = vadd.f32 %v15417_v56, %v15422_v40 }
 0x223   : > { %v15453_v51 = vpop.f32.mrb[48].mxu0  ;;  %1726 = vmax.xlane.f32.xlu1 %v1725_v6  ;;  %v1394_v12 = vpop.f32.mrb[62].mxu1 }
 0x224   : > { %v11926_v61 = vpop.f32.mrb[63].mxu1  ;;  %v11961_v2 = vpop.f32.mrb[49].mxu0  ;;  %v15461_v7 = vadd.f32 %v1394_v12, %v15458_v55 }
 0x226   : > { %v1728_v30 = vsel %vm1697_vm4, %v15461_v7, -inf }
 0x227   : > { %v15465_v31 = vpop.f32.mrb[50].mxu0  ;;  %1729 = vmax.xlane.f32.xlu1 %v1728_v30  ;;  %v1399_v32 = vpop.f32.mrb[64].mxu1  ;;  %v15503_v30 = vadd.f32 %v15403_v29, %v15422_v40 }
 0x228   : > { %v11929_v36 = vpop.f32.mrb[65].mxu1  ;;  %v11964_v50 = vpop.f32.mrb[51].mxu0  ;;  %v15473_v38 = vadd.f32 %v1399_v32, %v15470_v34 }
 0x22a   : > { %v1731_v39 = vsel %vm1697_vm4, %v15473_v38, -inf }
 0x22b   : > { %v15477_v41 = vpop.f32.mrb[52].mxu0  ;;  %1732 = vmax.xlane.f32.xlu0 %v1731_v39  ;;  %v1404_v42 = vpop.f32.mrb[66].mxu1  ;;  %v1698_v39 = vsel %vm1697_vm4, %v15503_v30, -inf }
 0x22c   : > { %v11932_v45 = vpop.f32.mrb[67].mxu1  ;;  %v11967_v5 = vpop.f32.mrb[53].mxu0  ;;  %v15485_v11 = vadd.f32 %v1404_v42, %v15482_v44 }
 0x22d   : > { %v15514_v45 = vadd.f32 %v15405_v52, %v15434_v0 }
 0x22e   : > { %v1734_v18 = vsel %vm1697_vm4, %v15485_v11, -inf }
 0x22f   : > { %v15489_v24 = vpop.f32.mrb[54].mxu0  ;;  %1735 = vmax.xlane.f32.xlu1 %v1734_v18  ;;  %v1409_v1 = vpop.f32.mrb[68].mxu1 }
 0x230   : > { %v11935_v6 = vpop.f32.mrb[69].mxu1  ;;  %v11970_v12 = vpop.f32.mrb[55].mxu0  ;;  %v15497_v61 = vadd.f32 %v1409_v1, %v15494_v49  ;;  %v1701_v1 = vsel %vm1697_vm4, %v15514_v45, -inf }
 0x231   : > { %v15525_v12 = vadd.f32 %v15407_v13, %v15446_v26 }
 0x232   : > { %v1737_v2 = vsel %vm1697_vm4, %v15497_v61, -inf }
 0x233   : > { %1738 = vmax.xlane.f32.xlu0 %v1737_v2  ;;  %v1663_v32 = vpop.f32.mrb[70].mxu1 }
 0x234   : > { %v11987_v36 = vpop.f32.mrb[71].mxu1  ;;  %v15506_v50 = vadd.f32 %v1663_v32, %v15422_v40  ;;  %v1746_v40 = vsel %vm1697_vm4, %v15596_v54, -inf }
 0x235   : > { %v1704_v36 = vsel %vm1697_vm4, %v15525_v12, -inf }
 0x236   : > { %v1761_v42 = vsel %vm1697_vm4, %v15506_v50, -inf }
 0x237   : > { %1699 = vmax.xlane.f32.xlu0 %v1698_v39  ;;  %1762 = vmax.xlane.f32.xlu1 %v1761_v42  ;;  %v1668_v29 = vpop.f32.mrb[72].mxu1  ;;  %v15536_v42 = vadd.f32 %v15409_v33, %v15458_v55 }
 0x238   : > { %v11990_v5 = vpop.f32.mrb[73].mxu1  ;;  %v15517_v18 = vadd.f32 %v1668_v29, %v15434_v0  ;;  %v15604_v0 = vadd.f32 %v15477_v41, %v15482_v44 }
 0x23a   : > { %v1764_v6 = vsel %vm1697_vm4, %v15517_v18, -inf  ;;  %v1755_v20 = vsel %vm1697_vm4, %v15604_v0, -inf }
 0x23b   : > { %1702 = vmax.xlane.f32.xlu0 %v1701_v1  ;;  %1765 = vmax.xlane.f32.xlu1 %v1764_v6  ;;  %v1673_v52 = vpop.f32.mrb[74].mxu1  ;;  %v1707_v1 = vsel %vm1697_vm4, %v15536_v42, -inf }
 0x23c   : > { %v11993_v2 = vpop.f32.mrb[75].mxu1  ;;  %v15528_v32 = vadd.f32 %v1673_v52, %v15446_v26  ;;  %v15547_v52 = vadd.f32 %v15411_v35, %v15470_v34 }
 0x23e   : > { %v1767_v39 = vsel %vm1697_vm4, %v15528_v32, -inf }
 0x23f   : > { %1705 = vmax.xlane.f32.xlu0 %v1704_v36  ;;  %1768 = vmax.xlane.f32.xlu1 %v1767_v39  ;;  %v1678_v13 = vpop.f32.mrb[76].mxu1  ;;  %v1710_v39 = vsel %vm1697_vm4, %v15547_v52, -inf }
 0x240   : > { %v11996_v29 = vpop.f32.mrb[77].mxu1  ;;  %v15539_v5 = vadd.f32 %v1678_v13, %v15458_v55 }
 0x241   : > { %v15558_v29 = vadd.f32 %v15413_v59, %v15482_v44 }
 0x242   : > { %v1770_v6 = vsel %vm1697_vm4, %v15539_v5, -inf }
 0x243   : > { %1708 = vmax.xlane.f32.xlu0 %v1707_v1  ;;  %1771 = vmax.xlane.f32.xlu1 %v1770_v6  ;;  %v1683_v33 = vpop.f32.mrb[78].mxu1 }
 0x244   : > { %v11999_v2 = vpop.f32.mrb[79].mxu1  ;;  %v15550_v36 = vadd.f32 %v1683_v33, %v15470_v34  ;;  %v1713_v33 = vsel %vm1697_vm4, %v15558_v29, -inf }
 0x246   : > { %v1773_v13 = vsel %vm1697_vm4, %v15550_v36, -inf }
 0x247   : > { %1711 = vmax.xlane.f32.xlu0 %v1710_v39  ;;  %1774 = vmax.xlane.f32.xlu1 %v1773_v13  ;;  %v1688_v35 = vpop.f32.mrb[80].mxu1 }
 0x248   : > { %v12002_v1 = vpop.f32.mrb[81].mxu1  ;;  %v15561_v6 = vadd.f32 %v1688_v35, %v15482_v44  ;;  %v1716_v35 = vsel %vm1697_vm4, %v15569_v8, -inf }
 0x24a   : > { %v1776_v2 = vsel %vm1697_vm4, %v15561_v6, -inf }
 0x24b   : > { %1714 = vmax.xlane.f32.xlu0 %v1713_v33  ;;  %1777 = vmax.xlane.f32.xlu1 %v1776_v2  ;;  %v1693_v59 = vpop.f32.mrb[82].mxu1  ;;  %v1743_v33 = vsel %vm1697_vm4, %v15580_v28, -inf  ;;  %v1740_v2 = vsel %vm1697_vm4, %v15584_v37, -inf }
 0x24c   : > { %v12005_v39 = vpop.f32.mrb[83].mxu1  ;;  %v15572_v13 = vadd.f32 %v1693_v59, %v15494_v49  ;;  %v15592_v59 = vadd.f32 %v15453_v51, %v15458_v55  ;;  %v15608_v51 = vadd.f32 %v15465_v31, %v15470_v34  ;;  %v15616_v55 = vadd.f32 %v15489_v24, %v15494_v49 }
 0x24e   : > { %v1779_v1 = vsel %vm1697_vm4, %v15572_v13, -inf  ;;  %v1749_v56 = vsel %vm1697_vm4, %v15592_v59, -inf  ;;  %v1752_v26 = vsel %vm1697_vm4, %v15608_v51, -inf  ;;  %v1758_v41 = vsel %vm1697_vm4, %v15616_v55, -inf }
 0x24f   : > { %1717 = vmax.xlane.f32.xlu0 %v1716_v35  ;;  %1780 = vmax.xlane.f32.xlu1 %v1779_v1 }
 0x253   : > { %1744 = vmax.xlane.f32.xlu0 %v1743_v33  ;;  %1741 = vmax.xlane.f32.xlu1 %v1740_v2 }
 0x257   : > { %1750 = vmax.xlane.f32.xlu0 %v1749_v56  ;;  %1747 = vmax.xlane.f32.xlu1 %v1746_v40 }
 0x25b   : > { %1756 = vmax.xlane.f32.xlu0 %v1755_v20  ;;  %1753 = vmax.xlane.f32.xlu1 %v1752_v26 }
 0x25f   : > { %1759 = vmax.xlane.f32.xlu1 %v1758_v41 }
 0x2a8   : > { %v1721_v31 = vpop.xlane.xlu0 %1720 }
 0x2a9   : > { %v1789_v34 = vsub.f32 %v15425_v43, %v1721_v31 }
 0x2ab   : > { %v1824_v44 = vmul.f32 1.442695, %v1789_v34 }
 0x2ac   : > { %v1724_v39 = vpop.xlane.xlu0 %1723 }
 0x2ad   : > { %14144 = vpow2.f32 %v1824_v44  ;;  %v1790_v35 = vsub.f32 %v15437_v14, %v1724_v39 }
 0x2af   : > { %v1826_v1 = vmul.f32 1.442695, %v1790_v35 }
 0x2b0   : > { %v1727_v33 = vpop.xlane.xlu1 %1726 }
 0x2b1   : > { %14146 = vpow2.f32 %v1826_v1  ;;  %v1791_v24 = vsub.f32 %v15449_v48, %v1727_v33 }
 0x2b3   : > { %v1828_v49 = vmul.f32 1.442695, %v1791_v24 }
 0x2b4   : > { %v1730_v2 = vpop.xlane.xlu1 %1729 }
 0x2b5   : > { %14148 = vpow2.f32 %v1828_v49  ;;  %v1792_v56 = vsub.f32 %v15461_v7, %v1730_v2 }
 0x2b7   : > { %v15624_v40 = vpop.eup %14144  ;;  %v1830_v20 = vmul.f32 1.442695, %v1792_v56 }
 0x2b8   : > { %v1733_v26 = vpop.xlane.xlu0 %1732  ;;  %v1887_v43 = vsel %vm1697_vm4, %v15624_v40, 0.0 }
 0x2b9   : > { %14150 = vpow2.f32 %v1830_v20  ;;  %v1793_v14 = vsub.f32 %v15473_v38, %v1733_v26  ;;  %1888 = vadd.xlane.f32.xlu0 %v1887_v43 }
 0x2bb   : > { %v15629_v41 = vpop.eup %14146  ;;  %v1832_v31 = vmul.f32 1.442695, %v1793_v14 }
 0x2bc   : > { %v1736_v48 = vpop.xlane.xlu1 %1735  ;;  %v1890_v34 = vsel %vm1697_vm4, %v15629_v41, 0.0 }
 0x2bd   : > { %14152 = vpow2.f32 %v1832_v31  ;;  %v1794_v7 = vsub.f32 %v15485_v11, %v1736_v48  ;;  %1891 = vadd.xlane.f32.xlu1 %v1890_v34 }
 0x2bf   : > { %v15634_v44 = vpop.eup %14148  ;;  %v1834_v39 = vmul.f32 1.442695, %v1794_v7 }
 0x2c0   : > { %v1739_v35 = vpop.xlane.xlu0 %1738  ;;  %v1893_v1 = vsel %vm1697_vm4, %v15634_v44, 0.0 }
 0x2c1   : > { %14154 = vpow2.f32 %v1834_v39  ;;  %v1795_v38 = vsub.f32 %v15497_v61, %v1739_v35  ;;  %1894 = vadd.xlane.f32.xlu0 %v1893_v1 }
 0x2c3   : > { %v15639_v33 = vpop.eup %14150  ;;  %v1836_v24 = vmul.f32 1.442695, %v1795_v38 }
 0x2c4   : > { %v1700_v49 = vpop.xlane.xlu0 %1699  ;;  %v1763_v2 = vpop.xlane.xlu1 %1762  ;;  %v1896_v11 = vsel %vm1697_vm4, %v15639_v33, 0.0 }
 0x2c5   : > { %14156 = vpow2.f32 %v1836_v24  ;;  %v1782_v56 = vsub.f32 %v15503_v30, %v1700_v49  ;;  %v1803_v20 = vsub.f32 %v15506_v50, %v1763_v2  ;;  %1897 = vadd.xlane.f32.xlu1 %v1896_v11 }
 0x2c7   : > { %v15645_v26 = vpop.eup %14152  ;;  %v1810_v43 = vmul.f32 1.442695, %v1782_v56  ;;  %v1852_v14 = vmul.f32 1.442695, %v1803_v20 }
 0x2c8   : > { %v1703_v61 = vpop.xlane.xlu0 %1702  ;;  %v1766_v31 = vpop.xlane.xlu1 %1765  ;;  %v1899_v48 = vsel %vm1697_vm4, %v15645_v26, 0.0 }
 0x2c9   : > { %14158 = vpow2.f32 %v1810_v43  ;;  %v1783_v34 = vsub.f32 %v15514_v45, %v1703_v61  ;;  %v1804_v7 = vsub.f32 %v15517_v18, %v1766_v31  ;;  %1900 = vadd.xlane.f32.xlu0 %v1899_v48 }
 0x2ca   : > { %14160 = vpow2.f32 %v1852_v14 }
 0x2cb   : > { %v15651_v30 = vpop.eup %14154  ;;  %v1812_v50 = vmul.f32 1.442695, %v1783_v34  ;;  %v1854_v39 = vmul.f32 1.442695, %v1804_v7 }
 0x2cc   : > { %v1706_v35 = vpop.xlane.xlu0 %1705  ;;  %v1769_v1 = vpop.xlane.xlu1 %1768  ;;  %v1902_v38 = vsel %vm1697_vm4, %v15651_v30, 0.0 }
 0x2cd   : > { %14162 = vpow2.f32 %v1812_v50  ;;  %v1784_v24 = vsub.f32 %v15525_v12, %v1706_v35  ;;  %v1805_v49 = vsub.f32 %v15528_v32, %v1769_v1  ;;  %1903 = vadd.xlane.f32.xlu1 %v1902_v38 }
 0x2ce   : > { %14164 = vpow2.f32 %v1854_v39 }
 0x2cf   : > { %v15657_v45 = vpop.eup %14156  ;;  %v1814_v18 = vmul.f32 1.442695, %v1784_v24  ;;  %v1856_v2 = vmul.f32 1.442695, %v1805_v49 }
 0x2d0   : > { %v1709_v11 = vpop.xlane.xlu0 %1708  ;;  %v1772_v56 = vpop.xlane.xlu1 %1771  ;;  %v1905_v20 = vsel %vm1697_vm4, %v15657_v45, 0.0 }
 0x2d1   : > { %14166 = vpow2.f32 %v1814_v18  ;;  %v1785_v43 = vsub.f32 %v15536_v42, %v1709_v11  ;;  %v1806_v14 = vsub.f32 %v15539_v5, %v1772_v56  ;;  %1906 = vadd.xlane.f32.xlu0 %v1905_v20 }
 0x2d2   : > { %14168 = vpow2.f32 %v1856_v2 }
 0x2d3   : > { %v15663_v12 = vpop.eup %14158  ;;  %v1816_v32 = vmul.f32 1.442695, %v1785_v43  ;;  %v1858_v61 = vmul.f32 1.442695, %v1806_v14 }
 0x2d4   : > { %v15665_v31 = vpop.eup %14160  ;;  %v1712_v48 = vpop.xlane.xlu0 %1711  ;;  %v1866_v7 = vsel %vm1697_vm4, %v15663_v12, 0.0 }
 0x2d5   : > { %v1775_v34 = vpop.xlane.xlu1 %1774  ;;  %14170 = vpow2.f32 %v1816_v32  ;;  %v1786_v50 = vsub.f32 %v15547_v52, %v1712_v48  ;;  %1867 = vadd.xlane.f32.xlu0 %v1866_v7  ;;  %v1929_v5 = vsel %vm1697_vm4, %v15665_v31, 0.0 }
 0x2d6   : > { %v1807_v42 = vsub.f32 %v15550_v36, %v1775_v34  ;;  %14172 = vpow2.f32 %v1858_v61  ;;  %1930 = vadd.xlane.f32.xlu1 %v1929_v5 }
 0x2d7   : > { %v15673_v39 = vpop.eup %14162  ;;  %v1818_v35 = vmul.f32 1.442695, %v1786_v50 }
 0x2d8   : > { %v1860_v1 = vmul.f32 1.442695, %v1807_v42  ;;  %v15675_v38 = vpop.eup %14164  ;;  %v1715_v24 = vpop.xlane.xlu0 %1714  ;;  %v1869_v18 = vsel %vm1697_vm4, %v15673_v39, 0.0 }
 0x2d9   : > { %v1778_v49 = vpop.xlane.xlu1 %1777  ;;  %14174 = vpow2.f32 %v1818_v35  ;;  %v1787_v52 = vsub.f32 %v15558_v29, %v1715_v24  ;;  %1870 = vadd.xlane.f32.xlu0 %v1869_v18  ;;  %v1932_v2 = vsel %vm1697_vm4, %v15675_v38, 0.0 }
 0x2da   : > { %v1808_v36 = vsub.f32 %v15561_v6, %v1778_v49  ;;  %14176 = vpow2.f32 %v1860_v1  ;;  %1933 = vadd.xlane.f32.xlu1 %v1932_v2 }
 0x2db   : > { %v15683_v11 = vpop.eup %14166  ;;  %v1820_v56 = vmul.f32 1.442695, %v1787_v52 }
 0x2dc   : > { %v1862_v20 = vmul.f32 1.442695, %v1808_v36  ;;  %v15685_v43 = vpop.eup %14168  ;;  %v1718_v14 = vpop.xlane.xlu0 %1717  ;;  %v1872_v61 = vsel %vm1697_vm4, %v15683_v11, 0.0 }
 0x2dd   : > { %v1781_v32 = vpop.xlane.xlu1 %1780  ;;  %14178 = vpow2.f32 %v1820_v56  ;;  %v1788_v29 = vsub.f32 %v15569_v8, %v1718_v14  ;;  %1873 = vadd.xlane.f32.xlu0 %v1872_v61  ;;  %v1935_v48 = vsel %vm1697_vm4, %v15685_v43, 0.0 }
 0x2de   : > { %v1809_v6 = vsub.f32 %v15572_v13, %v1781_v32  ;;  %14180 = vpow2.f32 %v1862_v20  ;;  %1936 = vadd.xlane.f32.xlu1 %v1935_v48 }
 0x2df   : > { %v15693_v34 = vpop.eup %14170  ;;  %v1822_v7 = vmul.f32 1.442695, %v1788_v29 }
 0x2e0   : > { %v1864_v50 = vmul.f32 1.442695, %v1809_v6  ;;  %v15695_v42 = vpop.eup %14172  ;;  %v1745_v5 = vpop.xlane.xlu0 %1744  ;;  %v1875_v1 = vsel %vm1697_vm4, %v15693_v34, 0.0 }
 0x2e1   : > { %v1742_v35 = vpop.xlane.xlu1 %1741  ;;  %14182 = vpow2.f32 %v1822_v7  ;;  %v1797_v8 = vsub.f32 %v15580_v28, %v1745_v5  ;;  %1876 = vadd.xlane.f32.xlu0 %v1875_v1  ;;  %v1938_v24 = vsel %vm1697_vm4, %v15695_v42, 0.0 }
 0x2e2   : > { %v1796_v13 = vsub.f32 %v15584_v37, %v1742_v35  ;;  %14184 = vpow2.f32 %v1864_v50  ;;  %1939 = vadd.xlane.f32.xlu1 %v1938_v24 }
 0x2e3   : > { %v15703_v49 = vpop.eup %14174  ;;  %v1840_v18 = vmul.f32 1.442695, %v1797_v8 }
 0x2e4   : > { %v1838_v52 = vmul.f32 1.442695, %v1796_v13  ;;  %v15705_v36 = vpop.eup %14176  ;;  %v1751_v2 = vpop.xlane.xlu0 %1750  ;;  %v1878_v20 = vsel %vm1697_vm4, %v15703_v49, 0.0 }
 0x2e5   : > { %v1748_v56 = vpop.xlane.xlu1 %1747  ;;  %14186 = vpow2.f32 %v1840_v18  ;;  %v1799_v28 = vsub.f32 %v15592_v59, %v1751_v2  ;;  %1879 = vadd.xlane.f32.xlu0 %v1878_v20  ;;  %v1941_v14 = vsel %vm1697_vm4, %v15705_v36, 0.0 }
 0x2e6   : > { %v1798_v37 = vsub.f32 %v15596_v54, %v1748_v56  ;;  %14188 = vpow2.f32 %v1838_v52  ;;  %1942 = vadd.xlane.f32.xlu1 %v1941_v14 }
 0x2e7   : > { %v15713_v32 = vpop.eup %14178  ;;  %v1844_v61 = vmul.f32 1.442695, %v1799_v28 }
 0x2e8   : > { %v1842_v29 = vmul.f32 1.442695, %v1798_v37  ;;  %v15715_v6 = vpop.eup %14180  ;;  %v1757_v48 = vpop.xlane.xlu0 %1756  ;;  %v1881_v50 = vsel %vm1697_vm4, %v15713_v32, 0.0 }
 0x2e9   : > { %v1754_v7 = vpop.xlane.xlu1 %1753  ;;  %14190 = vpow2.f32 %v1844_v61  ;;  %v1801_v59 = vsub.f32 %v15604_v0, %v1757_v48  ;;  %1882 = vadd.xlane.f32.xlu0 %v1881_v50  ;;  %v1944_v5 = vsel %vm1697_vm4, %v15715_v6, 0.0 }
 0x2ea   : > { %v1800_v54 = vsub.f32 %v15608_v51, %v1754_v7  ;;  %14192 = vpow2.f32 %v1842_v29  ;;  %1945 = vadd.xlane.f32.xlu1 %v1944_v5 }
 0x2eb   : > { %v15723_v35 = vpop.eup %14182  ;;  %v1848_v1 = vmul.f32 1.442695, %v1801_v59 }
 0x2ec   : > { %v1846_v8 = vmul.f32 1.442695, %v1800_v54  ;;  %v15725_v13 = vpop.eup %14184  ;;  %v1884_v18 = vsel %vm1697_vm4, %v15723_v35, 0.0 }
 0x2ed   : > { %v1760_v24 = vpop.xlane.xlu1 %1759  ;;  %14194 = vpow2.f32 %v1848_v1  ;;  %1885 = vadd.xlane.f32.xlu0 %v1884_v18  ;;  %v1947_v51 = vsel %vm1697_vm4, %v15725_v13, 0.0 }
 0x2ee   : > { %v1802_v0 = vsub.f32 %v15616_v55, %v1760_v24  ;;  %14196 = vpow2.f32 %v1846_v8  ;;  %1948 = vadd.xlane.f32.xlu1 %v1947_v51 }
 0x2ef   : > { %v15732_v52 = vpop.eup %14186 }
 0x2f0   : > { %v1850_v2 = vmul.f32 1.442695, %v1802_v0  ;;  %v15734_v56 = vpop.eup %14188  ;;  %v1911_v20 = vsel %vm1697_vm4, %v15732_v52, 0.0 }
 0x2f1   : > { %1912 = vadd.xlane.f32.xlu0 %v1911_v20  ;;  %v1908_v28 = vsel %vm1697_vm4, %v15734_v56, 0.0 }
 0x2f2   : > { %14198 = vpow2.f32 %v1850_v2  ;;  %1909 = vadd.xlane.f32.xlu1 %v1908_v28 }
 0x2f3   : > { %v15740_v55 = vpop.eup %14190 }
 0x2f4   : > { %v15742_v37 = vpop.eup %14192  ;;  %v1917_v14 = vsel %vm1697_vm4, %v15740_v55, 0.0 }
 0x2f5   : > { %1918 = vadd.xlane.f32.xlu0 %v1917_v14  ;;  %v1914_v61 = vsel %vm1697_vm4, %v15742_v37, 0.0 }
 0x2f6   : > { %1915 = vadd.xlane.f32.xlu1 %v1914_v61 }
 0x2f7   : > { %v15748_v29 = vpop.eup %14194 }
 0x2f8   : > { %v15750_v48 = vpop.eup %14196  ;;  %v1923_v7 = vsel %vm1697_vm4, %v15748_v29, 0.0 }
 0x2f9   : > { %1924 = vadd.xlane.f32.xlu0 %v1923_v7  ;;  %v1920_v50 = vsel %vm1697_vm4, %v15750_v48, 0.0 }
 0x2fa   : > { %1921 = vadd.xlane.f32.xlu1 %v1920_v50 }
 0x2fc   : > { %v15756_v59 = vpop.eup %14198 }
 0x2fd   : > { %v1926_v54 = vsel %vm1697_vm4, %v15756_v59, 0.0 }
 0x2fe   : > { %1927 = vadd.xlane.f32.xlu1 %v1926_v54 }
 0x346   : > { %v1889_v5 = vpop.xlane.xlu0 %1888 }
 0x347   : > { %14200 = vrcp.f32 %v1889_v5 }
 0x34a   : > { %v1892_v1 = vpop.xlane.xlu1 %1891 }
 0x34b   : > { %14202 = vrcp.f32 %v1892_v1  ;;  %v10108_v1 = vld [vmem:[%s19529_s2 + $0x38] sm:$0xff] }
 0x34e   : > { %v1895_v8 = vpop.xlane.xlu0 %1894 }
 0x34f   : > { %14204 = vrcp.f32 %v1895_v8 }
 0x351   : > { %v14201_v24 = vpop.eup %14200 }
 0x352   : > { %v1985_v18 = vmul.f32 %v14201_v24, %v15624_v40  ;;  %v1898_v0 = vpop.xlane.xlu1 %1897 }
 0x353   : > { %14206 = vrcp.f32 %v1898_v0 }
 0x354   : > { %12056 = vmatmul.mubr.msk.f32.vlgmr.msra.gmra.mrb[84].mxu1 %vm1697_vm4, %v1985_v18 }
 0x355   : > { %v14203_v51 = vpop.eup %14202  ;;  %13713 = vmatpush3.bf16.msra.mxu1 %v13712_v17  ;;  %12058 = vmatprep.mubr.msk.f32.mxu1 %vm14686_vm1, %v19540_v47  ;;  %v10105_v17 = vld [vmem:[%s19529_s2 + $0x20] sm:$0xff] }
 0x356   : > { %v1901_v2 = vpop.xlane.xlu0 %1900  ;;  %13714 = vmatprep.subr.bf16.mxu1 %v19538_v46  ;;  %v1986_v20 = vmul.f32 %v14203_v51, %v15629_v41  ;;  %v10106_v41 = vld [vmem:[%s19529_s2 + $0x28] sm:$0xff] }
 0x357   : > { %14208 = vrcp.f32 %v1901_v2 }
 0x358   : > { %12059 = vmatmul.mubr.msk.f32.gmra.mrb[86].mxu1 %vm1697_vm4, %v1986_v20 }
 0x359   : > { %v14205_v40 = vpop.eup %14204  ;;  %13716 = vmatpush3.bf16.msra.mxu1 %v13715_v9  ;;  %12061 = vmatprep.mubr.msk.f32.mxu1 %vm14686_vm1, %v19540_v47 }
 0x35a   : > { %v1904_v62 = vpop.xlane.xlu1 %1903  ;;  %13717 = vmatprep.subr.bf16.mxu1 %v19538_v46  ;;  %v1987_v57 = vmul.f32 %v14205_v40, %v15634_v44  ;;  %v13728_v44 = vpack.c.bf16 %v10106_v41, %v10105_v17  ;;  %v19548_v41 = vpack.c.bf16 %v15359_v27, %v15366_v16  ;;  %v13720_v27 = vpack.c.bf16 %v10072_v25, %v10071_v22  ;;  %v15992_v22 = vld [vmem:[%s14777_s30 + $0x70] sm:$0xff]  ;;  %v16006_v25 = vld [vmem:[%s14777_s30 + $0x80] sm:$0xff] }
 0x35b   : > { %14210 = vrcp.f32 %v1904_v62 }
 0x35c   : > { %12062 = vmatmul.mubr.msk.f32.gmra.mrb[88].mxu1 %vm1697_vm4, %v1987_v57 }
 0x35d   : > { %v14207_v4 = vpop.eup %14206  ;;  %13719 = vmatpush3.bf16.msra.mxu1 %v13718_v19  ;;  %12064 = vmatprep.mubr.msk.f32.mxu1 %vm14686_vm1, %v19540_v47 }
 0x35e   : > { %v1907_v63 = vpop.xlane.xlu0 %1906  ;;  %12123 = vmatprep.subr.mxu1 %v19540_v47  ;;  %v1988_v9 = vmul.f32 %v14207_v4, %v15639_v33 }
 0x35f   : > { %14212 = vrcp.f32 %v1907_v63 }
 0x360   : > { %12065 = vmatmul.mubr.msk.f32.gmra.mrb[90].mxu1 %vm1697_vm4, %v1988_v9 }
 0x361   : > { %v14209_v28 = vpop.eup %14208  ;;  %12124 = vmatpush3.msra.mxu1 %v15393_v3  ;;  %12067 = vmatprep.mubr.msk.f32.mxu1 %vm14686_vm1, %v19540_v47 }
 0x362   : > { %v1868_v10 = vpop.xlane.xlu0 %1867  ;;  %v1989_v15 = vmul.f32 %v14209_v28, %v15645_v26  ;;  %13729 = vmatprep.subr.bf16.mxu1 %v13728_v44 }
 0x363   : > { %14214 = vrcp.f32 %v1868_v10  ;;  %v1931_v19 = vpop.xlane.xlu1 %1930 }
 0x364   : > { %14216 = vrcp.f32 %v1931_v19  ;;  %12068 = vmatmul.mubr.msk.f32.gmra.mrb[92].mxu1 %vm1697_vm4, %v1989_v15 }
 0x365   : > { %v14211_v33 = vpop.eup %14210  ;;  %12070 = vmatprep.mubr.msk.f32.mxu1 %vm14686_vm1, %v19540_v47 }
 0x366   : > { %v1871_v14 = vpop.xlane.xlu0 %1870  ;;  %v1990_v61 = vmul.f32 %v14211_v33, %v15651_v30  ;;  %v10107_v30 = vld [vmem:[%s19529_s2 + $0x30] sm:$0xff] }
 0x367   : > { %14218 = vrcp.f32 %v1871_v14  ;;  %v1934_v3 = vpop.xlane.xlu1 %1933  ;;  %v13732_v51 = vpack.c.bf16 %v10108_v1, %v10107_v30  ;;  %v15901_v1 = vld [vmem:[%s14777_s30 + $0x8] sm:$0xff] }
 0x368   : > { %14220 = vrcp.f32 %v1934_v3  ;;  %12071 = vmatmul.mubr.msk.f32.gmra.mrb[94].mxu1 %vm1697_vm4, %v1990_v61 }
 0x369   : > { %v14213_v7 = vpop.eup %14212  ;;  %12073 = vmatprep.mubr.msk.f32.mxu1 %vm14686_vm1, %v19540_v47 }
 0x36a   : > { %v1874_v26 = vpop.xlane.xlu0 %1873  ;;  %v1991_v50 = vmul.f32 %v14213_v7, %v15657_v45  ;;  %v10073_v7 = vld [vmem:[%s19528_s1 + $0x30] sm:$0xff] }
 0x36b   : > { %14222 = vrcp.f32 %v1874_v26  ;;  %v1937_v54 = vpop.xlane.xlu1 %1936 }
 0x36c   : > { %14224 = vrcp.f32 %v1937_v54  ;;  %12074 = vmatmul.mubr.msk.f32.gmra.mrb[96].mxu1 %vm1697_vm4, %v1991_v50  ;;  %v15894_v50 = vld [vmem:[%s14777_s30] sm:$0xff] }
 0x36d   : > { %v14215_v5 = vpop.eup %14214  ;;  %12125 = vmatprep.mubr.msk.f32.mxu1 %vm14686_vm1, %v19540_v47 }
 0x36e   : > { %v14217_v8 = vpop.eup %14216  ;;  %v1978_v45 = vmul.f32 %v14215_v5, %v15663_v12  ;;  %v1877_v24 = vpop.xlane.xlu0 %1876 }
 0x36f   : > { %v1999_v18 = vmul.f32 %v14217_v8, %v15665_v31  ;;  %14226 = vrcp.f32 %v1877_v24  ;;  %v1940_v0 = vpop.xlane.xlu1 %1939  ;;  %v15908_v8 = vld [vmem:[%s14777_s30 + $0x10] sm:$0xff] }
 0x370   : > { %14228 = vrcp.f32 %v1940_v0  ;;  %12021 = vmatmul.mubr.msk.f32.vlgmr.msra.gmra.mrb[56].mxu0 %vm1697_vm4, %v1978_v45  ;;  %v15922_v0 = vld [vmem:[%s14777_s30 + $0x20] sm:$0xff] }
 0x371   : > { %v14219_v2 = vpop.eup %14218  ;;  %13704 = vmatpush3.bf16.msra.mxu0 %v13703_v58  ;;  %12126 = vmatmul.mubr.msk.f32.vlgmr.msra.gmra.mrb[98].mxu1 %vm1697_vm4, %v1999_v18  ;;  %v15915_v18 = vld [vmem:[%s14777_s30 + $0x18] sm:$0xff] }
 0x372   : > { %v14221_v20 = vpop.eup %14220  ;;  %v1880_v40 = vpop.xlane.xlu0 %1879  ;;  %12023 = vmatprep.mubr.msk.f32.mxu0 %vm14686_vm1, %v19540_v47  ;;  %13705 = vmatprep.subr.bf16.mxu0 %v19538_v46  ;;  %v1979_v12 = vmul.f32 %v14219_v2, %v15673_v39 }
 0x373   : > { %14230 = vrcp.f32 %v1880_v40  ;;  %v1943_v31 = vpop.xlane.xlu1 %1942  ;;  %12128 = vmatprep.mubr.msk.f32.mxu1 %vm14686_vm1, %v19540_v47  ;;  %v2000_v62 = vmul.f32 %v14221_v20, %v15675_v38  ;;  %13731 = vmatpush3.bf16.msra.mxu1 %v13728_v44  ;;  %v15929_v20 = vld [vmem:[%s14777_s30 + $0x28] sm:$0xff]  ;;  %v15936_v40 = vld [vmem:[%s14777_s30 + $0x30] sm:$0xff] }
 0x374   : > { %14232 = vrcp.f32 %v1943_v31  ;;  %12024 = vmatmul.mubr.msk.f32.gmra.mrb[58].mxu0 %vm1697_vm4, %v1979_v12  ;;  %13733 = vmatprep.subr.bf16.mxu1 %v13732_v51  ;;  %v15943_v31 = vld [vmem:[%s14777_s30 + $0x38] sm:$0xff] }
 0x375   : > { %v14223_v60 = vpop.eup %14222  ;;  %13707 = vmatpush3.bf16.msra.mxu0 %v19547_v21  ;;  %12129 = vmatmul.mubr.msk.f32.gmra.mrb[100].mxu1 %vm1697_vm4, %v2000_v62  ;;  %v15950_v62 = vld [vmem:[%s14777_s30 + $0x40] sm:$0xff]  ;;  %v15957_v21 = vld [vmem:[%s14777_s30 + $0x48] sm:$0xff] }
 0x376   : > { %v14225_v58 = vpop.eup %14224  ;;  %v1883_v39 = vpop.xlane.xlu0 %1882  ;;  %12026 = vmatprep.mubr.msk.f32.mxu0 %vm14686_vm1, %v19540_v47  ;;  %13708 = vmatprep.subr.bf16.mxu0 %v19538_v46  ;;  %v1980_v38 = vmul.f32 %v14223_v60, %v15683_v11 }
 0x377   : > { %14234 = vrcp.f32 %v1883_v39  ;;  %v1946_v57 = vpop.xlane.xlu1 %1945  ;;  %12131 = vmatprep.mubr.msk.f32.mxu1 %vm14686_vm1, %v19540_v47  ;;  %v2001_v17 = vmul.f32 %v14225_v58, %v15685_v43  ;;  %13735 = vmatpush3.bf16.msra.mxu1 %v13732_v51  ;;  %v15964_v58 = vld [vmem:[%s14777_s30 + $0x50] sm:$0xff] }
 0x378   : > { %14236 = vrcp.f32 %v1946_v57  ;;  %12027 = vmatmul.mubr.msk.f32.gmra.mrb[60].mxu0 %vm1697_vm4, %v1980_v38  ;;  %13744 = vmatprep.subr.bf16.mxu1 %v19538_v46  ;;  %v15971_v38 = vld [vmem:[%s14777_s30 + $0x58] sm:$0xff]  ;;  %v15978_v57 = vld [vmem:[%s14777_s30 + $0x60] sm:$0xff] }
 0x379   : > { %v14227_v11 = vpop.eup %14226  ;;  %13710 = vmatpush3.bf16.msra.mxu0 %v19548_v41  ;;  %12132 = vmatmul.mubr.msk.f32.gmra.mrb[102].mxu1 %vm1697_vm4, %v2001_v17  ;;  %v15985_v17 = vld [vmem:[%s14777_s30 + $0x68] sm:$0xff]  ;;  %v16020_v41 = vld [vmem:[%s14777_s30 + $0x90] sm:$0xff] }
 0x37a   : > { %v14229_v43 = vpop.eup %14228  ;;  %v1886_v4 = vpop.xlane.xlu0 %1885  ;;  %12029 = vmatprep.mubr.msk.f32.mxu0 %vm14686_vm1, %v19540_v47  ;;  %12088 = vmatprep.subr.mxu0 %v19540_v47  ;;  %v1981_v63 = vmul.f32 %v14227_v11, %v15693_v34  ;;  %v16013_v11 = vld [vmem:[%s14777_s30 + $0x88] sm:$0xff] }
 0x37b   : > { %14238 = vrcp.f32 %v1886_v4  ;;  %v1949_v9 = vpop.xlane.xlu1 %1948  ;;  %12134 = vmatprep.mubr.msk.f32.mxu1 %vm14686_vm1, %v19540_v47  ;;  %v2002_v44 = vmul.f32 %v14229_v43, %v15695_v42  ;;  %v16027_v43 = vld [vmem:[%s14777_s30 + $0x98] sm:$0xff]  ;;  %v16034_v4 = vld [vmem:[%s14777_s30 + $0xa0] sm:$0xff] }
 0x37c   : > { %14240 = vrcp.f32 %v1949_v9  ;;  %12030 = vmatmul.mubr.msk.f32.gmra.mrb[62].mxu0 %vm1697_vm4, %v1981_v63  ;;  %v16041_v63 = vld [vmem:[%s14777_s30 + $0xa8] sm:$0xff]  ;;  %v16048_v9 = vld [vmem:[%s14777_s30 + $0xb0] sm:$0xff] }
 0x37d   : > { %v14231_v16 = vpop.eup %14230  ;;  %12089 = vmatpush3.msra.mxu0 %v15375_v53  ;;  %12135 = vmatmul.mubr.msk.f32.gmra.mrb[104].mxu1 %vm1697_vm4, %v2002_v44  ;;  %v16055_v44 = vld [vmem:[%s14777_s30 + $0xb8] sm:$0xff] }
 0x37e   : > { %v14233_v28 = vpop.eup %14232  ;;  %12032 = vmatprep.mubr.msk.f32.mxu0 %vm14686_vm1, %v19540_v47  ;;  %12137 = vmatprep.mubr.msk.f32.mxu1 %vm14686_vm1, %v19540_v47  ;;  %v1982_v34 = vmul.f32 %v14231_v16, %v15703_v49  ;;  %v1913_v10 = vpop.xlane.xlu0 %1912  ;;  %v14617_v16 = vld [vmem:[%s14777_s30 + $0xc8] sm:$0xff] }
 0x37f   : > { %v1910_v42 = vpop.xlane.xlu1 %1909  ;;  %v2003_v15 = vmul.f32 %v14233_v28, %v15705_v36  ;;  %13721 = vmatprep.subr.bf16.mxu0 %v13720_v27  ;;  %v14618_v28 = vld [vmem:[%s14777_s30 + $0xd0] sm:$0xff] }
 0x380   : > { %14242 = vrcp.f32 %v1910_v42  ;;  %12033 = vmatmul.mubr.msk.f32.gmra.mrb[64].mxu0 %vm1697_vm4, %v1982_v34  ;;  %v14619_v34 = vld [vmem:[%s14777_s30 + $0xd8] sm:$0xff]  ;;  %v10140_v42 = vld [vmem:[%s19530_s3 + $0x28] sm:$0xff] }
 0x381   : > { %v14235_v53 = vpop.eup %14234  ;;  %12138 = vmatmul.mubr.msk.f32.gmra.mrb[106].mxu1 %vm1697_vm4, %v2003_v15  ;;  %12035 = vmatprep.mubr.msk.f32.mxu0 %vm14686_vm1, %v19540_v47  ;;  %14244 = vrcp.f32 %v1913_v10  ;;  %v10139_v10 = vld [vmem:[%s19530_s3 + $0x20] sm:$0xff] }
 0x382   : > { %v14237_v19 = vpop.eup %14236  ;;  %12140 = vmatprep.mubr.msk.f32.mxu1 %vm14686_vm1, %v19540_v47  ;;  %v1983_v49 = vmul.f32 %v14235_v53, %v15713_v32  ;;  %v1919_v32 = vpop.xlane.xlu0 %1918  ;;  %v13736_v15 = vpack.c.bf16 %v10140_v42, %v10139_v10  ;;  %v10141_v53 = vld [vmem:[%s19530_s3 + $0x30] sm:$0xff] }
 0x383   : > { %v1916_v33 = vpop.xlane.xlu1 %1915  ;;  %v2004_v36 = vmul.f32 %v14237_v19, %v15715_v6  ;;  %v10142_v19 = vld [vmem:[%s19530_s3 + $0x38] sm:$0xff] }
 0x384   : > { %12036 = vmatmul.mubr.msk.f32.gmra.mrb[66].mxu0 %vm1697_vm4, %v1983_v49  ;;  %14246 = vrcp.f32 %v1916_v33  ;;  %v13740_v49 = vpack.c.bf16 %v10142_v19, %v10141_v53 }
 0x385   : > { %v14239_v14 = vpop.eup %14238  ;;  %12141 = vmatmul.mubr.msk.f32.gmra.mrb[108].mxu1 %vm1697_vm4, %v2004_v36  ;;  %12038 = vmatprep.mubr.msk.f32.mxu0 %vm14686_vm1, %v19540_v47  ;;  %14248 = vrcp.f32 %v1919_v32 }
 0x386   : > { %v14241_v61 = vpop.eup %14240  ;;  %12143 = vmatprep.mubr.msk.f32.mxu1 %vm14686_vm1, %v19540_v47  ;;  %v1984_v3 = vmul.f32 %v14239_v14, %v15723_v35  ;;  %v10074_v35 = vld [vmem:[%s19528_s1 + $0x38] sm:$0xff] }
 0x387   : > { %v2005_v6 = vmul.f32 %v14241_v61, %v15725_v13  ;;  %v1922_v54 = vpop.xlane.xlu1 %1921  ;;  %v13724_v30 = vpack.c.bf16 %v10074_v35, %v10073_v7 }
 0x388   : > { %12039 = vmatmul.mubr.msk.f32.gmra.mrb[68].mxu0 %vm1697_vm4, %v1984_v3  ;;  %14250 = vrcp.f32 %v1922_v54 }
 0x389   : > { %12144 = vmatmul.mubr.msk.f32.gmra.mrb[110].mxu1 %vm1697_vm4, %v2005_v6  ;;  %12090 = vmatprep.mubr.msk.f32.mxu0 %vm14686_vm1, %v19540_v47 }
 0x38a   : > { %v14243_v26 = vpop.eup %14242  ;;  %12204 = vmatprep.mubr.msk.f32.mxu1 %vm399_vm0, %v15894_v50 }
 0x38b   : > { %v1992_v13 = vmul.f32 %v14243_v26, %v15734_v56  ;;  %v14245_v5 = vpop.eup %14244  ;;  %v1925_v56 = vpop.xlane.xlu0 %1924 }
 0x38c   : > { %v1993_v45 = vmul.f32 %v14245_v5, %v15732_v52  ;;  %14252 = vrcp.f32 %v1925_v56  ;;  %v1928_v52 = vpop.xlane.xlu1 %1927 }
 0x38d   : > { %12091 = vmatmul.mubr.msk.f32.vlgmr.msra.gmra.mrb[70].mxu0 %vm1697_vm4, %v1992_v13  ;;  %12205 = vmatmul.mubr.msk.f32.vlgmr.msra.gmra.mrb[112].mxu1 %vm399_vm0, %v15901_v1  ;;  %14254 = vrcp.f32 %v1928_v52 }
 0x38e   : > { %12093 = vmatprep.mubr.msk.f32.mxu0 %vm14686_vm1, %v19540_v47  ;;  %12207 = vmatprep.mubr.msk.f32.mxu1 %vm399_vm0, %v15908_v8  ;;  %v14247_v24 = vpop.eup %14246 }
 0x38f   : > { %13723 = vmatpush3.bf16.msra.mxu0 %v13720_v27  ;;  %v1994_v51 = vmul.f32 %v14247_v24, %v15742_v37  ;;  %v14249_v2 = vpop.eup %14248  ;;  %v14616_v27 = vld [vmem:[%s14777_s30 + $0xc0] sm:$0xff] }
 0x390   : > { %13725 = vmatprep.subr.bf16.mxu0 %v13724_v30  ;;  %v1995_v37 = vmul.f32 %v14249_v2, %v15740_v55 }
 0x391   : > { %12094 = vmatmul.mubr.msk.f32.gmra.mrb[72].mxu0 %vm1697_vm4, %v1993_v45  ;;  %12208 = vmatmul.mubr.msk.f32.gmra.mrb[114].mxu1 %vm399_vm0, %v15915_v18 }
 0x392   : > { %12096 = vmatprep.mubr.msk.f32.mxu0 %vm14686_vm1, %v19540_v47  ;;  %12210 = vmatprep.mubr.msk.f32.mxu1 %vm399_vm0, %v15922_v0  ;;  %v14251_v12 = vpop.eup %14250 }
 0x393   : > { %13727 = vmatpush3.bf16.msra.mxu0 %v13724_v30  ;;  %v1996_v55 = vmul.f32 %v14251_v12, %v15750_v48 }
 0x394   : > { %13737 = vmatprep.subr.bf16.mxu0 %v13736_v15 }
 0x395   : > { %12097 = vmatmul.mubr.msk.f32.gmra.mrb[74].mxu0 %vm1697_vm4, %v1994_v51  ;;  %12211 = vmatmul.mubr.msk.f32.gmra.mrb[116].mxu1 %vm399_vm0, %v15929_v20 }
 0x396   : > { %12099 = vmatprep.mubr.msk.f32.mxu0 %vm14686_vm1, %v19540_v47  ;;  %12213 = vmatprep.mubr.msk.f32.mxu1 %vm399_vm0, %v15936_v40  ;;  %v14253_v60 = vpop.eup %14252 }
 0x397   : > { %v1997_v48 = vmul.f32 %v14253_v60, %v15748_v29  ;;  %v14255_v39 = vpop.eup %14254 }
 0x398   : > { %v1998_v29 = vmul.f32 %v14255_v39, %v15756_v59  ;;  %v15999_v59 = vld [vmem:[%s14777_s30 + $0x78] sm:$0xff] }
 0x399   : > { %12100 = vmatmul.mubr.msk.f32.gmra.mrb[76].mxu0 %vm1697_vm4, %v1995_v37  ;;  %12214 = vmatmul.mubr.msk.f32.gmra.mrb[118].mxu1 %vm399_vm0, %v15943_v31 }
 0x39a   : > { %12102 = vmatprep.mubr.msk.f32.mxu0 %vm14686_vm1, %v19540_v47  ;;  %12216 = vmatprep.mubr.msk.f32.mxu1 %vm399_vm0, %v15950_v62 }
 0x39d   : > { %12103 = vmatmul.mubr.msk.f32.gmra.mrb[78].mxu0 %vm1697_vm4, %v1996_v55  ;;  %12217 = vmatmul.mubr.msk.f32.gmra.mrb[120].mxu1 %vm399_vm0, %v15957_v21 }
 0x39e   : > { %12105 = vmatprep.mubr.msk.f32.mxu0 %vm14686_vm1, %v19540_v47  ;;  %12219 = vmatprep.mubr.msk.f32.mxu1 %vm399_vm0, %v15964_v58 }
 0x3a1   : > { %12106 = vmatmul.mubr.msk.f32.gmra.mrb[80].mxu0 %vm1697_vm4, %v1997_v48  ;;  %12220 = vmatmul.mubr.msk.f32.gmra.mrb[122].mxu1 %vm399_vm0, %v15971_v38 }
 0x3a2   : > { %12108 = vmatprep.mubr.msk.f32.mxu0 %vm14686_vm1, %v19540_v47  ;;  %12222 = vmatprep.mubr.msk.f32.mxu1 %vm399_vm0, %v15978_v57 }
 0x3a5   : > { %12109 = vmatmul.mubr.msk.f32.gmra.mrb[82].mxu0 %vm1697_vm4, %v1998_v29  ;;  %12223 = vmatmul.mubr.msk.f32.gmra.mrb[124].mxu1 %vm399_vm0, %v15985_v17 }
 0x3a6   : > { %12154 = vmatprep.mubr.msk.f32.mxu0 %vm399_vm0, %v15894_v50  ;;  %12225 = vmatprep.mubr.msk.f32.mxu1 %vm399_vm0, %v15992_v22 }
 0x3a9   : > { %12155 = vmatmul.mubr.msk.f32.vlgmr.msra.gmra.mrb[84].mxu0 %vm399_vm0, %v15901_v1  ;;  %12226 = vmatmul.mubr.msk.f32.gmra.mrb[126].mxu1 %vm399_vm0, %v15999_v59 }
 0x3aa   : > { %12157 = vmatprep.mubr.msk.f32.mxu0 %vm399_vm0, %v15908_v8  ;;  %12228 = vmatprep.mubr.msk.f32.mxu1 %vm399_vm0, %v16006_v25 }
 0x3ab   : > { %13739 = vmatpush3.bf16.msra.mxu0 %v13736_v15 }
 0x3ac   : > { %13741 = vmatprep.subr.bf16.mxu0 %v13740_v49 }
 0x3ad   : > { %12158 = vmatmul.mubr.msk.f32.gmra.mrb[86].mxu0 %vm399_vm0, %v15915_v18  ;;  %12229 = vmatmul.mubr.msk.f32.gmra.mrb[128].mxu1 %vm399_vm0, %v16013_v11 }
 0x3ae   : > { %12160 = vmatprep.mubr.msk.f32.mxu0 %vm399_vm0, %v15922_v0  ;;  %12231 = vmatprep.mubr.msk.f32.mxu1 %vm399_vm0, %v16020_v41 }
 0x3af   : > { %13743 = vmatpush3.bf16.msra.mxu0 %v13740_v49 }
 0x3b0   : > { %13768 = vmatprep.subr.bf16.mxu0 %v19538_v46 }
 0x3b1   : > { %12161 = vmatmul.mubr.msk.f32.gmra.mrb[88].mxu0 %vm399_vm0, %v15929_v20  ;;  %12232 = vmatmul.mubr.msk.f32.gmra.mrb[130].mxu1 %vm399_vm0, %v16027_v43 }
 0x3b2   : > { %12163 = vmatprep.mubr.msk.f32.mxu0 %vm399_vm0, %v15936_v40  ;;  %12234 = vmatprep.mubr.msk.f32.mxu1 %vm399_vm0, %v16034_v4 }
 0x3b5   : > { %12164 = vmatmul.mubr.msk.f32.gmra.mrb[90].mxu0 %vm399_vm0, %v15943_v31  ;;  %12235 = vmatmul.mubr.msk.f32.gmra.mrb[132].mxu1 %vm399_vm0, %v16041_v63 }
 0x3b6   : > { %12166 = vmatprep.mubr.msk.f32.mxu0 %vm399_vm0, %v15950_v62  ;;  %12237 = vmatprep.mubr.msk.f32.mxu1 %vm399_vm0, %v16048_v9 }
 0x3b9   : > { %12167 = vmatmul.mubr.msk.f32.gmra.mrb[92].mxu0 %vm399_vm0, %v15957_v21  ;;  %12238 = vmatmul.mubr.msk.f32.gmra.mrb[134].mxu1 %vm399_vm0, %v16055_v44 }
 0x3ba   : > { %12169 = vmatprep.mubr.msk.f32.mxu0 %vm399_vm0, %v15964_v58  ;;  %12240 = vmatprep.mubr.msk.f32.mxu1 %vm399_vm0, %v14616_v27 }
 0x3bd   : > { %12170 = vmatmul.mubr.msk.f32.gmra.mrb[94].mxu0 %vm399_vm0, %v15971_v38  ;;  %12241 = vmatmul.mubr.msk.f32.gmra.mrb[136].mxu1 %vm399_vm0, %v14617_v16 }
 0x3be   : > { %12172 = vmatprep.mubr.msk.f32.mxu0 %vm399_vm0, %v15978_v57  ;;  %12243 = vmatprep.mubr.msk.f32.mxu1 %vm399_vm0, %v14618_v28 }
 0x3c1   : > { %12173 = vmatmul.mubr.msk.f32.gmra.mrb[96].mxu0 %vm399_vm0, %v15985_v17  ;;  %12244 = vmatmul.mubr.msk.f32.gmra.mrb[138].mxu1 %vm399_vm0, %v14619_v34 }
 0x3c2   : > { %12175 = vmatprep.mubr.msk.f32.mxu0 %vm399_vm0, %v15992_v22  ;;  %12310 = vmatprep.mubr.msk.f32.mxu1 %vm14686_vm1, %v19540_v47 }
 0x3c5   : > { %12176 = vmatmul.mubr.msk.f32.gmra.mrb[98].mxu0 %vm399_vm0, %v15999_v59 }
 0x3c6   : > { %12178 = vmatprep.mubr.msk.f32.mxu0 %vm399_vm0, %v16006_v25 }
 0x3c9   : > { %12179 = vmatmul.mubr.msk.f32.gmra.mrb[100].mxu0 %vm399_vm0, %v16013_v11 }
 0x3ca   : > { %12181 = vmatprep.mubr.msk.f32.mxu0 %vm399_vm0, %v16020_v41 }
 0x3cd   : > { %12182 = vmatmul.mubr.msk.f32.gmra.mrb[102].mxu0 %vm399_vm0, %v16027_v43 }
 0x3ce   : > { %12184 = vmatprep.mubr.msk.f32.mxu0 %vm399_vm0, %v16034_v4 }
 0x3d1   : > { %12185 = vmatmul.mubr.msk.f32.gmra.mrb[104].mxu0 %vm399_vm0, %v16041_v63 }
 0x3d2   : > { %12187 = vmatprep.mubr.msk.f32.mxu0 %vm399_vm0, %v16048_v9 }
 0x3d5   : > { %12188 = vmatmul.mubr.msk.f32.gmra.mrb[106].mxu0 %vm399_vm0, %v16055_v44 }
 0x3d6   : > { %12190 = vmatprep.mubr.msk.f32.mxu0 %vm399_vm0, %v14616_v27 }
 0x3d9   : > { %12191 = vmatmul.mubr.msk.f32.gmra.mrb[108].mxu0 %vm399_vm0, %v14617_v16 }
 0x3da   : > { %12193 = vmatprep.mubr.msk.f32.mxu0 %vm399_vm0, %v14618_v28 }
 0x3dd   : > { %12194 = vmatmul.mubr.msk.f32.gmra.mrb[110].mxu0 %vm399_vm0, %v14619_v34 }
 0x3de   : > { %12254 = vmatprep.mubr.msk.f32.mxu0 %vm399_vm0, %v15894_v50 }
 0x3e1   : > { %12255 = vmatmul.mubr.msk.f32.vlgmr.msra.gmra.mrb[112].mxu0 %vm399_vm0, %v15901_v1 }
 0x3e2   : > { %12257 = vmatprep.mubr.msk.f32.mxu0 %vm399_vm0, %v15908_v8 }
 0x3e5   : > { %12258 = vmatmul.mubr.msk.f32.gmra.mrb[114].mxu0 %vm399_vm0, %v15915_v18 }
 0x3e6   : > { %12260 = vmatprep.mubr.msk.f32.mxu0 %vm399_vm0, %v15922_v0 }
 0x3e9   : > { %12261 = vmatmul.mubr.msk.f32.gmra.mrb[116].mxu0 %vm399_vm0, %v15929_v20 }
 0x3ea   : > { %12263 = vmatprep.mubr.msk.f32.mxu0 %vm399_vm0, %v15936_v40 }
 0x3ed   : > { %12264 = vmatmul.mubr.msk.f32.gmra.mrb[118].mxu0 %vm399_vm0, %v15943_v31 }
 0x3ee   : > { %12266 = vmatprep.mubr.msk.f32.mxu0 %vm399_vm0, %v15950_v62 }
 0x3f1   : > { %12267 = vmatmul.mubr.msk.f32.gmra.mrb[120].mxu0 %vm399_vm0, %v15957_v21 }
 0x3f2   : > { %12269 = vmatprep.mubr.msk.f32.mxu0 %vm399_vm0, %v15964_v58 }
 0x3f5   : > { %12270 = vmatmul.mubr.msk.f32.gmra.mrb[122].mxu0 %vm399_vm0, %v15971_v38 }
 0x3f6   : > { %12272 = vmatprep.mubr.msk.f32.mxu0 %vm399_vm0, %v15978_v57 }
 0x3f9   : > { %12273 = vmatmul.mubr.msk.f32.gmra.mrb[124].mxu0 %vm399_vm0, %v15985_v17 }
 0x3fa   : > { %12275 = vmatprep.mubr.msk.f32.mxu0 %vm399_vm0, %v15992_v22 }
 0x3fd   : > { %12276 = vmatmul.mubr.msk.f32.gmra.mrb[126].mxu0 %vm399_vm0, %v15999_v59  ;;  %v16213_v59 = vld [vmem:[%s19532_s5 + $0x1] ss:$0 sm:$0xff] }
 0x3fe   : > { %12278 = vmatprep.mubr.msk.f32.mxu0 %vm399_vm0, %v16006_v25 }
 0x401   : > { %12279 = vmatmul.mubr.msk.f32.gmra.mrb[128].mxu0 %vm399_vm0, %v16013_v11 }
 0x402   : > { %12281 = vmatprep.mubr.msk.f32.mxu0 %vm399_vm0, %v16020_v41 }
 0x405   : > { %12282 = vmatmul.mubr.msk.f32.gmra.mrb[130].mxu0 %vm399_vm0, %v16027_v43 }
 0x406   : > { %12284 = vmatprep.mubr.msk.f32.mxu0 %vm399_vm0, %v16034_v4 }
 0x409   : > { %12285 = vmatmul.mubr.msk.f32.gmra.mrb[132].mxu0 %vm399_vm0, %v16041_v63 }
 0x40a   : > { %12287 = vmatprep.mubr.msk.f32.mxu0 %vm399_vm0, %v16048_v9 }
 0x40d   : > { %12288 = vmatmul.mubr.msk.f32.gmra.mrb[134].mxu0 %vm399_vm0, %v16055_v44 }
 0x40e   : > { %12290 = vmatprep.mubr.msk.f32.mxu0 %vm399_vm0, %v14616_v27 }
 0x411   : > { %12291 = vmatmul.mubr.msk.f32.gmra.mrb[136].mxu0 %vm399_vm0, %v14617_v16 }
 0x412   : > { %12293 = vmatprep.mubr.msk.f32.mxu0 %vm399_vm0, %v14618_v28 }
 0x415   : > { %12294 = vmatmul.mubr.msk.f32.gmra.mrb[138].mxu0 %vm399_vm0, %v14619_v34 }
 0x416   : > { %12380 = vmatprep.mubr.msk.f32.mxu0 %vm14686_vm1, %v19540_v47 }
 0x427   : > { %v16168_v33 = vpop.f32.mrb[84].mxu1 }
 0x428   : > { %v12057_v36 = vpop.f32.mrb[85].mxu1 }
 0x42b   : > { %v16170_v14 = vpop.f32.mrb[86].mxu1 }
 0x42c   : > { %19549 = vst [vmem:[#allocation3_spill] sm:$0xff] %v16170_v14  ;;  %v12060_v61 = vpop.f32.mrb[87].mxu1 }
 0x42f   : > { %v16172_v3 = vpop.f32.mrb[88].mxu1 }
 0x430   : > { %19550 = vst [vmem:[#allocation4_spill] sm:$0xff] %v16172_v3  ;;  %v12063_v32 = vpop.f32.mrb[89].mxu1 }
 0x433   : > { %v16174_v6 = vpop.f32.mrb[90].mxu1 }
 0x434   : > { %19551 = vst [vmem:[#allocation5_spill] sm:$0xff] %v16174_v6  ;;  %v12066_v7 = vpop.f32.mrb[91].mxu1 }
 0x437   : > { %v16176_v35 = vpop.f32.mrb[92].mxu1 }
 0x438   : > { %19552 = vst [vmem:[#allocation6_spill] sm:$0xff] %v16176_v35  ;;  %v12069_v26 = vpop.f32.mrb[93].mxu1 }
 0x43b   : > { %v16178_v50 = vpop.f32.mrb[94].mxu1 }
 0x43c   : > { %19553 = vst [vmem:[#allocation7_spill] sm:$0xff] %v16178_v50  ;;  %v12072_v13 = vpop.f32.mrb[95].mxu1 }
 0x43f   : > { %v16180_v54 = vpop.f32.mrb[96].mxu1 }
 0x440   : > { %19554 = vst [vmem:[#allocation8_spill] sm:$0xff] %v16180_v54  ;;  %v12075_v5 = vpop.f32.mrb[97].mxu1 }
 0x443   : > { %v16182_v30 = vpop.f32.mrb[56].mxu0 }
 0x444   : > { %v16184_v1 = vpop.f32.mrb[98].mxu1  ;;  %v12022_v8 = vpop.f32.mrb[57].mxu0 }
 0x445   : > { %19555 = vst [vmem:[#allocation9_spill] sm:$0xff] %v16184_v1  ;;  %v12127_v56 = vpop.f32.mrb[99].mxu1 }
 0x447   : > { %v16186_v45 = vpop.f32.mrb[58].mxu0 }
 0x448   : > { %v16188_v24 = vpop.f32.mrb[100].mxu1  ;;  %v12025_v18 = vpop.f32.mrb[59].mxu0 }
 0x449   : > { %19556 = vst [vmem:[#allocation10_spill] sm:$0xff] %v16188_v24  ;;  %v12130_v0 = vpop.f32.mrb[101].mxu1 }
 0x44b   : > { %v16190_v52 = vpop.f32.mrb[60].mxu0 }
 0x44c   : > { %v16192_v51 = vpop.f32.mrb[102].mxu1  ;;  %v12028_v2 = vpop.f32.mrb[61].mxu0 }
 0x44d   : > { %19557 = vst [vmem:[#allocation11_spill] sm:$0xff] %v16192_v51  ;;  %v12133_v20 = vpop.f32.mrb[103].mxu1 }
 0x44f   : > { %v16194_v40 = vpop.f32.mrb[62].mxu0 }
 0x450   : > { %v16196_v37 = vpop.f32.mrb[104].mxu1  ;;  %v12031_v12 = vpop.f32.mrb[63].mxu0 }
 0x451   : > { %19558 = vst [vmem:[#allocation12_spill] sm:$0xff] %v16196_v37  ;;  %v12136_v31 = vpop.f32.mrb[105].mxu1 }
 0x453   : > { %v16198_v62 = vpop.f32.mrb[64].mxu0 }
 0x454   : > { %v16200_v55 = vpop.f32.mrb[106].mxu1  ;;  %v12034_v60 = vpop.f32.mrb[65].mxu0 }
 0x455   : > { %19559 = vst [vmem:[#allocation13_spill] sm:$0xff] %v16200_v55  ;;  %v12139_v21 = vpop.f32.mrb[107].mxu1 }
 0x457   : > { %v16202_v58 = vpop.f32.mrb[66].mxu0 }
 0x458   : > { %v16204_v48 = vpop.f32.mrb[108].mxu1  ;;  %v12037_v39 = vpop.f32.mrb[67].mxu0 }
 0x459   : > { %19560 = vst [vmem:[#allocation14_spill] sm:$0xff] %v16204_v48  ;;  %v12142_v38 = vpop.f32.mrb[109].mxu1 }
 0x45b   : > { %v16206_v57 = vpop.f32.mrb[68].mxu0 }
 0x45c   : > { %v16208_v29 = vpop.f32.mrb[110].mxu1  ;;  %v12040_v17 = vpop.f32.mrb[69].mxu0 }
 0x45d   : > { %19561 = vst [vmem:[#allocation15_spill] sm:$0xff] %v16208_v29  ;;  %v12145_v22 = vpop.f32.mrb[111].mxu1 }
 0x460   : > { %v16215_v25 = vpop.f32.mrb[70].mxu0  ;;  %v12206_v11 = vpop.f32.mrb[112].mxu1 }
 0x461   : > { %19562 = vst [vmem:[#allocation16_spill] sm:$0xff] %v16215_v25  ;;  %v2794_v41 = vadd.f32 %v12206_v11, %v16213_v59  ;;  %v12092_v43 = vpop.f32.mrb[71].mxu0  ;;  %v2788_v4 = vpop.f32.mrb[113].mxu1 }
 0x462   : > { %v2789_v63 = vadd.f32 %v16213_v59, %v2788_v4 }
 0x464   : > { %v13745_v9 = vpack.c.bf16 %v2794_v41, %v2789_v63  ;;  %v16219_v44 = vpop.f32.mrb[72].mxu0  ;;  %v12209_v27 = vpop.f32.mrb[114].mxu1 }
 0x465   : > { %19563 = vst [vmem:[#allocation17_spill] sm:$0xff] %v16219_v44  ;;  %v12095_v16 = vpop.f32.mrb[73].mxu0  ;;  %v2804_v28 = vadd.f32 %v12209_v27, %v16213_v59  ;;  %v2798_v34 = vpop.f32.mrb[115].mxu1  ;;  %v16259_v27 = vld [vmem:[%s19531_s4 + $0x1] ss:$0 sm:$0xff] }
 0x466   : > { %13747 = vmatpush3.bf16.xpose.msk.msra.mxu1 %vm15110_vm3, %v13745_v9  ;;  %v2799_v10 = vadd.f32 %v16213_v59, %v2798_v34 }
 0x467   : > { %13748 = vmatprep.subr.bf16.mxu1 %v19538_v46 }
 0x468   : > { %v16226_v42 = vpop.f32.mrb[74].mxu0  ;;  %v13749_v15 = vpack.c.bf16 %v2804_v28, %v2799_v10  ;;  %v12212_v53 = vpop.f32.mrb[116].mxu1 }
 0x469   : > { %19564 = vst [vmem:[#allocation18_spill] sm:$0xff] %v16226_v42  ;;  %v12098_v19 = vpop.f32.mrb[75].mxu0  ;;  %v2814_v49 = vadd.f32 %v12212_v53, %v16213_v59  ;;  %v2808_v36 = vpop.f32.mrb[117].mxu1 }
 0x46a   : > { %v2809_v61 = vadd.f32 %v16213_v59, %v2808_v36 }
 0x46c   : > { %v16230_v32 = vpop.f32.mrb[76].mxu0  ;;  %v13753_v7 = vpack.c.bf16 %v2814_v49, %v2809_v61  ;;  %v12215_v26 = vpop.f32.mrb[118].mxu1 }
 0x46d   : > { %19565 = vst [vmem:[#allocation19_spill] sm:$0xff] %v16230_v32  ;;  %v12101_v13 = vpop.f32.mrb[77].mxu0  ;;  %v2818_v5 = vpop.f32.mrb[119].mxu1  ;;  %v2824_v56 = vadd.f32 %v12215_v26, %v16213_v59 }
 0x46e   : > { %13751 = vmatpush3.bf16.xpose.msk.msra.mxu1 %vm15110_vm3, %v13749_v15  ;;  %v2819_v16 = vadd.f32 %v16213_v59, %v2818_v5 }
 0x46f   : > { %13752 = vmatprep.subr.bf16.mxu1 %v19538_v46 }
 0x470   : > { %v16235_v8 = vpop.f32.mrb[78].mxu0  ;;  %v12218_v18 = vpop.f32.mrb[120].mxu1 }
 0x471   : > { %19566 = vst [vmem:[#allocation20_spill] sm:$0xff] %v16235_v8  ;;  %v12104_v0 = vpop.f32.mrb[79].mxu0  ;;  %v2828_v2 = vpop.f32.mrb[121].mxu1  ;;  %v2834_v31 = vadd.f32 %v12218_v18, %v16213_v59 }
 0x472   : > { %v2829_v20 = vadd.f32 %v16213_v59, %v2828_v2 }
 0x474   : > { %v16239_v12 = vpop.f32.mrb[80].mxu0  ;;  %v13757_v60 = vpack.c.bf16 %v2829_v20, %v2824_v56  ;;  %v12221_v21 = vpop.f32.mrb[122].mxu1 }
 0x475   : > { %19567 = vst [vmem:[#allocation21_spill] sm:$0xff] %v16239_v12  ;;  %v12107_v39 = vpop.f32.mrb[81].mxu0  ;;  %v2838_v38 = vpop.f32.mrb[123].mxu1  ;;  %v16249_v11 = vadd.f32 %v12221_v21, %v16213_v59 }
 0x476   : > { %13755 = vmatpush3.bf16.xpose.msk.msra.mxu1 %vm15110_vm3, %v13753_v7  ;;  %v2839_v17 = vadd.f32 %v16213_v59, %v2838_v38 }
 0x477   : > { %12308 = vmatprep.subr.mxu1 %v19540_v47 }
 0x478   : > { %v16246_v22 = vpop.f32.mrb[82].mxu0  ;;  %v13761_v41 = vpack.c.bf16 %v2839_v17, %v2834_v31  ;;  %v16251_v43 = vpop.f32.mrb[124].mxu1 }
 0x479   : > { %19568 = vst [vmem:[#allocation22_spill] sm:$0xff] %v16246_v22  ;;  %v12110_v4 = vpop.f32.mrb[83].mxu0  ;;  %v2848_v63 = vpop.f32.mrb[125].mxu1 }
 0x47a   : > { %v16254_v9 = vadd.f32 %v16213_v59, %v2848_v63 }
 0x47c   : > { %v13765_v28 = vpack.c.bf16 %v16254_v9, %v16249_v11  ;;  %v12156_v34 = vpop.f32.mrb[84].mxu0  ;;  %v12227_v10 = vpop.f32.mrb[126].mxu1 }
 0x47d   : > { %v2864_v15 = vadd.f32 %v12227_v10, %v16213_v59  ;;  %v2570_v53 = vpop.f32.mrb[85].mxu0  ;;  %v2858_v19 = vpop.f32.mrb[127].mxu1  ;;  %v2576_v0 = vadd.f32 %v12156_v34, %v16259_v27 }
 0x47e   : > { %v2571_v49 = vadd.f32 %v16259_v27, %v2570_v53  ;;  %v2859_v36 = vadd.f32 %v16213_v59, %v2858_v19  ;;  %12309 = vmatpush3.xpose.msk.msra.mxu1 %vm1128_vm2, %v2819_v16 }
 0x47f   : > { %13756 = vmatprep.subr.bf16.mxu1 %v19538_v46 }
 0x480   : > { %v13769_v61 = vpack.c.bf16 %v2864_v15, %v2859_v36  ;;  %v12159_v7 = vpop.f32.mrb[86].mxu0  ;;  %v12230_v26 = vpop.f32.mrb[128].mxu1 }
 0x481   : > { %12311 = vmatmul.mubr.msk.f32.vlgmr.msra.gmra.mrb[140].mxu1 %vm1128_vm2, %v2571_v49  ;;  %v2874_v13 = vadd.f32 %v12230_v26, %v16213_v59  ;;  %v2580_v5 = vpop.f32.mrb[87].mxu0  ;;  %v2868_v56 = vpop.f32.mrb[129].mxu1  ;;  %v2586_v15 = vadd.f32 %v12159_v7, %v16259_v27 }
 0x482   : > { %13759 = vmatpush3.bf16.xpose.msk.msra.mxu1 %vm15110_vm3, %v13757_v60  ;;  %13771 = vmatpush3.bf16.xpose.msk.msra.mxu0 %vm15110_vm3, %v13769_v61  ;;  %v2869_v18 = vadd.f32 %v16213_v59, %v2868_v56  ;;  %v2581_v21 = vadd.f32 %v16259_v27, %v2580_v5 }
 0x483   : > { %12313 = vmatprep.mubr.msk.f32.mxu1 %vm14686_vm1, %v19540_v47  ;;  %13760 = vmatprep.subr.bf16.mxu1 %v19538_v46 }
 0x484   : > { %v13773_v2 = vpack.c.bf16 %v2874_v13, %v2869_v18  ;;  %13772 = vmatprep.subr.bf16.mxu0 %v19538_v46  ;;  %v12162_v20 = vpop.f32.mrb[88].mxu0  ;;  %v12233_v31 = vpop.f32.mrb[130].mxu1 }
 0x485   : > { %12314 = vmatmul.mubr.msk.f32.gmra.mrb[142].mxu1 %vm1128_vm2, %v2576_v0  ;;  %v2884_v60 = vadd.f32 %v12233_v31, %v16213_v59  ;;  %v2590_v39 = vpop.f32.mrb[89].mxu0  ;;  %v2878_v38 = vpop.f32.mrb[131].mxu1 }
 0x486   : > { %12316 = vmatprep.mubr.msk.f32.mxu1 %vm14686_vm1, %v19540_v47  ;;  %v2879_v17 = vadd.f32 %v16213_v59, %v2878_v38  ;;  %v2591_v36 = vadd.f32 %v16259_v27, %v2590_v39 }
 0x488   : > { %v13777_v4 = vpack.c.bf16 %v2884_v60, %v2879_v17  ;;  %v12236_v63 = vpop.f32.mrb[132].mxu1  ;;  %v12165_v16 = vpop.f32.mrb[90].mxu0 }
 0x489   : > { %12317 = vmatmul.mubr.msk.f32.gmra.mrb[144].mxu1 %vm1128_vm2, %v2581_v21  ;;  %v2888_v34 = vpop.f32.mrb[133].mxu1  ;;  %v2600_v10 = vpop.f32.mrb[91].mxu0  ;;  %v2894_v53 = vadd.f32 %v12236_v63, %v16213_v59  ;;  %v2596_v21 = vadd.f32 %v12162_v20, %v16259_v27 }
 0x48a   : > { %13763 = vmatpush3.bf16.xpose.msk.msra.mxu1 %vm15110_vm3, %v13761_v41  ;;  %13775 = vmatpush3.bf16.xpose.msk.msra.mxu0 %vm15110_vm3, %v13773_v2  ;;  %v2601_v9 = vadd.f32 %v16259_v27, %v2600_v10  ;;  %v2889_v63 = vadd.f32 %v16213_v59, %v2888_v34 }
 0x48b   : > { %12319 = vmatprep.mubr.msk.f32.mxu1 %vm14686_vm1, %v19540_v47  ;;  %13764 = vmatprep.subr.bf16.mxu1 %v19538_v46 }
 0x48c   : > { %13776 = vmatprep.subr.bf16.mxu0 %v19538_v46  ;;  %v12239_v19 = vpop.f32.mrb[134].mxu1  ;;  %v12168_v49 = vpop.f32.mrb[92].mxu0 }
 0x48d   : > { %12320 = vmatmul.mubr.msk.f32.gmra.mrb[146].mxu1 %vm1128_vm2, %v2586_v15  ;;  %v16301_v41 = vadd.f32 %v12239_v19, %v16213_v59  ;;  %v2898_v61 = vpop.f32.mrb[135].mxu1  ;;  %v2610_v7 = vpop.f32.mrb[93].mxu0 }
 0x48e   : > { %12322 = vmatprep.mubr.msk.f32.mxu1 %vm14686_vm1, %v19540_v47  ;;  %v2899_v26 = vadd.f32 %v16213_v59, %v2898_v61 }
 0x490   : > { %v13781_v13 = vpack.c.bf16 %v2899_v26, %v2894_v53  ;;  %v16306_v5 = vpop.f32.mrb[94].mxu0  ;;  %v12242_v56 = vpop.f32.mrb[136].mxu1  ;;  %v2616_v26 = vadd.f32 %v12168_v49, %v16259_v27 }
 0x491   : > { %12323 = vmatmul.mubr.msk.f32.gmra.mrb[148].mxu1 %vm1128_vm2, %v2591_v36  ;;  %v16310_v18 = vadd.f32 %v12242_v56, %v16213_v59  ;;  %v2620_v0 = vpop.f32.mrb[95].mxu0  ;;  %v2908_v2 = vpop.f32.mrb[137].mxu1  ;;  %v2606_v36 = vadd.f32 %v12165_v16, %v16259_v27 }
 0x492   : > { %13767 = vmatpush3.bf16.xpose.msk.msra.mxu1 %vm15110_vm3, %v13765_v28  ;;  %13779 = vmatpush3.bf16.xpose.msk.msra.mxu0 %vm15110_vm3, %v13777_v4  ;;  %v2909_v31 = vadd.f32 %v16213_v59, %v2908_v2  ;;  %v2854_v4 = vadd.f32 %v16251_v43, %v16213_v59  ;;  %v2611_v43 = vadd.f32 %v16259_v27, %v2610_v7 }
 0x493   : > { %12325 = vmatprep.mubr.msk.f32.mxu1 %vm14686_vm1, %v19540_v47  ;;  %12343 = vmatprep.subr.mxu1 %v19540_v47  ;;  %v2621_v2 = vadd.f32 %v16259_v27, %v2620_v0  ;;  %v2626_v0 = vadd.f32 %v16306_v5, %v16259_v27 }
 0x494   : > { %v13785_v60 = vpack.c.bf16 %v2909_v31, %v16301_v41  ;;  %v16325_v39 = vpop.f32.mrb[96].mxu0  ;;  %12378 = vmatprep.subr.mxu0 %v19540_v47  ;;  %v12245_v11 = vpop.f32.mrb[138].mxu1 }
 0x495   : > { %12326 = vmatmul.mubr.msk.f32.gmra.mrb[150].mxu1 %vm1128_vm2, %v2596_v21  ;;  %v16330_v28 = vpop.f32.mrb[97].mxu0  ;;  %v16333_v20 = vadd.f32 %v12245_v11, %v16213_v59  ;;  %v2918_v38 = vpop.f32.mrb[139].mxu1 }
 0x496   : > { %12328 = vmatprep.mubr.msk.f32.mxu1 %vm14686_vm1, %v19540_v47  ;;  %v2919_v17 = vadd.f32 %v16213_v59, %v2918_v38  ;;  %v2631_v5 = vadd.f32 %v16259_v27, %v16330_v28 }
 0x498   : > { %v12177_v15 = vpop.f32.mrb[98].mxu0  ;;  %v13789_v10 = vpack.c.bf16 %v2919_v17, %v16310_v18 }
 0x499   : > { %12329 = vmatmul.mubr.msk.f32.gmra.mrb[152].mxu1 %vm1128_vm2, %v2601_v9  ;;  %v2640_v53 = vpop.f32.mrb[99].mxu0  ;;  %v2646_v34 = vadd.f32 %v12177_v15, %v16259_v27 }
 0x49a   : > { %12344 = vmatpush3.xpose.msk.msra.mxu1 %vm1128_vm2, %v2854_v4  ;;  %12379 = vmatpush3.xpose.msk.msra.mxu0 %vm1128_vm2, %v2889_v63  ;;  %v2641_v19 = vadd.f32 %v16259_v27, %v2640_v53 }
 0x49b   : > { %12345 = vmatprep.mubr.msk.f32.mxu1 %vm14686_vm1, %v19540_v47  ;;  %13780 = vmatprep.subr.bf16.mxu1 %v19538_v46 }
 0x49c   : > { %v12180_v59 = vpop.f32.mrb[100].mxu0  ;;  %13792 = vmatprep.subr.bf16.mxu0 %v19538_v46 }
 0x49d   : > { %12346 = vmatmul.mubr.msk.f32.vlgmr.msra.gmra.mrb[154].mxu1 %vm1128_vm2, %v2606_v36  ;;  %12381 = vmatmul.mubr.msk.f32.vlgmr.msra.gmra.mrb[140].mxu0 %vm1128_vm2, %v2641_v19  ;;  %v2650_v41 = vpop.f32.mrb[101].mxu0  ;;  %v2656_v56 = vadd.f32 %v12180_v59, %v16259_v27  ;;  %v2636_v19 = vadd.f32 %v16325_v39, %v16259_v27  ;;  %v16451_v39 = vld [vmem:[%s19533_s6 + $0x1] ss:$0 sm:$0xff] }
 0x49e   : > { %13783 = vmatpush3.bf16.xpose.msk.msra.mxu1 %vm15110_vm3, %v13781_v13  ;;  %12348 = vmatprep.mubr.msk.f32.mxu1 %vm14686_vm1, %v19540_v47  ;;  %v2651_v61 = vadd.f32 %v16259_v27, %v2650_v41 }
 0x49f   : > { %12383 = vmatprep.mubr.msk.f32.mxu0 %vm14686_vm1, %v19540_v47  ;;  %13784 = vmatprep.subr.bf16.mxu1 %v19538_v46 }
 0x4a0   : > { %v12183_v16 = vpop.f32.mrb[102].mxu0 }
 0x4a1   : > { %12349 = vmatmul.mubr.msk.f32.gmra.mrb[156].mxu1 %vm1128_vm2, %v2611_v43  ;;  %12384 = vmatmul.mubr.msk.f32.gmra.mrb[142].mxu0 %vm1128_vm2, %v2646_v34  ;;  %v2660_v7 = vpop.f32.mrb[103].mxu0  ;;  %v2666_v9 = vadd.f32 %v12183_v16, %v16259_v27 }
 0x4a2   : > { %12351 = vmatprep.mubr.msk.f32.mxu1 %vm14686_vm1, %v19540_v47  ;;  %12386 = vmatprep.mubr.msk.f32.mxu0 %vm14686_vm1, %v19540_v47  ;;  %v2661_v31 = vadd.f32 %v16259_v27, %v2660_v7 }
 0x4a4   : > { %v12186_v13 = vpop.f32.mrb[104].mxu0 }
 0x4a5   : > { %12352 = vmatmul.mubr.msk.f32.gmra.mrb[158].mxu1 %vm1128_vm2, %v2616_v26  ;;  %12387 = vmatmul.mubr.msk.f32.gmra.mrb[144].mxu0 %vm1128_vm2, %v2651_v61  ;;  %v2670_v18 = vpop.f32.mrb[105].mxu0  ;;  %v2676_v36 = vadd.f32 %v12186_v13, %v16259_v27 }
 0x4a6   : > { %13787 = vmatpush3.bf16.xpose.msk.msra.mxu1 %vm15110_vm3, %v13785_v60  ;;  %12354 = vmatprep.mubr.msk.f32.mxu1 %vm14686_vm1, %v19540_v47  ;;  %v2671_v15 = vadd.f32 %v16259_v27, %v2670_v18 }
 0x4a7   : > { %12389 = vmatprep.mubr.msk.f32.mxu0 %vm14686_vm1, %v19540_v47  ;;  %13788 = vmatprep.subr.bf16.mxu1 %v19538_v46 }
 0x4a8   : > { %v12189_v49 = vpop.f32.mrb[106].mxu0 }
 0x4a9   : > { %12355 = vmatmul.mubr.msk.f32.gmra.mrb[160].mxu1 %vm1128_vm2, %v2621_v2  ;;  %12390 = vmatmul.mubr.msk.f32.gmra.mrb[146].mxu0 %vm1128_vm2, %v2656_v56  ;;  %v2686_v21 = vadd.f32 %v12189_v49, %v16259_v27  ;;  %v2680_v60 = vpop.f32.mrb[107].mxu0 }
 0x4aa   : > { %12357 = vmatprep.mubr.msk.f32.mxu1 %vm14686_vm1, %v19540_v47  ;;  %12392 = vmatprep.mubr.msk.f32.mxu0 %vm14686_vm1, %v19540_v47  ;;  %v2681_v59 = vadd.f32 %v16259_v27, %v2680_v60 }
 0x4ac   : > { %v12192_v11 = vpop.f32.mrb[108].mxu0 }
 0x4ad   : > { %12358 = vmatmul.mubr.msk.f32.gmra.mrb[162].mxu1 %vm1128_vm2, %v2626_v0  ;;  %12393 = vmatmul.mubr.msk.f32.gmra.mrb[148].mxu0 %vm1128_vm2, %v2661_v31  ;;  %v2696_v38 = vadd.f32 %v12192_v11, %v16259_v27  ;;  %v2690_v17 = vpop.f32.mrb[109].mxu0 }
 0x4ae   : > { %13791 = vmatpush3.bf16.xpose.msk.msra.mxu1 %vm15110_vm3, %v13789_v10  ;;  %12360 = vmatprep.mubr.msk.f32.mxu1 %vm14686_vm1, %v19540_v47  ;;  %v2691_v4 = vadd.f32 %v16259_v27, %v2690_v17 }
 0x4af   : > { %12395 = vmatprep.mubr.msk.f32.mxu0 %vm14686_vm1, %v19540_v47  ;;  %12413 = vmatprep.subr.mxu1 %v19540_v47 }
 0x4b0   : > { %v12195_v63 = vpop.f32.mrb[110].mxu0 }
 0x4b1   : > { %12361 = vmatmul.mubr.msk.f32.gmra.mrb[164].mxu1 %vm1128_vm2, %v2631_v5  ;;  %12396 = vmatmul.mubr.msk.f32.gmra.mrb[150].mxu0 %vm1128_vm2, %v2666_v9  ;;  %v2706_v10 = vadd.f32 %v12195_v63, %v16259_v27  ;;  %v2700_v53 = vpop.f32.mrb[111].mxu0 }
 0x4b2   : > { %12363 = vmatprep.mubr.msk.f32.mxu1 %vm14686_vm1, %v19540_v47  ;;  %12398 = vmatprep.mubr.msk.f32.mxu0 %vm14686_vm1, %v19540_v47  ;;  %v2701_v28 = vadd.f32 %v16259_v27, %v2700_v53 }
 0x4b4   : > { %v12256_v27 = vpop.f32.mrb[112].mxu0 }
 0x4b5   : > { %12364 = vmatmul.mubr.msk.f32.gmra.mrb[166].mxu1 %vm1128_vm2, %v2636_v19  ;;  %12399 = vmatmul.mubr.msk.f32.gmra.mrb[152].mxu0 %vm1128_vm2, %v2671_v15  ;;  %v3006_v43 = vpop.f32.mrb[113].mxu0 }
 0x4b6   : > { %12414 = vmatpush3.xpose.msk.msra.mxu1 %vm1128_vm2, %v16333_v20  ;;  %12415 = vmatprep.mubr.msk.f32.mxu1 %vm14686_vm1, %v19540_v47  ;;  %v3012_v20 = vadd.f32 %v12256_v27, %v16451_v39  ;;  %v3007_v34 = vadd.f32 %v16451_v39, %v3006_v43 }
 0x4b7   : > { %13801 = vmatprep.subr.bf16.mxu1 %v19538_v46  ;;  %12450 = vmatprep.mubr.msk.f32.mxu0 %vm14686_vm1, %v19540_v47 }
 0x4b8   : > { %v13793_v41 = vpack.c.bf16 %v3012_v20, %v3007_v34  ;;  %v12259_v16 = vpop.f32.mrb[114].mxu0 }
 0x4b9   : > { %12416 = vmatmul.mubr.msk.f32.vlgmr.msra.gmra.mrb[168].mxu1 %vm1128_vm2, %v2676_v36  ;;  %v3022_v61 = vadd.f32 %v12259_v16, %v16451_v39  ;;  %v3016_v7 = vpop.f32.mrb[115].mxu0 }
 0x4ba   : > { %12418 = vmatprep.mubr.msk.f32.mxu1 %vm14686_vm1, %v19540_v47  ;;  %v3017_v26 = vadd.f32 %v16451_v39, %v3016_v7  ;;  %13794 = vmatpush3.bf16.msra.mxu0 %v13793_v41 }
 0x4bb   : > { %13795 = vmatprep.subr.bf16.mxu0 %v19538_v46 }
 0x4bc   : > { %v13796_v13 = vpack.c.bf16 %v3022_v61, %v3017_v26  ;;  %v12262_v56 = vpop.f32.mrb[116].mxu0 }
 0x4bd   : > { %12419 = vmatmul.mubr.msk.f32.gmra.mrb[170].mxu1 %vm1128_vm2, %v2681_v59  ;;  %v3032_v18 = vadd.f32 %v12262_v56, %v16451_v39  ;;  %v3026_v2 = vpop.f32.mrb[117].mxu0 }
 0x4be   : > { %12421 = vmatprep.mubr.msk.f32.mxu1 %vm14686_vm1, %v19540_v47  ;;  %v3027_v49 = vadd.f32 %v16451_v39, %v3026_v2  ;;  %13797 = vmatpush3.bf16.msra.mxu0 %v13796_v13 }
 0x4bf   : > { %13798 = vmatprep.subr.bf16.mxu0 %v19538_v46 }
 0x4c0   : > { %v12265_v31 = vpop.f32.mrb[118].mxu0 }
 0x4c1   : > { %12422 = vmatmul.mubr.msk.f32.gmra.mrb[172].mxu1 %vm1128_vm2, %v2686_v21  ;;  %v13799_v21 = vpack.c.bf16 %v3032_v18, %v3027_v49  ;;  %v3036_v60 = vpop.f32.mrb[119].mxu0  ;;  %v3042_v0 = vadd.f32 %v12265_v31, %v16451_v39 }
 0x4c2   : > { %12424 = vmatprep.mubr.msk.f32.mxu1 %vm14686_vm1, %v19540_v47  ;;  %v3037_v9 = vadd.f32 %v16451_v39, %v3036_v60 }
 0x4c3   : > { %13800 = vmatpush3.bf16.msra.mxu0 %v13799_v21 }
 0x4c4   : > { %v12268_v11 = vpop.f32.mrb[120].mxu0  ;;  %12448 = vmatprep.subr.mxu0 %v19540_v47 }
 0x4c5   : > { %12425 = vmatmul.mubr.msk.f32.gmra.mrb[174].mxu1 %vm1128_vm2, %v2691_v4  ;;  %v3052_v4 = vadd.f32 %v12268_v11, %v16451_v39 }
 0x4c6   : > { %12427 = vmatprep.mubr.msk.f32.mxu1 %vm14686_vm1, %v19540_v47 }
 0x4c7   : > { %12449 = vmatpush3.msra.mxu0 %v3037_v9 }
 0x4c8   : > { %13810 = vmatprep.subr.bf16.mxu0 %v19538_v46 }
 0x4c9   : > { %12428 = vmatmul.mubr.msk.f32.gmra.mrb[176].mxu1 %vm1128_vm2, %v2696_v38  ;;  %v3046_v38 = vpop.f32.mrb[121].mxu0 }
 0x4ca   : > { %12430 = vmatprep.mubr.msk.f32.mxu1 %vm14686_vm1, %v19540_v47  ;;  %v3047_v17 = vadd.f32 %v16451_v39, %v3046_v38  ;;  %v12271_v5 = vpop.f32.mrb[122].mxu0 }
 0x4cb   : > { %v3056_v15 = vpop.f32.mrb[123].mxu0  ;;  %v3062_v53 = vadd.f32 %v12271_v5, %v16451_v39 }
 0x4cc   : > { %v13802_v63 = vpack.c.bf16 %v3047_v17, %v3042_v0  ;;  %v12274_v19 = vpop.f32.mrb[124].mxu0 }
 0x4cd   : > { %12431 = vmatmul.mubr.msk.f32.gmra.mrb[178].mxu1 %vm1128_vm2, %v2701_v28  ;;  %v3066_v36 = vpop.f32.mrb[125].mxu0  ;;  %v3072_v61 = vadd.f32 %v12274_v19, %v16451_v39 }
 0x4ce   : > { %12433 = vmatprep.mubr.msk.f32.mxu1 %vm14686_vm1, %v19540_v47  ;;  %13803 = vmatpush3.bf16.msra.mxu1 %v13802_v63  ;;  %v3067_v59 = vadd.f32 %v16451_v39, %v3066_v36 }
 0x4cf   : > { %13804 = vmatprep.subr.bf16.mxu1 %v19538_v46 }
 0x4d0   : > { %v13808_v27 = vpack.c.bf16 %v3067_v59, %v3062_v53  ;;  %v12277_v20 = vpop.f32.mrb[126].mxu0 }
 0x4d1   : > { %12434 = vmatmul.mubr.msk.f32.gmra.mrb[180].mxu1 %vm1128_vm2, %v2706_v10  ;;  %v3057_v10 = vadd.f32 %v16451_v39, %v3056_v15  ;;  %v16473_v43 = vadd.f32 %v12277_v20, %v16451_v39  ;;  %v3076_v34 = vpop.f32.mrb[127].mxu0  ;;  %v16551_v20 = vld [vmem:[%s19536_s9 + $0x40] sm:$0xff] }
 0x4d2   : > { %12485 = vmatprep.mubr.msk.f32.mxu1 %vm14686_vm1, %v19540_v47  ;;  %v16476_v41 = vadd.f32 %v16451_v39, %v3076_v34 }
 0x4d3   : > { %v13805_v28 = vpack.c.bf16 %v3057_v10, %v3052_v4 }
 0x4d4   : > { %v12280_v16 = vpop.f32.mrb[128].mxu0 }
 0x4d5   : > { %13806 = vmatpush3.bf16.msra.mxu1 %v13805_v28  ;;  %v16480_v7 = vadd.f32 %v12280_v16, %v16451_v39  ;;  %v3086_v26 = vpop.f32.mrb[129].mxu0  ;;  %v16536_v16 = vld [vmem:[%s19536_s9 + $0x38] sm:$0xff] }
 0x4d6   : > { %13807 = vmatprep.subr.bf16.mxu1 %v19538_v46  ;;  %v16485_v56 = vadd.f32 %v16451_v39, %v3086_v26 }
 0x4d8   : > { %v12283_v18 = vpop.f32.mrb[130].mxu0 }
 0x4d9   : > { %13809 = vmatpush3.bf16.msra.mxu1 %v13808_v27  ;;  %v16489_v2 = vadd.f32 %v12283_v18, %v16451_v39  ;;  %v3096_v49 = vpop.f32.mrb[131].mxu0 }
 0x4da   : > { %12483 = vmatprep.subr.mxu1 %v19540_v47  ;;  %v16494_v21 = vadd.f32 %v16451_v39, %v3096_v49 }
 0x4dc   : > { %v12286_v60 = vpop.f32.mrb[132].mxu0 }
 0x4dd   : > { %v16497_v0 = vadd.f32 %v12286_v60, %v16451_v39  ;;  %v3106_v11 = vpop.f32.mrb[133].mxu0  ;;  %12484 = vmatpush3.msra.mxu1 %v3072_v61 }
 0x4de   : > { %v16502_v38 = vadd.f32 %v16451_v39, %v3106_v11  ;;  %13819 = vmatprep.subr.bf16.mxu1 %v19538_v46 }
 0x4e0   : > { %v12289_v17 = vpop.f32.mrb[134].mxu0 }
 0x4e1   : > { %v16506_v4 = vadd.f32 %v12289_v17, %v16451_v39  ;;  %v3116_v5 = vpop.f32.mrb[135].mxu0 }
 0x4e2   : > { %v16509_v63 = vadd.f32 %v16451_v39, %v3116_v5 }
 0x4e4   : > { %v12292_v15 = vpop.f32.mrb[136].mxu0 }
 0x4e5   : > { %v16512_v10 = vadd.f32 %v12292_v15, %v16451_v39  ;;  %v3126_v53 = vpop.f32.mrb[137].mxu0 }
 0x4e6   : > { %v16517_v19 = vadd.f32 %v16451_v39, %v3126_v53 }
 0x4e8   : > { %v12295_v36 = vpop.f32.mrb[138].mxu0 }
 0x4e9   : > { %v16520_v59 = vadd.f32 %v12295_v36, %v16451_v39  ;;  %v3136_v27 = vpop.f32.mrb[139].mxu0 }
 0x4ea   : > { %v16525_v34 = vadd.f32 %v16451_v39, %v3136_v27 }
 0x554   : > { %v3261_v61 = vpop.f32.mrb[140].mxu1 }
 0x555   : > { %v12312_v26 = vpop.f32.mrb[141].mxu1 }
 0x558   : > { %v3266_v18 = vpop.f32.mrb[142].mxu1 }
 0x559   : > { %v12315_v49 = vpop.f32.mrb[143].mxu1 }
 0x55c   : > { %v3271_v60 = vpop.f32.mrb[144].mxu1 }
 0x55d   : > { %v12318_v11 = vpop.f32.mrb[145].mxu1 }
 0x560   : > { %v3276_v17 = vpop.f32.mrb[146].mxu1 }
 0x561   : > { %v12321_v5 = vpop.f32.mrb[147].mxu1 }
 0x564   : > { %v3281_v15 = vpop.f32.mrb[148].mxu1 }
 0x565   : > { %v12324_v53 = vpop.f32.mrb[149].mxu1 }
 0x568   : > { %v16529_v36 = vpop.f32.mrb[150].mxu1 }
 0x569   : > { %v12327_v9 = vpop.f32.mrb[151].mxu1 }
 0x56a   : > { %v16546_v9 = vadd.f32 %v16536_v16, %v3261_v61 }
 0x56c   : > { %v16531_v31 = vpop.f32.mrb[152].mxu1  ;;  %v3721_v46 = vsel %vm1697_vm4, %v16546_v9, -inf }
 0x56d   : > { %v12330_v39 = vpop.f32.mrb[153].mxu1 }
 0x570   : > { %v3403_v27 = vpop.f32.mrb[154].mxu1  ;;  %v16538_v26 = vpop.f32.mrb[140].mxu0 }
 0x571   : > { %v12347_v49 = vpop.f32.mrb[155].mxu1  ;;  %v16541_v11 = vadd.f32 %v16536_v16, %v3403_v27  ;;  %v12382_v5 = vpop.f32.mrb[141].mxu0 }
 0x573   : > { %v3742_v53 = vsel %vm1697_vm4, %v16541_v11, -inf }
 0x574   : > { %3743 = vmax.xlane.f32.xlu0 %v3742_v53  ;;  %v3408_v39 = vpop.f32.mrb[156].mxu1  ;;  %v16553_v13 = vpop.f32.mrb[142].mxu0  ;;  %v16563_v53 = vadd.f32 %v16551_v20, %v3266_v18 }
 0x575   : > { %v12350_v49 = vpop.f32.mrb[157].mxu1  ;;  %v16556_v27 = vadd.f32 %v16551_v20, %v3408_v39  ;;  %v12385_v5 = vpop.f32.mrb[143].mxu0 }
 0x576   : > { %v16568_v49 = vld [vmem:[%s19536_s9 + $0x48] sm:$0xff]  ;;  %v3724_v48 = vsel %vm1697_vm4, %v16563_v53, -inf }
 0x577   : > { %v3745_v61 = vsel %vm1697_vm4, %v16556_v27, -inf  ;;  %v16580_v18 = vadd.f32 %v16568_v49, %v3271_v60 }
 0x578   : > { %3722 = vmax.xlane.f32.xlu0 %v3721_v46  ;;  %3746 = vmax.xlane.f32.xlu1 %v3745_v61  ;;  %v3413_v47 = vpop.f32.mrb[158].mxu1  ;;  %v16570_v39 = vpop.f32.mrb[144].mxu0 }
 0x579   : > { %v12353_v5 = vpop.f32.mrb[159].mxu1  ;;  %v16573_v28 = vadd.f32 %v16568_v49, %v3413_v47  ;;  %v12388_v29 = vpop.f32.mrb[145].mxu0  ;;  %v3727_v23 = vsel %vm1697_vm4, %v16580_v18, -inf }
 0x57a   : > { %v16585_v5 = vld [vmem:[%s19536_s9 + $0x50] sm:$0xff] }
 0x57b   : > { %v3748_v46 = vsel %vm1697_vm4, %v16573_v28, -inf  ;;  %v16597_v60 = vadd.f32 %v16585_v5, %v3276_v17 }
 0x57c   : > { %3725 = vmax.xlane.f32.xlu0 %v3724_v48  ;;  %3749 = vmax.xlane.f32.xlu1 %v3748_v46  ;;  %v3418_v61 = vpop.f32.mrb[160].mxu1  ;;  %v16587_v47 = vpop.f32.mrb[146].mxu0 }
 0x57d   : > { %v12356_v29 = vpop.f32.mrb[161].mxu1  ;;  %v16590_v55 = vadd.f32 %v16585_v5, %v3418_v61  ;;  %v12391_v37 = vpop.f32.mrb[147].mxu0  ;;  %v3730_v1 = vsel %vm1697_vm4, %v16597_v60, -inf }
 0x57e   : > { %v16602_v29 = vld [vmem:[%s19536_s9 + $0x58] sm:$0xff] }
 0x57f   : > { %v3751_v48 = vsel %vm1697_vm4, %v16590_v55, -inf  ;;  %v16614_v17 = vadd.f32 %v16602_v29, %v3281_v15 }
 0x580   : > { %3728 = vmax.xlane.f32.xlu0 %v3727_v23  ;;  %3752 = vmax.xlane.f32.xlu1 %v3751_v48  ;;  %v3423_v46 = vpop.f32.mrb[162].mxu1  ;;  %v16604_v61 = vpop.f32.mrb[148].mxu0 }
 0x581   : > { %v12359_v37 = vpop.f32.mrb[163].mxu1  ;;  %v16607_v51 = vadd.f32 %v16602_v29, %v3423_v46  ;;  %v12394_v24 = vpop.f32.mrb[149].mxu0  ;;  %v3733_v8 = vsel %vm1697_vm4, %v16614_v17, -inf }
 0x582   : > { %v16619_v37 = vld [vmem:[%s19536_s9 + $0x60] sm:$0xff] }
 0x583   : > { %v3754_v23 = vsel %vm1697_vm4, %v16607_v51, -inf  ;;  %v16632_v15 = vadd.f32 %v16619_v37, %v16529_v36 }
 0x584   : > { %3731 = vmax.xlane.f32.xlu0 %v3730_v1  ;;  %3755 = vmax.xlane.f32.xlu1 %v3754_v23  ;;  %v3428_v48 = vpop.f32.mrb[164].mxu1  ;;  %v16621_v46 = vpop.f32.mrb[150].mxu0 }
 0x585   : > { %v12362_v24 = vpop.f32.mrb[165].mxu1  ;;  %v12397_v22 = vpop.f32.mrb[151].mxu0  ;;  %v16624_v12 = vadd.f32 %v16619_v37, %v3428_v48  ;;  %v3736_v44 = vsel %vm1697_vm4, %v16632_v15, -inf }
 0x586   : > { %v10179_v22 = vld [vmem:[%s19536_s9 + $0x68] sm:$0xff] }
 0x587   : > { %v3757_v1 = vsel %vm1697_vm4, %v16624_v12, -inf  ;;  %v16644_v36 = vadd.f32 %v10179_v22, %v16531_v31 }
 0x588   : > { %3734 = vmax.xlane.f32.xlu0 %v3733_v8  ;;  %3758 = vmax.xlane.f32.xlu1 %v3757_v1  ;;  %v3433_v23 = vpop.f32.mrb[166].mxu1  ;;  %v3575_v24 = vpop.f32.mrb[152].mxu0 }
 0x589   : > { %v12365_v48 = vpop.f32.mrb[167].mxu1  ;;  %v12400_v32 = vpop.f32.mrb[153].mxu0  ;;  %v16637_v42 = vadd.f32 %v10179_v22, %v3433_v23  ;;  %v3739_v23 = vsel %vm1697_vm4, %v16644_v36, -inf }
 0x58a   : > { %v16651_v32 = vadd.f32 %v16536_v16, %v16538_v26 }
 0x58b   : > { %v3760_v25 = vsel %vm1697_vm4, %v16637_v42, -inf }
 0x58c   : > { %3737 = vmax.xlane.f32.xlu0 %v3736_v44  ;;  %3761 = vmax.xlane.f32.xlu1 %v3760_v25  ;;  %v3687_v8 = vpop.f32.mrb[168].mxu1 }
 0x58d   : > { %v12417_v1 = vpop.f32.mrb[169].mxu1  ;;  %v16647_v54 = vadd.f32 %v16536_v16, %v3687_v8  ;;  %v16662_v8 = vadd.f32 %v16551_v20, %v16553_v13  ;;  %v3763_v16 = vsel %vm1697_vm4, %v16651_v32, -inf }
 0x58f   : > { %v3784_v48 = vsel %vm1697_vm4, %v16647_v54, -inf  ;;  %v3766_v13 = vsel %vm1697_vm4, %v16662_v8, -inf }
 0x590   : > { %3740 = vmax.xlane.f32.xlu0 %v3739_v23  ;;  %3785 = vmax.xlane.f32.xlu1 %v3784_v48  ;;  %v3692_v31 = vpop.f32.mrb[170].mxu1 }
 0x591   : > { %v12420_v44 = vpop.f32.mrb[171].mxu1  ;;  %v16658_v25 = vadd.f32 %v16551_v20, %v3692_v31  ;;  %v16673_v31 = vadd.f32 %v16568_v49, %v16570_v39 }
 0x593   : > { %v3787_v26 = vsel %vm1697_vm4, %v16658_v25, -inf }
 0x594   : > { %3764 = vmax.xlane.f32.xlu0 %v3763_v16  ;;  %3788 = vmax.xlane.f32.xlu1 %v3787_v26  ;;  %v3697_v1 = vpop.f32.mrb[172].mxu1 }
 0x595   : > { %v12423_v23 = vpop.f32.mrb[173].mxu1  ;;  %v16669_v48 = vadd.f32 %v16568_v49, %v3697_v1  ;;  %v16684_v1 = vadd.f32 %v16585_v5, %v16587_v47  ;;  %v3769_v49 = vsel %vm1697_vm4, %v16673_v31, -inf }
 0x597   : > { %v3790_v20 = vsel %vm1697_vm4, %v16669_v48, -inf }
 0x598   : > { %3767 = vmax.xlane.f32.xlu0 %v3766_v13  ;;  %3791 = vmax.xlane.f32.xlu1 %v3790_v20  ;;  %v3702_v44 = vpop.f32.mrb[174].mxu1 }
 0x599   : > { %v12426_v16 = vpop.f32.mrb[175].mxu1  ;;  %v16680_v26 = vadd.f32 %v16585_v5, %v3702_v44  ;;  %v16695_v44 = vadd.f32 %v16602_v29, %v16604_v61  ;;  %v3772_v5 = vsel %vm1697_vm4, %v16684_v1, -inf }
 0x59b   : > { %v3793_v39 = vsel %vm1697_vm4, %v16680_v26, -inf }
 0x59c   : > { %3770 = vmax.xlane.f32.xlu0 %v3769_v49  ;;  %3794 = vmax.xlane.f32.xlu1 %v3793_v39  ;;  %v3707_v23 = vpop.f32.mrb[176].mxu1 }
 0x59d   : > { %v12429_v13 = vpop.f32.mrb[177].mxu1  ;;  %v16691_v20 = vadd.f32 %v16602_v29, %v3707_v23  ;;  %v16706_v23 = vadd.f32 %v16619_v37, %v16621_v46  ;;  %v3775_v29 = vsel %vm1697_vm4, %v16695_v44, -inf }
 0x59f   : > { %v3796_v47 = vsel %vm1697_vm4, %v16691_v20, -inf }
 0x5a0   : > { %3773 = vmax.xlane.f32.xlu0 %v3772_v5  ;;  %3797 = vmax.xlane.f32.xlu1 %v3796_v47  ;;  %v3712_v16 = vpop.f32.mrb[178].mxu1 }
 0x5a1   : > { %v12432_v49 = vpop.f32.mrb[179].mxu1  ;;  %v16702_v39 = vadd.f32 %v16619_v37, %v3712_v16  ;;  %v3778_v16 = vsel %vm1697_vm4, %v16706_v23, -inf }
 0x5a2   : > { %v16714_v49 = vadd.f32 %v10179_v22, %v3575_v24 }
 0x5a3   : > { %v3799_v61 = vsel %vm1697_vm4, %v16702_v39, -inf }
 0x5a4   : > { %3776 = vmax.xlane.f32.xlu0 %v3775_v29  ;;  %3800 = vmax.xlane.f32.xlu1 %v3799_v61  ;;  %v3717_v13 = vpop.f32.mrb[180].mxu1  ;;  %v3781_v46 = vsel %vm1697_vm4, %v16714_v49, -inf }
 0x5a5   : > { %v12435_v5 = vpop.f32.mrb[181].mxu1  ;;  %v16712_v47 = vadd.f32 %v10179_v22, %v3717_v13 }
 0x5a7   : > { %v3802_v37 = vsel %vm1697_vm4, %v16712_v47, -inf }
 0x5a8   : > { %3779 = vmax.xlane.f32.xlu0 %v3778_v16  ;;  %3803 = vmax.xlane.f32.xlu1 %v3802_v37 }
 0x5ac   : > { %3782 = vmax.xlane.f32.xlu1 %v3781_v46 }
 0x601   : > { %v3744_v29 = vpop.xlane.xlu0 %3743 }
 0x602   : > { %v3812_v61 = vsub.f32 %v16541_v11, %v3744_v29 }
 0x604   : > { %v3847_v5 = vmul.f32 1.442695, %v3812_v61 }
 0x605   : > { %v3723_v13 = vpop.xlane.xlu0 %3722  ;;  %v3747_v50 = vpop.xlane.xlu1 %3746 }
 0x606   : > { %14256 = vpow2.f32 %v3847_v5  ;;  %v3805_v22 = vsub.f32 %v16546_v9, %v3723_v13  ;;  %v3813_v24 = vsub.f32 %v16556_v27, %v3747_v50 }
 0x608   : > { %v3833_v35 = vmul.f32 1.442695, %v3805_v22  ;;  %v3849_v6 = vmul.f32 1.442695, %v3813_v24 }
 0x609   : > { %v3726_v3 = vpop.xlane.xlu0 %3725  ;;  %v3750_v16 = vpop.xlane.xlu1 %3749 }
 0x60a   : > { %14258 = vpow2.f32 %v3833_v35  ;;  %v3806_v37 = vsub.f32 %v16563_v53, %v3726_v3  ;;  %v3814_v46 = vsub.f32 %v16573_v28, %v3750_v16 }
 0x60b   : > { %14260 = vpow2.f32 %v3849_v6 }
 0x60c   : > { %v3835_v14 = vmul.f32 1.442695, %v3806_v37  ;;  %v3851_v11 = vmul.f32 1.442695, %v3814_v46 }
 0x60d   : > { %v3729_v29 = vpop.xlane.xlu0 %3728  ;;  %v3753_v61 = vpop.xlane.xlu1 %3752 }
 0x60e   : > { %14262 = vpow2.f32 %v3835_v14  ;;  %v3807_v5 = vsub.f32 %v16580_v18, %v3729_v29  ;;  %v3815_v9 = vsub.f32 %v16590_v55, %v3753_v61 }
 0x60f   : > { %14264 = vpow2.f32 %v3851_v11 }
 0x610   : > { %v16729_v50 = vpop.eup %14256  ;;  %v3837_v27 = vmul.f32 1.442695, %v3807_v5  ;;  %v3853_v13 = vmul.f32 1.442695, %v3815_v9 }
 0x611   : > { %v3732_v35 = vpop.xlane.xlu0 %3731  ;;  %v3756_v22 = vpop.xlane.xlu1 %3755  ;;  %v3910_v3 = vsel %vm1697_vm4, %v16729_v50, 0.0 }
 0x612   : > { %14266 = vpow2.f32 %v3837_v27  ;;  %v3808_v6 = vsub.f32 %v16597_v60, %v3732_v35  ;;  %v3816_v28 = vsub.f32 %v16607_v51, %v3756_v22  ;;  %3911 = vadd.xlane.f32.xlu0 %v3910_v3 }
 0x613   : > { %14268 = vpow2.f32 %v3853_v13 }
 0x614   : > { %v16735_v14 = vpop.eup %14258  ;;  %v3839_v55 = vmul.f32 1.442695, %v3808_v6  ;;  %v3855_v53 = vmul.f32 1.442695, %v3816_v28 }
 0x615   : > { %v16737_v18 = vpop.eup %14260  ;;  %v3735_v24 = vpop.xlane.xlu0 %3734  ;;  %v3889_v37 = vsel %vm1697_vm4, %v16735_v14, 0.0 }
 0x616   : > { %v3759_v16 = vpop.xlane.xlu1 %3758  ;;  %14270 = vpow2.f32 %v3839_v55  ;;  %v3809_v46 = vsub.f32 %v16614_v17, %v3735_v24  ;;  %3890 = vadd.xlane.f32.xlu0 %v3889_v37  ;;  %v3913_v51 = vsel %vm1697_vm4, %v16737_v18, 0.0 }
 0x617   : > { %v3817_v60 = vsub.f32 %v16624_v12, %v3759_v16  ;;  %14272 = vpow2.f32 %v3855_v53  ;;  %3914 = vadd.xlane.f32.xlu1 %v3913_v51 }
 0x618   : > { %v16745_v11 = vpop.eup %14262  ;;  %v3841_v29 = vmul.f32 1.442695, %v3809_v46 }
 0x619   : > { %v3857_v61 = vmul.f32 1.442695, %v3817_v60  ;;  %v16747_v5 = vpop.eup %14264  ;;  %v3738_v9 = vpop.xlane.xlu0 %3737  ;;  %v3892_v13 = vsel %vm1697_vm4, %v16745_v11, 0.0 }
 0x61a   : > { %v3762_v27 = vpop.xlane.xlu1 %3761  ;;  %14274 = vpow2.f32 %v3841_v29  ;;  %v3810_v12 = vsub.f32 %v16632_v15, %v3738_v9  ;;  %3893 = vadd.xlane.f32.xlu0 %v3892_v13  ;;  %v3916_v35 = vsel %vm1697_vm4, %v16747_v5, 0.0 }
 0x61b   : > { %v3818_v17 = vsub.f32 %v16637_v42, %v3762_v27  ;;  %14276 = vpow2.f32 %v3857_v61  ;;  %3917 = vadd.xlane.f32.xlu1 %v3916_v35 }
 0x61c   : > { %v16755_v22 = vpop.eup %14266  ;;  %v3843_v3 = vmul.f32 1.442695, %v3810_v12 }
 0x61d   : > { %v3859_v6 = vmul.f32 1.442695, %v3818_v17  ;;  %v16757_v28 = vpop.eup %14268  ;;  %v3741_v55 = vpop.xlane.xlu0 %3740  ;;  %v3895_v24 = vsel %vm1697_vm4, %v16755_v22, 0.0 }
 0x61e   : > { %v3786_v53 = vpop.xlane.xlu1 %3785  ;;  %14278 = vpow2.f32 %v3843_v3  ;;  %v3811_v42 = vsub.f32 %v16644_v36, %v3741_v55  ;;  %3896 = vadd.xlane.f32.xlu0 %v3895_v24  ;;  %v3919_v16 = vsel %vm1697_vm4, %v16757_v28, 0.0 }
 0x61f   : > { %v3826_v15 = vsub.f32 %v16647_v54, %v3786_v53  ;;  %14280 = vpow2.f32 %v3859_v6  ;;  %3920 = vadd.xlane.f32.xlu1 %v3919_v16 }
 0x620   : > { %v16765_v37 = vpop.eup %14270  ;;  %v3845_v46 = vmul.f32 1.442695, %v3811_v42 }
 0x621   : > { %v3875_v60 = vmul.f32 1.442695, %v3826_v15  ;;  %v16767_v51 = vpop.eup %14272  ;;  %v3765_v29 = vpop.xlane.xlu0 %3764  ;;  %v3898_v9 = vsel %vm1697_vm4, %v16765_v37, 0.0 }
 0x622   : > { %v3789_v61 = vpop.xlane.xlu1 %3788  ;;  %14282 = vpow2.f32 %v3845_v46  ;;  %v3819_v54 = vsub.f32 %v16651_v32, %v3765_v29  ;;  %3899 = vadd.xlane.f32.xlu0 %v3898_v9  ;;  %v3922_v27 = vsel %vm1697_vm4, %v16767_v51, 0.0 }
 0x623   : > { %v3827_v36 = vsub.f32 %v16658_v25, %v3789_v61  ;;  %14284 = vpow2.f32 %v3875_v60  ;;  %3923 = vadd.xlane.f32.xlu1 %v3922_v27 }
 0x624   : > { %v16775_v13 = vpop.eup %14274  ;;  %v3861_v12 = vmul.f32 1.442695, %v3819_v54 }
 0x625   : > { %v3877_v17 = vmul.f32 1.442695, %v3827_v36  ;;  %v16777_v35 = vpop.eup %14276  ;;  %v3768_v3 = vpop.xlane.xlu0 %3767  ;;  %v3901_v55 = vsel %vm1697_vm4, %v16775_v13, 0.0 }
 0x626   : > { %v3792_v6 = vpop.xlane.xlu1 %3791  ;;  %14286 = vpow2.f32 %v3861_v12  ;;  %v3820_v32 = vsub.f32 %v16662_v8, %v3768_v3  ;;  %3902 = vadd.xlane.f32.xlu0 %v3901_v55  ;;  %v3925_v53 = vsel %vm1697_vm4, %v16777_v35, 0.0 }
 0x627   : > { %v3828_v25 = vsub.f32 %v16669_v48, %v3792_v6  ;;  %14288 = vpow2.f32 %v3877_v17  ;;  %3926 = vadd.xlane.f32.xlu1 %v3925_v53 }
 0x628   : > { %v16785_v24 = vpop.eup %14278  ;;  %v3863_v42 = vmul.f32 1.442695, %v3820_v32 }
 0x629   : > { %v3879_v15 = vmul.f32 1.442695, %v3828_v25  ;;  %v16787_v16 = vpop.eup %14280  ;;  %v3771_v46 = vpop.xlane.xlu0 %3770  ;;  %v3904_v29 = vsel %vm1697_vm4, %v16785_v24, 0.0 }
 0x62a   : > { %v3795_v60 = vpop.xlane.xlu1 %3794  ;;  %14290 = vpow2.f32 %v3863_v42  ;;  %v3821_v8 = vsub.f32 %v16673_v31, %v3771_v46  ;;  %3905 = vadd.xlane.f32.xlu0 %v3904_v29  ;;  %v3928_v61 = vsel %vm1697_vm4, %v16787_v16, 0.0 }
 0x62b   : > { %v3829_v48 = vsub.f32 %v16680_v26, %v3795_v60  ;;  %14292 = vpow2.f32 %v3879_v15  ;;  %3929 = vadd.xlane.f32.xlu1 %v3928_v61 }
 0x62c   : > { %v16795_v9 = vpop.eup %14282  ;;  %v3865_v54 = vmul.f32 1.442695, %v3821_v8 }
 0x62d   : > { %v3881_v36 = vmul.f32 1.442695, %v3829_v48  ;;  %v16797_v27 = vpop.eup %14284  ;;  %v3774_v12 = vpop.xlane.xlu0 %3773  ;;  %v3907_v3 = vsel %vm1697_vm4, %v16795_v9, 0.0 }
 0x62e   : > { %v3798_v17 = vpop.xlane.xlu1 %3797  ;;  %14294 = vpow2.f32 %v3865_v54  ;;  %v3822_v31 = vsub.f32 %v16684_v1, %v3774_v12  ;;  %3908 = vadd.xlane.f32.xlu0 %v3907_v3  ;;  %v3952_v6 = vsel %vm1697_vm4, %v16797_v27, 0.0 }
 0x62f   : > { %v3830_v26 = vsub.f32 %v16691_v20, %v3798_v17  ;;  %14296 = vpow2.f32 %v3881_v36  ;;  %3953 = vadd.xlane.f32.xlu1 %v3952_v6 }
 0x630   : > { %v16805_v55 = vpop.eup %14286  ;;  %v3867_v32 = vmul.f32 1.442695, %v3822_v31 }
 0x631   : > { %v3883_v25 = vmul.f32 1.442695, %v3830_v26  ;;  %v16807_v53 = vpop.eup %14288  ;;  %v3777_v42 = vpop.xlane.xlu0 %3776  ;;  %v3931_v46 = vsel %vm1697_vm4, %v16805_v55, 0.0 }
 0x632   : > { %v3801_v15 = vpop.xlane.xlu1 %3800  ;;  %14298 = vpow2.f32 %v3867_v32  ;;  %v3823_v1 = vsub.f32 %v16695_v44, %v3777_v42  ;;  %3932 = vadd.xlane.f32.xlu0 %v3931_v46  ;;  %v3955_v60 = vsel %vm1697_vm4, %v16807_v53, 0.0 }
 0x633   : > { %v3831_v20 = vsub.f32 %v16702_v39, %v3801_v15  ;;  %14300 = vpow2.f32 %v3883_v25  ;;  %3956 = vadd.xlane.f32.xlu1 %v3955_v60 }
 0x634   : > { %v16815_v29 = vpop.eup %14290  ;;  %v3869_v8 = vmul.f32 1.442695, %v3823_v1 }
 0x635   : > { %v3885_v48 = vmul.f32 1.442695, %v3831_v20  ;;  %v16817_v61 = vpop.eup %14292  ;;  %v3780_v54 = vpop.xlane.xlu0 %3779  ;;  %v3934_v12 = vsel %vm1697_vm4, %v16815_v29, 0.0 }
 0x636   : > { %v3804_v36 = vpop.xlane.xlu1 %3803  ;;  %14302 = vpow2.f32 %v3869_v8  ;;  %v3824_v44 = vsub.f32 %v16706_v23, %v3780_v54  ;;  %3935 = vadd.xlane.f32.xlu0 %v3934_v12  ;;  %v3958_v17 = vsel %vm1697_vm4, %v16817_v61, 0.0 }
 0x637   : > { %v3832_v39 = vsub.f32 %v16712_v47, %v3804_v36  ;;  %14304 = vpow2.f32 %v3885_v48  ;;  %3959 = vadd.xlane.f32.xlu1 %v3958_v17 }
 0x638   : > { %v16825_v3 = vpop.eup %14294  ;;  %v3871_v31 = vmul.f32 1.442695, %v3824_v44 }
 0x639   : > { %v3887_v26 = vmul.f32 1.442695, %v3832_v39  ;;  %v16827_v6 = vpop.eup %14296  ;;  %v3937_v25 = vsel %vm1697_vm4, %v16825_v3, 0.0 }
 0x63a   : > { %v3783_v32 = vpop.xlane.xlu1 %3782  ;;  %14306 = vpow2.f32 %v3871_v31  ;;  %3938 = vadd.xlane.f32.xlu0 %v3937_v25  ;;  %v3961_v47 = vsel %vm1697_vm4, %v16827_v6, 0.0 }
 0x63b   : > { %v3825_v23 = vsub.f32 %v16714_v49, %v3783_v32  ;;  %14308 = vpow2.f32 %v3887_v26  ;;  %3962 = vadd.xlane.f32.xlu1 %v3961_v47 }
 0x63c   : > { %v16834_v42 = vpop.eup %14298 }
 0x63d   : > { %v3873_v15 = vmul.f32 1.442695, %v3825_v23  ;;  %v16836_v46 = vpop.eup %14300  ;;  %v3940_v1 = vsel %vm1697_vm4, %v16834_v42, 0.0 }
 0x63e   : > { %3941 = vadd.xlane.f32.xlu0 %v3940_v1  ;;  %v3964_v20 = vsel %vm1697_vm4, %v16836_v46, 0.0 }
 0x63f   : > { %14310 = vpow2.f32 %v3873_v15  ;;  %3965 = vadd.xlane.f32.xlu1 %v3964_v20 }
 0x640   : > { %v16842_v49 = vpop.eup %14302 }
 0x641   : > { %v16844_v60 = vpop.eup %14304  ;;  %v3943_v8 = vsel %vm1697_vm4, %v16842_v49, 0.0 }
 0x642   : > { %3944 = vadd.xlane.f32.xlu0 %v3943_v8  ;;  %v3967_v48 = vsel %vm1697_vm4, %v16844_v60, 0.0 }
 0x643   : > { %3968 = vadd.xlane.f32.xlu1 %v3967_v48  ;;  %v19569_v48 = vpack.c.bf16 %v16509_v63, %v16497_v0  ;;  %v19572_v0 = vpack.c.bf16 %v16473_v43, %v16476_v41 }
 0x644   : > { %v16850_v54 = vpop.eup %14306 }
 0x645   : > { %v16852_v36 = vpop.eup %14308  ;;  %v3946_v12 = vsel %vm1697_vm4, %v16850_v54, 0.0 }
 0x646   : > { %3947 = vadd.xlane.f32.xlu0 %v3946_v12  ;;  %v3970_v44 = vsel %vm1697_vm4, %v16852_v36, 0.0  ;;  %v19570_v12 = vmov 0.0  }
 0x647   : > { %3971 = vadd.xlane.f32.xlu1 %v3970_v44 }
 0x649   : > { %v16858_v39 = vpop.eup %14310 }
 0x64a   : > { %v3949_v17 = vsel %vm1697_vm4, %v16858_v39, 0.0 }
 0x64b   : > { %3950 = vadd.xlane.f32.xlu1 %v3949_v17 }
 0x69f   : > { %v3912_v31 = vpop.xlane.xlu0 %3911 }
 0x6a0   : > { %14312 = vrcp.f32 %v3912_v31 }
 0x6a3   : > { %v3891_v26 = vpop.xlane.xlu0 %3890 }
 0x6a4   : > { %14314 = vrcp.f32 %v3891_v26  ;;  %v3915_v32 = vpop.xlane.xlu1 %3914  ;;  %v19571_v26 = vmov 0.0|0.0  }
 0x6a5   : > { %14316 = vrcp.f32 %v3915_v32 }
 0x6a7   : > { %v3894_v25 = vpop.xlane.xlu0 %3893 }
 0x6a8   : > { %14318 = vrcp.f32 %v3894_v25  ;;  %v3918_v23 = vpop.xlane.xlu1 %3917 }
 0x6a9   : > { %14320 = vrcp.f32 %v3918_v23 }
 0x6aa   : > { %v14313_v47 = vpop.eup %14312 }
 0x6ab   : > { %v4008_v15 = vmul.f32 %v14313_v47, %v16729_v50  ;;  %v3897_v1 = vpop.xlane.xlu0 %3896 }
 0x6ac   : > { %14322 = vrcp.f32 %v3897_v1  ;;  %v3921_v20 = vpop.xlane.xlu1 %3920 }
 0x6ad   : > { %14324 = vrcp.f32 %v3921_v20  ;;  %12486 = vmatmul.mubr.msk.f32.vlgmr.msra.gmra.mrb[182].mxu1 %vm1697_vm4, %v4008_v15  ;;  %v19575_v15 = vpack.c.bf16 %v16525_v34, %v16512_v10 }
 0x6ae   : > { %v14315_v8 = vpop.eup %14314  ;;  %13821 = vmatpush3.bf16.msra.mxu1 %v19569_v48  ;;  %12488 = vmatprep.mubr.msk.f32.mxu1 %vm14686_vm1, %v19570_v12 }
 0x6af   : > { %v14317_v44 = vpop.eup %14316  ;;  %v4001_v17 = vmul.f32 %v14315_v8, %v16735_v14  ;;  %v3900_v31 = vpop.xlane.xlu0 %3899  ;;  %13822 = vmatprep.subr.bf16.mxu1 %v19571_v26  ;;  %v19573_v14 = vpack.c.bf16 %v16517_v19, %v16506_v4  ;;  %v19574_v4 = vpack.c.bf16 %v16480_v7, %v16485_v56  ;;  %v10321_v19 = vld [vmem:[%s19528_s1 + $0x40] sm:$0xff] }
 0x6b0   : > { %14326 = vrcp.f32 %v3900_v31  ;;  %v3924_v50 = vpop.xlane.xlu1 %3923  ;;  %v4009_v32 = vmul.f32 %v14317_v44, %v16737_v18 }
 0x6b1   : > { %14328 = vrcp.f32 %v3924_v50  ;;  %12451 = vmatmul.mubr.msk.f32.vlgmr.msra.gmra.mrb[154].mxu0 %vm1697_vm4, %v4001_v17 }
 0x6b2   : > { %v14319_v25 = vpop.eup %14318  ;;  %12489 = vmatmul.mubr.msk.f32.gmra.mrb[184].mxu1 %vm1697_vm4, %v4009_v32  ;;  %13812 = vmatpush3.bf16.msra.mxu0 %v19572_v0  ;;  %v10323_v0 = vld [vmem:[%s19528_s1 + $0x50] sm:$0xff] }
 0x6b3   : > { %v14321_v63 = vpop.eup %14320  ;;  %13824 = vmatpush3.bf16.msra.mxu1 %v19573_v14  ;;  %v3903_v23 = vpop.xlane.xlu0 %3902  ;;  %12453 = vmatprep.mubr.msk.f32.mxu0 %vm14686_vm1, %v19570_v12  ;;  %v4002_v18 = vmul.f32 %v14319_v25, %v16745_v11  ;;  %v10322_v11 = vld [vmem:[%s19528_s1 + $0x48] sm:$0xff] }
 0x6b4   : > { %14330 = vrcp.f32 %v3903_v23  ;;  %v3927_v47 = vpop.xlane.xlu1 %3926  ;;  %12491 = vmatprep.mubr.msk.f32.mxu1 %vm14686_vm1, %v19570_v12  ;;  %13813 = vmatprep.subr.bf16.mxu0 %v19571_v26  ;;  %v4010_v43 = vmul.f32 %v14321_v63, %v16747_v5  ;;  %v16911_v10 = vpack.c.bf16 %v10322_v11, %v10321_v19  ;;  %v10324_v63 = vld [vmem:[%s19528_s1 + $0x58] sm:$0xff] }
 0x6b5   : > { %14332 = vrcp.f32 %v3927_v47  ;;  %13825 = vmatprep.subr.bf16.mxu1 %v19571_v26  ;;  %12454 = vmatmul.mubr.msk.f32.gmra.mrb[156].mxu0 %vm1697_vm4, %v4002_v18 }
 0x6b6   : > { %v14323_v41 = vpop.eup %14322  ;;  %12492 = vmatmul.mubr.msk.f32.gmra.mrb[186].mxu1 %vm1697_vm4, %v4010_v43  ;;  %13815 = vmatpush3.bf16.msra.mxu0 %v19574_v4  ;;  %v13832_v43 = vpack.c.bf16 %v10324_v63, %v10323_v0  ;;  %v10356_v4 = vld [vmem:[%s19529_s2 + $0x48] sm:$0xff]  ;;  %v17060_v0 = vld [vmem:[%s14777_s30 + $0x30] sm:$0xff]  ;;  %v17065_v63 = vld [vmem:[%s14777_s30 + $0x38] sm:$0xff] }
 0x6b7   : > { %v14325_v5 = vpop.eup %14324  ;;  %13827 = vmatpush3.bf16.msra.mxu1 %v19575_v15  ;;  %v3906_v1 = vpop.xlane.xlu0 %3905  ;;  %12456 = vmatprep.mubr.msk.f32.mxu0 %vm14686_vm1, %v19570_v12  ;;  %v4003_v7 = vmul.f32 %v14323_v41, %v16755_v22  ;;  %v19576_v22 = vpack.c.bf16 %v16489_v2, %v16494_v21  ;;  %v10355_v41 = vld [vmem:[%s19529_s2 + $0x40] sm:$0xff] }
 0x6b8   : > { %14334 = vrcp.f32 %v3906_v1  ;;  %v3930_v56 = vpop.xlane.xlu1 %3929  ;;  %12494 = vmatprep.mubr.msk.f32.mxu1 %vm14686_vm1, %v19570_v12  ;;  %13816 = vmatprep.subr.bf16.mxu0 %v19571_v26  ;;  %v4011_v20 = vmul.f32 %v14325_v5, %v16757_v28  ;;  %v16972_v1 = vpack.c.bf16 %v10356_v4, %v10355_v41  ;;  %v17105_v41 = vld [vmem:[%s14777_s30 + $0x78] sm:$0xff]  ;;  %v17110_v4 = vld [vmem:[%s14777_s30 + $0x80] sm:$0xff] }
 0x6b9   : > { %14336 = vrcp.f32 %v3930_v56  ;;  %12553 = vmatprep.subr.mxu1 %v19570_v12  ;;  %12457 = vmatmul.mubr.msk.f32.gmra.mrb[158].mxu0 %vm1697_vm4, %v4003_v7 }
 0x6ba   : > { %v14327_v34 = vpop.eup %14326  ;;  %12495 = vmatmul.mubr.msk.f32.gmra.mrb[188].mxu1 %vm1697_vm4, %v4011_v20  ;;  %13818 = vmatpush3.bf16.msra.mxu0 %v19576_v22 }
 0x6bb   : > { %v14329_v8 = vpop.eup %14328  ;;  %12554 = vmatpush3.msra.mxu1 %v16520_v59  ;;  %v3909_v48 = vpop.xlane.xlu0 %3908  ;;  %12459 = vmatprep.mubr.msk.f32.mxu0 %vm14686_vm1, %v19570_v12  ;;  %v4004_v28 = vmul.f32 %v14327_v34, %v16765_v37 }
 0x6bc   : > { %14338 = vrcp.f32 %v3909_v48  ;;  %v3954_v44 = vpop.xlane.xlu1 %3953  ;;  %12497 = vmatprep.mubr.msk.f32.mxu1 %vm14686_vm1, %v19570_v12  ;;  %12518 = vmatprep.subr.mxu0 %v19570_v12  ;;  %v4012_v17 = vmul.f32 %v14329_v8, %v16767_v51 }
 0x6bd   : > { %14340 = vrcp.f32 %v3954_v44  ;;  %12460 = vmatmul.mubr.msk.f32.gmra.mrb[160].mxu0 %vm1697_vm4, %v4004_v28  ;;  %13829 = vmatprep.subr.bf16.mxu1 %v16911_v10 }
 0x6be   : > { %v14331_v2 = vpop.eup %14330  ;;  %12498 = vmatmul.mubr.msk.f32.gmra.mrb[190].mxu1 %vm1697_vm4, %v4012_v17  ;;  %12519 = vmatpush3.msra.mxu0 %v16502_v38 }
 0x6bf   : > { %v14333_v21 = vpop.eup %14332  ;;  %v3933_v59 = vpop.xlane.xlu0 %3932  ;;  %12462 = vmatprep.mubr.msk.f32.mxu0 %vm14686_vm1, %v19570_v12  ;;  %12500 = vmatprep.mubr.msk.f32.mxu1 %vm14686_vm1, %v19570_v12  ;;  %v4005_v37 = vmul.f32 %v14331_v2, %v16775_v13 }
 0x6c0   : > { %14342 = vrcp.f32 %v3933_v59  ;;  %v3957_v51 = vpop.xlane.xlu1 %3956  ;;  %v4013_v31 = vmul.f32 %v14333_v21, %v16777_v35 }
 0x6c1   : > { %14344 = vrcp.f32 %v3957_v51  ;;  %12463 = vmatmul.mubr.msk.f32.gmra.mrb[162].mxu0 %vm1697_vm4, %v4005_v37 }
 0x6c2   : > { %v14335_v50 = vpop.eup %14334  ;;  %12501 = vmatmul.mubr.msk.f32.gmra.mrb[192].mxu1 %vm1697_vm4, %v4013_v31  ;;  %12465 = vmatprep.mubr.msk.f32.mxu0 %vm14686_vm1, %v19570_v12  ;;  %v10358_v31 = vld [vmem:[%s19529_s2 + $0x58] sm:$0xff] }
 0x6c3   : > { %v14337_v38 = vpop.eup %14336  ;;  %v3936_v32 = vpop.xlane.xlu0 %3935  ;;  %12503 = vmatprep.mubr.msk.f32.mxu1 %vm14686_vm1, %v19570_v12  ;;  %v4006_v13 = vmul.f32 %v14335_v50, %v16785_v24  ;;  %v17026_v50 = vld [vmem:[%s14777_s30] sm:$0xff] }
 0x6c4   : > { %14346 = vrcp.f32 %v3936_v32  ;;  %v3960_v25 = vpop.xlane.xlu1 %3959  ;;  %v4014_v35 = vmul.f32 %v14337_v38, %v16787_v16  ;;  %v17033_v32 = vld [vmem:[%s14777_s30 + $0x8] sm:$0xff] }
 0x6c5   : > { %14348 = vrcp.f32 %v3960_v25  ;;  %12466 = vmatmul.mubr.msk.f32.gmra.mrb[164].mxu0 %vm1697_vm4, %v4006_v13  ;;  %v17038_v13 = vld [vmem:[%s14777_s30 + $0x10] sm:$0xff]  ;;  %v17049_v25 = vld [vmem:[%s14777_s30 + $0x20] sm:$0xff] }
 0x6c6   : > { %v14339_v14 = vpop.eup %14338  ;;  %12504 = vmatmul.mubr.msk.f32.gmra.mrb[194].mxu1 %vm1697_vm4, %v4014_v35  ;;  %12468 = vmatprep.mubr.msk.f32.mxu0 %vm14686_vm1, %v19570_v12  ;;  %v17055_v35 = vld [vmem:[%s14777_s30 + $0x28] sm:$0xff] }
 0x6c7   : > { %v14341_v24 = vpop.eup %14340  ;;  %v3939_v23 = vpop.xlane.xlu0 %3938  ;;  %12555 = vmatprep.mubr.msk.f32.mxu1 %vm14686_vm1, %v19570_v12  ;;  %v4007_v16 = vmul.f32 %v14339_v14, %v16795_v9  ;;  %v17070_v14 = vld [vmem:[%s14777_s30 + $0x40] sm:$0xff] }
 0x6c8   : > { %v4022_v18 = vmul.f32 %v14341_v24, %v16797_v27  ;;  %14350 = vrcp.f32 %v3939_v23  ;;  %v3963_v47 = vpop.xlane.xlu1 %3962  ;;  %v17075_v24 = vld [vmem:[%s14777_s30 + $0x48] sm:$0xff]  ;;  %v17080_v23 = vld [vmem:[%s14777_s30 + $0x50] sm:$0xff] }
 0x6c9   : > { %14352 = vrcp.f32 %v3963_v47  ;;  %12469 = vmatmul.mubr.msk.f32.gmra.mrb[166].mxu0 %vm1697_vm4, %v4007_v16  ;;  %v17085_v16 = vld [vmem:[%s14777_s30 + $0x58] sm:$0xff]  ;;  %v17095_v47 = vld [vmem:[%s14777_s30 + $0x68] sm:$0xff] }
 0x6ca   : > { %v14343_v19 = vpop.eup %14342  ;;  %12556 = vmatmul.mubr.msk.f32.vlgmr.msra.gmra.mrb[196].mxu1 %vm1697_vm4, %v4022_v18  ;;  %12520 = vmatprep.mubr.msk.f32.mxu0 %vm14686_vm1, %v19570_v12  ;;  %v17090_v18 = vld [vmem:[%s14777_s30 + $0x60] sm:$0xff] }
 0x6cb   : > { %v14345_v9 = vpop.eup %14344  ;;  %v4015_v27 = vmul.f32 %v14343_v19, %v16805_v55  ;;  %v3942_v11 = vpop.xlane.xlu0 %3941  ;;  %12558 = vmatprep.mubr.msk.f32.mxu1 %vm14686_vm1, %v19570_v12  ;;  %13831 = vmatpush3.bf16.msra.mxu1 %v16911_v10  ;;  %v17115_v19 = vld [vmem:[%s14777_s30 + $0x88] sm:$0xff] }
 0x6cc   : > { %14354 = vrcp.f32 %v3942_v11  ;;  %v3966_v5 = vpop.xlane.xlu1 %3965  ;;  %v4023_v15 = vmul.f32 %v14345_v9, %v16807_v53  ;;  %13833 = vmatprep.subr.bf16.mxu1 %v13832_v43  ;;  %v10264_v9 = vld [vmem:[%s19534_s7 + $0x8] sm:$0xff]  ;;  %v17128_v11 = vld [vmem:[%s14777_s30 + $0x98] sm:$0xff] }
 0x6cd   : > { %14356 = vrcp.f32 %v3966_v5  ;;  %12521 = vmatmul.mubr.msk.f32.vlgmr.msra.gmra.mrb[168].mxu0 %vm1697_vm4, %v4015_v27  ;;  %v17123_v27 = vld [vmem:[%s14777_s30 + $0x90] sm:$0xff]  ;;  %12576 = vmatprep.subr.mxu0 %v10264_v9  ;;  %v17133_v5 = vld [vmem:[%s14777_s30 + $0xa0] sm:$0xff] }
 0x6ce   : > { %v14347_v7 = vpop.eup %14346  ;;  %12559 = vmatmul.mubr.msk.f32.gmra.mrb[198].mxu1 %vm1697_vm4, %v4023_v15  ;;  %12523 = vmatprep.mubr.msk.f32.mxu0 %vm14686_vm1, %v19570_v12  ;;  %v17138_v15 = vld [vmem:[%s14777_s30 + $0xa8] sm:$0xff] }
 0x6cf   : > { %v14349_v55 = vpop.eup %14348  ;;  %v3945_v56 = vpop.xlane.xlu0 %3944  ;;  %12561 = vmatprep.mubr.msk.f32.mxu1 %vm14686_vm1, %v19570_v12  ;;  %v4016_v20 = vmul.f32 %v14347_v7, %v16815_v29  ;;  %13835 = vmatpush3.bf16.msra.mxu1 %v13832_v43  ;;  %v17100_v43 = vld [vmem:[%s14777_s30 + $0x70] sm:$0xff]  ;;  %v17148_v7 = vld [vmem:[%s14777_s30 + $0xb8] sm:$0xff] }
 0x6d0   : > { %14358 = vrcp.f32 %v3945_v56  ;;  %v3969_v53 = vpop.xlane.xlu1 %3968  ;;  %v4024_v10 = vmul.f32 %v14349_v55, %v16817_v61  ;;  %13837 = vmatprep.subr.bf16.mxu1 %v16972_v1  ;;  %12577 = vmatpush3.msra.mxu0 %v10264_v9  ;;  %v17153_v55 = vld [vmem:[%s14777_s30 + $0xc0] sm:$0xff]  ;;  %v17158_v56 = vld [vmem:[%s14777_s30 + $0xc8] sm:$0xff] }
 0x6d1   : > { %14360 = vrcp.f32 %v3969_v53  ;;  %12524 = vmatmul.mubr.msk.f32.gmra.mrb[170].mxu0 %vm1697_vm4, %v4016_v20  ;;  %v17163_v20 = vld [vmem:[%s14777_s30 + $0xd0] sm:$0xff]  ;;  %v17168_v53 = vld [vmem:[%s14777_s30 + $0xd8] sm:$0xff] }
 0x6d2   : > { %v14351_v34 = vpop.eup %14350  ;;  %12562 = vmatmul.mubr.msk.f32.gmra.mrb[200].mxu1 %vm1697_vm4, %v4024_v10  ;;  %12526 = vmatprep.mubr.msk.f32.mxu0 %vm14686_vm1, %v19570_v12  ;;  %v2490_v10 = vld [vmem:[%s19534_s7] sm:$0xff] }
 0x6d3   : > { %v14353_v22 = vpop.eup %14352  ;;  %v3948_v8 = vpop.xlane.xlu0 %3947  ;;  %12564 = vmatprep.mubr.msk.f32.mxu1 %vm14686_vm1, %v19570_v12  ;;  %v4017_v29 = vmul.f32 %v14351_v34, %v16825_v3  ;;  %12620 = vmatprep.subr.mxu0 %v2490_v10 }
 0x6d4   : > { %14362 = vrcp.f32 %v3948_v8  ;;  %v3972_v61 = vpop.xlane.xlu1 %3971  ;;  %v4025_v48 = vmul.f32 %v14353_v22, %v16827_v6 }
 0x6d5   : > { %14364 = vrcp.f32 %v3972_v61  ;;  %12527 = vmatmul.mubr.msk.f32.gmra.mrb[172].mxu0 %vm1697_vm4, %v4017_v29  ;;  %v10389_v29 = vld [vmem:[%s19530_s3 + $0x40] sm:$0xff]  ;;  %v10390_v61 = vld [vmem:[%s19530_s3 + $0x48] sm:$0xff] }
 0x6d6   : > { %v14355_v28 = vpop.eup %14354  ;;  %12565 = vmatmul.mubr.msk.f32.gmra.mrb[202].mxu1 %vm1697_vm4, %v4025_v48  ;;  %12529 = vmatprep.mubr.msk.f32.mxu0 %vm14686_vm1, %v19570_v12 }
 0x6d7   : > { %v14357_v44 = vpop.eup %14356  ;;  %12567 = vmatprep.mubr.msk.f32.mxu1 %vm14686_vm1, %v19570_v12  ;;  %v4018_v17 = vmul.f32 %v14355_v28, %v16834_v42 }
 0x6d8   : > { %v3951_v3 = vpop.xlane.xlu1 %3950  ;;  %v4026_v2 = vmul.f32 %v14357_v44, %v16836_v46 }
 0x6d9   : > { %14366 = vrcp.f32 %v3951_v3  ;;  %12530 = vmatmul.mubr.msk.f32.gmra.mrb[174].mxu0 %vm1697_vm4, %v4018_v17  ;;  %v17240_v17 = vpack.c.bf16 %v10390_v61, %v10389_v29 }
 0x6da   : > { %v14359_v6 = vpop.eup %14358  ;;  %12568 = vmatmul.mubr.msk.f32.gmra.mrb[204].mxu1 %vm1697_vm4, %v4026_v2  ;;  %12532 = vmatprep.mubr.msk.f32.mxu0 %vm14686_vm1, %v19570_v12 }
 0x6db   : > { %v14361_v21 = vpop.eup %14360  ;;  %12570 = vmatprep.mubr.msk.f32.mxu1 %vm14686_vm1, %v19570_v12  ;;  %v4019_v59 = vmul.f32 %v14359_v6, %v16842_v49 }
 0x6dc   : > { %v4027_v42 = vmul.f32 %v14361_v21, %v16844_v60  ;;  %v10357_v60 = vld [vmem:[%s19529_s2 + $0x50] sm:$0xff] }
 0x6dd   : > { %12533 = vmatmul.mubr.msk.f32.gmra.mrb[176].mxu0 %vm1697_vm4, %v4019_v59  ;;  %v13840_v38 = vpack.c.bf16 %v10358_v31, %v10357_v60 }
 0x6de   : > { %v14363_v46 = vpop.eup %14362  ;;  %12571 = vmatmul.mubr.msk.f32.gmra.mrb[206].mxu1 %vm1697_vm4, %v4027_v42  ;;  %12535 = vmatprep.mubr.msk.f32.mxu0 %vm14686_vm1, %v19570_v12 }
 0x6df   : > { %v14365_v37 = vpop.eup %14364  ;;  %12573 = vmatprep.mubr.msk.f32.mxu1 %vm14686_vm1, %v19570_v12  ;;  %v4020_v51 = vmul.f32 %v14363_v46, %v16850_v54 }
 0x6e0   : > { %v4028_v49 = vmul.f32 %v14365_v37, %v16852_v36 }
 0x6e1   : > { %12536 = vmatmul.mubr.msk.f32.gmra.mrb[178].mxu0 %vm1697_vm4, %v4020_v51 }
 0x6e2   : > { %12574 = vmatmul.mubr.msk.f32.gmra.mrb[208].mxu1 %vm1697_vm4, %v4028_v49  ;;  %12538 = vmatprep.mubr.msk.f32.mxu0 %vm14686_vm1, %v19570_v12 }
 0x6e3   : > { %v14367_v54 = vpop.eup %14366  ;;  %12672 = vmatprep.mubr.msk.f32.mxu1 %vm399_vm0, %v17026_v50 }
 0x6e4   : > { %v4021_v36 = vmul.f32 %v14367_v54, %v16858_v39  ;;  %v17044_v39 = vld [vmem:[%s14777_s30 + $0x18] sm:$0xff] }
 0x6e6   : > { %12539 = vmatmul.mubr.msk.f32.gmra.mrb[180].mxu0 %vm1697_vm4, %v4021_v36  ;;  %12673 = vmatmul.mubr.msk.f32.vlgmr.msra.gmra.mrb[210].mxu1 %vm399_vm0, %v17033_v32 }
 0x6e7   : > { %12675 = vmatprep.mubr.msk.f32.mxu1 %vm399_vm0, %v17038_v13  ;;  %13839 = vmatpush3.bf16.msra.mxu1 %v16972_v1  ;;  %v17143_v1 = vld [vmem:[%s14777_s30 + $0xb0] sm:$0xff] }
 0x6e8   : > { %13841 = vmatprep.subr.bf16.mxu1 %v13840_v38 }
 0x6ea   : > { %12676 = vmatmul.mubr.msk.f32.gmra.mrb[212].mxu1 %vm399_vm0, %v17044_v39 }
 0x6eb   : > { %12678 = vmatprep.mubr.msk.f32.mxu1 %vm399_vm0, %v17049_v25  ;;  %13843 = vmatpush3.bf16.msra.mxu1 %v13840_v38 }
 0x6ec   : > { %13852 = vmatprep.subr.bf16.mxu1 %v19571_v26 }
 0x6ee   : > { %12679 = vmatmul.mubr.msk.f32.gmra.mrb[214].mxu1 %vm399_vm0, %v17055_v35 }
 0x6ef   : > { %12681 = vmatprep.mubr.msk.f32.mxu1 %vm399_vm0, %v17060_v0 }
 0x6f2   : > { %12682 = vmatmul.mubr.msk.f32.gmra.mrb[216].mxu1 %vm399_vm0, %v17065_v63 }
 0x6f3   : > { %12684 = vmatprep.mubr.msk.f32.mxu1 %vm399_vm0, %v17070_v14 }
 0x6f6   : > { %12685 = vmatmul.mubr.msk.f32.gmra.mrb[218].mxu1 %vm399_vm0, %v17075_v24 }
 0x6f7   : > { %12687 = vmatprep.mubr.msk.f32.mxu1 %vm399_vm0, %v17080_v23 }
 0x6fa   : > { %12688 = vmatmul.mubr.msk.f32.gmra.mrb[220].mxu1 %vm399_vm0, %v17085_v16 }
 0x6fb   : > { %12690 = vmatprep.mubr.msk.f32.mxu1 %vm399_vm0, %v17090_v18 }
 0x6fe   : > { %12691 = vmatmul.mubr.msk.f32.gmra.mrb[222].mxu1 %vm399_vm0, %v17095_v47 }
 0x6ff   : > { %12693 = vmatprep.mubr.msk.f32.mxu1 %vm399_vm0, %v17100_v43 }
 0x702   : > { %12694 = vmatmul.mubr.msk.f32.gmra.mrb[224].mxu1 %vm399_vm0, %v17105_v41 }
 0x703   : > { %12696 = vmatprep.mubr.msk.f32.mxu1 %vm399_vm0, %v17110_v4 }
 0x706   : > { %12697 = vmatmul.mubr.msk.f32.gmra.mrb[226].mxu1 %vm399_vm0, %v17115_v19 }
 0x707   : > { %12699 = vmatprep.mubr.msk.f32.mxu1 %vm399_vm0, %v17123_v27 }
 0x70a   : > { %12700 = vmatmul.mubr.msk.f32.gmra.mrb[228].mxu1 %vm399_vm0, %v17128_v11 }
 0x70b   : > { %12702 = vmatprep.mubr.msk.f32.mxu1 %vm399_vm0, %v17133_v5 }
 0x70e   : > { %12703 = vmatmul.mubr.msk.f32.gmra.mrb[230].mxu1 %vm399_vm0, %v17138_v15 }
 0x70f   : > { %12705 = vmatprep.mubr.msk.f32.mxu1 %vm399_vm0, %v17143_v1 }
 0x712   : > { %12706 = vmatmul.mubr.msk.f32.gmra.mrb[232].mxu1 %vm399_vm0, %v17148_v7 }
 0x713   : > { %12708 = vmatprep.mubr.msk.f32.mxu1 %vm399_vm0, %v17153_v55 }
 0x716   : > { %12709 = vmatmul.mubr.msk.f32.gmra.mrb[234].mxu1 %vm399_vm0, %v17158_v56 }
 0x717   : > { %12711 = vmatprep.mubr.msk.f32.mxu1 %vm399_vm0, %v17163_v20 }
 0x71a   : > { %12712 = vmatmul.mubr.msk.f32.gmra.mrb[236].mxu1 %vm399_vm0, %v17168_v53 }
 0x71b   : > { %12722 = vmatprep.mubr.msk.f32.mxu1 %vm399_vm0, %v17026_v50 }
 0x71e   : > { %12723 = vmatmul.mubr.msk.f32.vlgmr.msra.gmra.mrb[238].mxu1 %vm399_vm0, %v17033_v32 }
 0x71f   : > { %12725 = vmatprep.mubr.msk.f32.mxu1 %vm399_vm0, %v17038_v13 }
 0x722   : > { %12726 = vmatmul.mubr.msk.f32.gmra.mrb[240].mxu1 %vm399_vm0, %v17044_v39 }
 0x723   : > { %12728 = vmatprep.mubr.msk.f32.mxu1 %vm399_vm0, %v17049_v25 }
 0x726   : > { %12729 = vmatmul.mubr.msk.f32.gmra.mrb[242].mxu1 %vm399_vm0, %v17055_v35 }
 0x727   : > { %12731 = vmatprep.mubr.msk.f32.mxu1 %vm399_vm0, %v17060_v0 }
 0x72a   : > { %12732 = vmatmul.mubr.msk.f32.gmra.mrb[244].mxu1 %vm399_vm0, %v17065_v63 }
 0x72b   : > { %12734 = vmatprep.mubr.msk.f32.mxu1 %vm399_vm0, %v17070_v14 }
 0x72e   : > { %12735 = vmatmul.mubr.msk.f32.gmra.mrb[246].mxu1 %vm399_vm0, %v17075_v24 }
 0x72f   : > { %12737 = vmatprep.mubr.msk.f32.mxu1 %vm399_vm0, %v17080_v23 }
 0x732   : > { %12738 = vmatmul.mubr.msk.f32.gmra.mrb[248].mxu1 %vm399_vm0, %v17085_v16 }
 0x733   : > { %12740 = vmatprep.mubr.msk.f32.mxu1 %vm399_vm0, %v17090_v18 }
 0x736   : > { %12741 = vmatmul.mubr.msk.f32.gmra.mrb[250].mxu1 %vm399_vm0, %v17095_v47 }
 0x737   : > { %12743 = vmatprep.mubr.msk.f32.mxu1 %vm399_vm0, %v17100_v43 }
 0x73a   : > { %12744 = vmatmul.mubr.msk.f32.gmra.mrb[252].mxu1 %vm399_vm0, %v17105_v41 }
 0x73b   : > { %12746 = vmatprep.mubr.msk.f32.mxu1 %vm399_vm0, %v17110_v4 }
 0x73e   : > { %12747 = vmatmul.mubr.msk.f32.gmra.mrb[254].mxu1 %vm399_vm0, %v17115_v19 }
 0x73f   : > { %12749 = vmatprep.mubr.msk.f32.mxu1 %vm399_vm0, %v17123_v27 }
 0x742   : > { %12750 = vmatmul.mubr.msk.f32.gmra.mrb[0].mxu1 %vm399_vm0, %v17128_v11 }
 0x743   : > { %12752 = vmatprep.mubr.msk.f32.mxu1 %vm399_vm0, %v17133_v5 }
 0x746   : > { %12753 = vmatmul.mubr.msk.f32.gmra.mrb[2].mxu1 %vm399_vm0, %v17138_v15 }
 0x747   : > { %12755 = vmatprep.mubr.msk.f32.mxu1 %vm399_vm0, %v17143_v1 }
 0x74a   : > { %12756 = vmatmul.mubr.msk.f32.gmra.mrb[4].mxu1 %vm399_vm0, %v17148_v7 }
 0x74b   : > { %12758 = vmatprep.mubr.msk.f32.mxu1 %vm399_vm0, %v17153_v55 }
 0x74e   : > { %12759 = vmatmul.mubr.msk.f32.gmra.mrb[6].mxu1 %vm399_vm0, %v17158_v56 }
 0x74f   : > { %12761 = vmatprep.mubr.msk.f32.mxu1 %vm399_vm0, %v17163_v20 }
 0x752   : > { %12762 = vmatmul.mubr.msk.f32.gmra.mrb[8].mxu1 %vm399_vm0, %v17168_v53 }
 0x753   : > { %12828 = vmatprep.mubr.msk.f32.mxu1 %vm14686_vm1, %v19570_v12 }
 0x780   : > { %v4237_v34 = vpop.f32.mrb[182].mxu1 }
 0x781   : > { %v12487_v22 = vpop.f32.mrb[183].mxu1 }
 0x784   : > { %v4116_v8 = vpop.f32.mrb[154].mxu0 }
 0x785   : > { %v4242_v48 = vpop.f32.mrb[184].mxu1  ;;  %v12452_v28 = vpop.f32.mrb[155].mxu0  ;;  %12578 = vmatprep.mubr.msk.f32.mxu0 %vm1128_vm2, %v4116_v8 }
 0x786   : > { %v12490_v44 = vpop.f32.mrb[185].mxu1 }
 0x788   : > { %v4121_v3 = vpop.f32.mrb[156].mxu0 }
 0x789   : > { %v4247_v2 = vpop.f32.mrb[186].mxu1  ;;  %v12455_v6 = vpop.f32.mrb[157].mxu0  ;;  %12579 = vmatmul.mubr.msk.f32.vlgmr.msra.gmra.mrb[182].mxu0 %vm1128_vm2, %v4121_v3 }
 0x78a   : > { %v12493_v21 = vpop.f32.mrb[187].mxu1  ;;  %12621 = vmatpush3.msra.mxu0 %v2490_v10 }
 0x78b   : > { %13845 = vmatprep.subr.bf16.mxu0 %v17240_v17 }
 0x78c   : > { %v4126_v59 = vpop.f32.mrb[158].mxu0 }
 0x78d   : > { %v4252_v42 = vpop.f32.mrb[188].mxu1  ;;  %v12458_v46 = vpop.f32.mrb[159].mxu0  ;;  %12581 = vmatprep.mubr.msk.f32.mxu0 %vm1128_vm2, %v4126_v59 }
 0x78e   : > { %v12496_v37 = vpop.f32.mrb[189].mxu1 }
 0x790   : > { %v4131_v51 = vpop.f32.mrb[160].mxu0 }
 0x791   : > { %v4257_v49 = vpop.f32.mrb[190].mxu1  ;;  %v12461_v60 = vpop.f32.mrb[161].mxu0  ;;  %12582 = vmatmul.mubr.msk.f32.gmra.mrb[184].mxu0 %vm1128_vm2, %v4131_v51 }
 0x792   : > { %v12499_v31 = vpop.f32.mrb[191].mxu1 }
 0x794   : > { %v4136_v54 = vpop.f32.mrb[162].mxu0 }
 0x795   : > { %v4262_v36 = vpop.f32.mrb[192].mxu1  ;;  %v12464_v38 = vpop.f32.mrb[163].mxu0  ;;  %12584 = vmatprep.mubr.msk.f32.mxu0 %vm1128_vm2, %v4136_v54 }
 0x796   : > { %v12502_v9 = vpop.f32.mrb[193].mxu1 }
 0x798   : > { %v4141_v10 = vpop.f32.mrb[164].mxu0 }
 0x799   : > { %v4267_v22 = vpop.f32.mrb[194].mxu1  ;;  %v12467_v8 = vpop.f32.mrb[165].mxu0  ;;  %12585 = vmatmul.mubr.msk.f32.gmra.mrb[186].mxu0 %vm1128_vm2, %v4141_v10 }
 0x79a   : > { %v12505_v29 = vpop.f32.mrb[195].mxu1 }
 0x79c   : > { %v4146_v61 = vpop.f32.mrb[166].mxu0 }
 0x79d   : > { %v4479_v28 = vpop.f32.mrb[196].mxu1  ;;  %v12470_v44 = vpop.f32.mrb[167].mxu0  ;;  %12587 = vmatprep.mubr.msk.f32.mxu0 %vm1128_vm2, %v4146_v61 }
 0x79e   : > { %v12557_v3 = vpop.f32.mrb[197].mxu1  ;;  %12588 = vmatmul.mubr.msk.f32.gmra.mrb[188].mxu0 %vm1128_vm2, %v4237_v34 }
 0x79f   : > { %12590 = vmatprep.mubr.msk.f32.mxu0 %vm1128_vm2, %v4242_v48 }
 0x7a0   : > { %v4358_v6 = vpop.f32.mrb[168].mxu0 }
 0x7a1   : > { %v4484_v21 = vpop.f32.mrb[198].mxu1  ;;  %v12522_v59 = vpop.f32.mrb[169].mxu0 }
 0x7a2   : > { %v12560_v46 = vpop.f32.mrb[199].mxu1  ;;  %12591 = vmatmul.mubr.msk.f32.gmra.mrb[190].mxu0 %vm1128_vm2, %v4247_v2 }
 0x7a3   : > { %12593 = vmatprep.mubr.msk.f32.mxu0 %vm1128_vm2, %v4252_v42 }
 0x7a4   : > { %v4363_v37 = vpop.f32.mrb[170].mxu0 }
 0x7a5   : > { %v4489_v51 = vpop.f32.mrb[200].mxu1  ;;  %v12525_v60 = vpop.f32.mrb[171].mxu0 }
 0x7a6   : > { %v12563_v31 = vpop.f32.mrb[201].mxu1  ;;  %12594 = vmatmul.mubr.msk.f32.gmra.mrb[192].mxu0 %vm1128_vm2, %v4257_v49 }
 0x7a7   : > { %12596 = vmatprep.mubr.msk.f32.mxu0 %vm1128_vm2, %v4262_v36 }
 0x7a8   : > { %v4368_v54 = vpop.f32.mrb[172].mxu0 }
 0x7a9   : > { %v4494_v34 = vpop.f32.mrb[202].mxu1  ;;  %v12528_v38 = vpop.f32.mrb[173].mxu0 }
 0x7aa   : > { %v12566_v48 = vpop.f32.mrb[203].mxu1  ;;  %12597 = vmatmul.mubr.msk.f32.gmra.mrb[194].mxu0 %vm1128_vm2, %v4267_v22 }
 0x7ab   : > { %12599 = vmatprep.mubr.msk.f32.mxu0 %vm1128_vm2, %v4358_v6 }
 0x7ac   : > { %v4373_v9 = vpop.f32.mrb[174].mxu0 }
 0x7ad   : > { %v4499_v2 = vpop.f32.mrb[204].mxu1  ;;  %v12531_v10 = vpop.f32.mrb[175].mxu0 }
 0x7ae   : > { %v12569_v42 = vpop.f32.mrb[205].mxu1  ;;  %12600 = vmatmul.mubr.msk.f32.gmra.mrb[196].mxu0 %vm1128_vm2, %v4363_v37 }
 0x7af   : > { %12602 = vmatprep.mubr.msk.f32.mxu0 %vm1128_vm2, %v4368_v54 }
 0x7b0   : > { %v4378_v8 = vpop.f32.mrb[176].mxu0 }
 0x7b1   : > { %v4504_v49 = vpop.f32.mrb[206].mxu1  ;;  %v12534_v29 = vpop.f32.mrb[177].mxu0 }
 0x7b2   : > { %v12572_v36 = vpop.f32.mrb[207].mxu1  ;;  %12603 = vmatmul.mubr.msk.f32.gmra.mrb[198].mxu0 %vm1128_vm2, %v4373_v9 }
 0x7b3   : > { %12605 = vmatprep.mubr.msk.f32.mxu0 %vm1128_vm2, %v4378_v8  ;;  %v19583_v36 = vld [vmem:[#allocation6_spill] sm:$0xff] }
 0x7b4   : > { %v4383_v61 = vpop.f32.mrb[178].mxu0 }
 0x7b5   : > { %v4509_v22 = vpop.f32.mrb[208].mxu1  ;;  %v12537_v44 = vpop.f32.mrb[179].mxu0 }
 0x7b6   : > { %v12575_v3 = vpop.f32.mrb[209].mxu1  ;;  %12606 = vmatmul.mubr.msk.f32.gmra.mrb[200].mxu0 %vm1128_vm2, %v4383_v61 }
 0x7b9   : > { %v4388_v6 = vpop.f32.mrb[180].mxu0  ;;  %v17262_v59 = vpop.f32.mrb[210].mxu1 }
 0x7ba   : > { %v12540_v46 = vpop.f32.mrb[181].mxu0  ;;  %12608 = vmatprep.mubr.msk.f32.mxu0 %vm1128_vm2, %v4388_v6  ;;  %v17265_v37 = vpop.f32.mrb[211].mxu1  ;;  %v19587_v6 = vld [vmem:[#allocation8_spill] sm:$0xff] }
 0x7bb   : > { %12609 = vmatmul.mubr.msk.f32.gmra.mrb[202].mxu0 %vm1128_vm2, %v4479_v28  ;;  %v19588_v46 = vld [vmem:[#allocation16_spill] sm:$0xff] }
 0x7bc   : > { %12611 = vmatprep.mubr.msk.f32.mxu0 %vm1128_vm2, %v4484_v21  ;;  %v10391_v21 = vld [vmem:[%s19530_s3 + $0x50] sm:$0xff] }
 0x7bd   : > { %v17269_v60 = vpop.f32.mrb[212].mxu1 }
 0x7be   : > { %v17271_v31 = vpop.f32.mrb[213].mxu1 }
 0x7bf   : > { %12612 = vmatmul.mubr.msk.f32.gmra.mrb[204].mxu0 %vm1128_vm2, %v4489_v51  ;;  %v10392_v51 = vld [vmem:[%s19530_s3 + $0x58] sm:$0xff] }
 0x7c0   : > { %12614 = vmatprep.mubr.msk.f32.mxu0 %vm1128_vm2, %v4494_v34  ;;  %v13848_v9 = vpack.c.bf16 %v10392_v51, %v10391_v21 }
 0x7c1   : > { %v17275_v54 = vpop.f32.mrb[214].mxu1 }
 0x7c2   : > { %v17277_v38 = vpop.f32.mrb[215].mxu1 }
 0x7c3   : > { %12615 = vmatmul.mubr.msk.f32.gmra.mrb[206].mxu0 %vm1128_vm2, %v4499_v2 }
 0x7c4   : > { %12617 = vmatprep.mubr.msk.f32.mxu0 %vm1128_vm2, %v4504_v49  ;;  %v19579_v49 = vld [vmem:[#allocation4_spill] sm:$0xff] }
 0x7c5   : > { %v17281_v48 = vpop.f32.mrb[216].mxu1 }
 0x7c6   : > { %v17283_v28 = vpop.f32.mrb[217].mxu1 }
 0x7c7   : > { %12618 = vmatmul.mubr.msk.f32.gmra.mrb[208].mxu0 %vm1128_vm2, %v4509_v22  ;;  %v17349_v22 = vld [vmem:[%s19531_s4 + $0x2] ss:$0 sm:$0xff] }
 0x7c8   : > { %12622 = vmatprep.mubr.msk.f32.mxu0 %vm1128_vm2, %v16182_v30 }
 0x7c9   : > { %v17294_v34 = vpop.f32.mrb[218].mxu1 }
 0x7ca   : > { %v17296_v2 = vpop.f32.mrb[219].mxu1 }
 0x7cb   : > { %12623 = vmatmul.mubr.msk.f32.vlgmr.msra.gmra.mrb[182].mxu0 %vm1128_vm2, %v16186_v45 }
 0x7cc   : > { %12625 = vmatprep.mubr.msk.f32.mxu0 %vm1128_vm2, %v16190_v52  ;;  %13847 = vmatpush3.bf16.msra.mxu0 %v17240_v17 }
 0x7cd   : > { %v17303_v10 = vpop.f32.mrb[220].mxu1  ;;  %13849 = vmatprep.subr.bf16.mxu0 %v13848_v9 }
 0x7ce   : > { %v17305_v42 = vpop.f32.mrb[221].mxu1 }
 0x7cf   : > { %12626 = vmatmul.mubr.msk.f32.gmra.mrb[184].mxu0 %vm1128_vm2, %v16194_v40  ;;  %v19577_v40 = vld [vmem:[#allocation3_spill] sm:$0xff] }
 0x7d0   : > { %12628 = vmatprep.mubr.msk.f32.mxu0 %vm1128_vm2, %v16198_v62  ;;  %13851 = vmatpush3.bf16.msra.mxu0 %v13848_v9 }
 0x7d1   : > { %v17311_v30 = vpop.f32.mrb[222].mxu1  ;;  %13876 = vmatprep.subr.bf16.mxu0 %v19571_v26 }
 0x7d2   : > { %v17314_v45 = vpop.f32.mrb[223].mxu1 }
 0x7d3   : > { %12629 = vmatmul.mubr.msk.f32.gmra.mrb[186].mxu0 %vm1128_vm2, %v16202_v58  ;;  %v19580_v58 = vld [vmem:[#allocation5_spill] sm:$0xff] }
 0x7d4   : > { %12631 = vmatprep.mubr.msk.f32.mxu0 %vm1128_vm2, %v16206_v57 }
 0x7d5   : > { %v17320_v52 = vpop.f32.mrb[224].mxu1 }
 0x7d6   : > { %v17322_v17 = vpop.f32.mrb[225].mxu1 }
 0x7d7   : > { %12632 = vmatmul.mubr.msk.f32.gmra.mrb[188].mxu0 %vm1128_vm2, %v16168_v33  ;;  %v19584_v33 = vld [vmem:[#allocation7_spill] sm:$0xff] }
 0x7d8   : > { %12634 = vmatprep.mubr.msk.f32.mxu0 %vm1128_vm2, %v19577_v40  ;;  %v19591_v40 = vld [vmem:[#allocation17_spill] sm:$0xff] }
 0x7d9   : > { %v17328_v62 = vpop.f32.mrb[226].mxu1 }
 0x7da   : > { %19578 = vst [vmem:[#allocation3_spill] sm:$0xff] %v17328_v62  ;;  %v17330_v8 = vpop.f32.mrb[227].mxu1  ;;  %v19608_v62 = vld [vmem:[#allocation15_spill] sm:$0xff] }
 0x7db   : > { %12635 = vmatmul.mubr.msk.f32.gmra.mrb[190].mxu0 %vm1128_vm2, %v19579_v49  ;;  %v19592_v49 = vld [vmem:[#allocation18_spill] sm:$0xff] }
 0x7dc   : > { %12637 = vmatprep.mubr.msk.f32.mxu0 %vm1128_vm2, %v19580_v58 }
 0x7dd   : > { %v17336_v57 = vpop.f32.mrb[228].mxu1 }
 0x7de   : > { %19581 = vst [vmem:[#allocation4_spill] sm:$0xff] %v17336_v57  ;;  %v17338_v29 = vpop.f32.mrb[229].mxu1 }
 0x7df   : > { %19582 = vst [vmem:[#allocation5_spill] sm:$0xff] %v17338_v29  ;;  %12638 = vmatmul.mubr.msk.f32.gmra.mrb[192].mxu0 %vm1128_vm2, %v19583_v36  ;;  %v19607_v29 = vld [vmem:[#allocation14_spill] sm:$0xff] }
 0x7e0   : > { %12640 = vmatprep.mubr.msk.f32.mxu0 %vm1128_vm2, %v19584_v33 }
 0x7e1   : > { %v17344_v61 = vpop.f32.mrb[230].mxu1 }
 0x7e2   : > { %19585 = vst [vmem:[#allocation6_spill] sm:$0xff] %v17344_v61  ;;  %v5272_v44 = vpop.f32.mrb[231].mxu1 }
 0x7e3   : > { %v17352_v3 = vadd.f32 %v17349_v22, %v5272_v44  ;;  %12641 = vmatmul.mubr.msk.f32.gmra.mrb[194].mxu0 %vm1128_vm2, %v19587_v6  ;;  %v19595_v6 = vld [vmem:[#allocation19_spill] sm:$0xff] }
 0x7e4   : > { %12643 = vmatprep.mubr.msk.f32.mxu0 %vm1128_vm2, %v19588_v46  ;;  %v19596_v46 = vld [vmem:[#allocation20_spill] sm:$0xff] }
 0x7e5   : > { %19586 = vst [vmem:[#allocation7_spill] sm:$0xff] %v17352_v3  ;;  %v12707_v21 = vpop.f32.mrb[232].mxu1 }
 0x7e6   : > { %v17359_v51 = vadd.f32 %v12707_v21, %v17349_v22  ;;  %v17361_v9 = vpop.f32.mrb[233].mxu1 }
 0x7e7   : > { %19590 = vst [vmem:[#allocation16_spill] sm:$0xff] %v17361_v9  ;;  %12644 = vmatmul.mubr.msk.f32.gmra.mrb[196].mxu0 %vm1128_vm2, %v19591_v40  ;;  %v19603_v9 = vld [vmem:[#allocation11_spill] sm:$0xff] }
 0x7e8   : > { %19589 = vst [vmem:[#allocation8_spill] sm:$0xff] %v17359_v51  ;;  %12646 = vmatprep.mubr.msk.f32.mxu0 %vm1128_vm2, %v19592_v49 }
 0x7e9   : > { %v12710_v58 = vpop.f32.mrb[234].mxu1 }
 0x7ea   : > { %v17368_v36 = vadd.f32 %v12710_v58, %v17349_v22  ;;  %v5292_v33 = vpop.f32.mrb[235].mxu1  ;;  %v19599_v58 = vld [vmem:[#allocation21_spill] sm:$0xff] }
 0x7eb   : > { %v17371_v44 = vadd.f32 %v17349_v22, %v5292_v33  ;;  %12647 = vmatmul.mubr.msk.f32.gmra.mrb[198].mxu0 %vm1128_vm2, %v19595_v6  ;;  %v17388_v33 = vld [vmem:[%s19532_s5 + $0x2] ss:$0 sm:$0xff] }
 0x7ec   : > { %19593 = vst [vmem:[#allocation17_spill] sm:$0xff] %v17368_v36  ;;  %12649 = vmatprep.mubr.msk.f32.mxu0 %vm1128_vm2, %v19596_v46  ;;  %v19600_v6 = vld [vmem:[#allocation22_spill] sm:$0xff] }
 0x7ed   : > { %19594 = vst [vmem:[#allocation18_spill] sm:$0xff] %v17371_v44  ;;  %v12713_v21 = vpop.f32.mrb[236].mxu1  ;;  %v19601_v44 = vld [vmem:[#allocation9_spill] sm:$0xff] }
 0x7ee   : > { %v17378_v40 = vadd.f32 %v12713_v21, %v17349_v22  ;;  %v5302_v3 = vpop.f32.mrb[237].mxu1 }
 0x7ef   : > { %v17381_v49 = vadd.f32 %v17349_v22, %v5302_v3  ;;  %12650 = vmatmul.mubr.msk.f32.gmra.mrb[200].mxu0 %vm1128_vm2, %v19599_v58  ;;  %v19602_v3 = vld [vmem:[#allocation10_spill] sm:$0xff] }
 0x7f0   : > { %19597 = vst [vmem:[#allocation19_spill] sm:$0xff] %v17378_v40  ;;  %12652 = vmatprep.mubr.msk.f32.mxu0 %vm1128_vm2, %v19600_v6 }
 0x7f1   : > { %19598 = vst [vmem:[#allocation20_spill] sm:$0xff] %v17381_v49  ;;  %v12724_v46 = vpop.f32.mrb[238].mxu1 }
 0x7f2   : > { %v5396_v36 = vadd.f32 %v12724_v46, %v17388_v33  ;;  %v5390_v21 = vpop.f32.mrb[239].mxu1 }
 0x7f3   : > { %v5391_v40 = vadd.f32 %v17388_v33, %v5390_v21  ;;  %12653 = vmatmul.mubr.msk.f32.gmra.mrb[202].mxu0 %vm1128_vm2, %v19601_v44  ;;  %v19605_v21 = vld [vmem:[#allocation12_spill] sm:$0xff] }
 0x7f4   : > { %12655 = vmatprep.mubr.msk.f32.mxu0 %vm1128_vm2, %v19602_v3 }
 0x7f5   : > { %v13853_v58 = vpack.c.bf16 %v5396_v36, %v5391_v40  ;;  %v12727_v49 = vpop.f32.mrb[240].mxu1 }
 0x7f6   : > { %v5406_v51 = vadd.f32 %v12727_v49, %v17388_v33  ;;  %v5400_v57 = vpop.f32.mrb[241].mxu1  ;;  %v19606_v49 = vld [vmem:[#allocation13_spill] sm:$0xff] }
 0x7f7   : > { %12656 = vmatmul.mubr.msk.f32.gmra.mrb[204].mxu0 %vm1128_vm2, %v19603_v9  ;;  %13855 = vmatpush3.bf16.xpose.msk.msra.mxu1 %vm15110_vm3, %v13853_v58  ;;  %v5401_v46 = vadd.f32 %v17388_v33, %v5400_v57 }
 0x7f8   : > { %12658 = vmatprep.mubr.msk.f32.mxu0 %vm1128_vm2, %v19605_v21  ;;  %13856 = vmatprep.subr.bf16.mxu1 %v19571_v26 }
 0x7f9   : > { %v13857_v44 = vpack.c.bf16 %v5406_v51, %v5401_v46  ;;  %v12730_v3 = vpop.f32.mrb[242].mxu1 }
 0x7fa   : > { %v5416_v36 = vadd.f32 %v12730_v3, %v17388_v33  ;;  %v5410_v40 = vpop.f32.mrb[243].mxu1 }
 0x7fb   : > { %12659 = vmatmul.mubr.msk.f32.gmra.mrb[206].mxu0 %vm1128_vm2, %v19606_v49  ;;  %v5411_v9 = vadd.f32 %v17388_v33, %v5410_v40 }
 0x7fc   : > { %12661 = vmatprep.mubr.msk.f32.mxu0 %vm1128_vm2, %v19607_v29 }
 0x7fd   : > { %v13861_v58 = vpack.c.bf16 %v5416_v36, %v5411_v9  ;;  %v12733_v57 = vpop.f32.mrb[244].mxu1 }
 0x7fe   : > { %v5420_v61 = vpop.f32.mrb[245].mxu1  ;;  %v5426_v51 = vadd.f32 %v12733_v57, %v17388_v33 }
 0x7ff   : > { %12662 = vmatmul.mubr.msk.f32.gmra.mrb[208].mxu0 %vm1128_vm2, %v19608_v62  ;;  %13859 = vmatpush3.bf16.xpose.msk.msra.mxu1 %vm15110_vm3, %v13857_v44 }
 0x800   : > { %12772 = vmatprep.mubr.msk.f32.mxu0 %vm399_vm0, %v17026_v50  ;;  %13860 = vmatprep.subr.bf16.mxu1 %v19571_v26 }
 0x801   : > { %v12736_v46 = vpop.f32.mrb[246].mxu1 }
 0x802   : > { %v5430_v21 = vpop.f32.mrb[247].mxu1  ;;  %v5436_v62 = vadd.f32 %v12736_v46, %v17388_v33 }
 0x803   : > { %12773 = vmatmul.mubr.msk.f32.vlgmr.msra.gmra.mrb[210].mxu0 %vm399_vm0, %v17033_v32  ;;  %v5431_v29 = vadd.f32 %v17388_v33, %v5430_v21 }
 0x804   : > { %12775 = vmatprep.mubr.msk.f32.mxu0 %vm399_vm0, %v17038_v13 }
 0x805   : > { %v13865_v44 = vpack.c.bf16 %v5431_v29, %v5426_v51  ;;  %v12739_v3 = vpop.f32.mrb[248].mxu1 }
 0x806   : > { %v5440_v36 = vpop.f32.mrb[249].mxu1  ;;  %v17436_v32 = vadd.f32 %v12739_v3, %v17388_v33 }
 0x807   : > { %12776 = vmatmul.mubr.msk.f32.gmra.mrb[212].mxu0 %vm399_vm0, %v17044_v39  ;;  %13863 = vmatpush3.bf16.xpose.msk.msra.mxu1 %vm15110_vm3, %v13861_v58  ;;  %v5441_v50 = vadd.f32 %v17388_v33, %v5440_v36 }
 0x808   : > { %12778 = vmatprep.mubr.msk.f32.mxu0 %vm399_vm0, %v17049_v25  ;;  %12826 = vmatprep.subr.mxu1 %v19570_v12  ;;  %v5421_v25 = vadd.f32 %v17388_v33, %v5420_v61 }
 0x809   : > { %v13869_v13 = vpack.c.bf16 %v5441_v50, %v5436_v62  ;;  %v17438_v40 = vpop.f32.mrb[250].mxu1 }
 0x80a   : > { %v5450_v49 = vpop.f32.mrb[251].mxu1 }
 0x80b   : > { %12779 = vmatmul.mubr.msk.f32.gmra.mrb[214].mxu0 %vm399_vm0, %v17055_v35  ;;  %v17443_v39 = vadd.f32 %v17388_v33, %v5450_v49  ;;  %v5173_v35 = vadd.f32 %v17349_v22, %v17265_v37 }
 0x80c   : > { %12781 = vmatprep.mubr.msk.f32.mxu0 %vm399_vm0, %v17060_v0 }
 0x80d   : > { %v13873_v9 = vpack.c.bf16 %v17443_v39, %v17436_v32  ;;  %v12745_v58 = vpop.f32.mrb[252].mxu1  ;;  %v5193_v32 = vadd.f32 %v17349_v22, %v17277_v38  ;;  %v5198_v38 = vadd.f32 %v17275_v54, %v17349_v22 }
 0x80e   : > { %v5466_v57 = vadd.f32 %v12745_v58, %v17388_v33  ;;  %v5460_v51 = vpop.f32.mrb[253].mxu1 }
 0x80f   : > { %v5461_v46 = vadd.f32 %v17388_v33, %v5460_v51  ;;  %12782 = vmatmul.mubr.msk.f32.gmra.mrb[216].mxu0 %vm399_vm0, %v17065_v63  ;;  %12827 = vmatpush3.xpose.msk.msra.mxu1 %vm1128_vm2, %v5421_v25 }
 0x810   : > { %12784 = vmatprep.mubr.msk.f32.mxu0 %vm399_vm0, %v17070_v14  ;;  %13864 = vmatprep.subr.bf16.mxu1 %v19571_v26  ;;  %v5178_v14 = vadd.f32 %v17262_v59, %v17349_v22 }
 0x811   : > { %v13877_v0 = vpack.c.bf16 %v5466_v57, %v5461_v46  ;;  %v12748_v61 = vpop.f32.mrb[254].mxu1  ;;  %v5456_v57 = vadd.f32 %v17438_v40, %v17388_v33  ;;  %v19615_v40 = vld [vmem:[#allocation7_spill] sm:$0xff] }
 0x812   : > { %12829 = vmatmul.mubr.msk.f32.vlgmr.msra.gmra.mrb[10].mxu1 %vm1128_vm2, %v5173_v35  ;;  %v5476_v21 = vadd.f32 %v12748_v61, %v17388_v33  ;;  %v5470_v29 = vpop.f32.mrb[255].mxu1  ;;  %v19617_v35 = vld [vmem:[#allocation17_spill] sm:$0xff]  ;;  %v19619_v61 = vld [vmem:[#allocation19_spill] sm:$0xff] }
 0x813   : > { %12785 = vmatmul.mubr.msk.f32.gmra.mrb[218].mxu0 %vm399_vm0, %v17075_v24  ;;  %13867 = vmatpush3.bf16.xpose.msk.msra.mxu1 %vm15110_vm3, %v13865_v44  ;;  %v5471_v63 = vadd.f32 %v17388_v33, %v5470_v29 }
 0x814   : > { %13879 = vmatpush3.bf16.xpose.msk.msra.mxu0 %vm15110_vm3, %v13877_v0  ;;  %12831 = vmatprep.mubr.msk.f32.mxu1 %vm14686_vm1, %v19570_v12  ;;  %v19618_v0 = vld [vmem:[#allocation20_spill] sm:$0xff] }
 0x815   : > { %v13881_v37 = vpack.c.bf16 %v5476_v21, %v5471_v63  ;;  %12787 = vmatprep.mubr.msk.f32.mxu0 %vm399_vm0, %v17080_v23  ;;  %13868 = vmatprep.subr.bf16.mxu1 %v19571_v26  ;;  %v12751_v24 = vpop.f32.mrb[0].mxu1  ;;  %v5183_v23 = vadd.f32 %v17349_v22, %v17271_v31  ;;  %v17682_v21 = vld [vmem:[%s19533_s6 + $0x2] ss:$0 sm:$0xff] }
 0x816   : > { %12832 = vmatmul.mubr.msk.f32.gmra.mrb[12].mxu1 %vm1128_vm2, %v5178_v14  ;;  %13880 = vmatprep.subr.bf16.mxu0 %v19571_v26  ;;  %v5486_v62 = vadd.f32 %v12751_v24, %v17388_v33  ;;  %v5480_v59 = vpop.f32.mrb[1].mxu1 }
 0x817   : > { %12788 = vmatmul.mubr.msk.f32.gmra.mrb[220].mxu0 %vm399_vm0, %v17085_v16  ;;  %12834 = vmatprep.mubr.msk.f32.mxu1 %vm14686_vm1, %v19570_v12  ;;  %v5481_v44 = vadd.f32 %v17388_v33, %v5480_v59  ;;  %v5188_v16 = vadd.f32 %v17269_v60, %v17349_v22 }
 0x818   : > { %12790 = vmatprep.mubr.msk.f32.mxu0 %vm399_vm0, %v17090_v18 }
 0x819   : > { %v13885_v3 = vpack.c.bf16 %v5486_v62, %v5481_v44  ;;  %v12754_v36 = vpop.f32.mrb[2].mxu1 }
 0x81a   : > { %12835 = vmatmul.mubr.msk.f32.gmra.mrb[14].mxu1 %vm1128_vm2, %v5183_v23  ;;  %v5490_v50 = vpop.f32.mrb[3].mxu1  ;;  %v5496_v18 = vadd.f32 %v12754_v36, %v17388_v33 }
 0x81b   : > { %12791 = vmatmul.mubr.msk.f32.gmra.mrb[222].mxu0 %vm399_vm0, %v17095_v47  ;;  %13871 = vmatpush3.bf16.xpose.msk.msra.mxu1 %vm15110_vm3, %v13869_v13  ;;  %v5491_v46 = vadd.f32 %v17388_v33, %v5490_v50 }
 0x81c   : > { %13883 = vmatpush3.bf16.xpose.msk.msra.mxu0 %vm15110_vm3, %v13881_v37  ;;  %12837 = vmatprep.mubr.msk.f32.mxu1 %vm14686_vm1, %v19570_v12 }
 0x81d   : > { %12793 = vmatprep.mubr.msk.f32.mxu0 %vm399_vm0, %v17100_v43  ;;  %13872 = vmatprep.subr.bf16.mxu1 %v19571_v26  ;;  %v12757_v47 = vpop.f32.mrb[4].mxu1 }
 0x81e   : > { %12838 = vmatmul.mubr.msk.f32.gmra.mrb[16].mxu1 %vm1128_vm2, %v5188_v16  ;;  %13884 = vmatprep.subr.bf16.mxu0 %v19571_v26  ;;  %v5506_v60 = vadd.f32 %v12757_v47, %v17388_v33  ;;  %v5500_v31 = vpop.f32.mrb[5].mxu1 }
 0x81f   : > { %12794 = vmatmul.mubr.msk.f32.gmra.mrb[224].mxu0 %vm399_vm0, %v17105_v41  ;;  %12840 = vmatprep.mubr.msk.f32.mxu1 %vm14686_vm1, %v19570_v12  ;;  %v5501_v43 = vadd.f32 %v17388_v33, %v5500_v31 }
 0x820   : > { %12796 = vmatprep.mubr.msk.f32.mxu0 %vm399_vm0, %v17110_v4 }
 0x821   : > { %v13889_v13 = vpack.c.bf16 %v5501_v43, %v5496_v18  ;;  %v12760_v49 = vpop.f32.mrb[6].mxu1  ;;  %v17695_v43 = vld [vmem:[%s19536_s9 + $0x70] sm:$0xff] }
 0x822   : > { %12841 = vmatmul.mubr.msk.f32.gmra.mrb[18].mxu1 %vm1128_vm2, %v5193_v32  ;;  %v5516_v39 = vadd.f32 %v12760_v49, %v17388_v33  ;;  %v5510_v25 = vpop.f32.mrb[7].mxu1 }
 0x823   : > { %12797 = vmatmul.mubr.msk.f32.gmra.mrb[226].mxu0 %vm399_vm0, %v17115_v19  ;;  %13875 = vmatpush3.bf16.xpose.msk.msra.mxu1 %vm15110_vm3, %v13873_v9  ;;  %v5511_v41 = vadd.f32 %v17388_v33, %v5510_v25 }
 0x824   : > { %13887 = vmatpush3.bf16.xpose.msk.msra.mxu0 %vm15110_vm3, %v13885_v3  ;;  %12843 = vmatprep.mubr.msk.f32.mxu1 %vm14686_vm1, %v19570_v12 }
 0x825   : > { %12799 = vmatprep.mubr.msk.f32.mxu0 %vm399_vm0, %v17123_v27  ;;  %v13893_v4 = vpack.c.bf16 %v5511_v41, %v5506_v60  ;;  %12861 = vmatprep.subr.mxu1 %v19570_v12  ;;  %v12763_v19 = vpop.f32.mrb[8].mxu1  ;;  %v5203_v27 = vadd.f32 %v17349_v22, %v17283_v28  ;;  %v19609_v28 = vld [vmem:[#allocation3_spill] sm:$0xff] }
 0x826   : > { %12844 = vmatmul.mubr.msk.f32.gmra.mrb[20].mxu1 %vm1128_vm2, %v5198_v38  ;;  %12896 = vmatprep.subr.mxu0 %v19570_v12  ;;  %v5526_v9 = vadd.f32 %v12763_v19, %v17388_v33  ;;  %v5520_v54 = vpop.f32.mrb[9].mxu1  ;;  %v17705_v38 = vld [vmem:[%s19536_s9 + $0x78] sm:$0xff] }
 0x827   : > { %12800 = vmatmul.mubr.msk.f32.gmra.mrb[228].mxu0 %vm399_vm0, %v17128_v11  ;;  %12846 = vmatprep.mubr.msk.f32.mxu1 %vm14686_vm1, %v19570_v12  ;;  %v5521_v58 = vadd.f32 %v17388_v33, %v5520_v54  ;;  %v5208_v11 = vadd.f32 %v17281_v48, %v17349_v22  ;;  %v5238_v48 = vadd.f32 %v17311_v30, %v17349_v22  ;;  %v19614_v33 = vld [vmem:[#allocation8_spill] sm:$0xff] }
 0x828   : > { %12802 = vmatprep.mubr.msk.f32.mxu0 %vm399_vm0, %v17133_v5  ;;  %v5213_v5 = vadd.f32 %v17349_v22, %v17296_v2  ;;  %v19610_v2 = vld [vmem:[#allocation6_spill] sm:$0xff] }
 0x829   : > { %v13897_v51 = vpack.c.bf16 %v5521_v58, %v5516_v39 }
 0x82a   : > { %12847 = vmatmul.mubr.msk.f32.gmra.mrb[22].mxu1 %vm1128_vm2, %v5203_v27 }
 0x82b   : > { %12803 = vmatmul.mubr.msk.f32.gmra.mrb[230].mxu0 %vm399_vm0, %v17138_v15  ;;  %12862 = vmatpush3.xpose.msk.msra.mxu1 %vm1128_vm2, %v5456_v57  ;;  %v5218_v15 = vadd.f32 %v17294_v34, %v17349_v22  ;;  %v5258_v34 = vadd.f32 %v19609_v28, %v17349_v22  ;;  %v17731_v28 = vld [vmem:[%s19536_s9 + $0x88] sm:$0xff] }
 0x82c   : > { %12897 = vmatpush3.xpose.msk.msra.mxu0 %vm1128_vm2, %v5491_v46  ;;  %12863 = vmatprep.mubr.msk.f32.mxu1 %vm14686_vm1, %v19570_v12 }
 0x82d   : > { %12805 = vmatprep.mubr.msk.f32.mxu0 %vm399_vm0, %v17143_v1  ;;  %13888 = vmatprep.subr.bf16.mxu1 %v19571_v26  ;;  %v5223_v1 = vadd.f32 %v17349_v22, %v17305_v42  ;;  %v19611_v42 = vld [vmem:[#allocation5_spill] sm:$0xff] }
 0x82e   : > { %12864 = vmatmul.mubr.msk.f32.vlgmr.msra.gmra.mrb[24].mxu1 %vm1128_vm2, %v5208_v11  ;;  %13900 = vmatprep.subr.bf16.mxu0 %v19571_v26  ;;  %v5263_v30 = vadd.f32 %v17349_v22, %v19611_v42  ;;  %v17718_v11 = vld [vmem:[%s19536_s9 + $0x80] sm:$0xff] }
 0x82f   : > { %12806 = vmatmul.mubr.msk.f32.gmra.mrb[232].mxu0 %vm399_vm0, %v17148_v7  ;;  %13891 = vmatpush3.bf16.xpose.msk.msra.mxu1 %vm15110_vm3, %v13889_v13  ;;  %v5243_v7 = vadd.f32 %v17349_v22, %v17322_v17  ;;  %v19613_v17 = vld [vmem:[#allocation4_spill] sm:$0xff] }
 0x830   : > { %12866 = vmatprep.mubr.msk.f32.mxu1 %vm14686_vm1, %v19570_v12  ;;  %12808 = vmatprep.mubr.msk.f32.mxu0 %vm399_vm0, %v17153_v55  ;;  %v5228_v55 = vadd.f32 %v17303_v10, %v17349_v22  ;;  %v5278_v10 = vadd.f32 %v19610_v2, %v17349_v22 }
 0x831   : > { %13892 = vmatprep.subr.bf16.mxu1 %v19571_v26 }
 0x832   : > { %12867 = vmatmul.mubr.msk.f32.gmra.mrb[26].mxu1 %vm1128_vm2, %v5213_v5 }
 0x833   : > { %12809 = vmatmul.mubr.msk.f32.gmra.mrb[234].mxu0 %vm399_vm0, %v17158_v56  ;;  %12869 = vmatprep.mubr.msk.f32.mxu1 %vm14686_vm1, %v19570_v12  ;;  %v5248_v56 = vadd.f32 %v17320_v52, %v17349_v22 }
 0x834   : > { %12811 = vmatprep.mubr.msk.f32.mxu0 %vm399_vm0, %v17163_v20  ;;  %v5233_v20 = vadd.f32 %v17349_v22, %v17314_v45  ;;  %v19612_v45 = vld [vmem:[#allocation16_spill] sm:$0xff] }
 0x835   : > { %v5283_v52 = vadd.f32 %v17349_v22, %v19612_v45 }
 0x836   : > { %12870 = vmatmul.mubr.msk.f32.gmra.mrb[28].mxu1 %vm1128_vm2, %v5218_v15 }
 0x837   : > { %12812 = vmatmul.mubr.msk.f32.gmra.mrb[236].mxu0 %vm399_vm0, %v17168_v53  ;;  %13895 = vmatpush3.bf16.xpose.msk.msra.mxu1 %vm15110_vm3, %v13893_v4  ;;  %v5253_v53 = vadd.f32 %v17349_v22, %v17330_v8  ;;  %v5268_v8 = vadd.f32 %v19613_v17, %v17349_v22  ;;  %v19616_v22 = vld [vmem:[#allocation18_spill] sm:$0xff] }
 0x838   : > { %12872 = vmatprep.mubr.msk.f32.mxu1 %vm14686_vm1, %v19570_v12  ;;  %12898 = vmatprep.mubr.msk.f32.mxu0 %vm14686_vm1, %v19570_v12 }
 0x839   : > { %13896 = vmatprep.subr.bf16.mxu1 %v19571_v26 }
 0x83a   : > { %12873 = vmatmul.mubr.msk.f32.gmra.mrb[30].mxu1 %vm1128_vm2, %v5223_v1 }
 0x83b   : > { %12899 = vmatmul.mubr.msk.f32.vlgmr.msra.gmra.mrb[238].mxu0 %vm1128_vm2, %v5243_v7  ;;  %12875 = vmatprep.mubr.msk.f32.mxu1 %vm14686_vm1, %v19570_v12 }
 0x83c   : > { %12901 = vmatprep.mubr.msk.f32.mxu0 %vm14686_vm1, %v19570_v12 }
 0x83e   : > { %12876 = vmatmul.mubr.msk.f32.gmra.mrb[32].mxu1 %vm1128_vm2, %v5228_v55 }
 0x83f   : > { %12902 = vmatmul.mubr.msk.f32.gmra.mrb[240].mxu0 %vm1128_vm2, %v5248_v56  ;;  %13899 = vmatpush3.bf16.xpose.msk.msra.mxu1 %vm15110_vm3, %v13897_v51 }
 0x840   : > { %12878 = vmatprep.mubr.msk.f32.mxu1 %vm14686_vm1, %v19570_v12  ;;  %12904 = vmatprep.mubr.msk.f32.mxu0 %vm14686_vm1, %v19570_v12 }
 0x841   : > { %12931 = vmatprep.subr.mxu1 %v19570_v12 }
 0x842   : > { %12879 = vmatmul.mubr.msk.f32.gmra.mrb[34].mxu1 %vm1128_vm2, %v5233_v20 }
 0x843   : > { %12905 = vmatmul.mubr.msk.f32.gmra.mrb[242].mxu0 %vm1128_vm2, %v5253_v53  ;;  %12881 = vmatprep.mubr.msk.f32.mxu1 %vm14686_vm1, %v19570_v12 }
 0x844   : > { %12907 = vmatprep.mubr.msk.f32.mxu0 %vm14686_vm1, %v19570_v12 }
 0x846   : > { %12882 = vmatmul.mubr.msk.f32.gmra.mrb[36].mxu1 %vm1128_vm2, %v5238_v48 }
 0x847   : > { %12908 = vmatmul.mubr.msk.f32.gmra.mrb[244].mxu0 %vm1128_vm2, %v5258_v34  ;;  %12932 = vmatpush3.xpose.msk.msra.mxu1 %vm1128_vm2, %v5526_v9 }
 0x848   : > { %12933 = vmatprep.mubr.msk.f32.mxu1 %vm14686_vm1, %v19570_v12  ;;  %12910 = vmatprep.mubr.msk.f32.mxu0 %vm14686_vm1, %v19570_v12 }
 0x849   : > { %13909 = vmatprep.subr.bf16.mxu1 %v19571_v26 }
 0x84a   : > { %12934 = vmatmul.mubr.msk.f32.vlgmr.msra.gmra.mrb[38].mxu1 %vm1128_vm2, %v5278_v10 }
 0x84b   : > { %12911 = vmatmul.mubr.msk.f32.gmra.mrb[246].mxu0 %vm1128_vm2, %v5263_v30  ;;  %12936 = vmatprep.mubr.msk.f32.mxu1 %vm14686_vm1, %v19570_v12 }
 0x84c   : > { %12913 = vmatprep.mubr.msk.f32.mxu0 %vm14686_vm1, %v19570_v12 }
 0x84e   : > { %12937 = vmatmul.mubr.msk.f32.gmra.mrb[40].mxu1 %vm1128_vm2, %v5283_v52 }
 0x84f   : > { %12914 = vmatmul.mubr.msk.f32.gmra.mrb[248].mxu0 %vm1128_vm2, %v5268_v8  ;;  %12939 = vmatprep.mubr.msk.f32.mxu1 %vm14686_vm1, %v19570_v12 }
 0x850   : > { %12916 = vmatprep.mubr.msk.f32.mxu0 %vm14686_vm1, %v19570_v12 }
 0x852   : > { %12940 = vmatmul.mubr.msk.f32.gmra.mrb[42].mxu1 %vm1128_vm2, %v19614_v33 }
 0x853   : > { %12917 = vmatmul.mubr.msk.f32.gmra.mrb[250].mxu0 %vm1128_vm2, %v19615_v40  ;;  %12942 = vmatprep.mubr.msk.f32.mxu1 %vm14686_vm1, %v19570_v12  ;;  %v17747_v40 = vld [vmem:[%s19536_s9 + $0x90] sm:$0xff] }
 0x854   : > { %12968 = vmatprep.mubr.msk.f32.mxu0 %vm14686_vm1, %v19570_v12 }
 0x856   : > { %12943 = vmatmul.mubr.msk.f32.gmra.mrb[44].mxu1 %vm1128_vm2, %v19616_v22 }
 0x857   : > { %12945 = vmatprep.mubr.msk.f32.mxu1 %vm14686_vm1, %v19570_v12 }
 0x85a   : > { %12946 = vmatmul.mubr.msk.f32.gmra.mrb[46].mxu1 %vm1128_vm2, %v19617_v35 }
 0x85b   : > { %12948 = vmatprep.mubr.msk.f32.mxu1 %vm14686_vm1, %v19570_v12 }
 0x85e   : > { %12949 = vmatmul.mubr.msk.f32.gmra.mrb[48].mxu1 %vm1128_vm2, %v19618_v0 }
 0x85f   : > { %12951 = vmatprep.mubr.msk.f32.mxu1 %vm14686_vm1, %v19570_v12 }
 0x862   : > { %12952 = vmatmul.mubr.msk.f32.gmra.mrb[50].mxu1 %vm1128_vm2, %v19619_v61 }
 0x863   : > { %13003 = vmatprep.mubr.msk.f32.mxu1 %vm14686_vm1, %v19570_v12 }
 0x8d6   : > { %v12774_v29 = vpop.f32.mrb[210].mxu0 }
 0x8d7   : > { %v5614_v63 = vadd.f32 %v12774_v29, %v17682_v21  ;;  %v5608_v14 = vpop.f32.mrb[211].mxu0 }
 0x8d8   : > { %v5609_v37 = vadd.f32 %v17682_v21, %v5608_v14 }
 0x8da   : > { %v13901_v24 = vpack.c.bf16 %v5614_v63, %v5609_v37  ;;  %v12777_v62 = vpop.f32.mrb[212].mxu0 }
 0x8db   : > { %v5624_v59 = vadd.f32 %v12777_v62, %v17682_v21  ;;  %v5618_v44 = vpop.f32.mrb[213].mxu0 }
 0x8dc   : > { %v5619_v23 = vadd.f32 %v17682_v21, %v5618_v44  ;;  %13902 = vmatpush3.bf16.msra.mxu0 %v13901_v24 }
 0x8dd   : > { %13903 = vmatprep.subr.bf16.mxu0 %v19571_v26 }
 0x8de   : > { %v13904_v3 = vpack.c.bf16 %v5624_v59, %v5619_v23  ;;  %v12780_v36 = vpop.f32.mrb[214].mxu0  ;;  %v17767_v59 = vld [vmem:[%s19536_s9 + $0x98] sm:$0xff] }
 0x8df   : > { %v5634_v50 = vadd.f32 %v12780_v36, %v17682_v21  ;;  %v5628_v16 = vpop.f32.mrb[215].mxu0 }
 0x8e0   : > { %v5629_v18 = vadd.f32 %v17682_v21, %v5628_v16  ;;  %13905 = vmatpush3.bf16.msra.mxu0 %v13904_v3 }
 0x8e1   : > { %13906 = vmatprep.subr.bf16.mxu0 %v19571_v26 }
 0x8e2   : > { %v13907_v47 = vpack.c.bf16 %v5634_v50, %v5629_v18  ;;  %v12783_v60 = vpop.f32.mrb[216].mxu0 }
 0x8e3   : > { %v5638_v31 = vpop.f32.mrb[217].mxu0  ;;  %v5644_v4 = vadd.f32 %v12783_v60, %v17682_v21 }
 0x8e4   : > { %v5639_v32 = vadd.f32 %v17682_v21, %v5638_v31  ;;  %13908 = vmatpush3.bf16.msra.mxu0 %v13907_v47  ;;  %v17786_v31 = vld [vmem:[%s19536_s9 + $0xa0] sm:$0xff] }
 0x8e5   : > { %v5863_v13 = vpop.f32.mrb[10].mxu1  ;;  %12966 = vmatprep.subr.mxu0 %v19570_v12 }
 0x8e6   : > { %v17700_v49 = vadd.f32 %v17695_v43, %v5863_v13  ;;  %v12786_v39 = vpop.f32.mrb[218].mxu0  ;;  %v12830_v25 = vpop.f32.mrb[11].mxu1 }
 0x8e7   : > { %v5648_v41 = vpop.f32.mrb[219].mxu0  ;;  %v5654_v5 = vadd.f32 %v12786_v39, %v17682_v21 }
 0x8e8   : > { %v5649_v19 = vadd.f32 %v17682_v21, %v5648_v41  ;;  %12967 = vmatpush3.msra.mxu0 %v5639_v32  ;;  %v6323_v9 = vsel %vm1697_vm4, %v17700_v49, -inf }
 0x8e9   : > { %6324 = vmax.xlane.f32.xlu0 %v6323_v9  ;;  %v5868_v54 = vpop.f32.mrb[12].mxu1  ;;  %13918 = vmatprep.subr.bf16.mxu0 %v19571_v26 }
 0x8ea   : > { %v13910_v58 = vpack.c.bf16 %v5649_v19, %v5644_v4  ;;  %v17713_v27 = vadd.f32 %v17705_v38, %v5868_v54  ;;  %v12789_v57 = vpop.f32.mrb[220].mxu0  ;;  %v12833_v51 = vpop.f32.mrb[13].mxu1 }
 0x8eb   : > { %v5658_v46 = vpop.f32.mrb[221].mxu0  ;;  %v5664_v34 = vadd.f32 %v12789_v57, %v17682_v21 }
 0x8ec   : > { %v5659_v15 = vadd.f32 %v17682_v21, %v5658_v46  ;;  %13911 = vmatpush3.bf16.msra.mxu1 %v13910_v58  ;;  %v6326_v1 = vsel %vm1697_vm4, %v17713_v27, -inf }
 0x8ed   : > { %6327 = vmax.xlane.f32.xlu1 %v6326_v1  ;;  %v5873_v7 = vpop.f32.mrb[14].mxu1  ;;  %13912 = vmatprep.subr.bf16.mxu1 %v19571_v26 }
 0x8ee   : > { %v13913_v55 = vpack.c.bf16 %v5659_v15, %v5654_v5  ;;  %v17726_v56 = vadd.f32 %v17718_v11, %v5873_v7  ;;  %v12792_v20 = vpop.f32.mrb[222].mxu0  ;;  %v12836_v53 = vpop.f32.mrb[15].mxu1 }
 0x8ef   : > { %v5668_v48 = vpop.f32.mrb[223].mxu0  ;;  %v5674_v61 = vadd.f32 %v12792_v20, %v17682_v21 }
 0x8f0   : > { %v5669_v2 = vadd.f32 %v17682_v21, %v5668_v48  ;;  %13914 = vmatpush3.bf16.msra.mxu1 %v13913_v55  ;;  %v6329_v10 = vsel %vm1697_vm4, %v17726_v56, -inf }
 0x8f1   : > { %6330 = vmax.xlane.f32.xlu0 %v6329_v10  ;;  %v5878_v42 = vpop.f32.mrb[16].mxu1  ;;  %13915 = vmatprep.subr.bf16.mxu1 %v19571_v26 }
 0x8f2   : > { %v13916_v30 = vpack.c.bf16 %v5669_v2, %v5664_v34  ;;  %v17739_v45 = vadd.f32 %v17731_v28, %v5878_v42  ;;  %v12839_v52 = vpop.f32.mrb[17].mxu1  ;;  %v12795_v17 = vpop.f32.mrb[224].mxu0 }
 0x8f3   : > { %v17742_v8 = vadd.f32 %v12795_v17, %v17682_v21  ;;  %v5678_v33 = vpop.f32.mrb[225].mxu0 }
 0x8f4   : > { %v17750_v22 = vadd.f32 %v17682_v21, %v5678_v33  ;;  %13917 = vmatpush3.bf16.msra.mxu1 %v13916_v30  ;;  %v6332_v35 = vsel %vm1697_vm4, %v17739_v45, -inf }
 0x8f5   : > { %6333 = vmax.xlane.f32.xlu1 %v6332_v35  ;;  %v5883_v0 = vpop.f32.mrb[18].mxu1  ;;  %13001 = vmatprep.subr.mxu1 %v19570_v12 }
 0x8f6   : > { %v13919_v29 = vpack.c.bf16 %v17742_v8, %v17750_v22  ;;  %v17759_v63 = vadd.f32 %v17747_v40, %v5883_v0  ;;  %v12842_v14 = vpop.f32.mrb[19].mxu1  ;;  %v12798_v37 = vpop.f32.mrb[226].mxu0 }
 0x8f7   : > { %v17762_v24 = vadd.f32 %v12798_v37, %v17682_v21  ;;  %v5688_v62 = vpop.f32.mrb[227].mxu0 }
 0x8f8   : > { %v17770_v44 = vadd.f32 %v17682_v21, %v5688_v62  ;;  %13002 = vmatpush3.msra.mxu1 %v5674_v61  ;;  %v6335_v23 = vsel %vm1697_vm4, %v17759_v63, -inf }
 0x8f9   : > { %6336 = vmax.xlane.f32.xlu1 %v6335_v23  ;;  %v5888_v3 = vpop.f32.mrb[20].mxu1  ;;  %13927 = vmatprep.subr.bf16.mxu1 %v19571_v26 }
 0x8fa   : > { %v13922_v36 = vpack.c.bf16 %v17762_v24, %v17770_v44  ;;  %v17778_v50 = vadd.f32 %v17767_v59, %v5888_v3  ;;  %v12845_v16 = vpop.f32.mrb[21].mxu1  ;;  %v12801_v18 = vpop.f32.mrb[228].mxu0 }
 0x8fb   : > { %v17781_v47 = vadd.f32 %v12801_v18, %v17682_v21  ;;  %v5698_v60 = vpop.f32.mrb[229].mxu0 }
 0x8fc   : > { %v17789_v32 = vadd.f32 %v17682_v21, %v5698_v60  ;;  %v6338_v13 = vsel %vm1697_vm4, %v17778_v50, -inf }
 0x8fd   : > { %6339 = vmax.xlane.f32.xlu1 %v6338_v13  ;;  %v5893_v39 = vpop.f32.mrb[22].mxu1 }
 0x8fe   : > { %v13925_v25 = vpack.c.bf16 %v17781_v47, %v17789_v32  ;;  %v17796_v41 = vadd.f32 %v17786_v31, %v5893_v39  ;;  %v12848_v4 = vpop.f32.mrb[23].mxu1  ;;  %v12804_v19 = vpop.f32.mrb[230].mxu0 }
 0x8ff   : > { %v17799_v9 = vadd.f32 %v12804_v19, %v17682_v21  ;;  %v5708_v54 = vpop.f32.mrb[231].mxu0 }
 0x900   : > { %v17802_v58 = vadd.f32 %v17682_v21, %v5708_v54  ;;  %v6341_v57 = vsel %vm1697_vm4, %v17796_v41, -inf }
 0x901   : > { %6342 = vmax.xlane.f32.xlu1 %v6341_v57  ;;  %v6005_v51 = vpop.f32.mrb[24].mxu1 }
 0x902   : > { %v17807_v46 = vadd.f32 %v17695_v43, %v6005_v51  ;;  %v12807_v5 = vpop.f32.mrb[232].mxu0  ;;  %v12865_v15 = vpop.f32.mrb[25].mxu1 }
 0x903   : > { %v17810_v1 = vadd.f32 %v12807_v5, %v17682_v21  ;;  %v5718_v7 = vpop.f32.mrb[233].mxu0 }
 0x904   : > { %v17813_v55 = vadd.f32 %v17682_v21, %v5718_v7  ;;  %v6344_v20 = vsel %vm1697_vm4, %v17807_v46, -inf }
 0x905   : > { %6345 = vmax.xlane.f32.xlu0 %v6344_v20  ;;  %v6010_v53 = vpop.f32.mrb[26].mxu1 }
 0x906   : > { %v13928_v48 = vpack.c.bf16 %v17813_v55, %v17799_v9  ;;  %v17820_v34 = vadd.f32 %v17705_v38, %v6010_v53  ;;  %v12810_v2 = vpop.f32.mrb[234].mxu0  ;;  %v12868_v10 = vpop.f32.mrb[27].mxu1 }
 0x907   : > { %v17823_v42 = vadd.f32 %v12810_v2, %v17682_v21  ;;  %v5728_v30 = vpop.f32.mrb[235].mxu0 }
 0x908   : > { %v17826_v52 = vadd.f32 %v17682_v21, %v5728_v30  ;;  %v6347_v17 = vsel %vm1697_vm4, %v17820_v34, -inf }
 0x909   : > { %6348 = vmax.xlane.f32.xlu0 %v6347_v17  ;;  %v6015_v33 = vpop.f32.mrb[28].mxu1 }
 0x90a   : > { %v13931_v35 = vpack.c.bf16 %v17826_v52, %v17810_v1  ;;  %v17833_v0 = vadd.f32 %v17718_v11, %v6015_v33  ;;  %v12813_v61 = vpop.f32.mrb[236].mxu0  ;;  %v12871_v14 = vpop.f32.mrb[29].mxu1 }
 0x90b   : > { %v17836_v37 = vadd.f32 %v12813_v61, %v17682_v21  ;;  %v5738_v62 = vpop.f32.mrb[237].mxu0 }
 0x90c   : > { %v17839_v23 = vadd.f32 %v17682_v21, %v5738_v62  ;;  %v6350_v3 = vsel %vm1697_vm4, %v17833_v0, -inf }
 0x90d   : > { %6351 = vmax.xlane.f32.xlu0 %v6350_v3  ;;  %v6020_v16 = vpop.f32.mrb[30].mxu1 }
 0x90e   : > { %v17846_v60 = vadd.f32 %v17731_v28, %v6020_v16  ;;  %v12874_v13 = vpop.f32.mrb[31].mxu1  ;;  %v6147_v39 = vpop.f32.mrb[238].mxu0 }
 0x90f   : > { %v17849_v4 = vadd.f32 %v17695_v43, %v6147_v39  ;;  %v12900_v19 = vpop.f32.mrb[239].mxu0 }
 0x910   : > { %v6353_v21 = vsel %vm1697_vm4, %v17846_v60, -inf }
 0x911   : > { %6354 = vmax.xlane.f32.xlu0 %v6353_v21  ;;  %v6025_v54 = vpop.f32.mrb[32].mxu1  ;;  %v6365_v57 = vsel %vm1697_vm4, %v17849_v4, -inf }
 0x912   : > { %v17856_v51 = vadd.f32 %v17747_v40, %v6025_v54  ;;  %v6152_v5 = vpop.f32.mrb[240].mxu0  ;;  %6366 = vmax.xlane.f32.xlu1 %v6365_v57  ;;  %v12877_v15 = vpop.f32.mrb[33].mxu1 }
 0x913   : > { %v17859_v7 = vadd.f32 %v17705_v38, %v6152_v5  ;;  %v12903_v20 = vpop.f32.mrb[241].mxu0 }
 0x914   : > { %v6356_v53 = vsel %vm1697_vm4, %v17856_v51, -inf }
 0x915   : > { %6357 = vmax.xlane.f32.xlu0 %v6356_v53  ;;  %v6030_v2 = vpop.f32.mrb[34].mxu1  ;;  %v6368_v10 = vsel %vm1697_vm4, %v17859_v7, -inf }
 0x916   : > { %v17866_v30 = vadd.f32 %v17767_v59, %v6030_v2  ;;  %v6157_v17 = vpop.f32.mrb[242].mxu0  ;;  %6369 = vmax.xlane.f32.xlu1 %v6368_v10  ;;  %v12880_v33 = vpop.f32.mrb[35].mxu1 }
 0x917   : > { %v17869_v61 = vadd.f32 %v17718_v11, %v6157_v17  ;;  %v12906_v14 = vpop.f32.mrb[243].mxu0 }
 0x918   : > { %v6359_v62 = vsel %vm1697_vm4, %v17866_v30, -inf }
 0x919   : > { %6360 = vmax.xlane.f32.xlu0 %v6359_v62  ;;  %v6035_v3 = vpop.f32.mrb[36].mxu1  ;;  %v6371_v16 = vsel %vm1697_vm4, %v17869_v61, -inf }
 0x91a   : > { %v17876_v13 = vadd.f32 %v17786_v31, %v6035_v3  ;;  %v6162_v39 = vpop.f32.mrb[244].mxu0  ;;  %6372 = vmax.xlane.f32.xlu1 %v6371_v16  ;;  %v12883_v19 = vpop.f32.mrb[37].mxu1 }
 0x91b   : > { %v17879_v21 = vadd.f32 %v17731_v28, %v6162_v39  ;;  %v12909_v54 = vpop.f32.mrb[245].mxu0 }
 0x91c   : > { %v6362_v57 = vsel %vm1697_vm4, %v17876_v13, -inf }
 0x91d   : > { %6363 = vmax.xlane.f32.xlu0 %v6362_v57  ;;  %v6289_v5 = vpop.f32.mrb[38].mxu1  ;;  %v6374_v15 = vsel %vm1697_vm4, %v17879_v21, -inf }
 0x91e   : > { %v17886_v20 = vadd.f32 %v17695_v43, %v6289_v5  ;;  %v6167_v53 = vpop.f32.mrb[246].mxu0  ;;  %6375 = vmax.xlane.f32.xlu1 %v6374_v15  ;;  %v12935_v2 = vpop.f32.mrb[39].mxu1 }
 0x91f   : > { %v17889_v10 = vadd.f32 %v17747_v40, %v6167_v53  ;;  %v12912_v17 = vpop.f32.mrb[247].mxu0 }
 0x920   : > { %v6386_v33 = vsel %vm1697_vm4, %v17886_v20, -inf }
 0x921   : > { %6387 = vmax.xlane.f32.xlu0 %v6386_v33  ;;  %v6294_v14 = vpop.f32.mrb[40].mxu1  ;;  %v6377_v62 = vsel %vm1697_vm4, %v17889_v10, -inf }
 0x922   : > { %v17896_v3 = vadd.f32 %v17705_v38, %v6294_v14  ;;  %v6172_v43 = vpop.f32.mrb[248].mxu0  ;;  %6378 = vmax.xlane.f32.xlu1 %v6377_v62  ;;  %v12938_v16 = vpop.f32.mrb[41].mxu1 }
 0x923   : > { %v17899_v39 = vadd.f32 %v17767_v59, %v6172_v43  ;;  %v12915_v19 = vpop.f32.mrb[249].mxu0 }
 0x924   : > { %v6389_v54 = vsel %vm1697_vm4, %v17896_v3, -inf }
 0x925   : > { %6390 = vmax.xlane.f32.xlu0 %v6389_v54  ;;  %v6299_v57 = vpop.f32.mrb[42].mxu1  ;;  %v6380_v5 = vsel %vm1697_vm4, %v17899_v39, -inf }
 0x926   : > { %v17906_v15 = vadd.f32 %v17718_v11, %v6299_v57  ;;  %v6177_v38 = vpop.f32.mrb[250].mxu0  ;;  %6381 = vmax.xlane.f32.xlu1 %v6380_v5  ;;  %v12941_v53 = vpop.f32.mrb[43].mxu1 }
 0x927   : > { %v17909_v2 = vadd.f32 %v17786_v31, %v6177_v38  ;;  %v12918_v17 = vpop.f32.mrb[251].mxu0 }
 0x928   : > { %v6392_v33 = vsel %vm1697_vm4, %v17906_v15, -inf }
 0x929   : > { %6393 = vmax.xlane.f32.xlu0 %v6392_v33  ;;  %v6304_v14 = vpop.f32.mrb[44].mxu1  ;;  %v6383_v62 = vsel %vm1697_vm4, %v17909_v2, -inf }
 0x92a   : > { %v17916_v43 = vadd.f32 %v17731_v28, %v6304_v14  ;;  %6384 = vmax.xlane.f32.xlu1 %v6383_v62  ;;  %v12944_v11 = vpop.f32.mrb[45].mxu1 }
 0x92c   : > { %v6395_v16 = vsel %vm1697_vm4, %v17916_v43, -inf }
 0x92d   : > { %6396 = vmax.xlane.f32.xlu0 %v6395_v16  ;;  %v6309_v19 = vpop.f32.mrb[46].mxu1 }
 0x92e   : > { %v17921_v54 = vadd.f32 %v17747_v40, %v6309_v19  ;;  %v12947_v57 = vpop.f32.mrb[47].mxu1 }
 0x930   : > { %v6398_v5 = vsel %vm1697_vm4, %v17921_v54, -inf }
 0x931   : > { %6399 = vmax.xlane.f32.xlu1 %v6398_v5  ;;  %v6314_v38 = vpop.f32.mrb[48].mxu1 }
 0x932   : > { %v17926_v53 = vadd.f32 %v17767_v59, %v6314_v38  ;;  %v12950_v28 = vpop.f32.mrb[49].mxu1 }
 0x934   : > { %v6401_v17 = vsel %vm1697_vm4, %v17926_v53, -inf }
 0x935   : > { %6402 = vmax.xlane.f32.xlu0 %v6401_v17  ;;  %v6319_v33 = vpop.f32.mrb[50].mxu1 }
 0x936   : > { %v17931_v14 = vadd.f32 %v17786_v31, %v6319_v33  ;;  %v12953_v40 = vpop.f32.mrb[51].mxu1 }
 0x938   : > { %v6404_v62 = vsel %vm1697_vm4, %v17931_v14, -inf }
 0x939   : > { %6405 = vmax.xlane.f32.xlu1 %v6404_v62 }
 0x976   : > { %v6325_v11 = vpop.xlane.xlu0 %6324 }
 0x977   : > { %v6407_v16 = vsub.f32 %v17700_v49, %v6325_v11 }
 0x979   : > { %v6435_v19 = vmul.f32 1.442695, %v6407_v16 }
 0x97a   : > { %v6328_v59 = vpop.xlane.xlu1 %6327 }
 0x97b   : > { %14368 = vpow2.f32 %v6435_v19  ;;  %v6408_v57 = vsub.f32 %v17713_v27, %v6328_v59 }
 0x97d   : > { %v6437_v5 = vmul.f32 1.442695, %v6408_v57 }
 0x97e   : > { %v6331_v38 = vpop.xlane.xlu0 %6330 }
 0x97f   : > { %14370 = vpow2.f32 %v6437_v5  ;;  %v6409_v28 = vsub.f32 %v17726_v56, %v6331_v38 }
 0x981   : > { %v6439_v31 = vmul.f32 1.442695, %v6409_v28 }
 0x982   : > { %v6334_v17 = vpop.xlane.xlu1 %6333 }
 0x983   : > { %14372 = vpow2.f32 %v6439_v31  ;;  %v6410_v33 = vsub.f32 %v17739_v45, %v6334_v17 }
 0x985   : > { %v17939_v40 = vpop.eup %14368  ;;  %v6441_v62 = vmul.f32 1.442695, %v6410_v33 }
 0x986   : > { %v6337_v18 = vpop.xlane.xlu1 %6336  ;;  %v6491_v49 = vsel %vm1697_vm4, %v17939_v40, 0.0 }
 0x987   : > { %14374 = vpow2.f32 %v6441_v62  ;;  %v6411_v27 = vsub.f32 %v17759_v63, %v6337_v18  ;;  %6492 = vadd.xlane.f32.xlu0 %v6491_v49 }
 0x989   : > { %v17944_v11 = vpop.eup %14370  ;;  %v6443_v16 = vmul.f32 1.442695, %v6411_v27 }
 0x98a   : > { %v6340_v56 = vpop.xlane.xlu1 %6339  ;;  %v6494_v19 = vsel %vm1697_vm4, %v17944_v11, 0.0 }
 0x98b   : > { %14376 = vpow2.f32 %v6443_v16  ;;  %v6412_v45 = vsub.f32 %v17778_v50, %v6340_v56  ;;  %6495 = vadd.xlane.f32.xlu1 %v6494_v19 }
 0x98d   : > { %v17949_v59 = vpop.eup %14372  ;;  %v6445_v57 = vmul.f32 1.442695, %v6412_v45 }
 0x98e   : > { %v6343_v5 = vpop.xlane.xlu1 %6342  ;;  %v6497_v38 = vsel %vm1697_vm4, %v17949_v59, 0.0 }
 0x98f   : > { %14378 = vpow2.f32 %v6445_v57  ;;  %v6413_v63 = vsub.f32 %v17796_v41, %v6343_v5  ;;  %6498 = vadd.xlane.f32.xlu0 %v6497_v38 }
 0x991   : > { %v17954_v18 = vpop.eup %14374  ;;  %v6447_v28 = vmul.f32 1.442695, %v6413_v63 }
 0x992   : > { %v6346_v31 = vpop.xlane.xlu0 %6345  ;;  %v6500_v17 = vsel %vm1697_vm4, %v17954_v18, 0.0 }
 0x993   : > { %14380 = vpow2.f32 %v6447_v28  ;;  %v6414_v50 = vsub.f32 %v17807_v46, %v6346_v31  ;;  %6501 = vadd.xlane.f32.xlu1 %v6500_v17 }
 0x995   : > { %v17959_v33 = vpop.eup %14376  ;;  %v6449_v62 = vmul.f32 1.442695, %v6414_v50 }
 0x996   : > { %v6349_v49 = vpop.xlane.xlu0 %6348  ;;  %v6503_v27 = vsel %vm1697_vm4, %v17959_v33, 0.0 }
 0x997   : > { %14382 = vpow2.f32 %v6449_v62  ;;  %v6415_v41 = vsub.f32 %v17820_v34, %v6349_v49  ;;  %6504 = vadd.xlane.f32.xlu1 %v6503_v27 }
 0x999   : > { %v17964_v16 = vpop.eup %14378  ;;  %v6451_v56 = vmul.f32 1.442695, %v6415_v41 }
 0x99a   : > { %v6352_v19 = vpop.xlane.xlu0 %6351  ;;  %v6506_v45 = vsel %vm1697_vm4, %v17964_v16, 0.0 }
 0x99b   : > { %14384 = vpow2.f32 %v6451_v56  ;;  %v6416_v46 = vsub.f32 %v17833_v0, %v6352_v19  ;;  %6507 = vadd.xlane.f32.xlu1 %v6506_v45 }
 0x99d   : > { %v17969_v57 = vpop.eup %14380  ;;  %v6453_v5 = vmul.f32 1.442695, %v6416_v46 }
 0x99e   : > { %v6355_v38 = vpop.xlane.xlu0 %6354  ;;  %v6509_v63 = vsel %vm1697_vm4, %v17969_v57, 0.0 }
 0x99f   : > { %14386 = vpow2.f32 %v6453_v5  ;;  %v6417_v34 = vsub.f32 %v17846_v60, %v6355_v38  ;;  %v6367_v28 = vpop.xlane.xlu1 %6366  ;;  %6510 = vadd.xlane.f32.xlu1 %v6509_v63 }
 0x9a0   : > { %v6421_v31 = vsub.f32 %v17849_v4, %v6367_v28 }
 0x9a1   : > { %v17975_v17 = vpop.eup %14382  ;;  %v6455_v50 = vmul.f32 1.442695, %v6417_v34 }
 0x9a2   : > { %v6463_v62 = vmul.f32 1.442695, %v6421_v31  ;;  %v6358_v0 = vpop.xlane.xlu0 %6357  ;;  %v6512_v49 = vsel %vm1697_vm4, %v17975_v17, 0.0 }
 0x9a3   : > { %14388 = vpow2.f32 %v6455_v50  ;;  %v6418_v27 = vsub.f32 %v17856_v51, %v6358_v0  ;;  %v6370_v41 = vpop.xlane.xlu1 %6369  ;;  %6513 = vadd.xlane.f32.xlu0 %v6512_v49 }
 0x9a4   : > { %14390 = vpow2.f32 %v6463_v62  ;;  %v6422_v60 = vsub.f32 %v17859_v7, %v6370_v41 }
 0x9a5   : > { %v17981_v56 = vpop.eup %14384  ;;  %v6457_v19 = vmul.f32 1.442695, %v6418_v27 }
 0x9a6   : > { %v6465_v4 = vmul.f32 1.442695, %v6422_v60  ;;  %v6361_v45 = vpop.xlane.xlu0 %6360  ;;  %v6515_v46 = vsel %vm1697_vm4, %v17981_v56, 0.0 }
 0x9a7   : > { %14392 = vpow2.f32 %v6457_v19  ;;  %v6419_v5 = vsub.f32 %v17866_v30, %v6361_v45  ;;  %v6373_v38 = vpop.xlane.xlu1 %6372  ;;  %6516 = vadd.xlane.f32.xlu0 %v6515_v46 }
 0x9a8   : > { %14394 = vpow2.f32 %v6465_v4  ;;  %v6423_v51 = vsub.f32 %v17869_v61, %v6373_v38 }
 0x9a9   : > { %v17987_v63 = vpop.eup %14386  ;;  %v6459_v34 = vmul.f32 1.442695, %v6419_v5 }
 0x9aa   : > { %v6467_v7 = vmul.f32 1.442695, %v6423_v51  ;;  %v6364_v28 = vpop.xlane.xlu0 %6363  ;;  %v6518_v31 = vsel %vm1697_vm4, %v17987_v63, 0.0 }
 0x9ab   : > { %14396 = vpow2.f32 %v6459_v34  ;;  %v6420_v50 = vsub.f32 %v17876_v13, %v6364_v28  ;;  %v6376_v62 = vpop.xlane.xlu1 %6375  ;;  %6519 = vadd.xlane.f32.xlu0 %v6518_v31 }
 0x9ac   : > { %14398 = vpow2.f32 %v6467_v7  ;;  %v6424_v30 = vsub.f32 %v17879_v21, %v6376_v62 }
 0x9ad   : > { %v17993_v0 = vpop.eup %14388  ;;  %v6461_v49 = vmul.f32 1.442695, %v6420_v50 }
 0x9ae   : > { %v17995_v61 = vpop.eup %14390  ;;  %v6469_v27 = vmul.f32 1.442695, %v6424_v30  ;;  %v6388_v41 = vpop.xlane.xlu0 %6387  ;;  %v6521_v60 = vsel %vm1697_vm4, %v17993_v0, 0.0 }
 0x9af   : > { %14400 = vpow2.f32 %v6461_v49  ;;  %v6428_v19 = vsub.f32 %v17886_v20, %v6388_v41  ;;  %v6379_v4 = vpop.xlane.xlu1 %6378  ;;  %6522 = vadd.xlane.f32.xlu0 %v6521_v60  ;;  %v6533_v13 = vsel %vm1697_vm4, %v17995_v61, 0.0 }
 0x9b0   : > { %14402 = vpow2.f32 %v6469_v27  ;;  %v6425_v21 = vsub.f32 %v17889_v10, %v6379_v4  ;;  %6534 = vadd.xlane.f32.xlu1 %v6533_v13 }
 0x9b1   : > { %v18003_v45 = vpop.eup %14392  ;;  %v6477_v46 = vmul.f32 1.442695, %v6428_v19 }
 0x9b2   : > { %v18005_v5 = vpop.eup %14394  ;;  %v6471_v38 = vmul.f32 1.442695, %v6425_v21  ;;  %v6391_v51 = vpop.xlane.xlu0 %6390  ;;  %v6524_v34 = vsel %vm1697_vm4, %v18003_v45, 0.0 }
 0x9b3   : > { %14404 = vpow2.f32 %v6477_v46  ;;  %v6429_v20 = vsub.f32 %v17896_v3, %v6391_v51  ;;  %v6382_v7 = vpop.xlane.xlu1 %6381  ;;  %6525 = vadd.xlane.f32.xlu0 %v6524_v34  ;;  %v6536_v28 = vsel %vm1697_vm4, %v18005_v5, 0.0 }
 0x9b4   : > { %14406 = vpow2.f32 %v6471_v38  ;;  %v6426_v10 = vsub.f32 %v17899_v39, %v6382_v7  ;;  %6537 = vadd.xlane.f32.xlu1 %v6536_v28 }
 0x9b5   : > { %v18013_v31 = vpop.eup %14396  ;;  %v6479_v50 = vmul.f32 1.442695, %v6429_v20 }
 0x9b6   : > { %v18015_v62 = vpop.eup %14398  ;;  %v6473_v30 = vmul.f32 1.442695, %v6426_v10  ;;  %v6394_v49 = vpop.xlane.xlu0 %6393  ;;  %v6527_v27 = vsel %vm1697_vm4, %v18013_v31, 0.0 }
 0x9b7   : > { %14408 = vpow2.f32 %v6479_v50  ;;  %v6430_v3 = vsub.f32 %v17906_v15, %v6394_v49  ;;  %v6385_v41 = vpop.xlane.xlu1 %6384  ;;  %6528 = vadd.xlane.f32.xlu0 %v6527_v27  ;;  %v6539_v60 = vsel %vm1697_vm4, %v18015_v62, 0.0 }
 0x9b8   : > { %14410 = vpow2.f32 %v6473_v30  ;;  %v6427_v39 = vsub.f32 %v17909_v2, %v6385_v41  ;;  %6540 = vadd.xlane.f32.xlu1 %v6539_v60 }
 0x9b9   : > { %v18023_v19 = vpop.eup %14400  ;;  %v6481_v4 = vmul.f32 1.442695, %v6430_v3 }
 0x9ba   : > { %v18025_v13 = vpop.eup %14402  ;;  %v6475_v21 = vmul.f32 1.442695, %v6427_v39  ;;  %v6397_v46 = vpop.xlane.xlu0 %6396  ;;  %v6530_v38 = vsel %vm1697_vm4, %v18023_v19, 0.0 }
 0x9bb   : > { %14412 = vpow2.f32 %v6481_v4  ;;  %v6431_v15 = vsub.f32 %v17916_v43, %v6397_v46  ;;  %6531 = vadd.xlane.f32.xlu0 %v6530_v38  ;;  %v6542_v51 = vsel %vm1697_vm4, %v18025_v13, 0.0 }
 0x9bc   : > { %14414 = vpow2.f32 %v6475_v21  ;;  %6543 = vadd.xlane.f32.xlu1 %v6542_v51 }
 0x9bd   : > { %v18032_v2 = vpop.eup %14404  ;;  %v6483_v34 = vmul.f32 1.442695, %v6431_v15 }
 0x9be   : > { %v18034_v20 = vpop.eup %14406  ;;  %v6400_v7 = vpop.xlane.xlu1 %6399  ;;  %v6554_v28 = vsel %vm1697_vm4, %v18032_v2, 0.0 }
 0x9bf   : > { %14416 = vpow2.f32 %v6483_v34  ;;  %v6432_v10 = vsub.f32 %v17921_v54, %v6400_v7  ;;  %6555 = vadd.xlane.f32.xlu0 %v6554_v28  ;;  %v6545_v43 = vsel %vm1697_vm4, %v18034_v20, 0.0 }
 0x9c0   : > { %6546 = vadd.xlane.f32.xlu1 %v6545_v43 }
 0x9c1   : > { %v18041_v50 = vpop.eup %14408  ;;  %v6485_v30 = vmul.f32 1.442695, %v6432_v10 }
 0x9c2   : > { %v18043_v49 = vpop.eup %14410  ;;  %v6403_v27 = vpop.xlane.xlu0 %6402  ;;  %v6557_v3 = vsel %vm1697_vm4, %v18041_v50, 0.0 }
 0x9c3   : > { %14418 = vpow2.f32 %v6485_v30  ;;  %v6433_v41 = vsub.f32 %v17926_v53, %v6403_v27  ;;  %6558 = vadd.xlane.f32.xlu0 %v6557_v3  ;;  %v6548_v54 = vsel %vm1697_vm4, %v18043_v49, 0.0 }
 0x9c4   : > { %6549 = vadd.xlane.f32.xlu1 %v6548_v54 }
 0x9c5   : > { %v18050_v60 = vpop.eup %14412  ;;  %v6487_v39 = vmul.f32 1.442695, %v6433_v41 }
 0x9c6   : > { %v18052_v4 = vpop.eup %14414  ;;  %v6406_v21 = vpop.xlane.xlu1 %6405  ;;  %v6560_v46 = vsel %vm1697_vm4, %v18050_v60, 0.0 }
 0x9c7   : > { %14420 = vpow2.f32 %v6487_v39  ;;  %v6434_v38 = vsub.f32 %v17931_v14, %v6406_v21  ;;  %6561 = vadd.xlane.f32.xlu0 %v6560_v46  ;;  %v6551_v53 = vsel %vm1697_vm4, %v18052_v4, 0.0 }
 0x9c8   : > { %6552 = vadd.xlane.f32.xlu1 %v6551_v53 }
 0x9c9   : > { %v18059_v15 = vpop.eup %14416  ;;  %v6489_v51 = vmul.f32 1.442695, %v6434_v38 }
 0x9ca   : > { %v6563_v34 = vsel %vm1697_vm4, %v18059_v15, 0.0 }
 0x9cb   : > { %14422 = vpow2.f32 %v6489_v51  ;;  %6564 = vadd.xlane.f32.xlu0 %v6563_v34 }
 0x9cd   : > { %v18063_v7 = vpop.eup %14418 }
 0x9ce   : > { %v6566_v28 = vsel %vm1697_vm4, %v18063_v7, 0.0 }
 0x9cf   : > { %6567 = vadd.xlane.f32.xlu1 %v6566_v28 }
 0x9d1   : > { %v18067_v14 = vpop.eup %14420 }
 0x9d2   : > { %v6569_v10 = vsel %vm1697_vm4, %v18067_v14, 0.0 }
 0x9d3   : > { %6570 = vadd.xlane.f32.xlu0 %v6569_v10 }
 0x9d5   : > { %v18071_v43 = vpop.eup %14422 }
 0x9d6   : > { %v6572_v30 = vsel %vm1697_vm4, %v18071_v43, 0.0 }
 0x9d7   : > { %6573 = vadd.xlane.f32.xlu1 %v6572_v30 }
 0xa14   : > { %v6493_v27 = vpop.xlane.xlu0 %6492 }
 0xa15   : > { %14424 = vrcp.f32 %v6493_v27 }
 0xa18   : > { %v6496_v3 = vpop.xlane.xlu1 %6495 }
 0xa19   : > { %14426 = vrcp.f32 %v6496_v3  ;;  %v19620_v3 = vpack.c.bf16 %v17839_v23, %v17823_v42 }
 0xa1c   : > { %v6499_v41 = vpop.xlane.xlu0 %6498 }
 0xa1d   : > { %14428 = vrcp.f32 %v6499_v41 }
 0xa1f   : > { %v14425_v54 = vpop.eup %14424 }
 0xa20   : > { %v6603_v39 = vmul.f32 %v14425_v54, %v17939_v40  ;;  %v6502_v21 = vpop.xlane.xlu1 %6501 }
 0xa21   : > { %14430 = vrcp.f32 %v6502_v21 }
 0xa22   : > { %12969 = vmatmul.mubr.msk.f32.vlgmr.msra.gmra.mrb[252].mxu0 %vm1697_vm4, %v6603_v39 }
 0xa23   : > { %v14427_v46 = vpop.eup %14426  ;;  %13920 = vmatpush3.bf16.msra.mxu0 %v13919_v29  ;;  %12971 = vmatprep.mubr.msk.f32.mxu0 %vm14686_vm1, %v19570_v12 }
 0xa24   : > { %v6505_v38 = vpop.xlane.xlu1 %6504  ;;  %13921 = vmatprep.subr.bf16.mxu0 %v19571_v26  ;;  %v6604_v53 = vmul.f32 %v14427_v46, %v17944_v11 }
 0xa25   : > { %14432 = vrcp.f32 %v6505_v38 }
 0xa26   : > { %12972 = vmatmul.mubr.msk.f32.gmra.mrb[254].mxu0 %vm1697_vm4, %v6604_v53 }
 0xa27   : > { %v14429_v40 = vpop.eup %14428  ;;  %13923 = vmatpush3.bf16.msra.mxu0 %v13922_v36  ;;  %12974 = vmatprep.mubr.msk.f32.mxu0 %vm14686_vm1, %v19570_v12 }
 0xa28   : > { %v6605_v8 = vmul.f32 %v14429_v40, %v17949_v59  ;;  %v6508_v22 = vpop.xlane.xlu1 %6507  ;;  %13924 = vmatprep.subr.bf16.mxu0 %v19571_v26 }
 0xa29   : > { %14434 = vrcp.f32 %v6508_v22 }
 0xa2a   : > { %12975 = vmatmul.mubr.msk.f32.gmra.mrb[0].mxu0 %vm1697_vm4, %v6605_v8 }
 0xa2b   : > { %v14431_v29 = vpop.eup %14430  ;;  %13926 = vmatpush3.bf16.msra.mxu0 %v13925_v25  ;;  %12977 = vmatprep.mubr.msk.f32.mxu0 %vm14686_vm1, %v19570_v12 }
 0xa2c   : > { %v6606_v24 = vmul.f32 %v14431_v29, %v17954_v18  ;;  %v6511_v44 = vpop.xlane.xlu1 %6510  ;;  %13036 = vmatprep.subr.mxu0 %v19570_v12 }
 0xa2d   : > { %14436 = vrcp.f32 %v6511_v44 }
 0xa2e   : > { %12978 = vmatmul.mubr.msk.f32.gmra.mrb[2].mxu0 %vm1697_vm4, %v6606_v24 }
 0xa2f   : > { %v14433_v36 = vpop.eup %14432  ;;  %13037 = vmatpush3.msra.mxu0 %v17802_v58  ;;  %12980 = vmatprep.mubr.msk.f32.mxu0 %vm14686_vm1, %v19570_v12 }
 0xa30   : > { %v6607_v47 = vmul.f32 %v14433_v36, %v17959_v33  ;;  %v6514_v32 = vpop.xlane.xlu0 %6513 }
 0xa31   : > { %14438 = vrcp.f32 %v6514_v32 }
 0xa32   : > { %12981 = vmatmul.mubr.msk.f32.gmra.mrb[4].mxu0 %vm1697_vm4, %v6607_v47 }
 0xa33   : > { %v14435_v25 = vpop.eup %14434  ;;  %12983 = vmatprep.mubr.msk.f32.mxu0 %vm14686_vm1, %v19570_v12 }
 0xa34   : > { %v6608_v11 = vmul.f32 %v14435_v25, %v17964_v16  ;;  %v6517_v59 = vpop.xlane.xlu0 %6516 }
 0xa35   : > { %14440 = vrcp.f32 %v6517_v59 }
 0xa36   : > { %12984 = vmatmul.mubr.msk.f32.gmra.mrb[6].mxu0 %vm1697_vm4, %v6608_v11 }
 0xa37   : > { %v14437_v58 = vpop.eup %14436  ;;  %12986 = vmatprep.mubr.msk.f32.mxu0 %vm14686_vm1, %v19570_v12 }
 0xa38   : > { %v6609_v18 = vmul.f32 %v14437_v58, %v17969_v57  ;;  %v6520_v33 = vpop.xlane.xlu0 %6519 }
 0xa39   : > { %14442 = vrcp.f32 %v6520_v33 }
 0xa3a   : > { %12987 = vmatmul.mubr.msk.f32.gmra.mrb[8].mxu0 %vm1697_vm4, %v6609_v18 }
 0xa3b   : > { %v14439_v51 = vpop.eup %14438  ;;  %13038 = vmatprep.mubr.msk.f32.mxu0 %vm14686_vm1, %v19570_v12 }
 0xa3c   : > { %v6610_v16 = vmul.f32 %v14439_v51, %v17975_v17  ;;  %v6523_v34 = vpop.xlane.xlu0 %6522 }
 0xa3d   : > { %14444 = vrcp.f32 %v6523_v34  ;;  %v6535_v28 = vpop.xlane.xlu1 %6534 }
 0xa3e   : > { %14446 = vrcp.f32 %v6535_v28  ;;  %13004 = vmatmul.mubr.msk.f32.vlgmr.msra.gmra.mrb[52].mxu1 %vm1697_vm4, %v6610_v16  ;;  %v18210_v28 = vld [vmem:[%s14777_s30] sm:$0xff] }
 0xa3f   : > { %v14441_v10 = vpop.eup %14440  ;;  %13929 = vmatpush3.bf16.msra.mxu1 %v13928_v48  ;;  %13006 = vmatprep.mubr.msk.f32.mxu1 %vm14686_vm1, %v19570_v12 }
 0xa40   : > { %v6611_v57 = vmul.f32 %v14441_v10, %v17981_v56  ;;  %v6526_v30 = vpop.xlane.xlu0 %6525  ;;  %13930 = vmatprep.subr.bf16.mxu1 %v19571_v26 }
 0xa41   : > { %14448 = vrcp.f32 %v6526_v30  ;;  %v6538_v17 = vpop.xlane.xlu1 %6537  ;;  %v10544_v30 = vld [vmem:[%s19528_s1 + $0x68] sm:$0xff] }
 0xa42   : > { %14450 = vrcp.f32 %v6538_v17  ;;  %13007 = vmatmul.mubr.msk.f32.gmra.mrb[54].mxu1 %vm1697_vm4, %v6611_v57  ;;  %v10543_v57 = vld [vmem:[%s19528_s1 + $0x60] sm:$0xff] }
 0xa43   : > { %v14443_v27 = vpop.eup %14442  ;;  %13932 = vmatpush3.bf16.msra.mxu1 %v13931_v35  ;;  %13009 = vmatprep.mubr.msk.f32.mxu1 %vm14686_vm1, %v19570_v12  ;;  %v13936_v17 = vpack.c.bf16 %v10544_v30, %v10543_v57  ;;  %v18396_v30 = vld [vmem:[%s14777_s30 + $0xd8] sm:$0xff] }
 0xa44   : > { %v6612_v9 = vmul.f32 %v14443_v27, %v17987_v63  ;;  %v6529_v55 = vpop.xlane.xlu0 %6528  ;;  %13933 = vmatprep.subr.bf16.mxu1 %v19571_v26  ;;  %v10545_v27 = vld [vmem:[%s19528_s1 + $0x70] sm:$0xff] }
 0xa45   : > { %14452 = vrcp.f32 %v6529_v55  ;;  %v6541_v48 = vpop.xlane.xlu1 %6540 }
 0xa46   : > { %14454 = vrcp.f32 %v6541_v48  ;;  %13010 = vmatmul.mubr.msk.f32.gmra.mrb[56].mxu1 %vm1697_vm4, %v6612_v9  ;;  %v10546_v9 = vld [vmem:[%s19528_s1 + $0x78] sm:$0xff]  ;;  %v18236_v48 = vld [vmem:[%s14777_s30 + $0x8] sm:$0xff] }
 0xa47   : > { %v14445_v56 = vpop.eup %14444  ;;  %13935 = vmatpush3.bf16.msra.mxu1 %v19620_v3  ;;  %13012 = vmatprep.mubr.msk.f32.mxu1 %vm14686_vm1, %v19570_v12  ;;  %v13940_v55 = vpack.c.bf16 %v10546_v9, %v10545_v27  ;;  %v18246_v3 = vld [vmem:[%s14777_s30 + $0x18] sm:$0xff] }
 0xa48   : > { %v14447_v1 = vpop.eup %14446  ;;  %v6613_v52 = vmul.f32 %v14445_v56, %v17993_v0  ;;  %v6532_v35 = vpop.xlane.xlu0 %6531  ;;  %13071 = vmatprep.subr.mxu1 %v19570_v12  ;;  %v18241_v56 = vld [vmem:[%s14777_s30 + $0x10] sm:$0xff] }
 0xa49   : > { %v6617_v63 = vmul.f32 %v14447_v1, %v17995_v61  ;;  %14456 = vrcp.f32 %v6532_v35  ;;  %v6544_v41 = vpop.xlane.xlu1 %6543  ;;  %v18251_v1 = vld [vmem:[%s14777_s30 + $0x20] sm:$0xff]  ;;  %v18261_v35 = vld [vmem:[%s14777_s30 + $0x30] sm:$0xff] }
 0xa4a   : > { %14458 = vrcp.f32 %v6544_v41  ;;  %13013 = vmatmul.mubr.msk.f32.gmra.mrb[58].mxu1 %vm1697_vm4, %v6613_v52  ;;  %v18256_v52 = vld [vmem:[%s14777_s30 + $0x28] sm:$0xff] }
 0xa4b   : > { %v14449_v54 = vpop.eup %14448  ;;  %13072 = vmatpush3.msra.mxu1 %v17836_v37  ;;  %13039 = vmatmul.mubr.msk.f32.vlgmr.msra.gmra.mrb[10].mxu0 %vm1697_vm4, %v6617_v63  ;;  %v18266_v63 = vld [vmem:[%s14777_s30 + $0x38] sm:$0xff] }
 0xa4c   : > { %v14451_v42 = vpop.eup %14450  ;;  %v6614_v23 = vmul.f32 %v14449_v54, %v18003_v45  ;;  %v6556_v39 = vpop.xlane.xlu0 %6555  ;;  %13015 = vmatprep.mubr.msk.f32.mxu1 %vm14686_vm1, %v19570_v12  ;;  %13041 = vmatprep.mubr.msk.f32.mxu0 %vm14686_vm1, %v19570_v12  ;;  %v10579_v54 = vld [vmem:[%s19529_s2 + $0x70] sm:$0xff] }
 0xa4d   : > { %v6618_v0 = vmul.f32 %v14451_v42, %v18005_v5  ;;  %14460 = vrcp.f32 %v6556_v39  ;;  %v6547_v61 = vpop.xlane.xlu1 %6546  ;;  %13937 = vmatprep.subr.bf16.mxu1 %v13936_v17  ;;  %v10580_v42 = vld [vmem:[%s19529_s2 + $0x78] sm:$0xff] }
 0xa4e   : > { %14462 = vrcp.f32 %v6547_v61  ;;  %13016 = vmatmul.mubr.msk.f32.gmra.mrb[60].mxu1 %vm1697_vm4, %v6614_v23  ;;  %v18277_v23 = vld [vmem:[%s14777_s30 + $0x40] sm:$0xff]  ;;  %v18283_v61 = vld [vmem:[%s14777_s30 + $0x48] sm:$0xff] }
 0xa4f   : > { %v14453_v37 = vpop.eup %14452  ;;  %13042 = vmatmul.mubr.msk.f32.gmra.mrb[12].mxu0 %vm1697_vm4, %v6618_v0  ;;  %13018 = vmatprep.mubr.msk.f32.mxu1 %vm14686_vm1, %v19570_v12  ;;  %v13948_v0 = vpack.c.bf16 %v10580_v42, %v10579_v54 }
 0xa50   : > { %v14455_v45 = vpop.eup %14454  ;;  %v6615_v21 = vmul.f32 %v14453_v37, %v18013_v31  ;;  %v6559_v46 = vpop.xlane.xlu0 %6558  ;;  %13044 = vmatprep.mubr.msk.f32.mxu0 %vm14686_vm1, %v19570_v12 }
 0xa51   : > { %v6619_v5 = vmul.f32 %v14455_v45, %v18015_v62  ;;  %14464 = vrcp.f32 %v6559_v46  ;;  %v6550_v38 = vpop.xlane.xlu1 %6549  ;;  %v18288_v45 = vld [vmem:[%s14777_s30 + $0x50] sm:$0xff]  ;;  %v18294_v46 = vld [vmem:[%s14777_s30 + $0x58] sm:$0xff] }
 0xa52   : > { %14466 = vrcp.f32 %v6550_v38  ;;  %13019 = vmatmul.mubr.msk.f32.gmra.mrb[62].mxu1 %vm1697_vm4, %v6615_v21  ;;  %v18299_v38 = vld [vmem:[%s14777_s30 + $0x60] sm:$0xff] }
 0xa53   : > { %v14457_v53 = vpop.eup %14456  ;;  %13045 = vmatmul.mubr.msk.f32.gmra.mrb[14].mxu0 %vm1697_vm4, %v6619_v5  ;;  %13021 = vmatprep.mubr.msk.f32.mxu1 %vm14686_vm1, %v19570_v12 }
 0xa54   : > { %v14459_v40 = vpop.eup %14458  ;;  %v6616_v31 = vmul.f32 %v14457_v53, %v18023_v19  ;;  %v6562_v8 = vpop.xlane.xlu0 %6561  ;;  %13047 = vmatprep.mubr.msk.f32.mxu0 %vm14686_vm1, %v19570_v12 }
 0xa55   : > { %v6620_v62 = vmul.f32 %v14459_v40, %v18025_v13  ;;  %14468 = vrcp.f32 %v6562_v8  ;;  %v6553_v22 = vpop.xlane.xlu1 %6552  ;;  %v10611_v40 = vld [vmem:[%s19530_s3 + $0x60] sm:$0xff]  ;;  %v10613_v8 = vld [vmem:[%s19530_s3 + $0x70] sm:$0xff] }
 0xa56   : > { %14470 = vrcp.f32 %v6553_v22  ;;  %13022 = vmatmul.mubr.msk.f32.gmra.mrb[64].mxu1 %vm1697_vm4, %v6616_v31  ;;  %v10612_v31 = vld [vmem:[%s19530_s3 + $0x68] sm:$0xff]  ;;  %v10614_v22 = vld [vmem:[%s19530_s3 + $0x78] sm:$0xff] }
 0xa57   : > { %v14461_v29 = vpop.eup %14460  ;;  %13048 = vmatmul.mubr.msk.f32.gmra.mrb[16].mxu0 %vm1697_vm4, %v6620_v62  ;;  %13073 = vmatprep.mubr.msk.f32.mxu1 %vm14686_vm1, %v19570_v12  ;;  %v13952_v62 = vpack.c.bf16 %v10612_v31, %v10611_v40 }
 0xa58   : > { %v14463_v24 = vpop.eup %14462  ;;  %v6624_v19 = vmul.f32 %v14461_v29, %v18032_v2  ;;  %v6565_v44 = vpop.xlane.xlu0 %6564  ;;  %13050 = vmatprep.mubr.msk.f32.mxu0 %vm14686_vm1, %v19570_v12  ;;  %v18317_v29 = vld [vmem:[%s14777_s30 + $0x68] sm:$0xff] }
 0xa59   : > { %v6621_v13 = vmul.f32 %v14463_v24, %v18034_v20  ;;  %14472 = vrcp.f32 %v6565_v44  ;;  %v13956_v24 = vpack.c.bf16 %v10614_v22, %v10613_v8  ;;  %v18323_v44 = vld [vmem:[%s14777_s30 + $0x70] sm:$0xff] }
 0xa5a   : > { %13074 = vmatmul.mubr.msk.f32.vlgmr.msra.gmra.mrb[66].mxu1 %vm1697_vm4, %v6624_v19 }
 0xa5b   : > { %v14465_v36 = vpop.eup %14464  ;;  %13051 = vmatmul.mubr.msk.f32.gmra.mrb[18].mxu0 %vm1697_vm4, %v6621_v13  ;;  %13076 = vmatprep.mubr.msk.f32.mxu1 %vm14686_vm1, %v19570_v12 }
 0xa5c   : > { %v14467_v47 = vpop.eup %14466  ;;  %v6625_v32 = vmul.f32 %v14465_v36, %v18041_v50  ;;  %v6568_v25 = vpop.xlane.xlu1 %6567  ;;  %13053 = vmatprep.mubr.msk.f32.mxu0 %vm14686_vm1, %v19570_v12  ;;  %13939 = vmatpush3.bf16.msra.mxu1 %v13936_v17  ;;  %v18329_v36 = vld [vmem:[%s14777_s30 + $0x78] sm:$0xff] }
 0xa5d   : > { %v6622_v2 = vmul.f32 %v14467_v47, %v18043_v49  ;;  %14474 = vrcp.f32 %v6568_v25  ;;  %13941 = vmatprep.subr.bf16.mxu1 %v13940_v55 }
 0xa5e   : > { %13077 = vmatmul.mubr.msk.f32.gmra.mrb[68].mxu1 %vm1697_vm4, %v6625_v32  ;;  %v18334_v32 = vld [vmem:[%s14777_s30 + $0x80] sm:$0xff] }
 0xa5f   : > { %v14469_v20 = vpop.eup %14468  ;;  %13054 = vmatmul.mubr.msk.f32.gmra.mrb[20].mxu0 %vm1697_vm4, %v6622_v2  ;;  %13079 = vmatprep.mubr.msk.f32.mxu1 %vm14686_vm1, %v19570_v12  ;;  %v18341_v2 = vld [vmem:[%s14777_s30 + $0x88] sm:$0xff] }
 0xa60   : > { %v14471_v11 = vpop.eup %14470  ;;  %v6626_v59 = vmul.f32 %v14469_v20, %v18050_v60  ;;  %v6571_v58 = vpop.xlane.xlu0 %6570  ;;  %13056 = vmatprep.mubr.msk.f32.mxu0 %vm14686_vm1, %v19570_v12  ;;  %13943 = vmatpush3.bf16.msra.mxu1 %v13940_v55 }
 0xa61   : > { %v6623_v50 = vmul.f32 %v14471_v11, %v18052_v4  ;;  %14476 = vrcp.f32 %v6571_v58  ;;  %13953 = vmatprep.subr.bf16.mxu1 %v13952_v62  ;;  %v18346_v11 = vld [vmem:[%s14777_s30 + $0x90] sm:$0xff]  ;;  %v18352_v58 = vld [vmem:[%s14777_s30 + $0x98] sm:$0xff] }
 0xa62   : > { %13080 = vmatmul.mubr.msk.f32.gmra.mrb[70].mxu1 %vm1697_vm4, %v6626_v59 }
 0xa63   : > { %v14473_v49 = vpop.eup %14472  ;;  %13057 = vmatmul.mubr.msk.f32.gmra.mrb[22].mxu0 %vm1697_vm4, %v6623_v50  ;;  %13082 = vmatprep.mubr.msk.f32.mxu1 %vm14686_vm1, %v19570_v12 }
 0xa64   : > { %v6627_v18 = vmul.f32 %v14473_v49, %v18059_v15  ;;  %v6574_v33 = vpop.xlane.xlu1 %6573  ;;  %v18357_v49 = vld [vmem:[%s14777_s30 + $0xa0] sm:$0xff] }
 0xa65   : > { %14478 = vrcp.f32 %v6574_v33  ;;  %v18363_v33 = vld [vmem:[%s14777_s30 + $0xa8] sm:$0xff] }
 0xa66   : > { %13083 = vmatmul.mubr.msk.f32.gmra.mrb[72].mxu1 %vm1697_vm4, %v6627_v18 }
 0xa67   : > { %v14475_v60 = vpop.eup %14474  ;;  %13085 = vmatprep.mubr.msk.f32.mxu1 %vm14686_vm1, %v19570_v12 }
 0xa68   : > { %v6628_v4 = vmul.f32 %v14475_v60, %v18063_v7  ;;  %v10514_v7 = vld [vmem:[%s19534_s7 + $0x10] sm:$0xff] }
 0xa69   : > { %13094 = vmatprep.subr.mxu0 %v10514_v7 }
 0xa6a   : > { %13086 = vmatmul.mubr.msk.f32.gmra.mrb[74].mxu1 %vm1697_vm4, %v6628_v4  ;;  %13095 = vmatpush3.msra.mxu0 %v10514_v7  ;;  %v18368_v4 = vld [vmem:[%s14777_s30 + $0xb0] sm:$0xff] }
 0xa6b   : > { %v14477_v51 = vpop.eup %14476  ;;  %13088 = vmatprep.mubr.msk.f32.mxu1 %vm14686_vm1, %v19570_v12 }
 0xa6c   : > { %v6629_v16 = vmul.f32 %v14477_v51, %v18067_v14  ;;  %v10577_v14 = vld [vmem:[%s19529_s2 + $0x60] sm:$0xff] }
 0xa6e   : > { %13089 = vmatmul.mubr.msk.f32.gmra.mrb[76].mxu1 %vm1697_vm4, %v6629_v16  ;;  %v18374_v16 = vld [vmem:[%s14777_s30 + $0xb8] sm:$0xff] }
 0xa6f   : > { %v14479_v15 = vpop.eup %14478  ;;  %13091 = vmatprep.mubr.msk.f32.mxu1 %vm14686_vm1, %v19570_v12 }
 0xa70   : > { %v6630_v34 = vmul.f32 %v14479_v15, %v18071_v43  ;;  %v10578_v43 = vld [vmem:[%s19529_s2 + $0x68] sm:$0xff] }
 0xa71   : > { %v13944_v10 = vpack.c.bf16 %v10578_v43, %v10577_v14  ;;  %v18385_v14 = vld [vmem:[%s14777_s30 + $0xc8] sm:$0xff] }
 0xa72   : > { %13092 = vmatmul.mubr.msk.f32.gmra.mrb[78].mxu1 %vm1697_vm4, %v6630_v34  ;;  %v18379_v34 = vld [vmem:[%s14777_s30 + $0xc0] sm:$0xff] }
 0xa73   : > { %13146 = vmatprep.mubr.msk.f32.mxu1 %vm399_vm0, %v18210_v28  ;;  %13945 = vmatprep.subr.bf16.mxu0 %v13944_v10 }
 0xa76   : > { %13147 = vmatmul.mubr.msk.f32.vlgmr.msra.gmra.mrb[80].mxu1 %vm399_vm0, %v18236_v48 }
 0xa77   : > { %13149 = vmatprep.mubr.msk.f32.mxu1 %vm399_vm0, %v18241_v56  ;;  %13955 = vmatpush3.bf16.msra.mxu1 %v13952_v62 }
 0xa78   : > { %13957 = vmatprep.subr.bf16.mxu1 %v13956_v24 }
 0xa7a   : > { %13150 = vmatmul.mubr.msk.f32.gmra.mrb[82].mxu1 %vm399_vm0, %v18246_v3 }
 0xa7b   : > { %13152 = vmatprep.mubr.msk.f32.mxu1 %vm399_vm0, %v18251_v1  ;;  %13959 = vmatpush3.bf16.msra.mxu1 %v13956_v24 }
 0xa7c   : > { %13972 = vmatprep.subr.bf16.mxu1 %v19571_v26 }
 0xa7e   : > { %13153 = vmatmul.mubr.msk.f32.gmra.mrb[84].mxu1 %vm399_vm0, %v18256_v52 }
 0xa7f   : > { %13155 = vmatprep.mubr.msk.f32.mxu1 %vm399_vm0, %v18261_v35 }
 0xa82   : > { %13156 = vmatmul.mubr.msk.f32.gmra.mrb[86].mxu1 %vm399_vm0, %v18266_v63 }
 0xa83   : > { %13158 = vmatprep.mubr.msk.f32.mxu1 %vm399_vm0, %v18277_v23 }
 0xa86   : > { %13159 = vmatmul.mubr.msk.f32.gmra.mrb[88].mxu1 %vm399_vm0, %v18283_v61 }
 0xa87   : > { %13161 = vmatprep.mubr.msk.f32.mxu1 %vm399_vm0, %v18288_v45 }
 0xa8a   : > { %13162 = vmatmul.mubr.msk.f32.gmra.mrb[90].mxu1 %vm399_vm0, %v18294_v46 }
 0xa8b   : > { %13164 = vmatprep.mubr.msk.f32.mxu1 %vm399_vm0, %v18299_v38 }
 0xa8e   : > { %13165 = vmatmul.mubr.msk.f32.gmra.mrb[92].mxu1 %vm399_vm0, %v18317_v29 }
 0xa8f   : > { %13167 = vmatprep.mubr.msk.f32.mxu1 %vm399_vm0, %v18323_v44 }
 0xa92   : > { %13168 = vmatmul.mubr.msk.f32.gmra.mrb[94].mxu1 %vm399_vm0, %v18329_v36 }
 0xa93   : > { %13170 = vmatprep.mubr.msk.f32.mxu1 %vm399_vm0, %v18334_v32 }
 0xa96   : > { %13171 = vmatmul.mubr.msk.f32.gmra.mrb[96].mxu1 %vm399_vm0, %v18341_v2 }
 0xa97   : > { %13173 = vmatprep.mubr.msk.f32.mxu1 %vm399_vm0, %v18346_v11 }
 0xa9a   : > { %13174 = vmatmul.mubr.msk.f32.gmra.mrb[98].mxu1 %vm399_vm0, %v18352_v58 }
 0xa9b   : > { %13176 = vmatprep.mubr.msk.f32.mxu1 %vm399_vm0, %v18357_v49 }
 0xa9e   : > { %13177 = vmatmul.mubr.msk.f32.gmra.mrb[100].mxu1 %vm399_vm0, %v18363_v33 }
 0xa9f   : > { %13179 = vmatprep.mubr.msk.f32.mxu1 %vm399_vm0, %v18368_v4 }
 0xaa2   : > { %13180 = vmatmul.mubr.msk.f32.gmra.mrb[102].mxu1 %vm399_vm0, %v18374_v16 }
 0xaa3   : > { %13182 = vmatprep.mubr.msk.f32.mxu1 %vm399_vm0, %v18379_v34 }
 0xaa6   : > { %13183 = vmatmul.mubr.msk.f32.gmra.mrb[104].mxu1 %vm399_vm0, %v18385_v14 }
 0xaf5   : > { %v6718_v41 = vpop.f32.mrb[252].mxu0 }
 0xaf6   : > { %v12970_v39 = vpop.f32.mrb[253].mxu0  ;;  %13096 = vmatprep.mubr.msk.f32.mxu0 %vm1128_vm2, %v6718_v41 }
 0xaf9   : > { %v6723_v37 = vpop.f32.mrb[254].mxu0 }
 0xafa   : > { %v12973_v21 = vpop.f32.mrb[255].mxu0  ;;  %13097 = vmatmul.mubr.msk.f32.vlgmr.msra.gmra.mrb[182].mxu0 %vm1128_vm2, %v6723_v37 }
 0xafb   : > { %13947 = vmatpush3.bf16.msra.mxu0 %v13944_v10  ;;  %v18390_v10 = vld [vmem:[%s14777_s30 + $0xd0] sm:$0xff] }
 0xafc   : > { %13949 = vmatprep.subr.bf16.mxu0 %v13948_v0  ;;  %13185 = vmatprep.mubr.msk.f32.mxu1 %vm399_vm0, %v18390_v10 }
 0xafd   : > { %v6728_v5 = vpop.f32.mrb[0].mxu0  ;;  %13186 = vmatmul.mubr.msk.f32.gmra.mrb[106].mxu1 %vm399_vm0, %v18396_v30 }
 0xafe   : > { %v12976_v53 = vpop.f32.mrb[1].mxu0  ;;  %13099 = vmatprep.mubr.msk.f32.mxu0 %vm1128_vm2, %v6728_v5  ;;  %13246 = vmatprep.mubr.msk.f32.mxu1 %vm399_vm0, %v18210_v28 }
 0xaff   : > { %13951 = vmatpush3.bf16.msra.mxu0 %v13948_v0 }
 0xb00   : > { %13960 = vmatprep.subr.bf16.mxu0 %v19571_v26 }
 0xb01   : > { %v6733_v19 = vpop.f32.mrb[2].mxu0  ;;  %13247 = vmatmul.mubr.msk.f32.vlgmr.msra.gmra.mrb[108].mxu1 %vm399_vm0, %v18236_v48 }
 0xb02   : > { %v12979_v13 = vpop.f32.mrb[3].mxu0  ;;  %13100 = vmatmul.mubr.msk.f32.gmra.mrb[184].mxu0 %vm1128_vm2, %v6733_v19  ;;  %13249 = vmatprep.mubr.msk.f32.mxu1 %vm399_vm0, %v18241_v56 }
 0xb05   : > { %v6738_v47 = vpop.f32.mrb[4].mxu0  ;;  %13250 = vmatmul.mubr.msk.f32.gmra.mrb[110].mxu1 %vm399_vm0, %v18246_v3 }
 0xb06   : > { %v12982_v25 = vpop.f32.mrb[5].mxu0  ;;  %13102 = vmatprep.mubr.msk.f32.mxu0 %vm1128_vm2, %v6738_v47  ;;  %13252 = vmatprep.mubr.msk.f32.mxu1 %vm399_vm0, %v18251_v1 }
 0xb09   : > { %v6743_v20 = vpop.f32.mrb[6].mxu0  ;;  %13253 = vmatmul.mubr.msk.f32.gmra.mrb[112].mxu1 %vm399_vm0, %v18256_v52 }
 0xb0a   : > { %v12985_v59 = vpop.f32.mrb[7].mxu0  ;;  %13103 = vmatmul.mubr.msk.f32.gmra.mrb[186].mxu0 %vm1128_vm2, %v6743_v20  ;;  %13255 = vmatprep.mubr.msk.f32.mxu1 %vm399_vm0, %v18261_v35 }
 0xb0d   : > { %v6748_v50 = vpop.f32.mrb[8].mxu0  ;;  %13256 = vmatmul.mubr.msk.f32.gmra.mrb[114].mxu1 %vm399_vm0, %v18266_v63 }
 0xb0e   : > { %v12988_v18 = vpop.f32.mrb[9].mxu0  ;;  %13105 = vmatprep.mubr.msk.f32.mxu0 %vm1128_vm2, %v6748_v50  ;;  %13258 = vmatprep.mubr.msk.f32.mxu1 %vm399_vm0, %v18277_v23 }
 0xb11   : > { %v6839_v60 = vpop.f32.mrb[52].mxu1  ;;  %13259 = vmatmul.mubr.msk.f32.gmra.mrb[116].mxu1 %vm399_vm0, %v18283_v61 }
 0xb12   : > { %v13005_v51 = vpop.f32.mrb[53].mxu1  ;;  %13106 = vmatmul.mubr.msk.f32.gmra.mrb[188].mxu0 %vm1128_vm2, %v6839_v60  ;;  %13261 = vmatprep.mubr.msk.f32.mxu1 %vm399_vm0, %v18288_v45 }
 0xb15   : > { %v6844_v15 = vpop.f32.mrb[54].mxu1  ;;  %13262 = vmatmul.mubr.msk.f32.gmra.mrb[118].mxu1 %vm399_vm0, %v18294_v46 }
 0xb16   : > { %v13008_v7 = vpop.f32.mrb[55].mxu1  ;;  %13108 = vmatprep.mubr.msk.f32.mxu0 %vm1128_vm2, %v6844_v15  ;;  %13264 = vmatprep.mubr.msk.f32.mxu1 %vm399_vm0, %v18299_v38 }
 0xb19   : > { %v6849_v43 = vpop.f32.mrb[56].mxu1  ;;  %13265 = vmatmul.mubr.msk.f32.gmra.mrb[120].mxu1 %vm399_vm0, %v18317_v29 }
 0xb1a   : > { %v13011_v57 = vpop.f32.mrb[57].mxu1  ;;  %13109 = vmatmul.mubr.msk.f32.gmra.mrb[190].mxu0 %vm1128_vm2, %v6849_v43  ;;  %13267 = vmatprep.mubr.msk.f32.mxu1 %vm399_vm0, %v18323_v44 }
 0xb1d   : > { %v6854_v17 = vpop.f32.mrb[58].mxu1  ;;  %13268 = vmatmul.mubr.msk.f32.gmra.mrb[122].mxu1 %vm399_vm0, %v18329_v36 }
 0xb1e   : > { %v13014_v27 = vpop.f32.mrb[59].mxu1  ;;  %v6960_v9 = vpop.f32.mrb[10].mxu0  ;;  %13111 = vmatprep.mubr.msk.f32.mxu0 %vm1128_vm2, %v6854_v17  ;;  %13270 = vmatprep.mubr.msk.f32.mxu1 %vm399_vm0, %v18334_v32 }
 0xb1f   : > { %v13040_v55 = vpop.f32.mrb[11].mxu0 }
 0xb21   : > { %v6859_v41 = vpop.f32.mrb[60].mxu1  ;;  %13271 = vmatmul.mubr.msk.f32.gmra.mrb[124].mxu1 %vm399_vm0, %v18341_v2 }
 0xb22   : > { %v13017_v54 = vpop.f32.mrb[61].mxu1  ;;  %v6965_v42 = vpop.f32.mrb[12].mxu0  ;;  %13112 = vmatmul.mubr.msk.f32.gmra.mrb[192].mxu0 %vm1128_vm2, %v6859_v41  ;;  %13273 = vmatprep.mubr.msk.f32.mxu1 %vm399_vm0, %v18346_v11 }
 0xb23   : > { %v13043_v39 = vpop.f32.mrb[13].mxu0 }
 0xb24   : > { %v18600_v39 = vld [vmem:[%s19533_s6 + $0x3] ss:$0 sm:$0xff] }
 0xb25   : > { %v6864_v0 = vpop.f32.mrb[62].mxu1  ;;  %13274 = vmatmul.mubr.msk.f32.gmra.mrb[126].mxu1 %vm399_vm0, %v18352_v58 }
 0xb26   : > { %v13020_v37 = vpop.f32.mrb[63].mxu1  ;;  %v6970_v21 = vpop.f32.mrb[14].mxu0  ;;  %13114 = vmatprep.mubr.msk.f32.mxu0 %vm1128_vm2, %v6864_v0  ;;  %13276 = vmatprep.mubr.msk.f32.mxu1 %vm399_vm0, %v18357_v49 }
 0xb27   : > { %v13046_v5 = vpop.f32.mrb[15].mxu0 }
 0xb29   : > { %v6869_v53 = vpop.f32.mrb[64].mxu1  ;;  %13277 = vmatmul.mubr.msk.f32.gmra.mrb[128].mxu1 %vm399_vm0, %v18363_v33 }
 0xb2a   : > { %v13023_v40 = vpop.f32.mrb[65].mxu1  ;;  %v6975_v31 = vpop.f32.mrb[16].mxu0  ;;  %13115 = vmatmul.mubr.msk.f32.gmra.mrb[194].mxu0 %vm1128_vm2, %v6869_v53  ;;  %13279 = vmatprep.mubr.msk.f32.mxu1 %vm399_vm0, %v18368_v4 }
 0xb2b   : > { %v13049_v8 = vpop.f32.mrb[17].mxu0  ;;  %13117 = vmatprep.mubr.msk.f32.mxu0 %vm1128_vm2, %v6960_v9 }
 0xb2d   : > { %v7081_v62 = vpop.f32.mrb[66].mxu1  ;;  %13280 = vmatmul.mubr.msk.f32.gmra.mrb[130].mxu1 %vm399_vm0, %v18374_v16 }
 0xb2e   : > { %v6980_v22 = vpop.f32.mrb[18].mxu0  ;;  %v13075_v24 = vpop.f32.mrb[67].mxu1  ;;  %13118 = vmatmul.mubr.msk.f32.gmra.mrb[196].mxu0 %vm1128_vm2, %v6965_v42  ;;  %13282 = vmatprep.mubr.msk.f32.mxu1 %vm399_vm0, %v18379_v34 }
 0xb2f   : > { %v13052_v19 = vpop.f32.mrb[19].mxu0  ;;  %13120 = vmatprep.mubr.msk.f32.mxu0 %vm1128_vm2, %v6970_v21 }
 0xb31   : > { %v7086_v13 = vpop.f32.mrb[68].mxu1  ;;  %13283 = vmatmul.mubr.msk.f32.gmra.mrb[132].mxu1 %vm399_vm0, %v18385_v14 }
 0xb32   : > { %v6985_v47 = vpop.f32.mrb[20].mxu0  ;;  %v13078_v25 = vpop.f32.mrb[69].mxu1  ;;  %13121 = vmatmul.mubr.msk.f32.gmra.mrb[198].mxu0 %vm1128_vm2, %v6975_v31  ;;  %13285 = vmatprep.mubr.msk.f32.mxu1 %vm399_vm0, %v18390_v10 }
 0xb33   : > { %v13055_v20 = vpop.f32.mrb[21].mxu0  ;;  %13123 = vmatprep.mubr.msk.f32.mxu0 %vm1128_vm2, %v6980_v22 }
 0xb35   : > { %v7091_v59 = vpop.f32.mrb[70].mxu1  ;;  %13286 = vmatmul.mubr.msk.f32.gmra.mrb[134].mxu1 %vm399_vm0, %v18396_v30 }
 0xb36   : > { %v6990_v50 = vpop.f32.mrb[22].mxu0  ;;  %v13081_v18 = vpop.f32.mrb[71].mxu1  ;;  %13124 = vmatmul.mubr.msk.f32.gmra.mrb[200].mxu0 %vm1128_vm2, %v6985_v47  ;;  %13337 = vmatprep.mubr.msk.f32.mxu1 %vm14686_vm1, %v19570_v12 }
 0xb37   : > { %v13058_v60 = vpop.f32.mrb[23].mxu0  ;;  %13126 = vmatprep.mubr.msk.f32.mxu0 %vm1128_vm2, %v6990_v50 }
 0xb39   : > { %v7096_v51 = vpop.f32.mrb[72].mxu1 }
 0xb3a   : > { %v13084_v15 = vpop.f32.mrb[73].mxu1  ;;  %13127 = vmatmul.mubr.msk.f32.gmra.mrb[202].mxu0 %vm1128_vm2, %v7081_v62 }
 0xb3b   : > { %13129 = vmatprep.mubr.msk.f32.mxu0 %vm1128_vm2, %v7086_v13 }
 0xb3d   : > { %v7101_v7 = vpop.f32.mrb[74].mxu1 }
 0xb3e   : > { %v13087_v43 = vpop.f32.mrb[75].mxu1  ;;  %13130 = vmatmul.mubr.msk.f32.gmra.mrb[204].mxu0 %vm1128_vm2, %v7091_v59 }
 0xb3f   : > { %13132 = vmatprep.mubr.msk.f32.mxu0 %vm1128_vm2, %v7096_v51 }
 0xb41   : > { %v7106_v57 = vpop.f32.mrb[76].mxu1 }
 0xb42   : > { %v13090_v17 = vpop.f32.mrb[77].mxu1  ;;  %13133 = vmatmul.mubr.msk.f32.gmra.mrb[206].mxu0 %vm1128_vm2, %v7101_v7 }
 0xb43   : > { %13135 = vmatprep.mubr.msk.f32.mxu0 %vm1128_vm2, %v7106_v57 }
 0xb45   : > { %v7111_v27 = vpop.f32.mrb[78].mxu1 }
 0xb46   : > { %v13093_v9 = vpop.f32.mrb[79].mxu1  ;;  %13136 = vmatmul.mubr.msk.f32.gmra.mrb[208].mxu0 %vm1128_vm2, %v7111_v27 }
 0xb47   : > { %13196 = vmatprep.mubr.msk.f32.mxu0 %vm399_vm0, %v18210_v28  ;;  %v18651_v9 = vld [vmem:[%s19532_s5 + $0x3] ss:$0 sm:$0xff] }
 0xb49   : > { %v18534_v28 = vpop.f32.mrb[80].mxu1 }
 0xb4a   : > { %13197 = vmatmul.mubr.msk.f32.vlgmr.msra.gmra.mrb[24].mxu0 %vm399_vm0, %v18236_v48  ;;  %v18536_v48 = vpop.f32.mrb[81].mxu1 }
 0xb4b   : > { %13199 = vmatprep.mubr.msk.f32.mxu0 %vm399_vm0, %v18241_v56 }
 0xb4d   : > { %v18538_v56 = vpop.f32.mrb[82].mxu1 }
 0xb4e   : > { %13200 = vmatmul.mubr.msk.f32.gmra.mrb[26].mxu0 %vm399_vm0, %v18246_v3  ;;  %v18540_v3 = vpop.f32.mrb[83].mxu1 }
 0xb4f   : > { %13202 = vmatprep.mubr.msk.f32.mxu0 %vm399_vm0, %v18251_v1 }
 0xb51   : > { %v18542_v1 = vpop.f32.mrb[84].mxu1 }
 0xb52   : > { %13203 = vmatmul.mubr.msk.f32.gmra.mrb[28].mxu0 %vm399_vm0, %v18256_v52  ;;  %v18544_v52 = vpop.f32.mrb[85].mxu1 }
 0xb53   : > { %13205 = vmatprep.mubr.msk.f32.mxu0 %vm399_vm0, %v18261_v35 }
 0xb55   : > { %v18546_v35 = vpop.f32.mrb[86].mxu1 }
 0xb56   : > { %13206 = vmatmul.mubr.msk.f32.gmra.mrb[30].mxu0 %vm399_vm0, %v18266_v63  ;;  %v18548_v63 = vpop.f32.mrb[87].mxu1 }
 0xb57   : > { %13208 = vmatprep.mubr.msk.f32.mxu0 %vm399_vm0, %v18277_v23 }
 0xb59   : > { %v18550_v23 = vpop.f32.mrb[88].mxu1 }
 0xb5a   : > { %13209 = vmatmul.mubr.msk.f32.gmra.mrb[32].mxu0 %vm399_vm0, %v18283_v61  ;;  %v18552_v61 = vpop.f32.mrb[89].mxu1 }
 0xb5b   : > { %13211 = vmatprep.mubr.msk.f32.mxu0 %vm399_vm0, %v18288_v45 }
 0xb5d   : > { %v18554_v45 = vpop.f32.mrb[90].mxu1 }
 0xb5e   : > { %13212 = vmatmul.mubr.msk.f32.gmra.mrb[34].mxu0 %vm399_vm0, %v18294_v46  ;;  %v18556_v46 = vpop.f32.mrb[91].mxu1 }
 0xb5f   : > { %13214 = vmatprep.mubr.msk.f32.mxu0 %vm399_vm0, %v18299_v38 }
 0xb61   : > { %v18558_v38 = vpop.f32.mrb[92].mxu1 }
 0xb62   : > { %13215 = vmatmul.mubr.msk.f32.gmra.mrb[36].mxu0 %vm399_vm0, %v18317_v29  ;;  %v18560_v29 = vpop.f32.mrb[93].mxu1 }
 0xb63   : > { %13217 = vmatprep.mubr.msk.f32.mxu0 %vm399_vm0, %v18323_v44 }
 0xb65   : > { %v18562_v44 = vpop.f32.mrb[94].mxu1 }
 0xb66   : > { %13218 = vmatmul.mubr.msk.f32.gmra.mrb[38].mxu0 %vm399_vm0, %v18329_v36  ;;  %v18564_v36 = vpop.f32.mrb[95].mxu1 }
 0xb67   : > { %13220 = vmatprep.mubr.msk.f32.mxu0 %vm399_vm0, %v18334_v32 }
 0xb69   : > { %v18566_v32 = vpop.f32.mrb[96].mxu1 }
 0xb6a   : > { %13221 = vmatmul.mubr.msk.f32.gmra.mrb[40].mxu0 %vm399_vm0, %v18341_v2  ;;  %v18568_v2 = vpop.f32.mrb[97].mxu1 }
 0xb6b   : > { %13223 = vmatprep.mubr.msk.f32.mxu0 %vm399_vm0, %v18346_v11 }
 0xb6d   : > { %v18570_v11 = vpop.f32.mrb[98].mxu1 }
 0xb6e   : > { %13224 = vmatmul.mubr.msk.f32.gmra.mrb[42].mxu0 %vm399_vm0, %v18352_v58  ;;  %v18572_v58 = vpop.f32.mrb[99].mxu1 }
 0xb6f   : > { %13226 = vmatprep.mubr.msk.f32.mxu0 %vm399_vm0, %v18357_v49 }
 0xb71   : > { %v18574_v49 = vpop.f32.mrb[100].mxu1 }
 0xb72   : > { %13227 = vmatmul.mubr.msk.f32.gmra.mrb[44].mxu0 %vm399_vm0, %v18363_v33  ;;  %v18576_v33 = vpop.f32.mrb[101].mxu1 }
 0xb73   : > { %13229 = vmatprep.mubr.msk.f32.mxu0 %vm399_vm0, %v18368_v4 }
 0xb75   : > { %v18578_v4 = vpop.f32.mrb[102].mxu1 }
 0xb76   : > { %13230 = vmatmul.mubr.msk.f32.gmra.mrb[46].mxu0 %vm399_vm0, %v18374_v16  ;;  %v18580_v16 = vpop.f32.mrb[103].mxu1 }
 0xb77   : > { %13232 = vmatprep.mubr.msk.f32.mxu0 %vm399_vm0, %v18379_v34 }
 0xb79   : > { %v18582_v34 = vpop.f32.mrb[104].mxu1 }
 0xb7a   : > { %13233 = vmatmul.mubr.msk.f32.gmra.mrb[48].mxu0 %vm399_vm0, %v18385_v14  ;;  %v18584_v14 = vpop.f32.mrb[105].mxu1 }
 0xb7b   : > { %13235 = vmatprep.mubr.msk.f32.mxu0 %vm399_vm0, %v18390_v10  ;;  %v18589_v10 = vld [vmem:[%s19531_s4 + $0x3] ss:$0 sm:$0xff] }
 0xb7c   : > { %v7579_v6 = vadd.f32 %v18558_v38, %v18589_v10  ;;  %v7604_v38 = vadd.f32 %v18589_v10, %v18572_v58  ;;  %v7609_v58 = vadd.f32 %v18570_v11, %v18589_v10  ;;  %v7614_v11 = vadd.f32 %v18589_v10, %v18576_v33 }
 0xb7d   : > { %v7639_v33 = vadd.f32 %v18582_v34, %v18589_v10 }
 0xb7e   : > { %13236 = vmatmul.mubr.msk.f32.gmra.mrb[50].mxu0 %vm399_vm0, %v18396_v30 }
 0xb7f   : > { %13302 = vmatprep.mubr.msk.f32.mxu0 %vm14686_vm1, %v19570_v12 }
 0xbd0   : > { %v13187_v30 = vpop.f32.mrb[106].mxu1 }
 0xbd1   : > { %v18592_v55 = vadd.f32 %v13187_v30, %v18589_v10  ;;  %v7643_v41 = vpop.f32.mrb[107].mxu1 }
 0xbd2   : > { %v18595_v54 = vadd.f32 %v18589_v10, %v7643_v41 }
 0xbd4   : > { %v13248_v42 = vpop.f32.mrb[108].mxu1 }
 0xbd5   : > { %v18603_v0 = vadd.f32 %v13248_v42, %v18600_v39  ;;  %v7949_v37 = vpop.f32.mrb[109].mxu1 }
 0xbd6   : > { %v18606_v21 = vadd.f32 %v18600_v39, %v7949_v37 }
 0xbd8   : > { %v13251_v5 = vpop.f32.mrb[110].mxu1  ;;  %v14009_v31 = vpack.c.bf16 %v18603_v0, %v18606_v21  ;;  %v7619_v21 = vadd.f32 %v18574_v49, %v18589_v10 }
 0xbd9   : > { %v18609_v53 = vadd.f32 %v13251_v5, %v18600_v39  ;;  %v7959_v40 = vpop.f32.mrb[111].mxu1 }
 0xbda   : > { %v18614_v8 = vadd.f32 %v18600_v39, %v7959_v40 }
 0xbdc   : > { %v13254_v62 = vpop.f32.mrb[112].mxu1 }
 0xbdd   : > { %v18617_v22 = vadd.f32 %v13254_v62, %v18600_v39  ;;  %v7969_v24 = vpop.f32.mrb[113].mxu1 }
 0xbde   : > { %v18622_v13 = vadd.f32 %v18600_v39, %v7969_v24 }
 0xbe0   : > { %v13257_v47 = vpop.f32.mrb[114].mxu1  ;;  %v19622_v0 = vpack.c.bf16 %v18617_v22, %v18622_v13 }
 0xbe1   : > { %v18624_v25 = vpop.f32.mrb[115].mxu1  ;;  %v18629_v59 = vadd.f32 %v13257_v47, %v18600_v39 }
 0xbe4   : > { %v13260_v50 = vpop.f32.mrb[116].mxu1 }
 0xbe5   : > { %v7989_v18 = vpop.f32.mrb[117].mxu1  ;;  %v18632_v60 = vadd.f32 %v13260_v50, %v18600_v39 }
 0xbe6   : > { %v18635_v51 = vadd.f32 %v18600_v39, %v7989_v18 }
 0xbe8   : > { %v18637_v15 = vpop.f32.mrb[118].mxu1  ;;  %v19623_v49 = vpack.c.bf16 %v18635_v51, %v18629_v59 }
 0xbe9   : > { %v7999_v7 = vpop.f32.mrb[119].mxu1 }
 0xbea   : > { %v18642_v57 = vadd.f32 %v18600_v39, %v7999_v7 }
 0xbec   : > { %v18644_v17 = vpop.f32.mrb[120].mxu1 }
 0xbed   : > { %v8015_v34 = vadd.f32 %v18644_v17, %v18600_v39 }
 0xc1d   : > { %v13198_v30 = vpop.f32.mrb[24].mxu0 }
 0xc1e   : > { %v7737_v41 = vadd.f32 %v13198_v30, %v18651_v9  ;;  %v7731_v42 = vpop.f32.mrb[25].mxu0 }
 0xc1f   : > { %v7732_v37 = vadd.f32 %v18651_v9, %v7731_v42 }
 0xc21   : > { %v13961_v5 = vpack.c.bf16 %v7737_v41, %v7732_v37  ;;  %v13201_v40 = vpop.f32.mrb[26].mxu0 }
 0xc22   : > { %v7747_v62 = vadd.f32 %v13201_v40, %v18651_v9  ;;  %v7741_v24 = vpop.f32.mrb[27].mxu0 }
 0xc23   : > { %v7742_v47 = vadd.f32 %v18651_v9, %v7741_v24  ;;  %13963 = vmatpush3.bf16.xpose.msk.msra.mxu0 %vm15110_vm3, %v13961_v5 }
 0xc24   : > { %13964 = vmatprep.subr.bf16.mxu0 %v19571_v26 }
 0xc25   : > { %v13965_v50 = vpack.c.bf16 %v7747_v62, %v7742_v47  ;;  %v13204_v18 = vpop.f32.mrb[28].mxu0 }
 0xc26   : > { %v7757_v7 = vadd.f32 %v13204_v18, %v18651_v9  ;;  %v7751_v30 = vpop.f32.mrb[29].mxu0 }
 0xc27   : > { %v7752_v27 = vadd.f32 %v18651_v9, %v7751_v30 }
 0xc29   : > { %v13969_v42 = vpack.c.bf16 %v7757_v7, %v7752_v27  ;;  %v13207_v41 = vpop.f32.mrb[30].mxu0 }
 0xc2a   : > { %v7761_v37 = vpop.f32.mrb[31].mxu0  ;;  %v7767_v5 = vadd.f32 %v13207_v41, %v18651_v9 }
 0xc2b   : > { %13967 = vmatpush3.bf16.xpose.msk.msra.mxu0 %vm15110_vm3, %v13965_v50 }
 0xc2c   : > { %13968 = vmatprep.subr.bf16.mxu0 %v19571_v26 }
 0xc2d   : > { %v13210_v40 = vpop.f32.mrb[32].mxu0 }
 0xc2e   : > { %v7771_v24 = vpop.f32.mrb[33].mxu0  ;;  %v7777_v20 = vadd.f32 %v13210_v40, %v18651_v9  ;;  %v7762_v40 = vadd.f32 %v18651_v9, %v7761_v37 }
 0xc2f   : > { %v7772_v62 = vadd.f32 %v18651_v9, %v7771_v24 }
 0xc31   : > { %v13973_v47 = vpack.c.bf16 %v7772_v62, %v7767_v5  ;;  %v13213_v43 = vpop.f32.mrb[34].mxu0 }
 0xc32   : > { %v7781_v18 = vpop.f32.mrb[35].mxu0  ;;  %v7787_v41 = vadd.f32 %v13213_v43, %v18651_v9 }
 0xc33   : > { %v7782_v27 = vadd.f32 %v18651_v9, %v7781_v18  ;;  %13971 = vmatpush3.bf16.xpose.msk.msra.mxu0 %vm15110_vm3, %v13969_v42  ;;  %13975 = vmatpush3.bf16.xpose.msk.msra.mxu1 %vm15110_vm3, %v13973_v47  ;;  %v7514_v47 = vadd.f32 %v18589_v10, %v18536_v48 }
 0xc34   : > { %13300 = vmatprep.subr.mxu0 %v19570_v12  ;;  %13976 = vmatprep.subr.bf16.mxu1 %v19571_v26 }
 0xc35   : > { %v13977_v50 = vpack.c.bf16 %v7782_v27, %v7777_v20  ;;  %v13216_v7 = vpop.f32.mrb[36].mxu0 }
 0xc36   : > { %v7791_v30 = vpop.f32.mrb[37].mxu0 }
 0xc37   : > { %v7792_v24 = vadd.f32 %v18651_v9, %v7791_v30 }
 0xc39   : > { %v13981_v5 = vpack.c.bf16 %v7792_v24, %v7787_v41  ;;  %v13219_v62 = vpop.f32.mrb[38].mxu0 }
 0xc3a   : > { %v7807_v42 = vadd.f32 %v13219_v62, %v18651_v9  ;;  %v7801_v18 = vpop.f32.mrb[39].mxu0 }
 0xc3b   : > { %v7802_v19 = vadd.f32 %v18651_v9, %v7801_v18  ;;  %13301 = vmatpush3.xpose.msk.msra.mxu0 %vm1128_vm2, %v7762_v40  ;;  %13979 = vmatpush3.bf16.xpose.msk.msra.mxu1 %vm15110_vm3, %v13977_v50  ;;  %v7519_v50 = vadd.f32 %v18534_v28, %v18589_v10  ;;  %v7524_v28 = vadd.f32 %v18589_v10, %v18540_v3 }
 0xc3c   : > { %13984 = vmatprep.subr.bf16.mxu0 %v19571_v26  ;;  %13980 = vmatprep.subr.bf16.mxu1 %v19571_v26  ;;  %v7797_v3 = vadd.f32 %v13216_v7, %v18651_v9 }
 0xc3d   : > { %v13985_v20 = vpack.c.bf16 %v7807_v42, %v7802_v19  ;;  %v13222_v43 = vpop.f32.mrb[40].mxu0 }
 0xc3e   : > { %13303 = vmatmul.mubr.msk.f32.vlgmr.msra.gmra.mrb[52].mxu0 %vm1128_vm2, %v7514_v47  ;;  %v7817_v37 = vadd.f32 %v13222_v43, %v18651_v9  ;;  %v7811_v27 = vpop.f32.mrb[41].mxu0 }
 0xc3f   : > { %13987 = vmatpush3.bf16.xpose.msk.msra.mxu0 %vm15110_vm3, %v13985_v20  ;;  %13305 = vmatprep.mubr.msk.f32.mxu0 %vm14686_vm1, %v19570_v12  ;;  %v7812_v48 = vadd.f32 %v18651_v9, %v7811_v27  ;;  %v7549_v27 = vadd.f32 %v18546_v35, %v18589_v10  ;;  %v7539_v35 = vadd.f32 %v18542_v1, %v18589_v10 }
 0xc40   : > { %13988 = vmatprep.subr.bf16.mxu0 %v19571_v26 }
 0xc41   : > { %v13989_v19 = vpack.c.bf16 %v7817_v37, %v7812_v48  ;;  %v13225_v30 = vpop.f32.mrb[42].mxu0 }
 0xc42   : > { %13306 = vmatmul.mubr.msk.f32.gmra.mrb[54].mxu0 %vm1128_vm2, %v7519_v50  ;;  %v7827_v41 = vadd.f32 %v13225_v30, %v18651_v9  ;;  %v7821_v24 = vpop.f32.mrb[43].mxu0  ;;  %v7554_v30 = vadd.f32 %v18589_v10, %v18552_v61 }
 0xc43   : > { %13983 = vmatpush3.bf16.xpose.msk.msra.mxu1 %vm15110_vm3, %v13981_v5  ;;  %13308 = vmatprep.mubr.msk.f32.mxu0 %vm14686_vm1, %v19570_v12  ;;  %v7822_v40 = vadd.f32 %v18651_v9, %v7821_v24  ;;  %v7529_v5 = vadd.f32 %v18538_v56, %v18589_v10  ;;  %v7534_v56 = vadd.f32 %v18589_v10, %v18544_v52 }
 0xc44   : > { %13335 = vmatprep.subr.mxu1 %v19570_v12 }
 0xc45   : > { %v13993_v62 = vpack.c.bf16 %v7827_v41, %v7822_v40  ;;  %v13228_v42 = vpop.f32.mrb[44].mxu0 }
 0xc46   : > { %13309 = vmatmul.mubr.msk.f32.gmra.mrb[56].mxu0 %vm1128_vm2, %v7524_v28  ;;  %v7831_v18 = vpop.f32.mrb[45].mxu0  ;;  %v7837_v43 = vadd.f32 %v13228_v42, %v18651_v9  ;;  %v7559_v42 = vadd.f32 %v18550_v23, %v18589_v10  ;;  %v7569_v23 = vadd.f32 %v18554_v45, %v18589_v10  ;;  %v7574_v45 = vadd.f32 %v18589_v10, %v18560_v29 }
 0xc47   : > { %13991 = vmatpush3.bf16.xpose.msk.msra.mxu0 %vm15110_vm3, %v13989_v19  ;;  %13311 = vmatprep.mubr.msk.f32.mxu0 %vm14686_vm1, %v19570_v12  ;;  %v7599_v29 = vadd.f32 %v18566_v32, %v18589_v10  ;;  %v7624_v32 = vadd.f32 %v18589_v10, %v18580_v16  ;;  %v7629_v16 = vadd.f32 %v18578_v4, %v18589_v10 }
 0xc48   : > { %13992 = vmatprep.subr.bf16.mxu0 %v19571_v26  ;;  %v8005_v4 = vadd.f32 %v18637_v15, %v18600_v39 }
 0xc49   : > { %v13231_v47 = vpop.f32.mrb[46].mxu0 }
 0xc4a   : > { %v7841_v20 = vpop.f32.mrb[47].mxu0  ;;  %13312 = vmatmul.mubr.msk.f32.gmra.mrb[58].mxu0 %vm1128_vm2, %v7529_v5  ;;  %v7847_v19 = vadd.f32 %v13231_v47, %v18651_v9  ;;  %v7832_v5 = vadd.f32 %v18651_v9, %v7831_v18  ;;  %v7584_v47 = vadd.f32 %v18589_v10, %v18564_v36  ;;  %v7594_v36 = vadd.f32 %v18589_v10, %v18568_v2 }
 0xc4b   : > { %v7842_v37 = vadd.f32 %v18651_v9, %v7841_v20  ;;  %13336 = vmatpush3.xpose.msk.msra.mxu1 %vm1128_vm2, %v7797_v3  ;;  %13314 = vmatprep.mubr.msk.f32.mxu0 %vm14686_vm1, %v19570_v12  ;;  %v7980_v2 = vadd.f32 %v18600_v39, %v18624_v25 }
 0xc4c   : > { %13996 = vmatprep.subr.bf16.mxu1 %v19571_v26 }
 0xc4d   : > { %v13997_v7 = vpack.c.bf16 %v7842_v37, %v7837_v43  ;;  %v13234_v48 = vpop.f32.mrb[48].mxu0 }
 0xc4e   : > { %13315 = vmatmul.mubr.msk.f32.gmra.mrb[60].mxu0 %vm1128_vm2, %v7534_v56  ;;  %13338 = vmatmul.mubr.msk.f32.vlgmr.msra.gmra.mrb[136].mxu1 %vm1128_vm2, %v7549_v27  ;;  %v7851_v50 = vpop.f32.mrb[49].mxu0  ;;  %v7857_v41 = vadd.f32 %v13234_v48, %v18651_v9 }
 0xc4f   : > { %13995 = vmatpush3.bf16.xpose.msk.msra.mxu0 %vm15110_vm3, %v13993_v62  ;;  %13999 = vmatpush3.bf16.xpose.msk.msra.mxu1 %vm15110_vm3, %v13997_v7  ;;  %v7852_v52 = vadd.f32 %v18651_v9, %v7851_v50  ;;  %v7544_v62 = vadd.f32 %v18589_v10, %v18548_v63  ;;  %v7564_v63 = vadd.f32 %v18589_v10, %v18556_v46 }
 0xc50   : > { %13317 = vmatprep.mubr.msk.f32.mxu0 %vm14686_vm1, %v19570_v12  ;;  %13340 = vmatprep.mubr.msk.f32.mxu1 %vm14686_vm1, %v19570_v12  ;;  %v7589_v46 = vadd.f32 %v18562_v44, %v18589_v10  ;;  %v19621_v44 = vpack.c.bf16 %v18609_v53, %v18614_v8  ;;  %v19624_v53 = vpack.c.bf16 %v18642_v57, %v18632_v60 }
 0xc51   : > { %v14001_v24 = vpack.c.bf16 %v7852_v52, %v7847_v19  ;;  %13370 = vmatprep.subr.mxu0 %v19570_v12  ;;  %14000 = vmatprep.subr.bf16.mxu1 %v19571_v26  ;;  %v13237_v40 = vpop.f32.mrb[50].mxu0 }
 0xc52   : > { %13318 = vmatmul.mubr.msk.f32.gmra.mrb[62].mxu0 %vm1128_vm2, %v7539_v35  ;;  %13341 = vmatmul.mubr.msk.f32.gmra.mrb[138].mxu1 %vm1128_vm2, %v7554_v30  ;;  %v7867_v1 = vadd.f32 %v13237_v40, %v18651_v9  ;;  %v7861_v61 = vpop.f32.mrb[51].mxu0 }
 0xc53   : > { %13320 = vmatprep.mubr.msk.f32.mxu0 %vm14686_vm1, %v19570_v12  ;;  %13343 = vmatprep.mubr.msk.f32.mxu1 %vm14686_vm1, %v19570_v12  ;;  %v7862_v28 = vadd.f32 %v18651_v9, %v7861_v61 }
 0xc55   : > { %v14005_v3 = vpack.c.bf16 %v7862_v28, %v7857_v41 }
 0xc56   : > { %13321 = vmatmul.mubr.msk.f32.gmra.mrb[64].mxu0 %vm1128_vm2, %v7544_v62  ;;  %13344 = vmatmul.mubr.msk.f32.gmra.mrb[140].mxu1 %vm1128_vm2, %v7559_v42  ;;  %v18948_v42 = vld [vmem:[%s19536_s9 + $0xa8] sm:$0xff] }
 0xc57   : > { %13371 = vmatpush3.xpose.msk.msra.mxu0 %vm1128_vm2, %v7832_v5  ;;  %14003 = vmatpush3.bf16.xpose.msk.msra.mxu1 %vm15110_vm3, %v14001_v24 }
 0xc58   : > { %13346 = vmatprep.mubr.msk.f32.mxu1 %vm14686_vm1, %v19570_v12  ;;  %13372 = vmatprep.mubr.msk.f32.mxu0 %vm14686_vm1, %v19570_v12 }
 0xc59   : > { %14004 = vmatprep.subr.bf16.mxu1 %v19571_v26  ;;  %14008 = vmatprep.subr.bf16.mxu0 %v19571_v26 }
 0xc5a   : > { %13347 = vmatmul.mubr.msk.f32.gmra.mrb[142].mxu1 %vm1128_vm2, %v7564_v63  ;;  %13373 = vmatmul.mubr.msk.f32.vlgmr.msra.gmra.mrb[66].mxu0 %vm1128_vm2, %v7584_v47  ;;  %v18956_v63 = vld [vmem:[%s19536_s9 + $0xb0] sm:$0xff] }
 0xc5b   : > { %13349 = vmatprep.mubr.msk.f32.mxu1 %vm14686_vm1, %v19570_v12  ;;  %13375 = vmatprep.mubr.msk.f32.mxu0 %vm14686_vm1, %v19570_v12 }
 0xc5c   : > { %14010 = vmatpush3.bf16.msra.mxu0 %v14009_v31  ;;  %v7634_v31 = vadd.f32 %v18589_v10, %v18584_v14  ;;  %v8009_v14 = vpop.f32.mrb[121].mxu1 }
 0xc5d   : > { %14011 = vmatprep.subr.bf16.mxu0 %v19571_v26  ;;  %v8010_v8 = vadd.f32 %v18600_v39, %v8009_v14  ;;  %v13269_v10 = vpop.f32.mrb[122].mxu1 }
 0xc5e   : > { %13350 = vmatmul.mubr.msk.f32.gmra.mrb[144].mxu1 %vm1128_vm2, %v7569_v23  ;;  %13376 = vmatmul.mubr.msk.f32.gmra.mrb[68].mxu0 %vm1128_vm2, %v7589_v46  ;;  %v8019_v13 = vpop.f32.mrb[123].mxu1 }
 0xc5f   : > { %14007 = vmatpush3.bf16.xpose.msk.msra.mxu1 %vm15110_vm3, %v14005_v3  ;;  %13352 = vmatprep.mubr.msk.f32.mxu1 %vm14686_vm1, %v19570_v12  ;;  %v14024_v22 = vpack.c.bf16 %v8010_v8, %v8005_v4  ;;  %v18897_v25 = vadd.f32 %v18600_v39, %v8019_v13  ;;  %v18999_v8 = vld [vmem:[%s19536_s9 + $0xd0] sm:$0xff] }
 0xc60   : > { %13378 = vmatprep.mubr.msk.f32.mxu0 %vm14686_vm1, %v19570_v12  ;;  %13405 = vmatprep.subr.mxu1 %v19570_v12 }
 0xc61   : > { %14013 = vmatpush3.bf16.msra.mxu0 %v19621_v44 }
 0xc62   : > { %13353 = vmatmul.mubr.msk.f32.gmra.mrb[146].mxu1 %vm1128_vm2, %v7574_v45  ;;  %13379 = vmatmul.mubr.msk.f32.gmra.mrb[70].mxu0 %vm1128_vm2, %v7594_v36  ;;  %v18966_v45 = vld [vmem:[%s19536_s9 + $0xb8] sm:$0xff] }
 0xc63   : > { %13355 = vmatprep.mubr.msk.f32.mxu1 %vm14686_vm1, %v19570_v12  ;;  %13381 = vmatprep.mubr.msk.f32.mxu0 %vm14686_vm1, %v19570_v12 }
 0xc64   : > { %14014 = vmatprep.subr.bf16.mxu0 %v19571_v26 }
 0xc65   : > { %14016 = vmatpush3.bf16.msra.mxu0 %v19622_v0  ;;  %v18976_v0 = vld [vmem:[%s19536_s9 + $0xc0] sm:$0xff] }
 0xc66   : > { %13356 = vmatmul.mubr.msk.f32.gmra.mrb[148].mxu1 %vm1128_vm2, %v7579_v6  ;;  %13382 = vmatmul.mubr.msk.f32.gmra.mrb[72].mxu0 %vm1128_vm2, %v7599_v29 }
 0xc67   : > { %13406 = vmatpush3.xpose.msk.msra.mxu1 %vm1128_vm2, %v7867_v1  ;;  %13384 = vmatprep.mubr.msk.f32.mxu0 %vm14686_vm1, %v19570_v12 }
 0xc68   : > { %13407 = vmatprep.mubr.msk.f32.mxu1 %vm14686_vm1, %v19570_v12  ;;  %13440 = vmatprep.subr.mxu0 %v19570_v12 }
 0xc69   : > { %14017 = vmatprep.subr.bf16.mxu1 %v19571_v26  ;;  %13441 = vmatpush3.msra.mxu0 %v7980_v2 }
 0xc6a   : > { %13385 = vmatmul.mubr.msk.f32.gmra.mrb[74].mxu0 %vm1128_vm2, %v7604_v38  ;;  %13408 = vmatmul.mubr.msk.f32.vlgmr.msra.gmra.mrb[150].mxu1 %vm1128_vm2, %v7619_v21 }
 0xc6b   : > { %13387 = vmatprep.mubr.msk.f32.mxu0 %vm14686_vm1, %v19570_v12  ;;  %13410 = vmatprep.mubr.msk.f32.mxu1 %vm14686_vm1, %v19570_v12 }
 0xc6c   : > { %14019 = vmatpush3.bf16.msra.mxu1 %v19623_v49  ;;  %14026 = vmatprep.subr.bf16.mxu0 %v19571_v26  ;;  %v18986_v49 = vld [vmem:[%s19536_s9 + $0xc8] sm:$0xff] }
 0xc6d   : > { %14020 = vmatprep.subr.bf16.mxu1 %v19571_v26 }
 0xc6e   : > { %13388 = vmatmul.mubr.msk.f32.gmra.mrb[76].mxu0 %vm1128_vm2, %v7609_v58  ;;  %13411 = vmatmul.mubr.msk.f32.gmra.mrb[152].mxu1 %vm1128_vm2, %v7624_v32 }
 0xc6f   : > { %13390 = vmatprep.mubr.msk.f32.mxu0 %vm14686_vm1, %v19570_v12  ;;  %13413 = vmatprep.mubr.msk.f32.mxu1 %vm14686_vm1, %v19570_v12 }
 0xc70   : > { %14022 = vmatpush3.bf16.msra.mxu1 %v19624_v53 }
 0xc71   : > { %14023 = vmatprep.subr.bf16.mxu1 %v19571_v26 }
 0xc72   : > { %13391 = vmatmul.mubr.msk.f32.gmra.mrb[78].mxu0 %vm1128_vm2, %v7614_v11  ;;  %13414 = vmatmul.mubr.msk.f32.gmra.mrb[154].mxu1 %vm1128_vm2, %v7629_v16 }
 0xc73   : > { %13416 = vmatprep.mubr.msk.f32.mxu1 %vm14686_vm1, %v19570_v12  ;;  %13442 = vmatprep.mubr.msk.f32.mxu0 %vm14686_vm1, %v19570_v12 }
 0xc74   : > { %14025 = vmatpush3.bf16.msra.mxu1 %v14024_v22 }
 0xc75   : > { %13475 = vmatprep.subr.mxu1 %v19570_v12 }
 0xc76   : > { %13417 = vmatmul.mubr.msk.f32.gmra.mrb[156].mxu1 %vm1128_vm2, %v7634_v31 }
 0xc77   : > { %13419 = vmatprep.mubr.msk.f32.mxu1 %vm14686_vm1, %v19570_v12 }
 0xc78   : > { %13476 = vmatpush3.msra.mxu1 %v8015_v34 }
 0xc79   : > { %14035 = vmatprep.subr.bf16.mxu1 %v19571_v26 }
 0xc7a   : > { %13420 = vmatmul.mubr.msk.f32.gmra.mrb[158].mxu1 %vm1128_vm2, %v7639_v33 }
 0xc7b   : > { %13422 = vmatprep.mubr.msk.f32.mxu1 %vm14686_vm1, %v19570_v12 }
 0xc7e   : > { %13423 = vmatmul.mubr.msk.f32.gmra.mrb[160].mxu1 %vm1128_vm2, %v18595_v54  ;;  %v18894_v54 = vadd.f32 %v13269_v10, %v18600_v39 }
 0xc7f   : > { %13425 = vmatprep.mubr.msk.f32.mxu1 %vm14686_vm1, %v19570_v12 }
 0xc80   : > { %v14027_v59 = vpack.c.bf16 %v18894_v54, %v18897_v25 }
 0xc82   : > { %13426 = vmatmul.mubr.msk.f32.gmra.mrb[162].mxu1 %vm1128_vm2, %v18592_v55  ;;  %v13272_v55 = vpop.f32.mrb[124].mxu1 }
 0xc83   : > { %13477 = vmatprep.mubr.msk.f32.mxu1 %vm14686_vm1, %v19570_v12  ;;  %v8029_v60 = vpop.f32.mrb[125].mxu1  ;;  %v18902_v51 = vadd.f32 %v13272_v55, %v18600_v39 }
 0xc84   : > { %v18905_v15 = vadd.f32 %v18600_v39, %v8029_v60  ;;  %v13275_v17 = vpop.f32.mrb[126].mxu1 }
 0xc85   : > { %v8039_v9 = vpop.f32.mrb[127].mxu1  ;;  %v18910_v18 = vadd.f32 %v13275_v17, %v18600_v39 }
 0xc86   : > { %v14030_v57 = vpack.c.bf16 %v18902_v51, %v18905_v15  ;;  %v18913_v20 = vadd.f32 %v18600_v39, %v8039_v9  ;;  %v13278_v43 = vpop.f32.mrb[128].mxu1 }
 0xc87   : > { %v18915_v37 = vpop.f32.mrb[129].mxu1  ;;  %v18920_v48 = vadd.f32 %v13278_v43, %v18600_v39  ;;  %v19014_v43 = vld [vmem:[%s19536_s9 + $0xd8] sm:$0xff] }
 0xc88   : > { %v14033_v56 = vpack.c.bf16 %v18910_v18, %v18913_v20  ;;  %v13281_v27 = vpop.f32.mrb[130].mxu1 }
 0xc89   : > { %v8059_v7 = vpop.f32.mrb[131].mxu1  ;;  %v18928_v30 = vadd.f32 %v13281_v27, %v18600_v39 }
 0xc8a   : > { %v18923_v50 = vadd.f32 %v18600_v39, %v8059_v7  ;;  %v13284_v52 = vpop.f32.mrb[132].mxu1 }
 0xc8b   : > { %v8069_v35 = vpop.f32.mrb[133].mxu1  ;;  %v18938_v1 = vadd.f32 %v13284_v52, %v18600_v39 }
 0xc8c   : > { %v14036_v19 = vpack.c.bf16 %v18923_v50, %v18920_v48  ;;  %v18931_v41 = vadd.f32 %v18600_v39, %v8069_v35  ;;  %v18935_v40 = vpop.f32.mrb[134].mxu1 }
 0xc8d   : > { %v8079_v61 = vpop.f32.mrb[135].mxu1 }
 0xc8e   : > { %v14039_v24 = vpack.c.bf16 %v18931_v41, %v18928_v30  ;;  %v18941_v28 = vadd.f32 %v18600_v39, %v8079_v61 }
 0xc90   : > { %v14042_v62 = vpack.c.bf16 %v18941_v28, %v18938_v1 }
 0xd11   : > { %v8204_v5 = vpop.f32.mrb[52].mxu0 }
 0xd12   : > { %v18951_v3 = vadd.f32 %v18948_v42, %v8204_v5  ;;  %v13304_v47 = vpop.f32.mrb[53].mxu0 }
 0xd14   : > { %v8664_v39 = vsel %vm1697_vm4, %v18951_v3, -inf }
 0xd15   : > { %8665 = vmax.xlane.f32.xlu0 %v8664_v39  ;;  %v8209_v23 = vpop.f32.mrb[54].mxu0 }
 0xd16   : > { %v18961_v46 = vadd.f32 %v18956_v63, %v8209_v23  ;;  %v13307_v36 = vpop.f32.mrb[55].mxu0 }
 0xd18   : > { %v8667_v44 = vsel %vm1697_vm4, %v18961_v46, -inf }
 0xd19   : > { %8668 = vmax.xlane.f32.xlu1 %v8667_v44  ;;  %v8214_v6 = vpop.f32.mrb[56].mxu0 }
 0xd1a   : > { %v18971_v29 = vadd.f32 %v18966_v45, %v8214_v6  ;;  %v13310_v2 = vpop.f32.mrb[57].mxu0 }
 0xd1c   : > { %v8670_v21 = vsel %vm1697_vm4, %v18971_v29, -inf }
 0xd1d   : > { %8671 = vmax.xlane.f32.xlu0 %v8670_v21  ;;  %v8219_v38 = vpop.f32.mrb[58].mxu0 }
 0xd1e   : > { %v18981_v32 = vadd.f32 %v18976_v0, %v8219_v38  ;;  %v13313_v58 = vpop.f32.mrb[59].mxu0 }
 0xd20   : > { %v8673_v11 = vsel %vm1697_vm4, %v18981_v32, -inf }
 0xd21   : > { %v8346_v16 = vpop.f32.mrb[136].mxu1  ;;  %8674 = vmax.xlane.f32.xlu1 %v8673_v11  ;;  %v8224_v53 = vpop.f32.mrb[60].mxu0 }
 0xd22   : > { %v18991_v31 = vadd.f32 %v18948_v42, %v8346_v16  ;;  %v18994_v33 = vadd.f32 %v18986_v49, %v8224_v53  ;;  %v13316_v4 = vpop.f32.mrb[61].mxu0  ;;  %v13339_v14 = vpop.f32.mrb[137].mxu1 }
 0xd24   : > { %v8685_v22 = vsel %vm1697_vm4, %v18991_v31, -inf  ;;  %v8676_v34 = vsel %vm1697_vm4, %v18994_v33, -inf }
 0xd25   : > { %v8351_v10 = vpop.f32.mrb[138].mxu1  ;;  %8686 = vmax.xlane.f32.xlu0 %v8685_v22  ;;  %8677 = vmax.xlane.f32.xlu1 %v8676_v34  ;;  %v8229_v13 = vpop.f32.mrb[62].mxu0 }
 0xd26   : > { %v19006_v55 = vadd.f32 %v18956_v63, %v8351_v10  ;;  %v19009_v60 = vadd.f32 %v18999_v8, %v8229_v13  ;;  %v13319_v17 = vpop.f32.mrb[63].mxu0  ;;  %v13342_v9 = vpop.f32.mrb[139].mxu1 }
 0xd28   : > { %v8688_v27 = vsel %vm1697_vm4, %v19006_v55, -inf  ;;  %v8679_v7 = vsel %vm1697_vm4, %v19009_v60, -inf }
 0xd29   : > { %v8356_v52 = vpop.f32.mrb[140].mxu1  ;;  %8689 = vmax.xlane.f32.xlu0 %v8688_v27  ;;  %8680 = vmax.xlane.f32.xlu1 %v8679_v7  ;;  %v8234_v35 = vpop.f32.mrb[64].mxu0 }
 0xd2a   : > { %v19021_v61 = vadd.f32 %v18966_v45, %v8356_v52  ;;  %v19024_v5 = vadd.f32 %v19014_v43, %v8234_v35  ;;  %v13322_v47 = vpop.f32.mrb[65].mxu0  ;;  %v13345_v39 = vpop.f32.mrb[141].mxu1 }
 0xd2c   : > { %v8691_v23 = vsel %vm1697_vm4, %v19021_v61, -inf  ;;  %v8682_v36 = vsel %vm1697_vm4, %v19024_v5, -inf }
 0xd2d   : > { %v8361_v44 = vpop.f32.mrb[142].mxu1  ;;  %8692 = vmax.xlane.f32.xlu0 %v8691_v23  ;;  %8683 = vmax.xlane.f32.xlu1 %v8682_v36  ;;  %v8488_v6 = vpop.f32.mrb[66].mxu0 }
 0xd2e   : > { %v19031_v2 = vadd.f32 %v18976_v0, %v8361_v44  ;;  %v19034_v21 = vadd.f32 %v18948_v42, %v8488_v6  ;;  %v13348_v38 = vpop.f32.mrb[143].mxu1  ;;  %v13374_v58 = vpop.f32.mrb[67].mxu0 }
 0xd30   : > { %v8694_v11 = vsel %vm1697_vm4, %v19031_v2, -inf  ;;  %v8706_v16 = vsel %vm1697_vm4, %v19034_v21, -inf }
 0xd31   : > { %v8366_v53 = vpop.f32.mrb[144].mxu1  ;;  %8695 = vmax.xlane.f32.xlu0 %v8694_v11  ;;  %8707 = vmax.xlane.f32.xlu1 %v8706_v16  ;;  %v8493_v4 = vpop.f32.mrb[68].mxu0 }
 0xd32   : > { %v19041_v14 = vadd.f32 %v18986_v49, %v8366_v53  ;;  %v19044_v22 = vadd.f32 %v18956_v63, %v8493_v4  ;;  %v13351_v34 = vpop.f32.mrb[145].mxu1  ;;  %v13377_v10 = vpop.f32.mrb[69].mxu0 }
 0xd34   : > { %v8697_v13 = vsel %vm1697_vm4, %v19041_v14, -inf  ;;  %v8709_v17 = vsel %vm1697_vm4, %v19044_v22, -inf }
 0xd35   : > { %v8371_v9 = vpop.f32.mrb[146].mxu1  ;;  %8698 = vmax.xlane.f32.xlu0 %v8697_v13  ;;  %8710 = vmax.xlane.f32.xlu1 %v8709_v17  ;;  %v8498_v27 = vpop.f32.mrb[70].mxu0 }
 0xd36   : > { %v19051_v7 = vadd.f32 %v18999_v8, %v8371_v9  ;;  %v19054_v52 = vadd.f32 %v18966_v45, %v8498_v27  ;;  %v13354_v35 = vpop.f32.mrb[147].mxu1  ;;  %v13380_v47 = vpop.f32.mrb[71].mxu0 }
 0xd38   : > { %v8700_v39 = vsel %vm1697_vm4, %v19051_v7, -inf  ;;  %v8712_v23 = vsel %vm1697_vm4, %v19054_v52, -inf }
 0xd39   : > { %v8376_v36 = vpop.f32.mrb[148].mxu1  ;;  %8701 = vmax.xlane.f32.xlu0 %v8700_v39  ;;  %8713 = vmax.xlane.f32.xlu1 %v8712_v23  ;;  %v8503_v44 = vpop.f32.mrb[72].mxu0 }
 0xd3a   : > { %v19061_v6 = vadd.f32 %v19014_v43, %v8376_v36  ;;  %v19064_v38 = vadd.f32 %v18976_v0, %v8503_v44  ;;  %v13357_v58 = vpop.f32.mrb[149].mxu1  ;;  %v13383_v11 = vpop.f32.mrb[73].mxu0 }
 0xd3c   : > { %v8703_v16 = vsel %vm1697_vm4, %v19061_v6, -inf  ;;  %v8715_v53 = vsel %vm1697_vm4, %v19064_v38, -inf }
 0xd3d   : > { %v8630_v4 = vpop.f32.mrb[150].mxu1  ;;  %8704 = vmax.xlane.f32.xlu0 %v8703_v16  ;;  %8716 = vmax.xlane.f32.xlu1 %v8715_v53  ;;  %v8508_v34 = vpop.f32.mrb[74].mxu0 }
 0xd3e   : > { %v19071_v10 = vadd.f32 %v18948_v42, %v8630_v4  ;;  %v19074_v13 = vadd.f32 %v18986_v49, %v8508_v34  ;;  %v13386_v17 = vpop.f32.mrb[75].mxu0  ;;  %v13409_v9 = vpop.f32.mrb[151].mxu1 }
 0xd40   : > { %v8727_v27 = vsel %vm1697_vm4, %v19071_v10, -inf  ;;  %v8718_v35 = vsel %vm1697_vm4, %v19074_v13, -inf }
 0xd41   : > { %v8635_v47 = vpop.f32.mrb[152].mxu1  ;;  %8728 = vmax.xlane.f32.xlu0 %v8727_v27  ;;  %8719 = vmax.xlane.f32.xlu1 %v8718_v35  ;;  %v8513_v39 = vpop.f32.mrb[76].mxu0 }
 0xd42   : > { %v19081_v23 = vadd.f32 %v18956_v63, %v8635_v47  ;;  %v19084_v42 = vadd.f32 %v18999_v8, %v8513_v39  ;;  %v13389_v36 = vpop.f32.mrb[77].mxu0  ;;  %v13412_v44 = vpop.f32.mrb[153].mxu1 }
 0xd44   : > { %v8730_v58 = vsel %vm1697_vm4, %v19081_v23, -inf  ;;  %v8721_v11 = vsel %vm1697_vm4, %v19084_v42, -inf }
 0xd45   : > { %v8640_v16 = vpop.f32.mrb[154].mxu1  ;;  %8731 = vmax.xlane.f32.xlu0 %v8730_v58  ;;  %8722 = vmax.xlane.f32.xlu1 %v8721_v11  ;;  %v8518_v53 = vpop.f32.mrb[78].mxu0 }
 0xd46   : > { %v19091_v4 = vadd.f32 %v18966_v45, %v8640_v16  ;;  %v19094_v63 = vadd.f32 %v19014_v43, %v8518_v53  ;;  %v13415_v34 = vpop.f32.mrb[155].mxu1  ;;  %v13392_v17 = vpop.f32.mrb[79].mxu0 }
 0xd48   : > { %v8733_v9 = vsel %vm1697_vm4, %v19091_v4, -inf  ;;  %v8724_v27 = vsel %vm1697_vm4, %v19094_v63, -inf }
 0xd49   : > { %v8645_v35 = vpop.f32.mrb[156].mxu1  ;;  %8734 = vmax.xlane.f32.xlu0 %v8733_v9  ;;  %8725 = vmax.xlane.f32.xlu1 %v8724_v27 }
 0xd4a   : > { %v19101_v47 = vadd.f32 %v18976_v0, %v8645_v35  ;;  %v13418_v39 = vpop.f32.mrb[157].mxu1 }
 0xd4c   : > { %v8736_v45 = vsel %vm1697_vm4, %v19101_v47, -inf }
 0xd4d   : > { %v8650_v36 = vpop.f32.mrb[158].mxu1  ;;  %8737 = vmax.xlane.f32.xlu0 %v8736_v45 }
 0xd4e   : > { %v19106_v44 = vadd.f32 %v18986_v49, %v8650_v36  ;;  %v13421_v58 = vpop.f32.mrb[159].mxu1 }
 0xd50   : > { %v8739_v11 = vsel %vm1697_vm4, %v19106_v44, -inf }
 0xd51   : > { %v8655_v16 = vpop.f32.mrb[160].mxu1  ;;  %8740 = vmax.xlane.f32.xlu1 %v8739_v11 }
 0xd52   : > { %v19111_v53 = vadd.f32 %v18999_v8, %v8655_v16  ;;  %v13424_v0 = vpop.f32.mrb[161].mxu1 }
 0xd54   : > { %v8742_v34 = vsel %vm1697_vm4, %v19111_v53, -inf }
 0xd55   : > { %v8660_v17 = vpop.f32.mrb[162].mxu1  ;;  %8743 = vmax.xlane.f32.xlu0 %v8742_v34 }
 0xd56   : > { %v19116_v9 = vadd.f32 %v19014_v43, %v8660_v17  ;;  %v13427_v49 = vpop.f32.mrb[163].mxu1 }
 0xd58   : > { %v8745_v27 = vsel %vm1697_vm4, %v19116_v9, -inf }
 0xd59   : > { %8746 = vmax.xlane.f32.xlu1 %v8745_v27 }
 0xda2   : > { %v8666_v35 = vpop.xlane.xlu0 %8665 }
 0xda3   : > { %v8748_v39 = vsub.f32 %v18951_v3, %v8666_v35 }
 0xda5   : > { %v8776_v45 = vmul.f32 1.442695, %v8748_v39 }
 0xda6   : > { %v8669_v8 = vpop.xlane.xlu1 %8668 }
 0xda7   : > { %14480 = vpow2.f32 %v8776_v45  ;;  %v8749_v36 = vsub.f32 %v18961_v46, %v8669_v8 }
 0xda9   : > { %v8778_v58 = vmul.f32 1.442695, %v8749_v36 }
 0xdaa   : > { %v8672_v11 = vpop.xlane.xlu0 %8671 }
 0xdab   : > { %14482 = vpow2.f32 %v8778_v58  ;;  %v8750_v16 = vsub.f32 %v18971_v29, %v8672_v11 }
 0xdad   : > { %v8780_v43 = vmul.f32 1.442695, %v8750_v16 }
 0xdae   : > { %v8675_v0 = vpop.xlane.xlu1 %8674 }
 0xdaf   : > { %14484 = vpow2.f32 %v8780_v43  ;;  %v8751_v34 = vsub.f32 %v18981_v32, %v8675_v0 }
 0xdb1   : > { %v19124_v17 = vpop.eup %14480  ;;  %v8782_v49 = vmul.f32 1.442695, %v8751_v34 }
 0xdb2   : > { %v8687_v27 = vpop.xlane.xlu0 %8686  ;;  %v8678_v3 = vpop.xlane.xlu1 %8677  ;;  %v8832_v35 = vsel %vm1697_vm4, %v19124_v17, 0.0 }
 0xdb3   : > { %14486 = vpow2.f32 %v8782_v49  ;;  %v8755_v46 = vsub.f32 %v18991_v31, %v8687_v27  ;;  %v8752_v39 = vsub.f32 %v18994_v33, %v8678_v3  ;;  %8833 = vadd.xlane.f32.xlu0 %v8832_v35 }
 0xdb5   : > { %v19130_v29 = vpop.eup %14482  ;;  %v8790_v45 = vmul.f32 1.442695, %v8755_v46  ;;  %v8784_v8 = vmul.f32 1.442695, %v8752_v39 }
 0xdb6   : > { %v8690_v36 = vpop.xlane.xlu0 %8689  ;;  %v8681_v32 = vpop.xlane.xlu1 %8680  ;;  %v8835_v58 = vsel %vm1697_vm4, %v19130_v29, 0.0 }
 0xdb7   : > { %14488 = vpow2.f32 %v8790_v45  ;;  %v8756_v11 = vsub.f32 %v19006_v55, %v8690_v36  ;;  %v8753_v16 = vsub.f32 %v19009_v60, %v8681_v32  ;;  %8836 = vadd.xlane.f32.xlu1 %v8835_v58 }
 0xdb8   : > { %14490 = vpow2.f32 %v8784_v8 }
 0xdb9   : > { %v19136_v31 = vpop.eup %14484  ;;  %v8792_v33 = vmul.f32 1.442695, %v8756_v11  ;;  %v8786_v43 = vmul.f32 1.442695, %v8753_v16 }
 0xdba   : > { %v8693_v0 = vpop.xlane.xlu0 %8692  ;;  %v8684_v34 = vpop.xlane.xlu1 %8683  ;;  %v8838_v49 = vsel %vm1697_vm4, %v19136_v31, 0.0 }
 0xdbb   : > { %14492 = vpow2.f32 %v8792_v33  ;;  %v8757_v27 = vsub.f32 %v19021_v61, %v8693_v0  ;;  %v8754_v3 = vsub.f32 %v19024_v5, %v8684_v34  ;;  %8839 = vadd.xlane.f32.xlu0 %v8838_v49 }
 0xdbc   : > { %14494 = vpow2.f32 %v8786_v43 }
 0xdbd   : > { %v19142_v55 = vpop.eup %14486  ;;  %v8794_v60 = vmul.f32 1.442695, %v8757_v27  ;;  %v8788_v35 = vmul.f32 1.442695, %v8754_v3 }
 0xdbe   : > { %v8696_v46 = vpop.xlane.xlu0 %8695  ;;  %v8708_v39 = vpop.xlane.xlu1 %8707  ;;  %v8841_v45 = vsel %vm1697_vm4, %v19142_v55, 0.0 }
 0xdbf   : > { %14496 = vpow2.f32 %v8794_v60  ;;  %v8758_v8 = vsub.f32 %v19031_v2, %v8696_v46  ;;  %v8762_v36 = vsub.f32 %v19034_v21, %v8708_v39  ;;  %8842 = vadd.xlane.f32.xlu1 %v8841_v45 }
 0xdc0   : > { %14498 = vpow2.f32 %v8788_v35 }
 0xdc1   : > { %v19148_v61 = vpop.eup %14488  ;;  %v8796_v5 = vmul.f32 1.442695, %v8758_v8  ;;  %v8804_v32 = vmul.f32 1.442695, %v8762_v36 }
 0xdc2   : > { %v19150_v58 = vpop.eup %14490  ;;  %v8699_v11 = vpop.xlane.xlu0 %8698  ;;  %v8853_v33 = vsel %vm1697_vm4, %v19148_v61, 0.0 }
 0xdc3   : > { %v8711_v16 = vpop.xlane.xlu1 %8710  ;;  %14500 = vpow2.f32 %v8796_v5  ;;  %v8759_v43 = vsub.f32 %v19041_v14, %v8699_v11  ;;  %8854 = vadd.xlane.f32.xlu0 %v8853_v33  ;;  %v8844_v21 = vsel %vm1697_vm4, %v19150_v58, 0.0 }
 0xdc4   : > { %v8763_v2 = vsub.f32 %v19044_v22, %v8711_v16  ;;  %14502 = vpow2.f32 %v8804_v32  ;;  %8845 = vadd.xlane.f32.xlu1 %v8844_v21 }
 0xdc5   : > { %v19158_v0 = vpop.eup %14492  ;;  %v8798_v34 = vmul.f32 1.442695, %v8759_v43 }
 0xdc6   : > { %v8806_v49 = vmul.f32 1.442695, %v8763_v2  ;;  %v19160_v27 = vpop.eup %14494  ;;  %v8702_v3 = vpop.xlane.xlu0 %8701  ;;  %v8856_v35 = vsel %vm1697_vm4, %v19158_v0, 0.0 }
 0xdc7   : > { %v8714_v60 = vpop.xlane.xlu1 %8713  ;;  %14504 = vpow2.f32 %v8798_v34  ;;  %v8760_v14 = vsub.f32 %v19051_v7, %v8702_v3  ;;  %8857 = vadd.xlane.f32.xlu0 %v8856_v35  ;;  %v8847_v46 = vsel %vm1697_vm4, %v19160_v27, 0.0 }
 0xdc8   : > { %v8764_v22 = vsub.f32 %v19054_v52, %v8714_v60  ;;  %14506 = vpow2.f32 %v8806_v49  ;;  %8848 = vadd.xlane.f32.xlu1 %v8847_v46 }
 0xdc9   : > { %v19168_v39 = vpop.eup %14496  ;;  %v8800_v45 = vmul.f32 1.442695, %v8760_v14 }
 0xdca   : > { %v8808_v8 = vmul.f32 1.442695, %v8764_v22  ;;  %v19170_v36 = vpop.eup %14498  ;;  %v8705_v5 = vpop.xlane.xlu0 %8704  ;;  %v8859_v11 = vsel %vm1697_vm4, %v19168_v39, 0.0 }
 0xdcb   : > { %v8717_v32 = vpop.xlane.xlu1 %8716  ;;  %14508 = vpow2.f32 %v8800_v45  ;;  %v8761_v7 = vsub.f32 %v19061_v6, %v8705_v5  ;;  %8860 = vadd.xlane.f32.xlu0 %v8859_v11  ;;  %v8850_v16 = vsel %vm1697_vm4, %v19170_v36, 0.0 }
 0xdcc   : > { %v8765_v52 = vsub.f32 %v19064_v38, %v8717_v32  ;;  %14510 = vpow2.f32 %v8808_v8  ;;  %8851 = vadd.xlane.f32.xlu1 %v8850_v16 }
 0xdcd   : > { %v19178_v33 = vpop.eup %14500  ;;  %v8802_v43 = vmul.f32 1.442695, %v8761_v7 }
 0xdce   : > { %v8810_v2 = vmul.f32 1.442695, %v8765_v52  ;;  %v19180_v21 = vpop.eup %14502  ;;  %v8729_v34 = vpop.xlane.xlu0 %8728  ;;  %v8862_v3 = vsel %vm1697_vm4, %v19178_v33, 0.0 }
 0xdcf   : > { %v8720_v49 = vpop.xlane.xlu1 %8719  ;;  %14512 = vpow2.f32 %v8802_v43  ;;  %v8769_v6 = vsub.f32 %v19071_v10, %v8729_v34  ;;  %8863 = vadd.xlane.f32.xlu0 %v8862_v3  ;;  %v8874_v60 = vsel %vm1697_vm4, %v19180_v21, 0.0 }
 0xdd0   : > { %v8766_v38 = vsub.f32 %v19074_v13, %v8720_v49  ;;  %14514 = vpow2.f32 %v8810_v2  ;;  %8875 = vadd.xlane.f32.xlu1 %v8874_v60 }
 0xdd1   : > { %v19188_v35 = vpop.eup %14504  ;;  %v8818_v14 = vmul.f32 1.442695, %v8769_v6 }
 0xdd2   : > { %v8812_v22 = vmul.f32 1.442695, %v8766_v38  ;;  %v19190_v46 = vpop.eup %14506  ;;  %v8732_v45 = vpop.xlane.xlu0 %8731  ;;  %v8865_v5 = vsel %vm1697_vm4, %v19188_v35, 0.0 }
 0xdd3   : > { %v8723_v8 = vpop.xlane.xlu1 %8722  ;;  %14516 = vpow2.f32 %v8818_v14  ;;  %v8770_v10 = vsub.f32 %v19081_v23, %v8732_v45  ;;  %8866 = vadd.xlane.f32.xlu0 %v8865_v5  ;;  %v8877_v32 = vsel %vm1697_vm4, %v19190_v46, 0.0 }
 0xdd4   : > { %v8767_v13 = vsub.f32 %v19084_v42, %v8723_v8  ;;  %14518 = vpow2.f32 %v8812_v22  ;;  %8878 = vadd.xlane.f32.xlu1 %v8877_v32 }
 0xdd5   : > { %v19198_v11 = vpop.eup %14508  ;;  %v8820_v7 = vmul.f32 1.442695, %v8770_v10 }
 0xdd6   : > { %v8814_v52 = vmul.f32 1.442695, %v8767_v13  ;;  %v19200_v16 = vpop.eup %14510  ;;  %v8735_v43 = vpop.xlane.xlu0 %8734  ;;  %v8868_v34 = vsel %vm1697_vm4, %v19198_v11, 0.0 }
 0xdd7   : > { %v8726_v2 = vpop.xlane.xlu1 %8725  ;;  %14520 = vpow2.f32 %v8820_v7  ;;  %v8771_v23 = vsub.f32 %v19091_v4, %v8735_v43  ;;  %8869 = vadd.xlane.f32.xlu0 %v8868_v34  ;;  %v8880_v49 = vsel %vm1697_vm4, %v19200_v16, 0.0 }
 0xdd8   : > { %v8768_v42 = vsub.f32 %v19094_v63, %v8726_v2  ;;  %14522 = vpow2.f32 %v8814_v52  ;;  %8881 = vadd.xlane.f32.xlu1 %v8880_v49 }
 0xdd9   : > { %v19208_v3 = vpop.eup %14512  ;;  %v8822_v6 = vmul.f32 1.442695, %v8771_v23 }
 0xdda   : > { %v8816_v38 = vmul.f32 1.442695, %v8768_v42  ;;  %v19210_v60 = vpop.eup %14514  ;;  %v8738_v14 = vpop.xlane.xlu0 %8737  ;;  %v8871_v22 = vsel %vm1697_vm4, %v19208_v3, 0.0 }
 0xddb   : > { %14524 = vpow2.f32 %v8822_v6  ;;  %v8772_v4 = vsub.f32 %v19101_v47, %v8738_v14  ;;  %8872 = vadd.xlane.f32.xlu0 %v8871_v22  ;;  %v8883_v63 = vsel %vm1697_vm4, %v19210_v60, 0.0 }
 0xddc   : > { %14526 = vpow2.f32 %v8816_v38  ;;  %8884 = vadd.xlane.f32.xlu1 %v8883_v63 }
 0xddd   : > { %v19217_v45 = vpop.eup %14516  ;;  %v8824_v8 = vmul.f32 1.442695, %v8772_v4 }
 0xdde   : > { %v19219_v5 = vpop.eup %14518  ;;  %v8741_v10 = vpop.xlane.xlu1 %8740  ;;  %v8895_v13 = vsel %vm1697_vm4, %v19217_v45, 0.0 }
 0xddf   : > { %14528 = vpow2.f32 %v8824_v8  ;;  %v8773_v32 = vsub.f32 %v19106_v44, %v8741_v10  ;;  %8896 = vadd.xlane.f32.xlu0 %v8895_v13  ;;  %v8886_v47 = vsel %vm1697_vm4, %v19219_v5, 0.0 }
 0xde0   : > { %8887 = vadd.xlane.f32.xlu1 %v8886_v47 }
 0xde1   : > { %v19226_v7 = vpop.eup %14520  ;;  %v8826_v52 = vmul.f32 1.442695, %v8773_v32 }
 0xde2   : > { %v19228_v43 = vpop.eup %14522  ;;  %v8744_v2 = vpop.xlane.xlu0 %8743  ;;  %v8898_v34 = vsel %vm1697_vm4, %v19226_v7, 0.0 }
 0xde3   : > { %14530 = vpow2.f32 %v8826_v52  ;;  %v8774_v23 = vsub.f32 %v19111_v53, %v8744_v2  ;;  %8899 = vadd.xlane.f32.xlu0 %v8898_v34  ;;  %v8889_v44 = vsel %vm1697_vm4, %v19228_v43, 0.0 }
 0xde4   : > { %8890 = vadd.xlane.f32.xlu1 %v8889_v44 }
 0xde5   : > { %v19235_v42 = vpop.eup %14524  ;;  %v8828_v49 = vmul.f32 1.442695, %v8774_v23 }
 0xde6   : > { %v19237_v6 = vpop.eup %14526  ;;  %v8747_v38 = vpop.xlane.xlu1 %8746  ;;  %v8901_v14 = vsel %vm1697_vm4, %v19235_v42, 0.0 }
 0xde7   : > { %14532 = vpow2.f32 %v8828_v49  ;;  %v8775_v22 = vsub.f32 %v19116_v9, %v8747_v38  ;;  %8902 = vadd.xlane.f32.xlu0 %v8901_v14  ;;  %v8892_v53 = vsel %vm1697_vm4, %v19237_v6, 0.0 }
 0xde8   : > { %8893 = vadd.xlane.f32.xlu1 %v8892_v53 }
 0xde9   : > { %v19244_v4 = vpop.eup %14528  ;;  %v8830_v63 = vmul.f32 1.442695, %v8775_v22 }
 0xdea   : > { %v8904_v8 = vsel %vm1697_vm4, %v19244_v4, 0.0 }
 0xdeb   : > { %14534 = vpow2.f32 %v8830_v63  ;;  %8905 = vadd.xlane.f32.xlu0 %v8904_v8 }
 0xded   : > { %v19248_v10 = vpop.eup %14530 }
 0xdee   : > { %v8907_v13 = vsel %vm1697_vm4, %v19248_v10, 0.0 }
 0xdef   : > { %8908 = vadd.xlane.f32.xlu1 %v8907_v13 }
 0xdf1   : > { %v19252_v9 = vpop.eup %14532 }
 0xdf2   : > { %v8910_v32 = vsel %vm1697_vm4, %v19252_v9, 0.0 }
 0xdf3   : > { %8911 = vadd.xlane.f32.xlu0 %v8910_v32 }
 0xdf5   : > { %v19256_v47 = vpop.eup %14534 }
 0xdf6   : > { %v8913_v52 = vsel %vm1697_vm4, %v19256_v47, 0.0 }
 0xdf7   : > { %8914 = vadd.xlane.f32.xlu1 %v8913_v52 }
 0xe40   : > { %v8834_v2 = vpop.xlane.xlu0 %8833 }
 0xe41   : > { %14536 = vrcp.f32 %v8834_v2 }
 0xe44   : > { %v8837_v34 = vpop.xlane.xlu1 %8836 }
 0xe45   : > { %14538 = vrcp.f32 %v8837_v34 }
 0xe48   : > { %v8840_v23 = vpop.xlane.xlu0 %8839 }
 0xe49   : > { %14540 = vrcp.f32 %v8840_v23 }
 0xe4b   : > { %v14537_v44 = vpop.eup %14536 }
 0xe4c   : > { %v8944_v49 = vmul.f32 %v14537_v44, %v19124_v17  ;;  %v8843_v38 = vpop.xlane.xlu1 %8842 }
 0xe4d   : > { %14542 = vrcp.f32 %v8843_v38 }
 0xe4e   : > { %13443 = vmatmul.mubr.msk.f32.vlgmr.msra.gmra.mrb[80].mxu0 %vm1697_vm4, %v8944_v49 }
 0xe4f   : > { %v14539_v14 = vpop.eup %14538  ;;  %14028 = vmatpush3.bf16.msra.mxu0 %v14027_v59  ;;  %13445 = vmatprep.mubr.msk.f32.mxu0 %vm14686_vm1, %v19570_v12 }
 0xe50   : > { %v8945_v22 = vmul.f32 %v14539_v14, %v19130_v29  ;;  %v8855_v53 = vpop.xlane.xlu0 %8854  ;;  %14029 = vmatprep.subr.bf16.mxu0 %v19571_v26 }
 0xe51   : > { %14544 = vrcp.f32 %v8855_v53  ;;  %v8846_v63 = vpop.xlane.xlu1 %8845 }
 0xe52   : > { %14546 = vrcp.f32 %v8846_v63  ;;  %13446 = vmatmul.mubr.msk.f32.gmra.mrb[82].mxu0 %vm1697_vm4, %v8945_v22 }
 0xe53   : > { %v14541_v17 = vpop.eup %14540  ;;  %14031 = vmatpush3.bf16.msra.mxu0 %v14030_v57  ;;  %13448 = vmatprep.mubr.msk.f32.mxu0 %vm14686_vm1, %v19570_v12  ;;  %v14676_v57 = vld [vmem:[%s19533_s6 + $0x3] ss:$0 sm:$0xff] }
 0xe54   : > { %v8946_v54 = vmul.f32 %v14541_v17, %v19136_v31  ;;  %v8858_v25 = vpop.xlane.xlu0 %8857  ;;  %14032 = vmatprep.subr.bf16.mxu0 %v19571_v26  ;;  %v8050_v31 = vadd.f32 %v14676_v57, %v18915_v37 }
 0xe55   : > { %14548 = vrcp.f32 %v8858_v25  ;;  %v8849_v59 = vpop.xlane.xlu1 %8848 }
 0xe56   : > { %14550 = vrcp.f32 %v8849_v59  ;;  %13449 = vmatmul.mubr.msk.f32.gmra.mrb[84].mxu0 %vm1697_vm4, %v8946_v54 }
 0xe57   : > { %v14543_v29 = vpop.eup %14542  ;;  %14034 = vmatpush3.bf16.msra.mxu0 %v14033_v56  ;;  %13451 = vmatprep.mubr.msk.f32.mxu0 %vm14686_vm1, %v19570_v12 }
 0xe58   : > { %v8947_v51 = vmul.f32 %v14543_v29, %v19142_v55  ;;  %v8861_v15 = vpop.xlane.xlu0 %8860  ;;  %13510 = vmatprep.subr.mxu0 %v19570_v12 }
 0xe59   : > { %14552 = vrcp.f32 %v8861_v15  ;;  %v8852_v8 = vpop.xlane.xlu1 %8851 }
 0xe5a   : > { %14554 = vrcp.f32 %v8852_v8  ;;  %13452 = vmatmul.mubr.msk.f32.gmra.mrb[86].mxu0 %vm1697_vm4, %v8947_v51 }
 0xe5b   : > { %v14545_v18 = vpop.eup %14544  ;;  %13511 = vmatpush3.msra.mxu0 %v8050_v31  ;;  %13454 = vmatprep.mubr.msk.f32.mxu0 %vm14686_vm1, %v19570_v12 }
 0xe5c   : > { %v14547_v20 = vpop.eup %14546  ;;  %v8951_v56 = vmul.f32 %v14545_v18, %v19148_v61  ;;  %v8864_v55 = vpop.xlane.xlu0 %8863 }
 0xe5d   : > { %v8948_v13 = vmul.f32 %v14547_v20, %v19150_v58  ;;  %14556 = vrcp.f32 %v8864_v55  ;;  %v8876_v32 = vpop.xlane.xlu1 %8875 }
 0xe5e   : > { %14558 = vrcp.f32 %v8876_v32  ;;  %13478 = vmatmul.mubr.msk.f32.vlgmr.msra.gmra.mrb[164].mxu1 %vm1697_vm4, %v8951_v56 }
 0xe5f   : > { %v14549_v37 = vpop.eup %14548  ;;  %13455 = vmatmul.mubr.msk.f32.gmra.mrb[88].mxu0 %vm1697_vm4, %v8948_v13  ;;  %14037 = vmatpush3.bf16.msra.mxu1 %v14036_v19 }
 0xe60   : > { %v14551_v52 = vpop.eup %14550  ;;  %v8952_v2 = vmul.f32 %v14549_v37, %v19158_v0  ;;  %v8867_v34 = vpop.xlane.xlu0 %8866  ;;  %13457 = vmatprep.mubr.msk.f32.mxu0 %vm14686_vm1, %v19570_v12  ;;  %13480 = vmatprep.mubr.msk.f32.mxu1 %vm14686_vm1, %v19570_v12 }
 0xe61   : > { %v8949_v61 = vmul.f32 %v14551_v52, %v19160_v27  ;;  %14560 = vrcp.f32 %v8867_v34  ;;  %v8879_v58 = vpop.xlane.xlu1 %8878  ;;  %14038 = vmatprep.subr.bf16.mxu1 %v19571_v26 }
 0xe62   : > { %14562 = vrcp.f32 %v8879_v58  ;;  %13481 = vmatmul.mubr.msk.f32.gmra.mrb[166].mxu1 %vm1697_vm4, %v8952_v2 }
 0xe63   : > { %v14553_v48 = vpop.eup %14552  ;;  %13458 = vmatmul.mubr.msk.f32.gmra.mrb[90].mxu0 %vm1697_vm4, %v8949_v61  ;;  %14040 = vmatpush3.bf16.msra.mxu1 %v14039_v24 }
 0xe64   : > { %v14555_v50 = vpop.eup %14554  ;;  %v8953_v19 = vmul.f32 %v14553_v48, %v19168_v39  ;;  %v8870_v0 = vpop.xlane.xlu0 %8869  ;;  %13460 = vmatprep.mubr.msk.f32.mxu0 %vm14686_vm1, %v19570_v12  ;;  %13483 = vmatprep.mubr.msk.f32.mxu1 %vm14686_vm1, %v19570_v12 }
 0xe65   : > { %v8950_v27 = vmul.f32 %v14555_v50, %v19170_v36  ;;  %14564 = vrcp.f32 %v8870_v0  ;;  %v8882_v23 = vpop.xlane.xlu1 %8881  ;;  %14041 = vmatprep.subr.bf16.mxu1 %v19571_v26  ;;  %v8085_v26 = vadd.f32 %v14676_v57, %v18935_v40 }
 0xe66   : > { %14566 = vrcp.f32 %v8882_v23  ;;  %13484 = vmatmul.mubr.msk.f32.gmra.mrb[168].mxu1 %vm1697_vm4, %v8953_v19 }
 0xe67   : > { %v14557_v30 = vpop.eup %14556  ;;  %13461 = vmatmul.mubr.msk.f32.gmra.mrb[92].mxu0 %vm1697_vm4, %v8950_v27  ;;  %14043 = vmatpush3.bf16.msra.mxu1 %v14042_v62 }
 0xe68   : > { %v14559_v41 = vpop.eup %14558  ;;  %v8954_v24 = vmul.f32 %v14557_v30, %v19178_v33  ;;  %v8873_v39 = vpop.xlane.xlu0 %8872  ;;  %13486 = vmatprep.mubr.msk.f32.mxu1 %vm14686_vm1, %v19570_v12  ;;  %13512 = vmatprep.mubr.msk.f32.mxu0 %vm14686_vm1, %v19570_v12 }
 0xe69   : > { %v8958_v36 = vmul.f32 %v14559_v41, %v19180_v21  ;;  %14568 = vrcp.f32 %v8873_v39  ;;  %v8885_v44 = vpop.xlane.xlu1 %8884  ;;  %13545 = vmatprep.subr.mxu1 %v19570_v12 }
 0xe6a   : > { %14570 = vrcp.f32 %v8885_v44  ;;  %13487 = vmatmul.mubr.msk.f32.gmra.mrb[170].mxu1 %vm1697_vm4, %v8954_v24 }
 0xe6b   : > { %v14561_v1 = vpop.eup %14560  ;;  %13513 = vmatmul.mubr.msk.f32.vlgmr.msra.gmra.mrb[94].mxu0 %vm1697_vm4, %v8958_v36  ;;  %13546 = vmatpush3.msra.mxu1 %v8085_v26 }
 0xe6c   : > { %v14563_v28 = vpop.eup %14562  ;;  %v8955_v62 = vmul.f32 %v14561_v1, %v19188_v35  ;;  %v8897_v33 = vpop.xlane.xlu0 %8896  ;;  %13489 = vmatprep.mubr.msk.f32.mxu1 %vm14686_vm1, %v19570_v12  ;;  %13515 = vmatprep.mubr.msk.f32.mxu0 %vm14686_vm1, %v19570_v12 }
 0xe6d   : > { %v8959_v40 = vmul.f32 %v14563_v28, %v19190_v46  ;;  %14572 = vrcp.f32 %v8897_v33  ;;  %v8888_v21 = vpop.xlane.xlu1 %8887 }
 0xe6e   : > { %14574 = vrcp.f32 %v8888_v21  ;;  %13490 = vmatmul.mubr.msk.f32.gmra.mrb[172].mxu1 %vm1697_vm4, %v8955_v62 }
 0xe6f   : > { %v14565_v49 = vpop.eup %14564  ;;  %13516 = vmatmul.mubr.msk.f32.gmra.mrb[96].mxu0 %vm1697_vm4, %v8959_v40  ;;  %13492 = vmatprep.mubr.msk.f32.mxu1 %vm14686_vm1, %v19570_v12 }
 0xe70   : > { %v14567_v35 = vpop.eup %14566  ;;  %v8956_v38 = vmul.f32 %v14565_v49, %v19198_v11  ;;  %v8900_v14 = vpop.xlane.xlu0 %8899  ;;  %13518 = vmatprep.mubr.msk.f32.mxu0 %vm14686_vm1, %v19570_v12 }
 0xe71   : > { %v8960_v46 = vmul.f32 %v14567_v35, %v19200_v16  ;;  %14576 = vrcp.f32 %v8900_v14  ;;  %v8891_v22 = vpop.xlane.xlu1 %8890 }
 0xe72   : > { %14578 = vrcp.f32 %v8891_v22  ;;  %13493 = vmatmul.mubr.msk.f32.gmra.mrb[174].mxu1 %vm1697_vm4, %v8956_v38 }
 0xe73   : > { %v14569_v53 = vpop.eup %14568  ;;  %13519 = vmatmul.mubr.msk.f32.gmra.mrb[98].mxu0 %vm1697_vm4, %v8960_v46  ;;  %13495 = vmatprep.mubr.msk.f32.mxu1 %vm14686_vm1, %v19570_v12 }
 0xe74   : > { %v14571_v63 = vpop.eup %14570  ;;  %v8957_v11 = vmul.f32 %v14569_v53, %v19208_v3  ;;  %v8903_v17 = vpop.xlane.xlu0 %8902  ;;  %13521 = vmatprep.mubr.msk.f32.mxu0 %vm14686_vm1, %v19570_v12 }
 0xe75   : > { %v8961_v16 = vmul.f32 %v14571_v63, %v19210_v60  ;;  %14580 = vrcp.f32 %v8903_v17  ;;  %v8894_v54 = vpop.xlane.xlu1 %8893 }
 0xe76   : > { %14582 = vrcp.f32 %v8894_v54  ;;  %13496 = vmatmul.mubr.msk.f32.gmra.mrb[176].mxu1 %vm1697_vm4, %v8957_v11 }
 0xe77   : > { %v14573_v25 = vpop.eup %14572  ;;  %13522 = vmatmul.mubr.msk.f32.gmra.mrb[100].mxu0 %vm1697_vm4, %v8961_v16  ;;  %13547 = vmatprep.mubr.msk.f32.mxu1 %vm14686_vm1, %v19570_v12 }
 0xe78   : > { %v14575_v59 = vpop.eup %14574  ;;  %v8965_v3 = vmul.f32 %v14573_v25, %v19217_v45  ;;  %v8906_v29 = vpop.xlane.xlu0 %8905  ;;  %13524 = vmatprep.mubr.msk.f32.mxu0 %vm14686_vm1, %v19570_v12 }
 0xe79   : > { %v8962_v60 = vmul.f32 %v14575_v59, %v19219_v5  ;;  %14584 = vrcp.f32 %v8906_v29 }
 0xe7a   : > { %13548 = vmatmul.mubr.msk.f32.vlgmr.msra.gmra.mrb[178].mxu1 %vm1697_vm4, %v8965_v3 }
 0xe7b   : > { %v14577_v51 = vpop.eup %14576  ;;  %13525 = vmatmul.mubr.msk.f32.gmra.mrb[102].mxu0 %vm1697_vm4, %v8962_v60  ;;  %13550 = vmatprep.mubr.msk.f32.mxu1 %vm14686_vm1, %v19570_v12 }
 0xe7c   : > { %v14579_v15 = vpop.eup %14578  ;;  %v8966_v57 = vmul.f32 %v14577_v51, %v19226_v7  ;;  %v8909_v31 = vpop.xlane.xlu1 %8908  ;;  %13527 = vmatprep.mubr.msk.f32.mxu0 %vm14686_vm1, %v19570_v12 }
 0xe7d   : > { %v8963_v45 = vmul.f32 %v14579_v15, %v19228_v43  ;;  %14586 = vrcp.f32 %v8909_v31 }
 0xe7e   : > { %13551 = vmatmul.mubr.msk.f32.gmra.mrb[180].mxu1 %vm1697_vm4, %v8966_v57 }
 0xe7f   : > { %v14581_v5 = vpop.eup %14580  ;;  %13528 = vmatmul.mubr.msk.f32.gmra.mrb[104].mxu0 %vm1697_vm4, %v8963_v45  ;;  %13553 = vmatprep.mubr.msk.f32.mxu1 %vm14686_vm1, %v19570_v12 }
 0xe80   : > { %v14583_v8 = vpop.eup %14582  ;;  %v8967_v18 = vmul.f32 %v14581_v5, %v19235_v42  ;;  %v8912_v20 = vpop.xlane.xlu0 %8911  ;;  %13530 = vmatprep.mubr.msk.f32.mxu0 %vm14686_vm1, %v19570_v12 }
 0xe81   : > { %v8964_v7 = vmul.f32 %v14583_v8, %v19237_v6  ;;  %14588 = vrcp.f32 %v8912_v20 }
 0xe82   : > { %13554 = vmatmul.mubr.msk.f32.gmra.mrb[182].mxu1 %vm1697_vm4, %v8967_v18 }
 0xe83   : > { %v14585_v43 = vpop.eup %14584  ;;  %13531 = vmatmul.mubr.msk.f32.gmra.mrb[106].mxu0 %vm1697_vm4, %v8964_v7  ;;  %13556 = vmatprep.mubr.msk.f32.mxu1 %vm14686_vm1, %v19570_v12 }
 0xe84   : > { %v8968_v56 = vmul.f32 %v14585_v43, %v19244_v4  ;;  %v8915_v55 = vpop.xlane.xlu1 %8914 }
 0xe85   : > { %14590 = vrcp.f32 %v8915_v55  ;;  %v19431_v55 = vld [vmem:[%s19535_s8] ss:$0 sm:$0xff] }
 0xe86   : > { %13557 = vmatmul.mubr.msk.f32.gmra.mrb[184].mxu1 %vm1697_vm4, %v8968_v56 }
 0xe87   : > { %v14587_v42 = vpop.eup %14586  ;;  %13559 = vmatprep.mubr.msk.f32.mxu1 %vm14686_vm1, %v19570_v12 }
 0xe88   : > { %v8969_v6 = vmul.f32 %v14587_v42, %v19248_v10  ;;  %v10736_v10 = vld [vmem:[%s19534_s7 + $0x18] sm:$0xff] }
 0xe89   : > { %13568 = vmatprep.subr.mxu0 %v10736_v10 }
 0xe8a   : > { %13560 = vmatmul.mubr.msk.f32.gmra.mrb[186].mxu1 %vm1697_vm4, %v8969_v6  ;;  %13569 = vmatpush3.msra.mxu0 %v10736_v10 }
 0xe8b   : > { %v14589_v13 = vpop.eup %14588  ;;  %13562 = vmatprep.mubr.msk.f32.mxu1 %vm14686_vm1, %v19570_v12 }
 0xe8c   : > { %v8970_v32 = vmul.f32 %v14589_v13, %v19252_v9 }
 0xe8e   : > { %13563 = vmatmul.mubr.msk.f32.gmra.mrb[188].mxu1 %vm1697_vm4, %v8970_v32 }
 0xe8f   : > { %v14591_v4 = vpop.eup %14590  ;;  %13565 = vmatprep.mubr.msk.f32.mxu1 %vm14686_vm1, %v19570_v12 }
 0xe90   : > { %v8971_v37 = vmul.f32 %v14591_v4, %v19256_v47 }
 0xe92   : > { %13566 = vmatmul.mubr.msk.f32.gmra.mrb[190].mxu1 %vm1697_vm4, %v8971_v37 }
 0xf21   : > { %v9059_v52 = vpop.f32.mrb[80].mxu0 }
 0xf22   : > { %v13444_v2 = vpop.f32.mrb[81].mxu0  ;;  %13570 = vmatprep.mubr.msk.f32.mxu0 %vm1128_vm2, %v9059_v52 }
 0xf25   : > { %v9064_v9 = vpop.f32.mrb[82].mxu0 }
 0xf26   : > { %v13447_v34 = vpop.f32.mrb[83].mxu0  ;;  %13571 = vmatmul.mubr.msk.f32.vlgmr.msra.gmra.mrb[182].mxu0 %vm1128_vm2, %v9064_v9 }
 0xf29   : > { %v9069_v61 = vpop.f32.mrb[84].mxu0 }
 0xf2a   : > { %v13450_v12 = vpop.f32.mrb[85].mxu0  ;;  %13573 = vmatprep.mubr.msk.f32.mxu0 %vm1128_vm2, %v9069_v61 }
 0xf2d   : > { %v9074_v47 = vpop.f32.mrb[86].mxu0 }
 0xf2e   : > { %v13453_v58 = vpop.f32.mrb[87].mxu0  ;;  %13574 = vmatmul.mubr.msk.f32.gmra.mrb[184].mxu0 %vm1128_vm2, %v9074_v47 }
 0xf31   : > { %v9180_v48 = vpop.f32.mrb[164].mxu1 }
 0xf32   : > { %v9079_v50 = vpop.f32.mrb[88].mxu0  ;;  %v13479_v19 = vpop.f32.mrb[165].mxu1 }
 0xf33   : > { %v13456_v0 = vpop.f32.mrb[89].mxu0  ;;  %13576 = vmatprep.mubr.msk.f32.mxu0 %vm1128_vm2, %v9079_v50 }
 0xf35   : > { %v9185_v27 = vpop.f32.mrb[166].mxu1 }
 0xf36   : > { %v9084_v23 = vpop.f32.mrb[90].mxu0  ;;  %v13482_v30 = vpop.f32.mrb[167].mxu1 }
 0xf37   : > { %v13459_v41 = vpop.f32.mrb[91].mxu0  ;;  %13577 = vmatmul.mubr.msk.f32.gmra.mrb[186].mxu0 %vm1128_vm2, %v9084_v23 }
 0xf39   : > { %v9190_v24 = vpop.f32.mrb[168].mxu1 }
 0xf3a   : > { %v9089_v39 = vpop.f32.mrb[92].mxu0  ;;  %v13485_v26 = vpop.f32.mrb[169].mxu1 }
 0xf3b   : > { %v13462_v36 = vpop.f32.mrb[93].mxu0  ;;  %13579 = vmatprep.mubr.msk.f32.mxu0 %vm1128_vm2, %v9089_v39 }
 0xf3c   : > { %13580 = vmatmul.mubr.msk.f32.gmra.mrb[188].mxu0 %vm1128_vm2, %v9180_v48 }
 0xf3d   : > { %13582 = vmatprep.mubr.msk.f32.mxu0 %vm1128_vm2, %v9185_v27  ;;  %v9195_v44 = vpop.f32.mrb[170].mxu1 }
 0xf3e   : > { %v9301_v1 = vpop.f32.mrb[94].mxu0  ;;  %v13488_v28 = vpop.f32.mrb[171].mxu1 }
 0xf3f   : > { %v13514_v62 = vpop.f32.mrb[95].mxu0 }
 0xf40   : > { %13583 = vmatmul.mubr.msk.f32.gmra.mrb[190].mxu0 %vm1128_vm2, %v9190_v24 }
 0xf41   : > { %13585 = vmatprep.mubr.msk.f32.mxu0 %vm1128_vm2, %v9195_v44  ;;  %v9200_v33 = vpop.f32.mrb[172].mxu1 }
 0xf42   : > { %v9306_v40 = vpop.f32.mrb[96].mxu0  ;;  %v13491_v21 = vpop.f32.mrb[173].mxu1 }
 0xf43   : > { %v13517_v49 = vpop.f32.mrb[97].mxu0 }
 0xf44   : > { %13586 = vmatmul.mubr.msk.f32.gmra.mrb[192].mxu0 %vm1128_vm2, %v9200_v33 }
 0xf45   : > { %v9205_v35 = vpop.f32.mrb[174].mxu1 }
 0xf46   : > { %v9311_v38 = vpop.f32.mrb[98].mxu0  ;;  %v13494_v14 = vpop.f32.mrb[175].mxu1  ;;  %13588 = vmatprep.mubr.msk.f32.mxu0 %vm1128_vm2, %v9205_v35 }
 0xf47   : > { %v13520_v46 = vpop.f32.mrb[99].mxu0 }
 0xf49   : > { %v9210_v22 = vpop.f32.mrb[176].mxu1 }
 0xf4a   : > { %v9316_v53 = vpop.f32.mrb[100].mxu0  ;;  %v13497_v63 = vpop.f32.mrb[177].mxu1  ;;  %13589 = vmatmul.mubr.msk.f32.gmra.mrb[194].mxu0 %vm1128_vm2, %v9210_v22 }
 0xf4b   : > { %v13523_v11 = vpop.f32.mrb[101].mxu0  ;;  %13591 = vmatprep.mubr.msk.f32.mxu0 %vm1128_vm2, %v9301_v1 }
 0xf4d   : > { %v9422_v17 = vpop.f32.mrb[178].mxu1 }
 0xf4e   : > { %v9321_v16 = vpop.f32.mrb[102].mxu0  ;;  %v13549_v54 = vpop.f32.mrb[179].mxu1  ;;  %13592 = vmatmul.mubr.msk.f32.gmra.mrb[196].mxu0 %vm1128_vm2, %v9306_v40 }
 0xf4f   : > { %v13526_v25 = vpop.f32.mrb[103].mxu0  ;;  %13594 = vmatprep.mubr.msk.f32.mxu0 %vm1128_vm2, %v9311_v38 }
 0xf51   : > { %v9427_v59 = vpop.f32.mrb[180].mxu1 }
 0xf52   : > { %v9326_v3 = vpop.f32.mrb[104].mxu0  ;;  %v13552_v29 = vpop.f32.mrb[181].mxu1  ;;  %13595 = vmatmul.mubr.msk.f32.gmra.mrb[198].mxu0 %vm1128_vm2, %v9316_v53 }
 0xf53   : > { %v13529_v60 = vpop.f32.mrb[105].mxu0  ;;  %13597 = vmatprep.mubr.msk.f32.mxu0 %vm1128_vm2, %v9321_v16 }
 0xf55   : > { %v9432_v51 = vpop.f32.mrb[182].mxu1 }
 0xf56   : > { %v9331_v15 = vpop.f32.mrb[106].mxu0  ;;  %v13555_v57 = vpop.f32.mrb[183].mxu1  ;;  %13598 = vmatmul.mubr.msk.f32.gmra.mrb[200].mxu0 %vm1128_vm2, %v9326_v3 }
 0xf57   : > { %v13532_v31 = vpop.f32.mrb[107].mxu0  ;;  %13600 = vmatprep.mubr.msk.f32.mxu0 %vm1128_vm2, %v9331_v15 }
 0xf59   : > { %v9437_v45 = vpop.f32.mrb[184].mxu1 }
 0xf5a   : > { %v13558_v5 = vpop.f32.mrb[185].mxu1  ;;  %13601 = vmatmul.mubr.msk.f32.gmra.mrb[202].mxu0 %vm1128_vm2, %v9422_v17 }
 0xf5b   : > { %13603 = vmatprep.mubr.msk.f32.mxu0 %vm1128_vm2, %v9427_v59 }
 0xf5d   : > { %v9442_v8 = vpop.f32.mrb[186].mxu1 }
 0xf5e   : > { %v13561_v18 = vpop.f32.mrb[187].mxu1  ;;  %13604 = vmatmul.mubr.msk.f32.gmra.mrb[204].mxu0 %vm1128_vm2, %v9432_v51 }
 0xf5f   : > { %13606 = vmatprep.mubr.msk.f32.mxu0 %vm1128_vm2, %v9437_v45 }
 0xf61   : > { %v9447_v20 = vpop.f32.mrb[188].mxu1 }
 0xf62   : > { %v13564_v7 = vpop.f32.mrb[189].mxu1  ;;  %13607 = vmatmul.mubr.msk.f32.gmra.mrb[206].mxu0 %vm1128_vm2, %v9442_v8 }
 0xf63   : > { %13609 = vmatprep.mubr.msk.f32.mxu0 %vm1128_vm2, %v9447_v20 }
 0xf65   : > { %v9452_v43 = vpop.f32.mrb[190].mxu1 }
 0xf66   : > { %v13567_v56 = vpop.f32.mrb[191].mxu1  ;;  %13610 = vmatmul.mubr.msk.f32.gmra.mrb[208].mxu0 %vm1128_vm2, %v9452_v43 }
 0xff9   : > { %v13572_v42 = vpop.f32.mrb[182].mxu0 }
 0xffa   : > { %v9783_v6 = vadd.f32 %v13572_v42, %v19431_v55  ;;  %v9608_v13 = vpop.f32.mrb[183].mxu0 }
 0xffb   : > { %v9782_v32 = vadd.f32 %v19431_v55, %v9608_v13 }
 0xffc   : > { %9811 = vst.msk [vmem:[%s19438_s11 + $0x8] sm:$0xff] %vm399_vm0, %v9783_v6 }
 0xffd   : > { %9810 = vst.msk [vmem:[%s19438_s11] sm:$0xff] %vm399_vm0, %v9782_v32 }
0x1001   : > { %v13575_v4 = vpop.f32.mrb[184].mxu0 }
0x1002   : > { %v9785_v37 = vadd.f32 %v13575_v4, %v19431_v55  ;;  %v9618_v10 = vpop.f32.mrb[185].mxu0 }
0x1003   : > { %v9784_v52 = vadd.f32 %v19431_v55, %v9618_v10 }
0x1004   : > { %9813 = vst.msk [vmem:[%s19438_s11 + $0x18] sm:$0xff] %vm399_vm0, %v9785_v37 }
0x1005   : > { %9812 = vst.msk [vmem:[%s19438_s11 + $0x10] sm:$0xff] %vm399_vm0, %v9784_v52 }
0x100a   : > { %v13578_v2 = vpop.f32.mrb[186].mxu0 }
0x100b   : > { %v9787_v9 = vadd.f32 %v13578_v2, %v19431_v55  ;;  %v9628_v34 = vpop.f32.mrb[187].mxu0 }
0x100c   : > { %v9786_v61 = vadd.f32 %v19431_v55, %v9628_v34 }
0x100d   : > { %9815 = vst.msk [vmem:[%s19438_s11 + $0x28] sm:$0xff] %vm399_vm0, %v9787_v9 }
0x100e   : > { %9814 = vst.msk [vmem:[%s19438_s11 + $0x20] sm:$0xff] %vm399_vm0, %v9786_v61 }
0x100f   : > { %v13581_v12 = vpop.f32.mrb[188].mxu0 }
0x1010   : > { %v9789_v47 = vadd.f32 %v13581_v12, %v19431_v55  ;;  %v9638_v58 = vpop.f32.mrb[189].mxu0 }
0x1011   : > { %v9788_v48 = vadd.f32 %v19431_v55, %v9638_v58 }
0x1012   : > { %9817 = vst.msk [vmem:[%s19438_s11 + $0x38] sm:$0xff] %vm399_vm0, %v9789_v47 }
0x1013   : > { %9816 = vst.msk [vmem:[%s19438_s11 + $0x30] sm:$0xff] %vm399_vm0, %v9788_v48  ;;  %v13584_v50 = vpop.f32.mrb[190].mxu0 }
0x1014   : > { %v9791_v19 = vadd.f32 %v13584_v50, %v19431_v55  ;;  %v9648_v0 = vpop.f32.mrb[191].mxu0 }
0x1015   : > { %v9790_v27 = vadd.f32 %v19431_v55, %v9648_v0 }
0x1016   : > { %9819 = vst.msk [vmem:[%s19438_s11 + $0x48] sm:$0xff] %vm399_vm0, %v9791_v19 }
0x1017   : > { %9818 = vst.msk [vmem:[%s19438_s11 + $0x40] sm:$0xff] %vm399_vm0, %v9790_v27  ;;  %v13587_v23 = vpop.f32.mrb[192].mxu0 }
0x1018   : > { %v9793_v30 = vadd.f32 %v13587_v23, %v19431_v55  ;;  %v9658_v41 = vpop.f32.mrb[193].mxu0 }
0x1019   : > { %v9792_v24 = vadd.f32 %v19431_v55, %v9658_v41 }
0x101a   : > { %9821 = vst.msk [vmem:[%s19438_s11 + $0x58] sm:$0xff] %vm399_vm0, %v9793_v30 }
0x101b   : > { %9820 = vst.msk [vmem:[%s19438_s11 + $0x50] sm:$0xff] %vm399_vm0, %v9792_v24 }
0x101d   : > { %v13590_v39 = vpop.f32.mrb[194].mxu0 }
0x101e   : > { %v9795_v26 = vadd.f32 %v13590_v39, %v19431_v55  ;;  %v9668_v36 = vpop.f32.mrb[195].mxu0 }
0x101f   : > { %v9794_v44 = vadd.f32 %v19431_v55, %v9668_v36 }
0x1020   : > { %9823 = vst.msk [vmem:[%s19438_s11 + $0x68] sm:$0xff] %vm399_vm0, %v9795_v26 }
0x1021   : > { %9822 = vst.msk [vmem:[%s19438_s11 + $0x60] sm:$0xff] %vm399_vm0, %v9794_v44  ;;  %v13593_v1 = vpop.f32.mrb[196].mxu0 }
0x1022   : > { %v9797_v28 = vadd.f32 %v13593_v1, %v19431_v55  ;;  %v9678_v62 = vpop.f32.mrb[197].mxu0 }
0x1023   : > { %v9796_v33 = vadd.f32 %v19431_v55, %v9678_v62 }
0x1024   : > { %9825 = vst.msk [vmem:[%s19438_s11 + $0x78] sm:$0xff] %vm399_vm0, %v9797_v28 }
0x1025   : > { %9824 = vst.msk [vmem:[%s19438_s11 + $0x70] sm:$0xff] %vm399_vm0, %v9796_v33  ;;  %v13596_v40 = vpop.f32.mrb[198].mxu0 }
0x1026   : > { %v9799_v21 = vadd.f32 %v13596_v40, %v19431_v55  ;;  %v9688_v49 = vpop.f32.mrb[199].mxu0 }
0x1027   : > { %v9798_v35 = vadd.f32 %v19431_v55, %v9688_v49 }
0x1028   : > { %9827 = vst.msk [vmem:[%s19438_s11 + $0x88] sm:$0xff] %vm399_vm0, %v9799_v21 }
0x1029   : > { %9826 = vst.msk [vmem:[%s19438_s11 + $0x80] sm:$0xff] %vm399_vm0, %v9798_v35  ;;  %v13599_v38 = vpop.f32.mrb[200].mxu0 }
0x102a   : > { %v9801_v14 = vadd.f32 %v13599_v38, %v19431_v55  ;;  %v9698_v46 = vpop.f32.mrb[201].mxu0 }
0x102b   : > { %v9800_v22 = vadd.f32 %v19431_v55, %v9698_v46 }
0x102c   : > { %9829 = vst.msk [vmem:[%s19438_s11 + $0x98] sm:$0xff] %vm399_vm0, %v9801_v14 }
0x102d   : > { %9828 = vst.msk [vmem:[%s19438_s11 + $0x90] sm:$0xff] %vm399_vm0, %v9800_v22  ;;  %v13602_v53 = vpop.f32.mrb[202].mxu0 }
0x102e   : > { %v9803_v63 = vadd.f32 %v13602_v53, %v19431_v55  ;;  %v9708_v11 = vpop.f32.mrb[203].mxu0 }
0x102f   : > { %v9802_v17 = vadd.f32 %v19431_v55, %v9708_v11 }
0x1030   : > { %9831 = vst.msk [vmem:[%s19438_s11 + $0xa8] sm:$0xff] %vm399_vm0, %v9803_v63 }
0x1031   : > { %9830 = vst.msk [vmem:[%s19438_s11 + $0xa0] sm:$0xff] %vm399_vm0, %v9802_v17  ;;  %v13605_v16 = vpop.f32.mrb[204].mxu0 }
0x1032   : > { %v9805_v54 = vadd.f32 %v13605_v16, %v19431_v55  ;;  %v9718_v25 = vpop.f32.mrb[205].mxu0 }
0x1033   : > { %v9804_v59 = vadd.f32 %v19431_v55, %v9718_v25 }
0x1034   : > { %9833 = vst.msk [vmem:[%s19438_s11 + $0xb8] sm:$0xff] %vm399_vm0, %v9805_v54 }
0x1035   : > { %9832 = vst.msk [vmem:[%s19438_s11 + $0xb0] sm:$0xff] %vm399_vm0, %v9804_v59  ;;  %v13608_v3 = vpop.f32.mrb[206].mxu0 }
0x1036   : > { %v9807_v29 = vadd.f32 %v13608_v3, %v19431_v55  ;;  %v9728_v60 = vpop.f32.mrb[207].mxu0 }
0x1037   : > { %v9806_v51 = vadd.f32 %v19431_v55, %v9728_v60 }
0x1038   : > { %9835 = vst.msk [vmem:[%s19438_s11 + $0xc8] sm:$0xff] %vm399_vm0, %v9807_v29 }
0x1039   : > { %9834 = vst.msk [vmem:[%s19438_s11 + $0xc0] sm:$0xff] %vm399_vm0, %v9806_v51  ;;  %v13611_v15 = vpop.f32.mrb[208].mxu0 }
0x103a   : > { %v9809_v57 = vadd.f32 %v13611_v15, %v19431_v55  ;;  %v9738_v31 = vpop.f32.mrb[209].mxu0 }
0x103b   : > { %v9808_v45 = vadd.f32 %v19431_v55, %v9738_v31 }
0x103c   : > { %9837 = vst.msk [vmem:[%s19438_s11 + $0xd8] sm:$0xff] %vm399_vm0, %v9809_v57 }
0x103d   : > { %9836 = vst.msk [vmem:[%s19438_s11 + $0xd0] sm:$0xff] %vm399_vm0, %v9808_v45 }
0x103e PF: > { %s20_s13 = sadd.s32 1, %s14683_s13  }
0x103f   : > { %p17_p4 = scmp.ge.s32.totalorder %s20_s13, 4  }
0x1041   :  { %19 = sbr.rel (!%p17_p4) target bundleno = 1 (0x1), region = 114 }

</bundles_post_ra>
